<compile_context>
chip_gen: v5e
topology: v5e:2x2
jax: 0.10.0
libtpu: 0.0.40
codegen_flags: <defaults>
</compile_context>

<pallas_src>
import functools

import jax
import jax.numpy as jnp
from jax.experimental import pallas as pl
from jax.experimental.pallas import tpu as pltpu


def _fused_mlp_kernel(*refs):
    """refs = (x, w1_hbm, b1, ..., wL_hbm, bL, o, w1_vmem, ..., wL_vmem, sems).

    x / biases / output are whole-array VMEM refs (auto-DMA'd by Pallas).
    Weights arrive as raw HBM refs and are streamed manually so that the
    DMA of layer i+1's weights overlaps layer i's matmul.
    """
    n_layers = (len(refs) - 3) // 3
    x_ref = refs[0]
    wb_refs = refs[1:1 + 2 * n_layers]               # (w_hbm, b) per layer
    o_ref = refs[1 + 2 * n_layers]
    w_vmem = refs[2 + 2 * n_layers:2 + 3 * n_layers]  # per-layer VMEM buffers
    sems = refs[-1]                                   # DMA sems, shape (L,)

    # Issue every weight DMA immediately; each wait sits right before the
    # matmul that consumes it, so later streams hide under earlier compute.
    copies = []
    for i in range(n_layers):
        cp = pltpu.make_async_copy(wb_refs[2 * i], w_vmem[i], sems.at[i])
        cp.start()
        copies.append(cp)

    h = x_ref[...].astype(jnp.bfloat16)               # bf16 LHS for the MXU
    for i in range(n_layers):
        b_ref = wb_refs[2 * i + 1]
        copies[i].wait()                              # weight i now in VMEM
        h = jnp.dot(h, w_vmem[i][...],                # bf16 x bf16 -> f32 acc
                    preferred_element_type=jnp.float32)
        h = h + b_ref[...]                            # f32 bias broadcast
        if i < n_layers - 1:
            # Fused ReLU + downcast to next layer's bf16 LHS.
            h = jnp.maximum(h, 0.0).astype(jnp.bfloat16)
    o_ref[...] = h.astype(o_ref.dtype)


def fused_mlp(x, params):
    """Whole MLP in one pallas_call.

    x: [M, d_in] f32.  params: list of (w [in, out] bf16, b [1, out] f32).
    """
    M, _ = x.shape
    d_out = params[-1][0].shape[1]
    n_layers = len(params)

    vmem_spec = pl.BlockSpec(memory_space=pltpu.MemorySpace.VMEM)
    hbm_spec = pl.BlockSpec(memory_space=pl.ANY)

    flat = []
    in_specs = [vmem_spec]                            # x
    scratch_shapes = []
    for w, b in params:
        flat += [w, b]
        in_specs += [hbm_spec, vmem_spec]             # w stays in HBM, b in VMEM
        scratch_shapes.append(pltpu.VMEM(w.shape, w.dtype))
    scratch_shapes.append(pltpu.SemaphoreType.DMA((n_layers,)))

    return pl.pallas_call(
        _fused_mlp_kernel,
        out_shape=jax.ShapeDtypeStruct((M, d_out), x.dtype),
        in_specs=in_specs,
        out_specs=vmem_spec,
        scratch_shapes=scratch_shapes,
        compiler_params=pltpu.CompilerParams(
            vmem_limit_bytes=12 * 1024 * 1024,        # ~4 MiB actual footprint
        ),
    )(x, *flat)


def init_params(key, input_dim=512, hidden_dim=1024, num_layers=3):
    """f32 params matching nn.Linear default init; weights stored [in, out]."""
    dims = []
    for i in range(num_layers):
        if i == 0:
            dims.append((input_dim, hidden_dim))
        elif i == num_layers - 1:
            dims.append((hidden_dim, input_dim))
        else:
            dims.append((hidden_dim, hidden_dim))
    params = []
    for fan_in, fan_out in dims:
        key, kw, kb = jax.random.split(key, 3)
        bound = 1.0 / (fan_in ** 0.5)                 # PyTorch Linear init range
        w = jax.random.uniform(kw, (fan_in, fan_out), jnp.float32, -bound, bound)
        b = jax.random.uniform(kb, (1, fan_out), jnp.float32, -bound, bound)
        params.append((w, b))
    return params


def prepare_params(params_f32):
    """Cast weights to bf16 for HBM-bandwidth-bound streaming; biases stay f32."""
    return [(w.astype(jnp.bfloat16), b) for (w, b) in params_f32]


@functools.partial(jax.jit, static_argnames=())
def simple_test_model(x, params):
    return fused_mlp(x, params)


if __name__ == "__main__":
    key = jax.random.PRNGKey(0)
    k_x, k_p = jax.random.split(key)

    batch, input_dim, hidden_dim, num_layers = 8, 512, 1024, 3
    x = jax.random.normal(k_x, (batch, input_dim), jnp.float32)
    params_f32 = init_params(k_p, input_dim=input_dim, hidden_dim=hidden_dim,
                             num_layers=num_layers)
    params = prepare_params(params_f32)

    out = simple_test_model(x, params)
    jax.block_until_ready(out)
    assert out.shape == (batch, input_dim)
    assert out.dtype == jnp.float32

    # Reference 1: true f32 PyTorch SimpleTestModel semantics (loose tol,
    # accounts for the bf16 weight/activation storage in the kernel).
    ref_f32 = x
    for i, (w, b) in enumerate(params_f32):
        ref_f32 = jnp.dot(ref_f32, w) + b
        if i < num_layers - 1:
            ref_f32 = jnp.maximum(ref_f32, 0.0)
    assert jnp.allclose(out, ref_f32, atol=5e-2, rtol=5e-2), (
        "vs f32 ref:", float(jnp.max(jnp.abs(out - ref_f32))))

    # Reference 2: mirrors the kernel's bf16 numerics exactly (tight tol).
    ref_bf = x.astype(jnp.bfloat16)
    for i, (w, b) in enumerate(params):
        ref_bf = jnp.dot(ref_bf, w, preferred_element_type=jnp.float32) + b
        if i < num_layers - 1:
            ref_bf = jnp.maximum(ref_bf, 0.0).astype(jnp.bfloat16)
    ref_bf = ref_bf.astype(jnp.float32)
    assert jnp.allclose(out, ref_bf, atol=1e-2, rtol=1e-2), (
        "vs bf16 ref:", float(jnp.max(jnp.abs(out - ref_bf))))

    print("KERNEL_OK")
</pallas_src>

<mosaic_0001>
module attributes {stable_mosaic.version = 11 : i64} {
  func.func @_fused_mlp_kernel(%arg0: memref<8x512xf32, #tpu.memory_space<vmem>>, %arg1: memref<512x1024xbf16, #tpu.memory_space<any>>, %arg2: memref<1x1024xf32, #tpu.memory_space<vmem>>, %arg3: memref<1024x1024xbf16, #tpu.memory_space<any>>, %arg4: memref<1x1024xf32, #tpu.memory_space<vmem>>, %arg5: memref<1024x512xbf16, #tpu.memory_space<any>>, %arg6: memref<1x512xf32, #tpu.memory_space<vmem>>, %arg7: memref<8x512xf32, #tpu.memory_space<vmem>>, %arg8: memref<512x1024xbf16, #tpu.memory_space<vmem>>, %arg9: memref<1024x1024xbf16, #tpu.memory_space<vmem>>, %arg10: memref<1024x512xbf16, #tpu.memory_space<vmem>>, %arg11: memref<3x!tpu.dma_semaphore, #tpu.memory_space<semaphore_mem>>) attributes {dimension_semantics = [], scalar_prefetch = 0 : i64, scratch_operands = 4 : i64, tpu.core_type = #tpu.core_type<tc>} {
    %c0_i32 = arith.constant 0 : i32
    %0 = tpu.memref_slice %arg11[%c0_i32] : memref<3x!tpu.dma_semaphore, #tpu.memory_space<semaphore_mem>> -> memref<1x!tpu.dma_semaphore, #tpu.memory_space<semaphore_mem>>
    %1 = tpu.memref_squeeze %0 : memref<1x!tpu.dma_semaphore, #tpu.memory_space<semaphore_mem>> -> memref<!tpu.dma_semaphore, #tpu.memory_space<semaphore_mem>>
    tpu.enqueue_dma source(%arg1 : memref<512x1024xbf16, #tpu.memory_space<any>>) target(%arg8 : memref<512x1024xbf16, #tpu.memory_space<vmem>>) target_semaphore(%1 : memref<!tpu.dma_semaphore, #tpu.memory_space<semaphore_mem>>)
    %c1_i32 = arith.constant 1 : i32
    %2 = tpu.memref_slice %arg11[%c1_i32] : memref<3x!tpu.dma_semaphore, #tpu.memory_space<semaphore_mem>> -> memref<1x!tpu.dma_semaphore, #tpu.memory_space<semaphore_mem>>
    %3 = tpu.memref_squeeze %2 : memref<1x!tpu.dma_semaphore, #tpu.memory_space<semaphore_mem>> -> memref<!tpu.dma_semaphore, #tpu.memory_space<semaphore_mem>>
    tpu.enqueue_dma source(%arg3 : memref<1024x1024xbf16, #tpu.memory_space<any>>) target(%arg9 : memref<1024x1024xbf16, #tpu.memory_space<vmem>>) target_semaphore(%3 : memref<!tpu.dma_semaphore, #tpu.memory_space<semaphore_mem>>)
    %c2_i32 = arith.constant 2 : i32
    %4 = tpu.memref_slice %arg11[%c2_i32] : memref<3x!tpu.dma_semaphore, #tpu.memory_space<semaphore_mem>> -> memref<1x!tpu.dma_semaphore, #tpu.memory_space<semaphore_mem>>
    %5 = tpu.memref_squeeze %4 : memref<1x!tpu.dma_semaphore, #tpu.memory_space<semaphore_mem>> -> memref<!tpu.dma_semaphore, #tpu.memory_space<semaphore_mem>>
    tpu.enqueue_dma source(%arg5 : memref<1024x512xbf16, #tpu.memory_space<any>>) target(%arg10 : memref<1024x512xbf16, #tpu.memory_space<vmem>>) target_semaphore(%5 : memref<!tpu.dma_semaphore, #tpu.memory_space<semaphore_mem>>)
    %c0 = arith.constant 0 : index
    %c0_0 = arith.constant 0 : index
    %6 = vector.load %arg0[%c0, %c0_0] : memref<8x512xf32, #tpu.memory_space<vmem>>, vector<8x512xf32>
    %7 = arith.truncf %6 : vector<8x512xf32> to vector<8x512xbf16>
    %c0_i32_1 = arith.constant 0 : i32
    %8 = tpu.memref_slice %arg11[%c0_i32_1] : memref<3x!tpu.dma_semaphore, #tpu.memory_space<semaphore_mem>> -> memref<1x!tpu.dma_semaphore, #tpu.memory_space<semaphore_mem>>
    %9 = tpu.memref_squeeze %8 : memref<1x!tpu.dma_semaphore, #tpu.memory_space<semaphore_mem>> -> memref<!tpu.dma_semaphore, #tpu.memory_space<semaphore_mem>>
    tpu.wait_dma2 semaphore(%9 : memref<!tpu.dma_semaphore, #tpu.memory_space<semaphore_mem>>) src(%arg1 : memref<512x1024xbf16, #tpu.memory_space<any>>) dst(%arg8 : memref<512x1024xbf16, #tpu.memory_space<vmem>>)
    %c0_2 = arith.constant 0 : index
    %c0_3 = arith.constant 0 : index
    %10 = vector.load %arg8[%c0_2, %c0_3] : memref<512x1024xbf16, #tpu.memory_space<vmem>>, vector<512x1024xbf16>
    %cst = arith.constant dense<0.000000e+00> : vector<8x1024xf32>
    %11 = tpu.matmul %7, %10, %cst {dimension_numbers = #tpu.dot_dimension_numbers<[1], [0], [0], [1], [0, 0, 1, 1], [], []>} : vector<8x512xbf16>, vector<512x1024xbf16>, vector<8x1024xf32> -> vector<8x1024xf32>
    %c0_4 = arith.constant 0 : index
    %c0_5 = arith.constant 0 : index
    %12 = vector.load %arg2[%c0_4, %c0_5] : memref<1x1024xf32, #tpu.memory_space<vmem>>, vector<1x1024xf32>
    %13 = vector.broadcast %12 : vector<1x1024xf32> to vector<8x1024xf32>
    %14 = arith.addf %11, %13 : vector<8x1024xf32>
    %cst_6 = arith.constant 0.000000e+00 : f32
    %15 = vector.broadcast %cst_6 : f32 to vector<8x1024xf32>
    %16 = arith.maximumf %14, %15 : vector<8x1024xf32>
    %17 = arith.truncf %16 : vector<8x1024xf32> to vector<8x1024xbf16>
    %c1_i32_7 = arith.constant 1 : i32
    %18 = tpu.memref_slice %arg11[%c1_i32_7] : memref<3x!tpu.dma_semaphore, #tpu.memory_space<semaphore_mem>> -> memref<1x!tpu.dma_semaphore, #tpu.memory_space<semaphore_mem>>
    %19 = tpu.memref_squeeze %18 : memref<1x!tpu.dma_semaphore, #tpu.memory_space<semaphore_mem>> -> memref<!tpu.dma_semaphore, #tpu.memory_space<semaphore_mem>>
    tpu.wait_dma2 semaphore(%19 : memref<!tpu.dma_semaphore, #tpu.memory_space<semaphore_mem>>) src(%arg3 : memref<1024x1024xbf16, #tpu.memory_space<any>>) dst(%arg9 : memref<1024x1024xbf16, #tpu.memory_space<vmem>>)
    %c0_8 = arith.constant 0 : index
    %c0_9 = arith.constant 0 : index
    %20 = vector.load %arg9[%c0_8, %c0_9] : memref<1024x1024xbf16, #tpu.memory_space<vmem>>, vector<1024x1024xbf16>
    %cst_10 = arith.constant dense<0.000000e+00> : vector<8x1024xf32>
    %21 = tpu.matmul %17, %20, %cst_10 {dimension_numbers = #tpu.dot_dimension_numbers<[1], [0], [0], [1], [0, 0, 1, 1], [], []>} : vector<8x1024xbf16>, vector<1024x1024xbf16>, vector<8x1024xf32> -> vector<8x1024xf32>
    %c0_11 = arith.constant 0 : index
    %c0_12 = arith.constant 0 : index
    %22 = vector.load %arg4[%c0_11, %c0_12] : memref<1x1024xf32, #tpu.memory_space<vmem>>, vector<1x1024xf32>
    %23 = vector.broadcast %22 : vector<1x1024xf32> to vector<8x1024xf32>
    %24 = arith.addf %21, %23 : vector<8x1024xf32>
    %cst_13 = arith.constant 0.000000e+00 : f32
    %25 = vector.broadcast %cst_13 : f32 to vector<8x1024xf32>
    %26 = arith.maximumf %24, %25 : vector<8x1024xf32>
    %27 = arith.truncf %26 : vector<8x1024xf32> to vector<8x1024xbf16>
    %c2_i32_14 = arith.constant 2 : i32
    %28 = tpu.memref_slice %arg11[%c2_i32_14] : memref<3x!tpu.dma_semaphore, #tpu.memory_space<semaphore_mem>> -> memref<1x!tpu.dma_semaphore, #tpu.memory_space<semaphore_mem>>
    %29 = tpu.memref_squeeze %28 : memref<1x!tpu.dma_semaphore, #tpu.memory_space<semaphore_mem>> -> memref<!tpu.dma_semaphore, #tpu.memory_space<semaphore_mem>>
    tpu.wait_dma2 semaphore(%29 : memref<!tpu.dma_semaphore, #tpu.memory_space<semaphore_mem>>) src(%arg5 : memref<1024x512xbf16, #tpu.memory_space<any>>) dst(%arg10 : memref<1024x512xbf16, #tpu.memory_space<vmem>>)
    %c0_15 = arith.constant 0 : index
    %c0_16 = arith.constant 0 : index
    %30 = vector.load %arg10[%c0_15, %c0_16] : memref<1024x512xbf16, #tpu.memory_space<vmem>>, vector<1024x512xbf16>
    %cst_17 = arith.constant dense<0.000000e+00> : vector<8x512xf32>
    %31 = tpu.matmul %27, %30, %cst_17 {dimension_numbers = #tpu.dot_dimension_numbers<[1], [0], [0], [1], [0, 0, 1, 1], [], []>} : vector<8x1024xbf16>, vector<1024x512xbf16>, vector<8x512xf32> -> vector<8x512xf32>
    %c0_18 = arith.constant 0 : index
    %c0_19 = arith.constant 0 : index
    %32 = vector.load %arg6[%c0_18, %c0_19] : memref<1x512xf32, #tpu.memory_space<vmem>>, vector<1x512xf32>
    %33 = vector.broadcast %32 : vector<1x512xf32> to vector<8x512xf32>
    %34 = arith.addf %31, %33 : vector<8x512xf32>
    %c0_20 = arith.constant 0 : index
    %c0_21 = arith.constant 0 : index
    %35 = vector.load %arg7[%c0_20, %c0_21] : memref<8x512xf32, #tpu.memory_space<vmem>>, vector<8x512xf32>
    tpu.vector_store %arg7[%c0_20, %c0_21], %34 {strides = array<i32>} : memref<8x512xf32, #tpu.memory_space<vmem>>, vector<8x512xf32>,
    return
  }
}

</mosaic_0001>

<bundles_post_ra>
// kernel: simple_test_model.1
= control target key start
LH: loop header
LB: loop body
LE: loop exit
PB: predicated region body
PF: predicated region fallthrough
CT: control target
= control target key end

     0   :  { %12 = vsyncpa [#allocation7], 0  ;;  %s13707_s0 = inlined_call_operand.hbm [shape: f32[8,512], index: 0, kind: input, shape index: {}]   ;;  %s13708_s1 = inlined_call_operand.hbm [shape: bf16[512,1024], index: 1, kind: input, shape index: {}]   ;;  %s13709_s2 = inlined_call_operand.hbm [shape: f32[1,1024], index: 2, kind: input, shape index: {}]   ;;  %s13710_s3 = inlined_call_operand.hbm [shape: bf16[1024,1024], index: 3, kind: input, shape index: {}]   ;;  %s13711_s4 = inlined_call_operand.hbm [shape: f32[1,1024], index: 4, kind: input, shape index: {}]   ;;  %s13712_s5 = inlined_call_operand.hbm [shape: bf16[1024,512], index: 5, kind: input, shape index: {}]   ;;  %s13713_s6 = inlined_call_operand.hbm [shape: f32[1,512], index: 6, kind: input, shape index: {}]   ;;  %s13714_s7 = inlined_call_operand.hbm [shape: f32[8,512], index: 7, kind: output, shape index: {}]  }
   0x1   :  { %13 = vsyncpa [#allocation10], 0 }
   0x2   :  { %14 = vsyncpa [#allocation13], 0  ;;  %s32_s26 = sshll.u32 %s13709_s2, 4  ;;  %s33_s26 = int_to_ptr.hbm [resolvable:$true] %s32_s26 }
   0x3   :  { %15 = vsyncpa [#allocation8], 0  ;;  %s13404_s27 = smov [#allocation9]   ;;  %s21_s8 = sshll.u32 %s13707_s0, 4  ;;  %s22_s8 = int_to_ptr.hbm [resolvable:$true] %s21_s8 }
   0x4   :  { %s34_s28 = sshll.u32 %s13404_s27, 4  ;;  %s13405_s9 = smov [#allocation6]   ;;  %s35_s28 = int_to_ptr.vmem [resolvable:$true] %s34_s28 }
   0x5   :  { %37 = dma.hbm_to_vmem [thread:$0]  %s33_s26, 128, %s35_s28, [#allocation10]  }
   0x6   :  { %s23_s10 = sshll.u32 %s13405_s9, 4  ;;  %s43_s13 = sshll.u32 %s13711_s4, 4  ;;  %s24_s10 = int_to_ptr.vmem [resolvable:$true] %s23_s10  ;;  %s44_s13 = int_to_ptr.hbm [resolvable:$true] %s43_s13 }
   0x7   :  { %26 = dma.hbm_to_vmem [thread:$0]  %s22_s8, 512, %s24_s10, [#allocation7]  }
   0x8   :  { %s54_s15 = sshll.u32 %s13713_s6, 4  ;;  %s13406_s16 = smov [#allocation11]   ;;  %s55_s15 = int_to_ptr.hbm [resolvable:$true] %s54_s15 }
   0x9   :  { %s45_s17 = sshll.u32 %s13406_s16, 4  ;;  %s13407_s0 = smov [#allocation12]   ;;  %s46_s17 = int_to_ptr.vmem [resolvable:$true] %s45_s17 }
   0xa   :  { %48 = dma.hbm_to_vmem [thread:$0]  %s44_s13, 128, %s46_s17, [#allocation10]  }
   0xb   :  { %s56_s18 = sshll.u32 %s13407_s0, 4  ;;  %s57_s18 = int_to_ptr.vmem [resolvable:$true] %s56_s18 }
   0xc   :  { %59 = dma.hbm_to_vmem [thread:$0]  %s55_s15, 64, %s57_s18, [#allocation13]  }
   0xd   :  { %13390 = dma.done.wait [#allocation7], 512  }
   0xe   :  { %13391 = vsyncadd [#allocation7], 4294966784 }
   0xf   :  { %13392 = dma.done.wait [#allocation10], 256  }
  0x10   :  { %13393 = vsyncadd [#allocation10], 4294967040 }
  0x11   :  { %13394 = dma.done.wait [#allocation13], 64  }
  0x12   :  { %13395 = vsyncadd [#allocation13], 4294967232  ;;  %s83_s20 = sshll.u32 %s13708_s1, 4  ;;  %s13408_s6 = smov [#allocation2]   ;;  %v117_v0 = vld [vmem:[#allocation6] sm:$0xff]  ;;  %v118_v1 = vld [vmem:[#allocation6 + $0x8] sm:$0xff]  ;;  %s84_s20 = int_to_ptr.hbm [resolvable:$true] %s83_s20 }
  0x13   :  { %s85_s21 = sshll.u32 %s13408_s6, 4  ;;  %s97_s24 = sshll.u32 %s13710_s3, 4  ;;  %v119_v2 = vld [vmem:[#allocation6 + $0x10] sm:$0xff]  ;;  %v120_v3 = vld [vmem:[#allocation6 + $0x18] sm:$0xff]  ;;  %v13473_v4 = vpack.c.bf16 %v117_v0, %v117_v0  ;;  %v13475_v5 = vpack.c.bf16 %v118_v1, %v118_v1  ;;  %s86_s21 = int_to_ptr.vmem [resolvable:$true] %s85_s21  ;;  %s98_s24 = int_to_ptr.hbm [resolvable:$true] %s97_s24 }
  0x14   :  { %88 = dma.hbm_to_vmem [thread:$0]  %s84_s20, 32768, %s86_s21, [#allocation5]  ;;  %v13477_v6 = vpack.c.bf16 %v119_v2, %v119_v2  ;;  %v13479_v7 = vpack.c.bf16 %v120_v3, %v120_v3 }
  0x15   :  { %s13409_s25 = smov [#allocation3]   ;;  %s111_s29 = sshll.u32 %s13712_s5, 4  ;;  %s112_s29 = int_to_ptr.hbm [resolvable:$true] %s111_s29 }
  0x16   :  { %s99_s26 = sshll.u32 %s13409_s25, 4  ;;  %s13410_s1 = smov [#allocation4]   ;;  %s100_s26 = int_to_ptr.vmem [resolvable:$true] %s99_s26 }
  0x17   :  { %102 = dma.hbm_to_vmem [thread:$0]  %s98_s24, 65536, %s100_s26, [#allocation5 + $0x1] }
  0x18   :  { %s113_s3 = sshll.u32 %s13410_s1, 4  ;;  %s114_s3 = int_to_ptr.vmem [resolvable:$true] %s113_s3 }
  0x19   :  { %116 = dma.hbm_to_vmem [thread:$0]  %s112_s29, 32768, %s114_s3, [#allocation5 + $0x2] }
  0x1a   :  { %13396 = dma.done.wait [#allocation5], 32768 }
  0x1b   :  { %13397 = vsyncadd [#allocation5], 4294934528  ;;  %v8291_v8 = vld [vmem:[#allocation2 + $0x1c0] sm:$0xf] }
  0x1c   :  { %v12224_v9 = vld [vmem:[#allocation2 + $0x1dc] sm:$0xf0] }
  0x1d   :  { %v8547_v10 = vld [vmem:[#allocation2 + $0x3c0] sm:$0xf]  ;;  %v8292_v11 = vor.u32 %v12224_v9, %v8291_v8 }
  0x1e   :  { %v12288_v12 = vld [vmem:[#allocation2 + $0x3dc] sm:$0xf0] }
  0x1f   :  { %v8803_v13 = vld [vmem:[#allocation2 + $0x5c0] sm:$0xf]  ;;  %v8548_v15 = vor.u32 %v12288_v12, %v8547_v10  ;;  %1683 = vmatpush.bf16.msra.mxu0 %v8292_v11 }
  0x20   :  { %v12352_v14 = vld [vmem:[#allocation2 + $0x5dc] sm:$0xf0] }
  0x21   :  { %v8804_v16 = vor.u32 %v12352_v14, %v8803_v13  ;;  %v9059_v17 = vld [vmem:[#allocation2 + $0x7c0] sm:$0xf]  ;;  %1696 = vmatpush.bf16.msra.mxu1 %v8548_v15 }
  0x22   :  { %v12416_v18 = vld [vmem:[#allocation2 + $0x7dc] sm:$0xf0] }
  0x23   :  { %v8259_v19 = vld [vmem:[#allocation2 + $0x180] sm:$0xf]  ;;  %v9060_v20 = vor.u32 %v12416_v18, %v9059_v17  ;;  %1709 = vmatpush.bf16.msra.mxu2 %v8804_v16 }
  0x24   :  { %v12216_v21 = vld [vmem:[#allocation2 + $0x19c] sm:$0xf0] }
  0x25   :  { %v8515_v22 = vld [vmem:[#allocation2 + $0x380] sm:$0xf]  ;;  %v8260_v24 = vor.u32 %v12216_v21, %v8259_v19  ;;  %1722 = vmatpush.bf16.msra.mxu3 %v9060_v20 }
  0x26   :  { %v12280_v23 = vld [vmem:[#allocation2 + $0x39c] sm:$0xf0] }
  0x27   :  { %v8516_v25 = vor.u32 %v12280_v23, %v8515_v22  ;;  %v8771_v26 = vld [vmem:[#allocation2 + $0x580] sm:$0xf]  ;;  %1684 = vmatpush.bf16.msra.mxu0 %v8260_v24 }
  0x28   :  { %v12344_v27 = vld [vmem:[#allocation2 + $0x59c] sm:$0xf0] }
  0x29   :  { %v9027_v28 = vld [vmem:[#allocation2 + $0x780] sm:$0xf]  ;;  %v8772_v29 = vor.u32 %v12344_v27, %v8771_v26  ;;  %1697 = vmatpush.bf16.msra.mxu1 %v8516_v25 }
  0x2a   :  { %v12408_v30 = vld [vmem:[#allocation2 + $0x79c] sm:$0xf0] }
  0x2b   :  { %v8227_v31 = vld [vmem:[#allocation2 + $0x140] sm:$0xf]  ;;  %v9028_v33 = vor.u32 %v12408_v30, %v9027_v28  ;;  %1710 = vmatpush.bf16.msra.mxu2 %v8772_v29 }
  0x2c   :  { %v12208_v32 = vld [vmem:[#allocation2 + $0x15c] sm:$0xf0] }
  0x2d   :  { %v8483_v34 = vld [vmem:[#allocation2 + $0x340] sm:$0xf]  ;;  %v8228_v37 = vor.u32 %v12208_v32, %v8227_v31  ;;  %1723 = vmatpush.bf16.msra.mxu3 %v9028_v33 }
  0x2e   :  { %v12272_v35 = vld [vmem:[#allocation2 + $0x35c] sm:$0xf0] }
  0x2f   :  { %v8739_v36 = vld [vmem:[#allocation2 + $0x540] sm:$0xf]  ;;  %v8484_v41 = vor.u32 %v12272_v35, %v8483_v34  ;;  %1685 = vmatpush.bf16.msra.mxu0 %v8228_v37 }
  0x30   :  { %v12336_v38 = vld [vmem:[#allocation2 + $0x55c] sm:$0xf0] }
  0x31   :  { %v8995_v39 = vld [vmem:[#allocation2 + $0x740] sm:$0xf]  ;;  %v8740_v42 = vor.u32 %v12336_v38, %v8739_v36  ;;  %1698 = vmatpush.bf16.msra.mxu1 %v8484_v41  ;;  %v8293_v41 = vld [vmem:[#allocation2 + $0x1e0] sm:$0xf0] }
  0x32   :  { %v12400_v40 = vld [vmem:[#allocation2 + $0x75c] sm:$0xf0] }
  0x33   :  { %v8195_v43 = vld [vmem:[#allocation2 + $0x100] sm:$0xf]  ;;  %v8996_v46 = vor.u32 %v12400_v40, %v8995_v39  ;;  %1711 = vmatpush.bf16.msra.mxu2 %v8740_v42  ;;  %v12220_v40 = vld [vmem:[#allocation2 + $0x1c4] sm:$0xf] }
  0x34   :  { %v12200_v44 = vld [vmem:[#allocation2 + $0x11c] sm:$0xf0]  ;;  %v12284_v42 = vld [vmem:[#allocation2 + $0x3c4] sm:$0xf] }
  0x35   :  { %v8451_v45 = vld [vmem:[#allocation2 + $0x300] sm:$0xf]  ;;  %v8196_v52 = vor.u32 %v12200_v44, %v8195_v43  ;;  %1724 = vmatpush.bf16.msra.mxu3 %v8996_v46  ;;  %v8549_v44 = vld [vmem:[#allocation2 + $0x3e0] sm:$0xf0] }
  0x36   :  { %v12264_v47 = vld [vmem:[#allocation2 + $0x31c] sm:$0xf0]  ;;  %v8805_v46 = vld [vmem:[#allocation2 + $0x5e0] sm:$0xf0] }
  0x37   :  { %v8707_v48 = vld [vmem:[#allocation2 + $0x500] sm:$0xf]  ;;  %v8452_v53 = vor.u32 %v12264_v47, %v8451_v45  ;;  %1686 = vmatpush.bf16.msra.mxu0 %v8196_v52  ;;  %v12348_v45 = vld [vmem:[#allocation2 + $0x5c4] sm:$0xf]  ;;  %v8296_v52 = vor.u32 %v12220_v40, %v8293_v41 }
  0x38   :  { %v12328_v49 = vld [vmem:[#allocation2 + $0x51c] sm:$0xf0] }
  0x39   :  { %v8963_v50 = vld [vmem:[#allocation2 + $0x700] sm:$0xf]  ;;  %v8708_v54 = vor.u32 %v12328_v49, %v8707_v48  ;;  %1699 = vmatpush.bf16.msra.mxu1 %v8452_v53  ;;  %v12412_v49 = vld [vmem:[#allocation2 + $0x7c4] sm:$0xf]  ;;  %v8552_v53 = vor.u32 %v12284_v42, %v8549_v44 }
  0x3a   :  { %v12392_v51 = vld [vmem:[#allocation2 + $0x71c] sm:$0xf0]  ;;  %v8133_v44 = vld [vmem:[#allocation2 + $0xa0] sm:$0xf0] }
  0x3b   :  { %v8163_v55 = vld [vmem:[#allocation2 + $0xc0] sm:$0xf]  ;;  %v8964_v58 = vor.u32 %v12392_v51, %v8963_v50  ;;  %1712 = vmatpush.bf16.msra.mxu2 %v8708_v54  ;;  %v9061_v50 = vld [vmem:[#allocation2 + $0x7e0] sm:$0xf0]  ;;  %v8808_v54 = vor.u32 %v12348_v45, %v8805_v46 }
  0x3c   :  { %v12192_v56 = vld [vmem:[#allocation2 + $0xdc] sm:$0xf0]  ;;  %v12244_v45 = vld [vmem:[#allocation2 + $0x284] sm:$0xf] }
  0x3d   :  { %v8419_v57 = vld [vmem:[#allocation2 + $0x2c0] sm:$0xf]  ;;  %v8164_v0 = vor.u32 %v12192_v56, %v8163_v55  ;;  %1725 = vmatpush.bf16.msra.mxu3 %v8964_v58  ;;  %v12212_v55 = vld [vmem:[#allocation2 + $0x184] sm:$0xf]  ;;  %v9064_v58 = vor.u32 %v12412_v49, %v9061_v50 }
  0x3e   :  { %v12256_v59 = vld [vmem:[#allocation2 + $0x2dc] sm:$0xf0]  ;;  %v8261_v56 = vld [vmem:[#allocation2 + $0x1a0] sm:$0xf0] }
  0x3f   :  { %v8675_v60 = vld [vmem:[#allocation2 + $0x4c0] sm:$0xf]  ;;  %v8420_v1 = vor.u32 %v12256_v59, %v8419_v57  ;;  %1687 = vmatpush.bf16.msra.mxu0 %v8164_v0  ;;  %v12276_v57 = vld [vmem:[#allocation2 + $0x384] sm:$0xf]  ;;  %v8264_v0 = vor.u32 %v12212_v55, %v8261_v56 }
  0x40   :  { %v12320_v61 = vld [vmem:[#allocation2 + $0x4dc] sm:$0xf0]  ;;  %v8517_v59 = vld [vmem:[#allocation2 + $0x3a0] sm:$0xf0] }
  0x41   :  { %v8931_v62 = vld [vmem:[#allocation2 + $0x6c0] sm:$0xf]  ;;  %v8676_v2 = vor.u32 %v12320_v61, %v8675_v60  ;;  %1700 = vmatpush.bf16.msra.mxu1 %v8420_v1  ;;  %v12340_v60 = vld [vmem:[#allocation2 + $0x584] sm:$0xf]  ;;  %v8520_v1 = vor.u32 %v12276_v57, %v8517_v59 }
  0x42   :  { %v12384_v63 = vld [vmem:[#allocation2 + $0x6dc] sm:$0xf0]  ;;  %v8773_v61 = vld [vmem:[#allocation2 + $0x5a0] sm:$0xf0] }
  0x43   :  { %v8131_v3 = vld [vmem:[#allocation2 + $0x80] sm:$0xf]  ;;  %v8932_v10 = vor.u32 %v12384_v63, %v8931_v62  ;;  %1713 = vmatpush.bf16.msra.mxu2 %v8676_v2  ;;  %v12404_v62 = vld [vmem:[#allocation2 + $0x784] sm:$0xf]  ;;  %v8776_v2 = vor.u32 %v12340_v60, %v8773_v61 }
  0x44   :  { %v12184_v8 = vld [vmem:[#allocation2 + $0x9c] sm:$0xf0]  ;;  %v9029_v63 = vld [vmem:[#allocation2 + $0x7a0] sm:$0xf0] }
  0x45   :  { %v8387_v9 = vld [vmem:[#allocation2 + $0x280] sm:$0xf]  ;;  %v8132_v16 = vor.u32 %v12184_v8, %v8131_v3  ;;  %1726 = vmatpush.bf16.msra.mxu3 %v8932_v10  ;;  %v12204_v3 = vld [vmem:[#allocation2 + $0x144] sm:$0xf]  ;;  %v9032_v10 = vor.u32 %v12404_v62, %v9029_v63 }
  0x46   :  { %v12248_v11 = vld [vmem:[#allocation2 + $0x29c] sm:$0xf0]  ;;  %v8229_v8 = vld [vmem:[#allocation2 + $0x160] sm:$0xf0] }
  0x47   :  { %v8643_v12 = vld [vmem:[#allocation2 + $0x480] sm:$0xf]  ;;  %v8388_v17 = vor.u32 %v12248_v11, %v8387_v9  ;;  %1688 = vmatpush.bf16.msra.mxu0 %v8132_v16  ;;  %v12268_v9 = vld [vmem:[#allocation2 + $0x344] sm:$0xf]  ;;  %v8232_v16 = vor.u32 %v12204_v3, %v8229_v8 }
  0x48   :  { %v12312_v13 = vld [vmem:[#allocation2 + $0x49c] sm:$0xf0]  ;;  %v8485_v11 = vld [vmem:[#allocation2 + $0x360] sm:$0xf0] }
  0x49   :  { %v8899_v14 = vld [vmem:[#allocation2 + $0x680] sm:$0xf]  ;;  %v8644_v18 = vor.u32 %v12312_v13, %v8643_v12  ;;  %1701 = vmatpush.bf16.msra.mxu1 %v8388_v17  ;;  %v12332_v12 = vld [vmem:[#allocation2 + $0x544] sm:$0xf]  ;;  %v8488_v17 = vor.u32 %v12268_v9, %v8485_v11 }
  0x4a   :  { %v12376_v15 = vld [vmem:[#allocation2 + $0x69c] sm:$0xf0]  ;;  %v8741_v13 = vld [vmem:[#allocation2 + $0x560] sm:$0xf0] }
  0x4b   :  { %v8099_v19 = vld [vmem:[#allocation2 + $0x40] sm:$0xf]  ;;  %v8900_v22 = vor.u32 %v12376_v15, %v8899_v14  ;;  %1714 = vmatpush.bf16.msra.mxu2 %v8644_v18  ;;  %v12396_v14 = vld [vmem:[#allocation2 + $0x744] sm:$0xf]  ;;  %v8744_v18 = vor.u32 %v12332_v12, %v8741_v13 }
  0x4c   :  { %v12176_v20 = vld [vmem:[#allocation2 + $0x5c] sm:$0xf0]  ;;  %v8997_v15 = vld [vmem:[#allocation2 + $0x760] sm:$0xf0] }
  0x4d   :  { %v8355_v21 = vld [vmem:[#allocation2 + $0x240] sm:$0xf]  ;;  %v8100_v28 = vor.u32 %v12176_v20, %v8099_v19  ;;  %1727 = vmatpush.bf16.msra.mxu3 %v8900_v22  ;;  %v12196_v19 = vld [vmem:[#allocation2 + $0x104] sm:$0xf]  ;;  %v9000_v22 = vor.u32 %v12396_v14, %v8997_v15 }
  0x4e   :  { %v12240_v23 = vld [vmem:[#allocation2 + $0x25c] sm:$0xf0]  ;;  %v8197_v20 = vld [vmem:[#allocation2 + $0x120] sm:$0xf0] }
  0x4f   :  { %v8611_v24 = vld [vmem:[#allocation2 + $0x440] sm:$0xf]  ;;  %v8356_v31 = vor.u32 %v12240_v23, %v8355_v21  ;;  %1689 = vmatpush.bf16.msra.mxu0 %v8100_v28  ;;  %v12260_v21 = vld [vmem:[#allocation2 + $0x304] sm:$0xf]  ;;  %v8200_v28 = vor.u32 %v12196_v19, %v8197_v20  ;;  %v12289_v20 = vld [vmem:[#allocation2 + $0x3e4] sm:$0xf0] }
  0x50   :  { %v12304_v25 = vld [vmem:[#allocation2 + $0x45c] sm:$0xf0]  ;;  %v8453_v23 = vld [vmem:[#allocation2 + $0x320] sm:$0xf0] }
  0x51   :  { %v8867_v26 = vld [vmem:[#allocation2 + $0x640] sm:$0xf]  ;;  %v8612_v32 = vor.u32 %v12304_v25, %v8611_v24  ;;  %1702 = vmatpush.bf16.msra.mxu1 %v8356_v31  ;;  %v12324_v24 = vld [vmem:[#allocation2 + $0x504] sm:$0xf] }
  0x52   :  { %v12368_v27 = vld [vmem:[#allocation2 + $0x65c] sm:$0xf0]  ;;  %v8709_v25 = vld [vmem:[#allocation2 + $0x520] sm:$0xf0] }
  0x53   :  { %v8067_v29 = vld [vmem:[#allocation2] sm:$0xf]  ;;  %v8868_v36 = vor.u32 %v12368_v27, %v8867_v26  ;;  %1715 = vmatpush.bf16.msra.mxu2 %v8612_v32  ;;  %v12388_v26 = vld [vmem:[#allocation2 + $0x704] sm:$0xf] }
  0x54   :  { %v12168_v30 = vld [vmem:[#allocation2 + $0x1c] sm:$0xf0]  ;;  %v8965_v27 = vld [vmem:[#allocation2 + $0x720] sm:$0xf0] }
  0x55   :  { %v8323_v33 = vld [vmem:[#allocation2 + $0x200] sm:$0xf]  ;;  %v8068_v43 = vor.u32 %v12168_v30, %v8067_v29  ;;  %1728 = vmatpush.bf16.msra.mxu3 %v8868_v36  ;;  %v8456_v29 = vor.u32 %v12260_v21, %v8453_v23  ;;  %v8712_v30 = vor.u32 %v12324_v24, %v8709_v25  ;;  %v12188_v31 = vld [vmem:[#allocation2 + $0xc4] sm:$0xf]  ;;  %v8811_v21 = vld [vmem:[#allocation2 + $0x5c8] sm:$0xf] }
  0x56   :  { %v12232_v34 = vld [vmem:[#allocation2 + $0x21c] sm:$0xf0]  ;;  %v8165_v32 = vld [vmem:[#allocation2 + $0xe0] sm:$0xf0]  ;;  %v9067_v25 = vld [vmem:[#allocation2 + $0x7c8] sm:$0xf] }
  0x57   :  { %v8579_v35 = vld [vmem:[#allocation2 + $0x400] sm:$0xf]  ;;  %v8324_v47 = vor.u32 %v12232_v34, %v8323_v33  ;;  %1690 = vmatpush.bf16.msra.mxu0 %v8068_v43  ;;  %v12252_v33 = vld [vmem:[#allocation2 + $0x2c4] sm:$0xf]  ;;  %v8968_v34 = vor.u32 %v12388_v26, %v8965_v27  ;;  %v8168_v40 = vor.u32 %v12188_v31, %v8165_v32  ;;  %v12417_v26 = vld [vmem:[#allocation2 + $0x7e4] sm:$0xf0] }
  0x58   :  { %v12296_v37 = vld [vmem:[#allocation2 + $0x41c] sm:$0xf0]  ;;  %v12316_v36 = vld [vmem:[#allocation2 + $0x4c4] sm:$0xf]  ;;  %v8267_v31 = vld [vmem:[#allocation2 + $0x188] sm:$0xf] }
  0x59   :  { %v8835_v38 = vld [vmem:[#allocation2 + $0x600] sm:$0xf]  ;;  %v8580_v48 = vor.u32 %v12296_v37, %v8579_v35  ;;  %1703 = vmatpush.bf16.msra.mxu1 %v8324_v47  ;;  %v8421_v35 = vld [vmem:[#allocation2 + $0x2e0] sm:$0xf0]  ;;  %v12217_v32 = vld [vmem:[#allocation2 + $0x1a4] sm:$0xf0] }
  0x5a   :  { %v12360_v39 = vld [vmem:[#allocation2 + $0x61c] sm:$0xf0]  ;;  %1691 = vmatmul.bf16.vlgmr.msra.gmra.mxu0 %v13473_v4  ;;  %v8677_v37 = vld [vmem:[#allocation2 + $0x4e0] sm:$0xf0]  ;;  %v8424_v41 = vor.u32 %v12252_v33, %v8421_v35  ;;  %v8523_v33 = vld [vmem:[#allocation2 + $0x388] sm:$0xf] }
  0x5b   :  { %v8836_v51 = vor.u32 %v12360_v39, %v8835_v38  ;;  %1716 = vmatpush.bf16.msra.mxu2 %v8580_v48  ;;  %1735 = vmatpush.bf16.msrb.mxu0 %v8296_v52  ;;  %v12380_v38 = vld [vmem:[#allocation2 + $0x6c4] sm:$0xf]  ;;  %v8680_v42 = vor.u32 %v12316_v36, %v8677_v37  ;;  %v12281_v35 = vld [vmem:[#allocation2 + $0x3a4] sm:$0xf0] }
  0x5c   :  { %1704 = vmatmul.bf16.vlgmr.msra.gmra.mxu1 %v13475_v5  ;;  %v8933_v39 = vld [vmem:[#allocation2 + $0x6e0] sm:$0xf0]  ;;  %v8779_v36 = vld [vmem:[#allocation2 + $0x588] sm:$0xf] }
  0x5d   :  { %1729 = vmatpush.bf16.msra.mxu3 %v8836_v51  ;;  %1748 = vmatpush.bf16.msrb.mxu1 %v8552_v53  ;;  %v12180_v43 = vld [vmem:[#allocation2 + $0x84] sm:$0xf]  ;;  %v8936_v46 = vor.u32 %v12380_v38, %v8933_v39  ;;  %v12345_v37 = vld [vmem:[#allocation2 + $0x5a4] sm:$0xf0] }
  0x5e   :  { %1717 = vmatmul.bf16.vlgmr.msra.gmra.mxu2 %v13477_v6  ;;  %v8389_v47 = vld [vmem:[#allocation2 + $0x2a0] sm:$0xf0]  ;;  %v8136_v52 = vor.u32 %v12180_v43, %v8133_v44  ;;  %v9035_v38 = vld [vmem:[#allocation2 + $0x788] sm:$0xf] }
  0x5f   :  { %1761 = vmatpush.bf16.msrb.mxu2 %v8808_v54  ;;  %1736 = vmatpush.bf16.msrb.mxu0 %v8264_v0  ;;  %v12308_v48 = vld [vmem:[#allocation2 + $0x484] sm:$0xf]  ;;  %v8392_v53 = vor.u32 %v12244_v45, %v8389_v47  ;;  %v12409_v39 = vld [vmem:[#allocation2 + $0x7a4] sm:$0xf0] }
  0x60   :  { %1730 = vmatmul.bf16.vlgmr.msra.gmra.mxu3 %v13479_v7  ;;  %v8645_v49 = vld [vmem:[#allocation2 + $0x4a0] sm:$0xf0]  ;;  %v8235_v43 = vld [vmem:[#allocation2 + $0x148] sm:$0xf] }
  0x61   :  { %1774 = vmatpush.bf16.msrb.mxu3 %v9064_v58  ;;  %1749 = vmatpush.bf16.msrb.mxu1 %v8520_v1  ;;  %v12372_v50 = vld [vmem:[#allocation2 + $0x684] sm:$0xf]  ;;  %v8648_v54 = vor.u32 %v12308_v48, %v8645_v49  ;;  %v12209_v44 = vld [vmem:[#allocation2 + $0x164] sm:$0xf0] }
  0x62   :  { %v8901_v51 = vld [vmem:[#allocation2 + $0x6a0] sm:$0xf0]  ;;  %v8491_v45 = vld [vmem:[#allocation2 + $0x348] sm:$0xf] }
  0x63   :  { %1762 = vmatpush.bf16.msrb.mxu2 %v8776_v2  ;;  %1737 = vmatpush.bf16.msrb.mxu0 %v8232_v16  ;;  %v12172_v55 = vld [vmem:[#allocation2 + $0x44] sm:$0xf]  ;;  %v8904_v58 = vor.u32 %v12372_v50, %v8901_v51  ;;  %v8299_v16 = vld [vmem:[#allocation2 + $0x1c8] sm:$0xf] }
  0x64   :  { %v8101_v56 = vld [vmem:[#allocation2 + $0x60] sm:$0xf0]  ;;  %v12273_v47 = vld [vmem:[#allocation2 + $0x364] sm:$0xf0] }
  0x65   :  { %1775 = vmatpush.bf16.msrb.mxu3 %v9032_v10  ;;  %1750 = vmatpush.bf16.msrb.mxu1 %v8488_v17  ;;  %v12236_v57 = vld [vmem:[#allocation2 + $0x244] sm:$0xf]  ;;  %v8104_v0 = vor.u32 %v12172_v55, %v8101_v56  ;;  %v12225_v17 = vld [vmem:[#allocation2 + $0x1e4] sm:$0xf0] }
  0x66   :  { %v8357_v59 = vld [vmem:[#allocation2 + $0x260] sm:$0xf0]  ;;  %v8747_v48 = vld [vmem:[#allocation2 + $0x548] sm:$0xf] }
  0x67   :  { %1763 = vmatpush.bf16.msrb.mxu2 %v8744_v18  ;;  %1738 = vmatpush.bf16.msrb.mxu0 %v8200_v28  ;;  %v12300_v60 = vld [vmem:[#allocation2 + $0x444] sm:$0xf]  ;;  %v8360_v3 = vor.u32 %v12236_v57, %v8357_v59  ;;  %v8555_v18 = vld [vmem:[#allocation2 + $0x3c8] sm:$0xf]  ;;  %v8300_v28 = vor.u32 %v12225_v17, %v8299_v16 }
  0x68   :  { %v8613_v61 = vld [vmem:[#allocation2 + $0x460] sm:$0xf0]  ;;  %v12337_v49 = vld [vmem:[#allocation2 + $0x564] sm:$0xf0] }
  0x69   :  { %1776 = vmatpush.bf16.msrb.mxu3 %v9000_v22  ;;  %1751 = vmatpush.bf16.msrb.mxu1 %v8456_v29  ;;  %v12364_v62 = vld [vmem:[#allocation2 + $0x644] sm:$0xf]  ;;  %v8616_v8 = vor.u32 %v12300_v60, %v8613_v61  ;;  %v12353_v22 = vld [vmem:[#allocation2 + $0x5e4] sm:$0xf0]  ;;  %v8556_v29 = vor.u32 %v12289_v20, %v8555_v18 }
  0x6a   :  { %v8869_v63 = vld [vmem:[#allocation2 + $0x660] sm:$0xf0]  ;;  %v9003_v50 = vld [vmem:[#allocation2 + $0x748] sm:$0xf] }
  0x6b   :  { %1764 = vmatpush.bf16.msrb.mxu2 %v8712_v30  ;;  %1739 = vmatpush.bf16.msrb.mxu0 %v8168_v40  ;;  %v12164_v1 = vld [vmem:[#allocation2 + $0x4] sm:$0xf]  ;;  %v8872_v12 = vor.u32 %v12364_v62, %v8869_v63  ;;  %v8812_v30 = vor.u32 %v12353_v22, %v8811_v21  ;;  %v8268_v40 = vor.u32 %v12217_v32, %v8267_v31  ;;  %v12401_v51 = vld [vmem:[#allocation2 + $0x764] sm:$0xf0] }
  0x6c   :  { %v8069_v2 = vld [vmem:[#allocation2 + $0x20] sm:$0xf0]  ;;  %v8203_v55 = vld [vmem:[#allocation2 + $0x108] sm:$0xf] }
  0x6d   :  { %1777 = vmatpush.bf16.msrb.mxu3 %v8968_v34  ;;  %1752 = vmatpush.bf16.msrb.mxu1 %v8424_v41  ;;  %v12228_v9 = vld [vmem:[#allocation2 + $0x204] sm:$0xf]  ;;  %v8072_v19 = vor.u32 %v12164_v1, %v8069_v2  ;;  %v9068_v34 = vor.u32 %v12417_v26, %v9067_v25  ;;  %v8524_v41 = vor.u32 %v12281_v35, %v8523_v33  ;;  %v12201_v56 = vld [vmem:[#allocation2 + $0x124] sm:$0xf0] }
  0x6e   :  { %v8325_v10 = vld [vmem:[#allocation2 + $0x220] sm:$0xf0]  ;;  %v8459_v57 = vld [vmem:[#allocation2 + $0x308] sm:$0xf] }
  0x6f   :  { %1765 = vmatpush.bf16.msrb.mxu2 %v8680_v42  ;;  %1740 = vmatpush.bf16.msrb.mxu0 %v8136_v52  ;;  %v12292_v11 = vld [vmem:[#allocation2 + $0x404] sm:$0xf]  ;;  %v8328_v23 = vor.u32 %v12228_v9, %v8325_v10  ;;  %v8780_v42 = vor.u32 %v12345_v37, %v8779_v36  ;;  %v8236_v52 = vor.u32 %v12209_v44, %v8235_v43  ;;  %v12265_v59 = vld [vmem:[#allocation2 + $0x324] sm:$0xf0] }
  0x70   :  { %v8581_v13 = vld [vmem:[#allocation2 + $0x420] sm:$0xf0]  ;;  %v8715_v60 = vld [vmem:[#allocation2 + $0x508] sm:$0xf]  ;;  %v8460_v1 = vor.u32 %v12265_v59, %v8459_v57  ;;  %v12349_v57 = vld [vmem:[#allocation2 + $0x5cc] sm:$0xf] }
  0x71   :  { %1778 = vmatpush.bf16.msrb.mxu3 %v8936_v46  ;;  %1753 = vmatpush.bf16.msrb.mxu1 %v8392_v53  ;;  %v12356_v14 = vld [vmem:[#allocation2 + $0x604] sm:$0xf]  ;;  %v8584_v24 = vor.u32 %v12292_v11, %v8581_v13  ;;  %v9036_v46 = vor.u32 %v12409_v39, %v9035_v38  ;;  %v8492_v53 = vor.u32 %v12273_v47, %v8491_v45  ;;  %v12329_v61 = vld [vmem:[#allocation2 + $0x524] sm:$0xf0] }
  0x72   :  { %v8837_v15 = vld [vmem:[#allocation2 + $0x620] sm:$0xf0]  ;;  %v8971_v62 = vld [vmem:[#allocation2 + $0x708] sm:$0xf]  ;;  %v8716_v2 = vor.u32 %v12329_v61, %v8715_v60  ;;  %v12413_v61 = vld [vmem:[#allocation2 + $0x7cc] sm:$0xf] }
  0x73   :  { %1766 = vmatpush.bf16.msrb.mxu2 %v8648_v54  ;;  %1741 = vmatpush.bf16.msrb.mxu0 %v8104_v0  ;;  %v8840_v27 = vor.u32 %v12356_v14, %v8837_v15  ;;  %v8748_v54 = vor.u32 %v12337_v49, %v8747_v48  ;;  %v12393_v63 = vld [vmem:[#allocation2 + $0x724] sm:$0xf0]  ;;  %v8204_v0 = vor.u32 %v12201_v56, %v8203_v55  ;;  %v8557_v56 = vld [vmem:[#allocation2 + $0x3e8] sm:$0xf0] }
  0x74   :  { %v8427_v9 = vld [vmem:[#allocation2 + $0x2c8] sm:$0xf]  ;;  %v8972_v10 = vor.u32 %v12393_v63, %v8971_v62  ;;  %v9069_v62 = vld [vmem:[#allocation2 + $0x7e8] sm:$0xf0] }
  0x75   :  { %1779 = vmatpush.bf16.msrb.mxu3 %v8904_v58  ;;  %1754 = vmatpush.bf16.msrb.mxu1 %v8360_v3  ;;  %v9004_v58 = vor.u32 %v12401_v51, %v9003_v50  ;;  %v8171_v3 = vld [vmem:[#allocation2 + $0xc8] sm:$0xf] }
  0x76   :  { %v12257_v11 = vld [vmem:[#allocation2 + $0x2e4] sm:$0xf0] }
  0x77   :  { %1767 = vmatpush.bf16.msrb.mxu2 %v8616_v8  ;;  %1742 = vmatpush.bf16.msrb.mxu0 %v8072_v19  ;;  %v12193_v8 = vld [vmem:[#allocation2 + $0xe4] sm:$0xf0]  ;;  %v8428_v17 = vor.u32 %v12257_v11, %v8427_v9  ;;  %v12277_v9 = vld [vmem:[#allocation2 + $0x38c] sm:$0xf] }
  0x78   :  { %v12321_v13 = vld [vmem:[#allocation2 + $0x4e4] sm:$0xf0]  ;;  %v8172_v16 = vor.u32 %v12193_v8, %v8171_v3  ;;  %v12213_v3 = vld [vmem:[#allocation2 + $0x18c] sm:$0xf] }
  0x79   :  { %1780 = vmatpush.bf16.msrb.mxu3 %v8872_v12  ;;  %1755 = vmatpush.bf16.msrb.mxu1 %v8328_v23  ;;  %v8683_v12 = vld [vmem:[#allocation2 + $0x4c8] sm:$0xf]  ;;  %v8269_v8 = vld [vmem:[#allocation2 + $0x1a8] sm:$0xf0] }
  0x7a   :  { %1743 = vmatmul.bf16.vlgmr.msrb.gmra.mxu0 %v13473_v4  ;;  %v8939_v14 = vld [vmem:[#allocation2 + $0x6c8] sm:$0xf]  ;;  %v8684_v18 = vor.u32 %v12321_v13, %v8683_v12  ;;  %v8525_v11 = vld [vmem:[#allocation2 + $0x3a8] sm:$0xf0] }
  0x7b   :  { %1768 = vmatpush.bf16.msrb.mxu2 %v8584_v24  ;;  %1787 = vmatpush.bf16.msra.mxu0 %v8300_v28  ;;  %v12385_v15 = vld [vmem:[#allocation2 + $0x6e4] sm:$0xf0]  ;;  %v12341_v12 = vld [vmem:[#allocation2 + $0x58c] sm:$0xf] }
  0x7c   :  { %1756 = vmatmul.bf16.vlgmr.msrb.gmra.mxu1 %v13475_v5  ;;  %v8139_v19 = vld [vmem:[#allocation2 + $0x88] sm:$0xf]  ;;  %v8940_v22 = vor.u32 %v12385_v15, %v8939_v14  ;;  %v8781_v13 = vld [vmem:[#allocation2 + $0x5a8] sm:$0xf0] }
  0x7d   :  { %1781 = vmatpush.bf16.msrb.mxu3 %v8840_v27  ;;  %1800 = vmatpush.bf16.msra.mxu1 %v8556_v29  ;;  %v12185_v20 = vld [vmem:[#allocation2 + $0xa4] sm:$0xf0]  ;;  %v12405_v14 = vld [vmem:[#allocation2 + $0x78c] sm:$0xf] }
  0x7e   :  { %1769 = vmatmul.bf16.vlgmr.msrb.gmra.mxu2 %v13477_v6  ;;  %v8395_v21 = vld [vmem:[#allocation2 + $0x288] sm:$0xf]  ;;  %v8140_v28 = vor.u32 %v12185_v20, %v8139_v19  ;;  %v9037_v15 = vld [vmem:[#allocation2 + $0x7a8] sm:$0xf0] }
  0x7f   :  { %1813 = vmatpush.bf16.msra.mxu2 %v8812_v30  ;;  %1788 = vmatpush.bf16.msra.mxu0 %v8268_v40  ;;  %v12249_v23 = vld [vmem:[#allocation2 + $0x2a4] sm:$0xf0]  ;;  %v12205_v19 = vld [vmem:[#allocation2 + $0x14c] sm:$0xf] }
  0x80   :  { %1782 = vmatmul.bf16.vlgmr.msrb.gmra.mxu3 %v13479_v7  ;;  %v8651_v24 = vld [vmem:[#allocation2 + $0x488] sm:$0xf]  ;;  %v8396_v29 = vor.u32 %v12249_v23, %v8395_v21  ;;  %v8237_v20 = vld [vmem:[#allocation2 + $0x168] sm:$0xf0] }
  0x81   :  { %1826 = vmatpush.bf16.msra.mxu3 %v9068_v34  ;;  %1801 = vmatpush.bf16.msra.mxu1 %v8524_v41  ;;  %v12313_v25 = vld [vmem:[#allocation2 + $0x4a4] sm:$0xf0]  ;;  %v12269_v21 = vld [vmem:[#allocation2 + $0x34c] sm:$0xf] }
  0x82   :  { %v8907_v26 = vld [vmem:[#allocation2 + $0x688] sm:$0xf]  ;;  %v8652_v30 = vor.u32 %v12313_v25, %v8651_v24  ;;  %v8493_v23 = vld [vmem:[#allocation2 + $0x368] sm:$0xf0] }
  0x83   :  { %1814 = vmatpush.bf16.msra.mxu2 %v8780_v42  ;;  %1789 = vmatpush.bf16.msra.mxu0 %v8236_v52  ;;  %v12377_v27 = vld [vmem:[#allocation2 + $0x6a4] sm:$0xf0]  ;;  %v12221_v52 = vld [vmem:[#allocation2 + $0x1cc] sm:$0xf] }
  0x84   :  { %v8107_v31 = vld [vmem:[#allocation2 + $0x48] sm:$0xf]  ;;  %v8908_v34 = vor.u32 %v12377_v27, %v8907_v26  ;;  %v12333_v24 = vld [vmem:[#allocation2 + $0x54c] sm:$0xf] }
  0x85   :  { %1827 = vmatpush.bf16.msra.mxu3 %v9036_v46  ;;  %1802 = vmatpush.bf16.msra.mxu1 %v8492_v53  ;;  %v12177_v32 = vld [vmem:[#allocation2 + $0x64] sm:$0xf0]  ;;  %v8301_v53 = vld [vmem:[#allocation2 + $0x1e8] sm:$0xf0] }
  0x86   :  { %v8363_v33 = vld [vmem:[#allocation2 + $0x248] sm:$0xf]  ;;  %v8108_v40 = vor.u32 %v12177_v32, %v8107_v31  ;;  %v8749_v25 = vld [vmem:[#allocation2 + $0x568] sm:$0xf0] }
  0x87   :  { %1815 = vmatpush.bf16.msra.mxu2 %v8748_v54  ;;  %1790 = vmatpush.bf16.msra.mxu0 %v8204_v0  ;;  %v12241_v35 = vld [vmem:[#allocation2 + $0x264] sm:$0xf0]  ;;  %v12285_v54 = vld [vmem:[#allocation2 + $0x3cc] sm:$0xf]  ;;  %v8304_v0 = vor.u32 %v12221_v52, %v8301_v53 }
  0x88   :  { %v8619_v36 = vld [vmem:[#allocation2 + $0x448] sm:$0xf]  ;;  %v8364_v43 = vor.u32 %v12241_v35, %v8363_v33  ;;  %v12397_v26 = vld [vmem:[#allocation2 + $0x74c] sm:$0xf] }
  0x89   :  { %1828 = vmatpush.bf16.msra.mxu3 %v9004_v58  ;;  %1803 = vmatpush.bf16.msra.mxu1 %v8460_v1  ;;  %v12305_v37 = vld [vmem:[#allocation2 + $0x464] sm:$0xf0]  ;;  %v8813_v58 = vld [vmem:[#allocation2 + $0x5e8] sm:$0xf0]  ;;  %v8560_v1 = vor.u32 %v12285_v54, %v8557_v56 }
  0x8a   :  { %v8875_v38 = vld [vmem:[#allocation2 + $0x648] sm:$0xf]  ;;  %v8620_v44 = vor.u32 %v12305_v37, %v8619_v36  ;;  %v9005_v27 = vld [vmem:[#allocation2 + $0x768] sm:$0xf0] }
  0x8b   :  { %1816 = vmatpush.bf16.msra.mxu2 %v8716_v2  ;;  %1791 = vmatpush.bf16.msra.mxu0 %v8172_v16  ;;  %v12369_v39 = vld [vmem:[#allocation2 + $0x664] sm:$0xf0]  ;;  %v8816_v2 = vor.u32 %v12349_v57, %v8813_v58  ;;  %v8272_v16 = vor.u32 %v12213_v3, %v8269_v8  ;;  %v12197_v31 = vld [vmem:[#allocation2 + $0x10c] sm:$0xf] }
  0x8c   :  { %v8075_v41 = vld [vmem:[#allocation2 + $0x8] sm:$0xf]  ;;  %v8876_v48 = vor.u32 %v12369_v39, %v8875_v38  ;;  %v8205_v32 = vld [vmem:[#allocation2 + $0x128] sm:$0xf0] }
  0x8d   :  { %1829 = vmatpush.bf16.msra.mxu3 %v8972_v10  ;;  %1804 = vmatpush.bf16.msra.mxu1 %v8428_v17  ;;  %v12169_v42 = vld [vmem:[#allocation2 + $0x24] sm:$0xf0]  ;;  %v9072_v10 = vor.u32 %v12413_v61, %v9069_v62  ;;  %v8528_v17 = vor.u32 %v12277_v9, %v8525_v11  ;;  %v12261_v33 = vld [vmem:[#allocation2 + $0x30c] sm:$0xf] }
  0x8e   :  { %v8331_v45 = vld [vmem:[#allocation2 + $0x208] sm:$0xf]  ;;  %v8076_v55 = vor.u32 %v12169_v42, %v8075_v41  ;;  %v8461_v35 = vld [vmem:[#allocation2 + $0x328] sm:$0xf0] }
  0x8f   :  { %1817 = vmatpush.bf16.msra.mxu2 %v8684_v18  ;;  %1792 = vmatpush.bf16.msra.mxu0 %v8140_v28  ;;  %v12233_v46 = vld [vmem:[#allocation2 + $0x224] sm:$0xf0]  ;;  %v8784_v18 = vor.u32 %v12341_v12, %v8781_v13  ;;  %v8240_v28 = vor.u32 %v12205_v19, %v8237_v20  ;;  %v12325_v36 = vld [vmem:[#allocation2 + $0x50c] sm:$0xf]  ;;  %v8464_v41 = vor.u32 %v12261_v33, %v8461_v35  ;;  %v8819_v33 = vld [vmem:[#allocation2 + $0x5d0] sm:$0xf] }
  0x90   :  { %v8587_v47 = vld [vmem:[#allocation2 + $0x408] sm:$0xf]  ;;  %v8332_v59 = vor.u32 %v12233_v46, %v8331_v45  ;;  %v8717_v37 = vld [vmem:[#allocation2 + $0x528] sm:$0xf0] }
  0x91   :  { %1830 = vmatpush.bf16.msra.mxu3 %v8940_v22  ;;  %1805 = vmatpush.bf16.msra.mxu1 %v8396_v29  ;;  %v12297_v49 = vld [vmem:[#allocation2 + $0x424] sm:$0xf0]  ;;  %v9040_v22 = vor.u32 %v12405_v14, %v9037_v15  ;;  %v8496_v29 = vor.u32 %v12269_v21, %v8493_v23  ;;  %v12389_v38 = vld [vmem:[#allocation2 + $0x70c] sm:$0xf]  ;;  %v8720_v42 = vor.u32 %v12325_v36, %v8717_v37  ;;  %v9075_v37 = vld [vmem:[#allocation2 + $0x7d0] sm:$0xf] }
  0x92   :  { %v8843_v50 = vld [vmem:[#allocation2 + $0x608] sm:$0xf]  ;;  %v8588_v60 = vor.u32 %v12297_v49, %v8587_v47  ;;  %v8973_v39 = vld [vmem:[#allocation2 + $0x728] sm:$0xf0] }
  0x93   :  { %1818 = vmatpush.bf16.msra.mxu2 %v8652_v30  ;;  %v12361_v51 = vld [vmem:[#allocation2 + $0x624] sm:$0xf0]  ;;  %1793 = vmatpush.bf16.msra.mxu0 %v8108_v40  ;;  %v8752_v30 = vor.u32 %v12333_v24, %v8749_v25  ;;  %v8208_v40 = vor.u32 %v12197_v31, %v8205_v32  ;;  %v12253_v45 = vld [vmem:[#allocation2 + $0x2cc] sm:$0xf]  ;;  %v8976_v46 = vor.u32 %v12389_v38, %v8973_v39  ;;  %v12290_v32 = vld [vmem:[#allocation2 + $0x3ec] sm:$0xf0] }
  0x94   :  { %v8844_v63 = vor.u32 %v12361_v51, %v8843_v50  ;;  %v8429_v47 = vld [vmem:[#allocation2 + $0x2e8] sm:$0xf0]  ;;  %v12418_v38 = vld [vmem:[#allocation2 + $0x7ec] sm:$0xf0] }
  0x95   :  { %1831 = vmatpush.bf16.msra.mxu3 %v8908_v34  ;;  %1806 = vmatpush.bf16.msra.mxu1 %v8364_v43  ;;  %v9008_v34 = vor.u32 %v12397_v26, %v9005_v27  ;;  %v12189_v43 = vld [vmem:[#allocation2 + $0xcc] sm:$0xf]  ;;  %v8432_v53 = vor.u32 %v12253_v45, %v8429_v47  ;;  %v8531_v45 = vld [vmem:[#allocation2 + $0x390] sm:$0xf] }
  0x96   :  { %v8685_v49 = vld [vmem:[#allocation2 + $0x4e8] sm:$0xf0]  ;;  %v12282_v47 = vld [vmem:[#allocation2 + $0x3ac] sm:$0xf0] }
  0x97   :  { %1819 = vmatpush.bf16.msra.mxu2 %v8620_v44  ;;  %1794 = vmatpush.bf16.msra.mxu0 %v8076_v55  ;;  %v8173_v44 = vld [vmem:[#allocation2 + $0xe8] sm:$0xf0] }
  0x98   :  { %v12381_v50 = vld [vmem:[#allocation2 + $0x6cc] sm:$0xf]  ;;  %v8176_v52 = vor.u32 %v12189_v43, %v8173_v44  ;;  %v8275_v43 = vld [vmem:[#allocation2 + $0x190] sm:$0xf] }
  0x99   :  { %1832 = vmatpush.bf16.msra.mxu3 %v8876_v48  ;;  %1807 = vmatpush.bf16.msra.mxu1 %v8332_v59  ;;  %v12317_v48 = vld [vmem:[#allocation2 + $0x4cc] sm:$0xf]  ;;  %v12218_v44 = vld [vmem:[#allocation2 + $0x1ac] sm:$0xf0] }
  0x9a   :  { %1795 = vmatmul.bf16.vlgmr.msra.gmra.mxu0 %v13473_v4  ;;  %v8941_v51 = vld [vmem:[#allocation2 + $0x6e8] sm:$0xf0]  ;;  %v8688_v54 = vor.u32 %v12317_v48, %v8685_v49  ;;  %v8787_v48 = vld [vmem:[#allocation2 + $0x590] sm:$0xf] }
  0x9b   :  { %1820 = vmatpush.bf16.msra.mxu2 %v8588_v60  ;;  %1839 = vmatpush.bf16.msrb.mxu0 %v8304_v0  ;;  %v12181_v55 = vld [vmem:[#allocation2 + $0x8c] sm:$0xf]  ;;  %v8944_v58 = vor.u32 %v12381_v50, %v8941_v51  ;;  %v12346_v49 = vld [vmem:[#allocation2 + $0x5ac] sm:$0xf0] }
  0x9c   :  { %1808 = vmatmul.bf16.vlgmr.msra.gmra.mxu1 %v13475_v5  ;;  %v8141_v56 = vld [vmem:[#allocation2 + $0xa8] sm:$0xf0]  ;;  %v9043_v50 = vld [vmem:[#allocation2 + $0x790] sm:$0xf] }
  0x9d   :  { %1833 = vmatpush.bf16.msra.mxu3 %v8844_v63  ;;  %1852 = vmatpush.bf16.msrb.mxu1 %v8560_v1  ;;  %v12245_v57 = vld [vmem:[#allocation2 + $0x28c] sm:$0xf]  ;;  %v8144_v0 = vor.u32 %v12181_v55, %v8141_v56  ;;  %v12410_v51 = vld [vmem:[#allocation2 + $0x7ac] sm:$0xf0] }
  0x9e   :  { %1821 = vmatmul.bf16.vlgmr.msra.gmra.mxu2 %v13477_v6  ;;  %v8397_v59 = vld [vmem:[#allocation2 + $0x2a8] sm:$0xf0]  ;;  %v8243_v55 = vld [vmem:[#allocation2 + $0x150] sm:$0xf] }
  0x9f   :  { %1865 = vmatpush.bf16.msrb.mxu2 %v8816_v2  ;;  %1840 = vmatpush.bf16.msrb.mxu0 %v8272_v16  ;;  %v12309_v60 = vld [vmem:[#allocation2 + $0x48c] sm:$0xf]  ;;  %v8400_v1 = vor.u32 %v12245_v57, %v8397_v59  ;;  %v12210_v56 = vld [vmem:[#allocation2 + $0x16c] sm:$0xf0] }
  0xa0   :  { %1834 = vmatmul.bf16.vlgmr.msra.gmra.mxu3 %v13479_v7  ;;  %v8653_v61 = vld [vmem:[#allocation2 + $0x4a8] sm:$0xf0]  ;;  %v8499_v57 = vld [vmem:[#allocation2 + $0x350] sm:$0xf] }
  0xa1   :  { %1878 = vmatpush.bf16.msrb.mxu3 %v9072_v10  ;;  %1853 = vmatpush.bf16.msrb.mxu1 %v8528_v17  ;;  %v12373_v62 = vld [vmem:[#allocation2 + $0x68c] sm:$0xf]  ;;  %v8656_v2 = vor.u32 %v12309_v60, %v8653_v61  ;;  %v12274_v59 = vld [vmem:[#allocation2 + $0x36c] sm:$0xf0] }
  0xa2   :  { %v8909_v63 = vld [vmem:[#allocation2 + $0x6a8] sm:$0xf0]  ;;  %v8755_v60 = vld [vmem:[#allocation2 + $0x550] sm:$0xf] }
  0xa3   :  { %1866 = vmatpush.bf16.msrb.mxu2 %v8784_v18  ;;  %1841 = vmatpush.bf16.msrb.mxu0 %v8240_v28  ;;  %v12173_v3 = vld [vmem:[#allocation2 + $0x4c] sm:$0xf]  ;;  %v8912_v10 = vor.u32 %v12373_v62, %v8909_v63  ;;  %v8307_v28 = vld [vmem:[#allocation2 + $0x1d0] sm:$0xf] }
  0xa4   :  { %v8109_v8 = vld [vmem:[#allocation2 + $0x68] sm:$0xf0]  ;;  %v12338_v61 = vld [vmem:[#allocation2 + $0x56c] sm:$0xf0] }
  0xa5   :  { %1879 = vmatpush.bf16.msrb.mxu3 %v9040_v22  ;;  %1854 = vmatpush.bf16.msrb.mxu1 %v8496_v29  ;;  %v12237_v9 = vld [vmem:[#allocation2 + $0x24c] sm:$0xf]  ;;  %v8112_v16 = vor.u32 %v12173_v3, %v8109_v8  ;;  %v12226_v29 = vld [vmem:[#allocation2 + $0x1ec] sm:$0xf0] }
  0xa6   :  { %v8365_v11 = vld [vmem:[#allocation2 + $0x268] sm:$0xf0]  ;;  %v9011_v62 = vld [vmem:[#allocation2 + $0x750] sm:$0xf] }
  0xa7   :  { %1867 = vmatpush.bf16.msrb.mxu2 %v8752_v30  ;;  %1842 = vmatpush.bf16.msrb.mxu0 %v8208_v40  ;;  %v12301_v12 = vld [vmem:[#allocation2 + $0x44c] sm:$0xf]  ;;  %v8368_v19 = vor.u32 %v12237_v9, %v8365_v11  ;;  %v8563_v30 = vld [vmem:[#allocation2 + $0x3d0] sm:$0xf]  ;;  %v8308_v40 = vor.u32 %v12226_v29, %v8307_v28 }
  0xa8   :  { %v8621_v13 = vld [vmem:[#allocation2 + $0x468] sm:$0xf0]  ;;  %v12402_v63 = vld [vmem:[#allocation2 + $0x76c] sm:$0xf0] }
  0xa9   :  { %1880 = vmatpush.bf16.msrb.mxu3 %v9008_v34  ;;  %1855 = vmatpush.bf16.msrb.mxu1 %v8464_v41  ;;  %v12365_v14 = vld [vmem:[#allocation2 + $0x64c] sm:$0xf]  ;;  %v8624_v20 = vor.u32 %v12301_v12, %v8621_v13  ;;  %v12354_v34 = vld [vmem:[#allocation2 + $0x5ec] sm:$0xf0]  ;;  %v8564_v41 = vor.u32 %v12290_v32, %v8563_v30 }
  0xaa   :  { %v8877_v15 = vld [vmem:[#allocation2 + $0x668] sm:$0xf0]  ;;  %v8211_v3 = vld [vmem:[#allocation2 + $0x110] sm:$0xf] }
  0xab   :  { %1868 = vmatpush.bf16.msrb.mxu2 %v8720_v42  ;;  %1843 = vmatpush.bf16.msrb.mxu0 %v8176_v52  ;;  %v12165_v17 = vld [vmem:[#allocation2 + $0xc] sm:$0xf]  ;;  %v8880_v24 = vor.u32 %v12365_v14, %v8877_v15  ;;  %v8820_v42 = vor.u32 %v12354_v34, %v8819_v33  ;;  %v8276_v52 = vor.u32 %v12218_v44, %v8275_v43  ;;  %v12202_v8 = vld [vmem:[#allocation2 + $0x12c] sm:$0xf0] }
  0xac   :  { %v8077_v18 = vld [vmem:[#allocation2 + $0x28] sm:$0xf0]  ;;  %v8467_v9 = vld [vmem:[#allocation2 + $0x310] sm:$0xf] }
  0xad   :  { %1881 = vmatpush.bf16.msrb.mxu3 %v8976_v46  ;;  %1856 = vmatpush.bf16.msrb.mxu1 %v8432_v53  ;;  %v12229_v21 = vld [vmem:[#allocation2 + $0x20c] sm:$0xf]  ;;  %v8080_v31 = vor.u32 %v12165_v17, %v8077_v18  ;;  %v9076_v46 = vor.u32 %v12418_v38, %v9075_v37  ;;  %v8532_v53 = vor.u32 %v12282_v47, %v8531_v45  ;;  %v12266_v11 = vld [vmem:[#allocation2 + $0x32c] sm:$0xf0] }
  0xae   :  { %v8333_v22 = vld [vmem:[#allocation2 + $0x228] sm:$0xf0]  ;;  %v8723_v12 = vld [vmem:[#allocation2 + $0x510] sm:$0xf]  ;;  %v8468_v17 = vor.u32 %v12266_v11, %v8467_v9  ;;  %v12350_v9 = vld [vmem:[#allocation2 + $0x5d4] sm:$0xf] }
  0xaf   :  { %1869 = vmatpush.bf16.msrb.mxu2 %v8688_v54  ;;  %1844 = vmatpush.bf16.msrb.mxu0 %v8144_v0  ;;  %v12293_v23 = vld [vmem:[#allocation2 + $0x40c] sm:$0xf]  ;;  %v8336_v35 = vor.u32 %v12229_v21, %v8333_v22  ;;  %v8788_v54 = vor.u32 %v12346_v49, %v8787_v48  ;;  %v8244_v0 = vor.u32 %v12210_v56, %v8243_v55  ;;  %v12330_v13 = vld [vmem:[#allocation2 + $0x52c] sm:$0xf0] }
  0xb0   :  { %v8589_v25 = vld [vmem:[#allocation2 + $0x428] sm:$0xf0]  ;;  %v8979_v14 = vld [vmem:[#allocation2 + $0x710] sm:$0xf]  ;;  %v8724_v18 = vor.u32 %v12330_v13, %v8723_v12  ;;  %v12414_v13 = vld [vmem:[#allocation2 + $0x7d4] sm:$0xf] }
  0xb1   :  { %1882 = vmatpush.bf16.msrb.mxu3 %v8944_v58  ;;  %1857 = vmatpush.bf16.msrb.mxu1 %v8400_v1  ;;  %v12357_v26 = vld [vmem:[#allocation2 + $0x60c] sm:$0xf]  ;;  %v8592_v36 = vor.u32 %v12293_v23, %v8589_v25  ;;  %v9044_v58 = vor.u32 %v12410_v51, %v9043_v50  ;;  %v8500_v1 = vor.u32 %v12274_v59, %v8499_v57  ;;  %v12394_v15 = vld [vmem:[#allocation2 + $0x72c] sm:$0xf0] }
  0xb2   :  { %v8845_v27 = vld [vmem:[#allocation2 + $0x628] sm:$0xf0]  ;;  %v8435_v21 = vld [vmem:[#allocation2 + $0x2d0] sm:$0xf]  ;;  %v8980_v22 = vor.u32 %v12394_v15, %v8979_v14  ;;  %v9077_v14 = vld [vmem:[#allocation2 + $0x7f0] sm:$0xf0] }
  0xb3   :  { %1870 = vmatpush.bf16.msrb.mxu2 %v8656_v2  ;;  %1845 = vmatpush.bf16.msrb.mxu0 %v8112_v16  ;;  %v8848_v39 = vor.u32 %v12357_v26, %v8845_v27  ;;  %v8756_v2 = vor.u32 %v12338_v61, %v8755_v60  ;;  %v8212_v16 = vor.u32 %v12202_v8, %v8211_v3  ;;  %v12258_v23 = vld [vmem:[#allocation2 + $0x2ec] sm:$0xf0]  ;;  %v8565_v8 = vld [vmem:[#allocation2 + $0x3f0] sm:$0xf0] }
  0xb4   :  { %v12322_v25 = vld [vmem:[#allocation2 + $0x4ec] sm:$0xf0]  ;;  %v8436_v29 = vor.u32 %v12258_v23, %v8435_v21  ;;  %v12278_v21 = vld [vmem:[#allocation2 + $0x394] sm:$0xf] }
  0xb5   :  { %1883 = vmatpush.bf16.msrb.mxu3 %v8912_v10  ;;  %1858 = vmatpush.bf16.msrb.mxu1 %v8368_v19  ;;  %v9012_v10 = vor.u32 %v12402_v63, %v9011_v62  ;;  %v8179_v19 = vld [vmem:[#allocation2 + $0xd0] sm:$0xf]  ;;  %v8533_v23 = vld [vmem:[#allocation2 + $0x3b0] sm:$0xf0] }
  0xb6   :  { %v8947_v26 = vld [vmem:[#allocation2 + $0x6d0] sm:$0xf] }
  0xb7   :  { %1871 = vmatpush.bf16.msrb.mxu2 %v8624_v20  ;;  %1846 = vmatpush.bf16.msrb.mxu0 %v8080_v31  ;;  %v12194_v20 = vld [vmem:[#allocation2 + $0xec] sm:$0xf0] }
  0xb8   :  { %v12386_v27 = vld [vmem:[#allocation2 + $0x6ec] sm:$0xf0]  ;;  %v8180_v28 = vor.u32 %v12194_v20, %v8179_v19  ;;  %v12214_v19 = vld [vmem:[#allocation2 + $0x194] sm:$0xf] }
  0xb9   :  { %1884 = vmatpush.bf16.msrb.mxu3 %v8880_v24  ;;  %1859 = vmatpush.bf16.msrb.mxu1 %v8336_v35  ;;  %v8691_v24 = vld [vmem:[#allocation2 + $0x4d0] sm:$0xf]  ;;  %v8948_v34 = vor.u32 %v12386_v27, %v8947_v26  ;;  %v8277_v20 = vld [vmem:[#allocation2 + $0x1b0] sm:$0xf0] }
  0xba   :  { %1847 = vmatmul.bf16.vlgmr.msrb.gmra.mxu0 %v13473_v4  ;;  %v8692_v30 = vor.u32 %v12322_v25, %v8691_v24  ;;  %v8147_v31 = vld [vmem:[#allocation2 + $0x90] sm:$0xf]  ;;  %v12342_v24 = vld [vmem:[#allocation2 + $0x594] sm:$0xf] }
  0xbb   :  { %1872 = vmatpush.bf16.msrb.mxu2 %v8592_v36  ;;  %1891 = vmatpush.bf16.msra.mxu0 %v8308_v40  ;;  %v12186_v32 = vld [vmem:[#allocation2 + $0xac] sm:$0xf0]  ;;  %v8789_v25 = vld [vmem:[#allocation2 + $0x5b0] sm:$0xf0] }
  0xbc   :  { %1860 = vmatmul.bf16.vlgmr.msrb.gmra.mxu1 %v13475_v5  ;;  %v8403_v33 = vld [vmem:[#allocation2 + $0x290] sm:$0xf]  ;;  %v8148_v40 = vor.u32 %v12186_v32, %v8147_v31  ;;  %v12406_v26 = vld [vmem:[#allocation2 + $0x794] sm:$0xf]  ;;  %v8792_v31 = vor.u32 %v12342_v24, %v8789_v25 }
  0xbd   :  { %1885 = vmatpush.bf16.msrb.mxu3 %v8848_v39  ;;  %1904 = vmatpush.bf16.msra.mxu1 %v8564_v41  ;;  %v12250_v35 = vld [vmem:[#allocation2 + $0x2ac] sm:$0xf0]  ;;  %v9045_v27 = vld [vmem:[#allocation2 + $0x7b0] sm:$0xf0] }
  0xbe   :  { %1873 = vmatmul.bf16.vlgmr.msrb.gmra.mxu2 %v13477_v6  ;;  %v8659_v36 = vld [vmem:[#allocation2 + $0x490] sm:$0xf]  ;;  %v8404_v41 = vor.u32 %v12250_v35, %v8403_v33  ;;  %v8245_v32 = vld [vmem:[#allocation2 + $0x170] sm:$0xf0]  ;;  %v9048_v35 = vor.u32 %v12406_v26, %v9045_v27 }
  0xbf   :  { %1917 = vmatpush.bf16.msra.mxu2 %v8820_v42  ;;  %1892 = vmatpush.bf16.msra.mxu0 %v8276_v52  ;;  %v12314_v37 = vld [vmem:[#allocation2 + $0x4ac] sm:$0xf0]  ;;  %v12270_v33 = vld [vmem:[#allocation2 + $0x354] sm:$0xf] }
  0xc0   :  { %1886 = vmatmul.bf16.vlgmr.msrb.gmra.mxu3 %v13479_v7  ;;  %v8915_v38 = vld [vmem:[#allocation2 + $0x690] sm:$0xf]  ;;  %v8660_v42 = vor.u32 %v12314_v37, %v8659_v36  ;;  %v12334_v36 = vld [vmem:[#allocation2 + $0x554] sm:$0xf] }
  0xc1   :  { %1930 = vmatpush.bf16.msra.mxu3 %v9076_v46  ;;  %1905 = vmatpush.bf16.msra.mxu1 %v8532_v53  ;;  %v12378_v39 = vld [vmem:[#allocation2 + $0x6ac] sm:$0xf0]  ;;  %v8757_v37 = vld [vmem:[#allocation2 + $0x570] sm:$0xf0] }
  0xc2   :  { %v8115_v43 = vld [vmem:[#allocation2 + $0x50] sm:$0xf]  ;;  %v8916_v46 = vor.u32 %v12378_v39, %v8915_v38  ;;  %v13498_v38 = vld [vmem:[#allocation9] sm:$0xff]  ;;  %v12398_v39 = vld [vmem:[#allocation2 + $0x754] sm:$0xf] }
  0xc3   :  { %1918 = vmatpush.bf16.msra.mxu2 %v8788_v54  ;;  %1893 = vmatpush.bf16.msra.mxu0 %v8244_v0  ;;  %v12178_v44 = vld [vmem:[#allocation2 + $0x6c] sm:$0xf0]  ;;  %v12222_v0 = vld [vmem:[#allocation2 + $0x1d4] sm:$0xf] }
  0xc4   :  { %v8371_v45 = vld [vmem:[#allocation2 + $0x250] sm:$0xf]  ;;  %v8116_v52 = vor.u32 %v12178_v44, %v8115_v43  ;;  %v8760_v44 = vor.u32 %v12334_v36, %v8757_v37  ;;  %v8917_v24 = vld [vmem:[#allocation2 + $0x6b0] sm:$0xf0] }
  0xc5   :  { %1931 = vmatpush.bf16.msra.mxu3 %v9044_v58  ;;  %1906 = vmatpush.bf16.msra.mxu1 %v8500_v1  ;;  %v12242_v47 = vld [vmem:[#allocation2 + $0x26c] sm:$0xf0]  ;;  %v8309_v1 = vld [vmem:[#allocation2 + $0x1f0] sm:$0xf0] }
  0xc6   :  { %v8627_v48 = vld [vmem:[#allocation2 + $0x450] sm:$0xf]  ;;  %v8372_v55 = vor.u32 %v12242_v47, %v8371_v45  ;;  %v8213_v45 = vld [vmem:[#allocation2 + $0x130] sm:$0xf0]  ;;  %v387_v47 = vperm.slane %v13498_v38, 0 }
  0xc7   :  { %1919 = vmatpush.bf16.msra.mxu2 %v8756_v2  ;;  %1894 = vmatpush.bf16.msra.mxu0 %v8212_v16  ;;  %v12306_v49 = vld [vmem:[#allocation2 + $0x46c] sm:$0xf0]  ;;  %v12286_v2 = vld [vmem:[#allocation2 + $0x3d4] sm:$0xf]  ;;  %v8312_v16 = vor.u32 %v12222_v0, %v8309_v1 }
  0xc8   :  { %v8883_v50 = vld [vmem:[#allocation2 + $0x650] sm:$0xf]  ;;  %v8628_v56 = vor.u32 %v12306_v49, %v8627_v48  ;;  %v8469_v49 = vld [vmem:[#allocation2 + $0x330] sm:$0xf0] }
  0xc9   :  { %1932 = vmatpush.bf16.msra.mxu3 %v9012_v10  ;;  %1907 = vmatpush.bf16.msra.mxu1 %v8468_v17  ;;  %v12370_v51 = vld [vmem:[#allocation2 + $0x66c] sm:$0xf0]  ;;  %v8821_v10 = vld [vmem:[#allocation2 + $0x5f0] sm:$0xf0]  ;;  %v8568_v17 = vor.u32 %v12286_v2, %v8565_v8 }
  0xca   :  { %v8083_v53 = vld [vmem:[#allocation2 + $0x10] sm:$0xf]  ;;  %v8884_v60 = vor.u32 %v12370_v51, %v8883_v50  ;;  %v12326_v50 = vld [vmem:[#allocation2 + $0x514] sm:$0xf] }
  0xcb   :  { %1920 = vmatpush.bf16.msra.mxu2 %v8724_v18  ;;  %1895 = vmatpush.bf16.msra.mxu0 %v8180_v28  ;;  %v12170_v54 = vld [vmem:[#allocation2 + $0x2c] sm:$0xf0]  ;;  %v8824_v18 = vor.u32 %v12350_v9, %v8821_v10  ;;  %v8280_v28 = vor.u32 %v12214_v19, %v8277_v20  ;;  %v8725_v51 = vld [vmem:[#allocation2 + $0x530] sm:$0xf0] }
  0xcc   :  { %v8339_v57 = vld [vmem:[#allocation2 + $0x210] sm:$0xf]  ;;  %v8084_v3 = vor.u32 %v12170_v54, %v8083_v53  ;;  %v8981_v53 = vld [vmem:[#allocation2 + $0x730] sm:$0xf0] }
  0xcd   :  { %1933 = vmatpush.bf16.msra.mxu3 %v8980_v22  ;;  %1908 = vmatpush.bf16.msra.mxu1 %v8436_v29  ;;  %v12234_v58 = vld [vmem:[#allocation2 + $0x22c] sm:$0xf0]  ;;  %v9080_v22 = vor.u32 %v12414_v13, %v9077_v14  ;;  %v12206_v29 = vld [vmem:[#allocation2 + $0x154] sm:$0xf] }
  0xce   :  { %v8595_v59 = vld [vmem:[#allocation2 + $0x410] sm:$0xf]  ;;  %v8340_v11 = vor.u32 %v12234_v58, %v8339_v57  ;;  %v8728_v57 = vor.u32 %v12326_v50, %v8725_v51  ;;  %v12190_v58 = vld [vmem:[#allocation2 + $0xd4] sm:$0xf] }
  0xcf   :  { %1921 = vmatpush.bf16.msra.mxu2 %v8692_v30  ;;  %1896 = vmatpush.bf16.msra.mxu0 %v8148_v40  ;;  %v12298_v61 = vld [vmem:[#allocation2 + $0x42c] sm:$0xf0]  ;;  %v8536_v30 = vor.u32 %v12278_v21, %v8533_v23  ;;  %v9013_v40 = vld [vmem:[#allocation2 + $0x770] sm:$0xf0] }
  0xd0   :  { %v8851_v62 = vld [vmem:[#allocation2 + $0x610] sm:$0xf]  ;;  %v8596_v12 = vor.u32 %v12298_v61, %v8595_v59  ;;  %v9016_v48 = vor.u32 %v12398_v39, %v9013_v40  ;;  %v8181_v59 = vld [vmem:[#allocation2 + $0xf0] sm:$0xf0] }
  0xd1   :  { %1934 = vmatpush.bf16.msra.mxu3 %v8948_v34  ;;  %1909 = vmatpush.bf16.msra.mxu1 %v8404_v41  ;;  %v12362_v63 = vld [vmem:[#allocation2 + $0x62c] sm:$0xf0]  ;;  %v8501_v34 = vld [vmem:[#allocation2 + $0x370] sm:$0xf0]  ;;  %v8248_v41 = vor.u32 %v12206_v29, %v8245_v32  ;;  %v8184_v10 = vor.u32 %v12190_v58, %v8181_v59  ;;  %v12227_v58 = vld [vmem:[#allocation2 + $0x1f4] sm:$0xf0] }
  0xd2   :  { %v8852_v15 = vor.u32 %v12362_v63, %v8851_v62  ;;  %v8504_v43 = vor.u32 %v12270_v33, %v8501_v34  ;;  %v8437_v0 = vld [vmem:[#allocation2 + $0x2f0] sm:$0xf0]  ;;  %v8571_v59 = vld [vmem:[#allocation2 + $0x3d8] sm:$0xf] }
  0xd3   :  { %1922 = vmatpush.bf16.msra.mxu2 %v8660_v42  ;;  %1897 = vmatpush.bf16.msra.mxu0 %v8116_v52  ;;  %v12198_v42 = vld [vmem:[#allocation2 + $0x114] sm:$0xf] }
  0xd4   :  { %v12390_v52 = vld [vmem:[#allocation2 + $0x714] sm:$0xf]  ;;  %v8216_v54 = vor.u32 %v12198_v42, %v8213_v45 }
  0xd5   :  { %1935 = vmatpush.bf16.msra.mxu3 %v8916_v46  ;;  %1910 = vmatpush.bf16.msra.mxu1 %v8372_v55  ;;  %v12262_v46 = vld [vmem:[#allocation2 + $0x314] sm:$0xf]  ;;  %v8984_v63 = vor.u32 %v12390_v52, %v8981_v53 }
  0xd6   :  { %v12318_v1 = vld [vmem:[#allocation2 + $0x4d4] sm:$0xf] }
  0xd7   :  { %1923 = vmatpush.bf16.msra.mxu2 %v8628_v56  ;;  %1898 = vmatpush.bf16.msra.mxu0 %v8084_v3  ;;  %v1692_v55 = vpop.f32.mrf.mxu0  ;;  %v8472_v56 = vor.u32 %v12262_v46, %v8469_v49  ;;  %v8693_v2 = vld [vmem:[#allocation2 + $0x4f0] sm:$0xf0] }
  0xd8   :  { %v1693_v61 = vadd.f32 %v1692_v55, %v387_v47  ;;  %v12382_v3 = vld [vmem:[#allocation2 + $0x6d4] sm:$0xf] }
  0xd9   :  { %1936 = vmatpush.bf16.msra.mxu3 %v8884_v60  ;;  %1911 = vmatpush.bf16.msra.mxu1 %v8340_v11  ;;  %v12254_v60 = vld [vmem:[#allocation2 + $0x2d4] sm:$0xf]  ;;  %v1705_v62 = vpop.f32.mrf.mxu1 }
  0xda   :  { %1899 = vmatmul.bf16.vlgmr.msra.gmra.mxu0 %v13473_v4  ;;  %v8949_v8 = vld [vmem:[#allocation2 + $0x6f0] sm:$0xf0]  ;;  %v1706_v9 = vadd.f32 %v1705_v62, %v1693_v61  ;;  %v8440_v11 = vor.u32 %v12254_v60, %v8437_v0  ;;  %v12291_v61 = vld [vmem:[#allocation2 + $0x3f4] sm:$0xf0] }
  0xdb   :  { %1924 = vmatpush.bf16.msra.mxu2 %v8596_v12  ;;  %1943 = vmatpush.bf16.msrb.mxu0 %v8312_v16  ;;  %v8696_v12 = vor.u32 %v12318_v1, %v8693_v2  ;;  %v12182_v13 = vld [vmem:[#allocation2 + $0x94] sm:$0xf]  ;;  %v8827_v62 = vld [vmem:[#allocation2 + $0x5d8] sm:$0xf] }
  0xdc   :  { %1912 = vmatmul.bf16.vlgmr.msra.gmra.mxu1 %v13475_v5  ;;  %v8149_v14 = vld [vmem:[#allocation2 + $0xb0] sm:$0xf0]  ;;  %v9083_v2 = vld [vmem:[#allocation2 + $0x7d8] sm:$0xf] }
  0xdd   :  { %1937 = vmatpush.bf16.msra.mxu3 %v8852_v15  ;;  %1956 = vmatpush.bf16.msrb.mxu1 %v8568_v17  ;;  %v12246_v15 = vld [vmem:[#allocation2 + $0x294] sm:$0xf]  ;;  %v8952_v17 = vor.u32 %v12382_v3, %v8949_v8  ;;  %v8152_v25 = vor.u32 %v12182_v13, %v8149_v14  ;;  %v12419_v3 = vld [vmem:[#allocation2 + $0x7f4] sm:$0xf0] }
  0xde   :  { %1925 = vmatmul.bf16.vlgmr.msra.gmra.mxu2 %v13477_v6  ;;  %v12310_v19 = vld [vmem:[#allocation2 + $0x494] sm:$0xf]  ;;  %v12219_v13 = vld [vmem:[#allocation2 + $0x1b4] sm:$0xf0] }
  0xdf   :  { %1969 = vmatpush.bf16.msrb.mxu2 %v8824_v18  ;;  %1944 = vmatpush.bf16.msrb.mxu0 %v8280_v28  ;;  %v8405_v18 = vld [vmem:[#allocation2 + $0x2b0] sm:$0xf0]  ;;  %v1694_v28 = vpop.f32.mrf.mxu0  ;;  %v8539_v14 = vld [vmem:[#allocation2 + $0x398] sm:$0xf] }
  0xe0   :  { %1938 = vmatmul.bf16.vlgmr.msra.gmra.mxu3 %v13479_v7  ;;  %v8661_v20 = vld [vmem:[#allocation2 + $0x4b0] sm:$0xf0]  ;;  %v8408_v29 = vor.u32 %v12246_v15, %v8405_v18  ;;  %v9084_v15 = vor.u32 %v12419_v3, %v9083_v2  ;;  %v12347_v18 = vld [vmem:[#allocation2 + $0x5b4] sm:$0xf0] }
  0xe1   :  { %1982 = vmatpush.bf16.msrb.mxu3 %v9080_v22  ;;  %1957 = vmatpush.bf16.msrb.mxu1 %v8536_v30  ;;  %v1718_v16 = vpop.f32.mrf.mxu2  ;;  %v12374_v23 = vld [vmem:[#allocation2 + $0x694] sm:$0xf]  ;;  %v8664_v30 = vor.u32 %v12310_v19, %v8661_v20  ;;  %v1707_v34 = vpop.f32.mrf.mxu1  ;;  %v9051_v19 = vld [vmem:[#allocation2 + $0x798] sm:$0xf] }
  0xe2   :  { %v1719_v21 = vadd.f32 %v1718_v16, %v1706_v9  ;;  %v12174_v26 = vld [vmem:[#allocation2 + $0x54] sm:$0xf]  ;;  %v12283_v16 = vld [vmem:[#allocation2 + $0x3b4] sm:$0xf0] }
  0xe3   :  { %1970 = vmatpush.bf16.msrb.mxu2 %v8792_v31  ;;  %1945 = vmatpush.bf16.msrb.mxu0 %v8248_v41  ;;  %v1731_v22 = vpop.f32.mrf.mxu3  ;;  %v8117_v31 = vld [vmem:[#allocation2 + $0x70] sm:$0xf0]  ;;  %v12411_v20 = vld [vmem:[#allocation2 + $0x7b4] sm:$0xf0] }
  0xe4   :  { %v1732_v27 = vadd.f32 %v1731_v22, %v1719_v21  ;;  %v12238_v32 = vld [vmem:[#allocation2 + $0x254] sm:$0xf]  ;;  %v8120_v42 = vor.u32 %v12174_v26, %v8117_v31  ;;  %v8540_v22 = vor.u32 %v12283_v16, %v8539_v14  ;;  %v8507_v26 = vld [vmem:[#allocation2 + $0x358] sm:$0xf] }
  0xe5   :  { %1983 = vmatpush.bf16.msrb.mxu3 %v9048_v35  ;;  %1958 = vmatpush.bf16.msrb.mxu1 %v8504_v43  ;;  %v8373_v33 = vld [vmem:[#allocation2 + $0x270] sm:$0xf0]  ;;  %v8920_v35 = vor.u32 %v12374_v23, %v8917_v24  ;;  %v8251_v24 = vld [vmem:[#allocation2 + $0x158] sm:$0xf] }
  0xe6   :  { %v12302_v36 = vld [vmem:[#allocation2 + $0x454] sm:$0xf]  ;;  %v2099_v39 = vmax.f32 %v1732_v27, 0.0  ;;  %v8376_v46 = vor.u32 %v12238_v32, %v8373_v33  ;;  %v9052_v27 = vor.u32 %v12411_v20, %v9051_v19  ;;  %v12275_v28 = vld [vmem:[#allocation2 + $0x374] sm:$0xf0] }
  0xe7   :  { %1971 = vmatpush.bf16.msrb.mxu2 %v8760_v44  ;;  %1946 = vmatpush.bf16.msrb.mxu0 %v8216_v54  ;;  %v8629_v37 = vld [vmem:[#allocation2 + $0x470] sm:$0xf0]  ;;  %v9019_v31 = vld [vmem:[#allocation2 + $0x758] sm:$0xf] }
  0xe8   :  { %v12366_v40 = vld [vmem:[#allocation2 + $0x654] sm:$0xf]  ;;  %v13504_v45 = vpack.c.bf16 %v2099_v39, %v2099_v39  ;;  %v8632_v47 = vor.u32 %v12302_v36, %v8629_v37  ;;  %v12403_v32 = vld [vmem:[#allocation2 + $0x774] sm:$0xf0] }
  0xe9   :  { %1984 = vmatpush.bf16.msrb.mxu3 %v9016_v48  ;;  %1959 = vmatpush.bf16.msrb.mxu1 %v8472_v56  ;;  %v8885_v41 = vld [vmem:[#allocation2 + $0x670] sm:$0xf0]  ;;  %v1720_v51 = vpop.f32.mrf.mxu2  ;;  %v8219_v34 = vld [vmem:[#allocation2 + $0x118] sm:$0xf] }
  0xea   :  { %v12166_v43 = vld [vmem:[#allocation2 + $0x14] sm:$0xf]  ;;  %v8888_v52 = vor.u32 %v12366_v40, %v8885_v41  ;;  %v12203_v37 = vld [vmem:[#allocation2 + $0x134] sm:$0xf0]  ;;  %v388_v40 = vperm.slane %v13498_v38, 1  ;;  %v9020_v41 = vor.u32 %v12403_v32, %v9019_v31 }
  0xeb   :  { %1972 = vmatpush.bf16.msrb.mxu2 %v8728_v57  ;;  %1947 = vmatpush.bf16.msrb.mxu0 %v8184_v10  ;;  %v8085_v44 = vld [vmem:[#allocation2 + $0x30] sm:$0xf0]  ;;  %v1733_v56 = vpop.f32.mrf.mxu3  ;;  %v8315_v57 = vld [vmem:[#allocation2 + $0x1d8] sm:$0xf]  ;;  %v8572_v10 = vor.u32 %v12291_v61, %v8571_v59 }
  0xec   :  { %v12230_v48 = vld [vmem:[#allocation2 + $0x214] sm:$0xf]  ;;  %v8088_v60 = vor.u32 %v12166_v43, %v8085_v44  ;;  %v8316_v9 = vor.u32 %v12227_v58, %v8315_v57  ;;  %v8475_v39 = vld [vmem:[#allocation2 + $0x318] sm:$0xf] }
  0xed   :  { %1985 = vmatpush.bf16.msrb.mxu3 %v8984_v63  ;;  %1960 = vmatpush.bf16.msrb.mxu1 %v8440_v11  ;;  %v8341_v49 = vld [vmem:[#allocation2 + $0x230] sm:$0xf0]  ;;  %v12355_v63 = vld [vmem:[#allocation2 + $0x5f4] sm:$0xf0] }
  0xee   :  { %v12294_v50 = vld [vmem:[#allocation2 + $0x414] sm:$0xf]  ;;  %v8344_v0 = vor.u32 %v12230_v48, %v8341_v49  ;;  %v8828_v11 = vor.u32 %v12355_v63, %v8827_v62  ;;  %v8731_v43 = vld [vmem:[#allocation2 + $0x518] sm:$0xf]  ;;  %v8220_v48 = vor.u32 %v12203_v37, %v8219_v34 }
  0xef   :  { %1973 = vmatpush.bf16.msrb.mxu2 %v8696_v12  ;;  %1948 = vmatpush.bf16.msrb.mxu0 %v8152_v25  ;;  %v8597_v53 = vld [vmem:[#allocation2 + $0x430] sm:$0xf0]  ;;  %v8283_v12 = vld [vmem:[#allocation2 + $0x198] sm:$0xf] }
  0xf0   :  { %v12358_v54 = vld [vmem:[#allocation2 + $0x614] sm:$0xf]  ;;  %v8600_v1 = vor.u32 %v12294_v50, %v8597_v53  ;;  %v8284_v21 = vor.u32 %v12219_v13, %v8283_v12  ;;  %v12211_v25 = vld [vmem:[#allocation2 + $0x174] sm:$0xf0] }
  0xf1   :  { %1986 = vmatpush.bf16.msrb.mxu3 %v8952_v17  ;;  %1961 = vmatpush.bf16.msrb.mxu1 %v8408_v29  ;;  %v8853_v55 = vld [vmem:[#allocation2 + $0x630] sm:$0xf0]  ;;  %v8795_v17 = vld [vmem:[#allocation2 + $0x598] sm:$0xf]  ;;  %v8252_v33 = vor.u32 %v12211_v25, %v8251_v24 }
  0xf2   :  { %v8856_v8 = vor.u32 %v12358_v54, %v8853_v55  ;;  %v8796_v23 = vor.u32 %v12347_v18, %v8795_v17  ;;  %v8763_v29 = vld [vmem:[#allocation2 + $0x558] sm:$0xf] }
  0xf3   :  { %1974 = vmatpush.bf16.msrb.mxu2 %v8664_v30  ;;  %1949 = vmatpush.bf16.msrb.mxu0 %v8120_v42  ;;  %v12339_v30 = vld [vmem:[#allocation2 + $0x574] sm:$0xf0] }
  0xf4   :  { %v8764_v36 = vor.u32 %v12339_v30, %v8763_v29  ;;  %v12267_v42 = vld [vmem:[#allocation2 + $0x334] sm:$0xf0] }
  0xf5   :  { %1987 = vmatpush.bf16.msrb.mxu3 %v8920_v35  ;;  %1962 = vmatpush.bf16.msrb.mxu1 %v8376_v46  ;;  %v8508_v35 = vor.u32 %v12275_v28, %v8507_v26  ;;  %v12331_v44 = vld [vmem:[#allocation2 + $0x534] sm:$0xf0]  ;;  %v8476_v50 = vor.u32 %v12267_v42, %v8475_v39 }
  0xf6   :  { %v8987_v46 = vld [vmem:[#allocation2 + $0x718] sm:$0xf]  ;;  %v8732_v51 = vor.u32 %v12331_v44, %v8731_v43 }
  0xf7   :  { %1975 = vmatpush.bf16.msrb.mxu2 %v8632_v47  ;;  %1950 = vmatpush.bf16.msrb.mxu0 %v8088_v60  ;;  %v12395_v47 = vld [vmem:[#allocation2 + $0x734] sm:$0xf0]  ;;  %v1744_v49 = vpop.f32.mrf.mxu0 }
  0xf8   :  { %v12195_v53 = vld [vmem:[#allocation2 + $0xf4] sm:$0xf0]  ;;  %v1745_v55 = vadd.f32 %v1744_v49, %v388_v40  ;;  %v8988_v57 = vor.u32 %v12395_v47, %v8987_v46 }
  0xf9   :  { %1988 = vmatpush.bf16.msrb.mxu3 %v8888_v52  ;;  %1963 = vmatpush.bf16.msrb.mxu1 %v8344_v0  ;;  %v8187_v52 = vld [vmem:[#allocation2 + $0xd8] sm:$0xf]  ;;  %v1757_v56 = vpop.f32.mrf.mxu1 }
  0xfa   :  { %1951 = vmatmul.bf16.vlgmr.msrb.gmra.mxu0 %v13473_v4  ;;  %v8443_v54 = vld [vmem:[#allocation2 + $0x2d8] sm:$0xf]  ;;  %v1758_v63 = vadd.f32 %v1757_v56, %v1745_v55  ;;  %v8188_v0 = vor.u32 %v12195_v53, %v8187_v52  ;;  %v12223_v52 = vld [vmem:[#allocation2 + $0x1dc] sm:$0xf] }
  0xfb   :  { %1976 = vmatpush.bf16.msrb.mxu2 %v8600_v1  ;;  %1995 = vmatpush.bf16.msra.mxu0 %v8316_v9  ;;  %v12259_v58 = vld [vmem:[#allocation2 + $0x2f4] sm:$0xf0]  ;;  %v8317_v53 = vld [vmem:[#allocation2 + $0x1f8] sm:$0xf0] }
  0xfc   :  { %1964 = vmatmul.bf16.vlgmr.msrb.gmra.mxu1 %v13475_v5  ;;  %v8699_v59 = vld [vmem:[#allocation2 + $0x4d8] sm:$0xf]  ;;  %v8444_v1 = vor.u32 %v12259_v58, %v8443_v54  ;;  %v12287_v54 = vld [vmem:[#allocation2 + $0x3dc] sm:$0xf] }
  0xfd   :  { %1989 = vmatpush.bf16.msrb.mxu3 %v8856_v8  ;;  %2008 = vmatpush.bf16.msra.mxu1 %v8572_v10  ;;  %v12323_v60 = vld [vmem:[#allocation2 + $0x4f4] sm:$0xf0]  ;;  %v8573_v56 = vld [vmem:[#allocation2 + $0x3f8] sm:$0xf0] }
  0xfe   :  { %1977 = vmatmul.bf16.vlgmr.msrb.gmra.mxu2 %v13477_v6  ;;  %v8955_v61 = vld [vmem:[#allocation2 + $0x6d8] sm:$0xf]  ;;  %v8700_v2 = vor.u32 %v12323_v60, %v8699_v59  ;;  %v8829_v58 = vld [vmem:[#allocation2 + $0x5f8] sm:$0xf0] }
  0xff   :  { %2021 = vmatpush.bf16.msra.mxu2 %v8828_v11  ;;  %1996 = vmatpush.bf16.msra.mxu0 %v8284_v21  ;;  %v12387_v62 = vld [vmem:[#allocation2 + $0x6f4] sm:$0xf0] }
 0x100   :  { %1990 = vmatmul.bf16.vlgmr.msrb.gmra.mxu3 %v13479_v7  ;;  %v8155_v3 = vld [vmem:[#allocation2 + $0x98] sm:$0xf]  ;;  %v8956_v11 = vor.u32 %v12387_v62, %v8955_v61  ;;  %v12415_v61 = vld [vmem:[#allocation2 + $0x7dc] sm:$0xf] }
 0x101   :  { %2034 = vmatpush.bf16.msra.mxu3 %v9084_v15  ;;  %2009 = vmatpush.bf16.msra.mxu1 %v8540_v22  ;;  %v12187_v8 = vld [vmem:[#allocation2 + $0xb4] sm:$0xf0]  ;;  %v1770_v10 = vpop.f32.mrf.mxu2  ;;  %v1746_v22 = vpop.f32.mrf.mxu0  ;;  %v9085_v62 = vld [vmem:[#allocation2 + $0x7f8] sm:$0xf0] }
 0x102   :  { %v8411_v9 = vld [vmem:[#allocation2 + $0x298] sm:$0xf]  ;;  %v1771_v15 = vadd.f32 %v1770_v10, %v1758_v63  ;;  %v8156_v19 = vor.u32 %v12187_v8, %v8155_v3  ;;  %v1759_v28 = vpop.f32.mrf.mxu1  ;;  %v12215_v3 = vld [vmem:[#allocation2 + $0x19c] sm:$0xf]  ;;  %v9088_v10 = vor.u32 %v12415_v61, %v9085_v62 }
 0x103   :  { %2022 = vmatpush.bf16.msra.mxu2 %v8796_v23  ;;  %1997 = vmatpush.bf16.msra.mxu0 %v8252_v33  ;;  %v12251_v12 = vld [vmem:[#allocation2 + $0x2b4] sm:$0xf0]  ;;  %v1783_v16 = vpop.f32.mrf.mxu3  ;;  %v8285_v8 = vld [vmem:[#allocation2 + $0x1b8] sm:$0xf0] }
 0x104   :  { %v8667_v13 = vld [vmem:[#allocation2 + $0x498] sm:$0xf]  ;;  %v1784_v21 = vadd.f32 %v1783_v16, %v1771_v15  ;;  %v8412_v23 = vor.u32 %v12251_v12, %v8411_v9  ;;  %v12279_v9 = vld [vmem:[#allocation2 + $0x39c] sm:$0xf]  ;;  %v8288_v16 = vor.u32 %v12215_v3, %v8285_v8 }
 0x105   :  { %2035 = vmatpush.bf16.msra.mxu3 %v9052_v27  ;;  %2010 = vmatpush.bf16.msra.mxu1 %v8508_v35  ;;  %v12315_v14 = vld [vmem:[#allocation2 + $0x4b4] sm:$0xf0]  ;;  %v12343_v12 = vld [vmem:[#allocation2 + $0x59c] sm:$0xf] }
 0x106   :  { %v8923_v17 = vld [vmem:[#allocation2 + $0x698] sm:$0xf]  ;;  %v8668_v24 = vor.u32 %v12315_v14, %v8667_v13  ;;  %v2100_v32 = vmax.f32 %v1784_v21, 0.0  ;;  %v8797_v13 = vld [vmem:[#allocation2 + $0x5b8] sm:$0xf0] }
 0x107   :  { %2023 = vmatpush.bf16.msra.mxu2 %v8764_v36  ;;  %1998 = vmatpush.bf16.msra.mxu0 %v8220_v48  ;;  %v12379_v18 = vld [vmem:[#allocation2 + $0x6b4] sm:$0xf0]  ;;  %v12407_v14 = vld [vmem:[#allocation2 + $0x79c] sm:$0xf] }
 0x108   :  { %v8123_v20 = vld [vmem:[#allocation2 + $0x58] sm:$0xf]  ;;  %v8924_v29 = vor.u32 %v12379_v18, %v8923_v17  ;;  %v13511_v39 = vpack.c.bf16 %v2100_v32, %v2100_v32  ;;  %v9053_v15 = vld [vmem:[#allocation2 + $0x7b8] sm:$0xf0]  ;;  %v8800_v18 = vor.u32 %v12343_v12, %v8797_v13 }
 0x109   :  { %2036 = vmatpush.bf16.msra.mxu3 %v9020_v41  ;;  %2011 = vmatpush.bf16.msra.mxu1 %v8476_v50  ;;  %v12179_v25 = vld [vmem:[#allocation2 + $0x74] sm:$0xf0]  ;;  %v1772_v46 = vpop.f32.mrf.mxu2  ;;  %v12271_v21 = vld [vmem:[#allocation2 + $0x35c] sm:$0xf]  ;;  %v9056_v22 = vor.u32 %v12407_v14, %v9053_v15 }
 0x10a   :  { %v8379_v26 = vld [vmem:[#allocation2 + $0x258] sm:$0xf]  ;;  %v8124_v35 = vor.u32 %v12179_v25, %v8123_v20  ;;  %v8253_v20 = vld [vmem:[#allocation2 + $0x178] sm:$0xf0] }
 0x10b   :  { %2024 = vmatpush.bf16.msra.mxu2 %v8732_v51  ;;  %1999 = vmatpush.bf16.msra.mxu0 %v8188_v0  ;;  %v12243_v27 = vld [vmem:[#allocation2 + $0x274] sm:$0xf0]  ;;  %v1785_v51 = vpop.f32.mrf.mxu3  ;;  %v8320_v0 = vor.u32 %v12223_v52, %v8317_v53  ;;  %v8765_v25 = vld [vmem:[#allocation2 + $0x578] sm:$0xf0] }
 0x10c   :  { %v8635_v30 = vld [vmem:[#allocation2 + $0x458] sm:$0xf]  ;;  %v8380_v40 = vor.u32 %v12243_v27, %v8379_v26  ;;  %v12399_v26 = vld [vmem:[#allocation2 + $0x75c] sm:$0xf] }
 0x10d   :  { %2037 = vmatpush.bf16.msra.mxu3 %v8988_v57  ;;  %2012 = vmatpush.bf16.msra.mxu1 %v8444_v1  ;;  %v12307_v31 = vld [vmem:[#allocation2 + $0x474] sm:$0xf0]  ;;  %v12351_v57 = vld [vmem:[#allocation2 + $0x5dc] sm:$0xf]  ;;  %v8576_v1 = vor.u32 %v12287_v54, %v8573_v56 }
 0x10e   :  { %v8891_v33 = vld [vmem:[#allocation2 + $0x658] sm:$0xf]  ;;  %v8636_v41 = vor.u32 %v12307_v31, %v8635_v30  ;;  %v9021_v27 = vld [vmem:[#allocation2 + $0x778] sm:$0xf0] }
 0x10f   :  { %2025 = vmatpush.bf16.msra.mxu2 %v8700_v2  ;;  %v12371_v34 = vld [vmem:[#allocation2 + $0x674] sm:$0xf0]  ;;  %2000 = vmatpush.bf16.msra.mxu0 %v8156_v19  ;;  %v8832_v2 = vor.u32 %v12351_v57, %v8829_v58  ;;  %v12207_v19 = vld [vmem:[#allocation2 + $0x15c] sm:$0xf] }
 0x110   :  { %v8091_v36 = vld [vmem:[#allocation2 + $0x18] sm:$0xf]  ;;  %v8892_v47 = vor.u32 %v12371_v34, %v8891_v33  ;;  %v8256_v28 = vor.u32 %v12207_v19, %v8253_v20  ;;  %v8221_v32 = vld [vmem:[#allocation2 + $0x138] sm:$0xf0]  ;;  %v389_v34 = vperm.slane %v13498_v38, 2 }
 0x111   :  { %2038 = vmatpush.bf16.msra.mxu3 %v8956_v11  ;;  %v12171_v37 = vld [vmem:[#allocation2 + $0x34] sm:$0xf0]  ;;  %2013 = vmatpush.bf16.msra.mxu1 %v8412_v23  ;;  %v8541_v11 = vld [vmem:[#allocation2 + $0x3b8] sm:$0xf0] }
 0x112   :  { %v8347_v42 = vld [vmem:[#allocation2 + $0x218] sm:$0xf]  ;;  %v8092_v55 = vor.u32 %v12171_v37, %v8091_v36  ;;  %v8544_v17 = vor.u32 %v12279_v9, %v8541_v11  ;;  %v8509_v23 = vld [vmem:[#allocation2 + $0x378] sm:$0xf0] }
 0x113   :  { %2026 = vmatpush.bf16.msra.mxu2 %v8668_v24  ;;  %v12235_v43 = vld [vmem:[#allocation2 + $0x234] sm:$0xf0]  ;;  %2001 = vmatpush.bf16.msra.mxu0 %v8124_v35  ;;  %v12335_v24 = vld [vmem:[#allocation2 + $0x55c] sm:$0xf]  ;;  %v8512_v30 = vor.u32 %v12271_v21, %v8509_v23  ;;  %v9024_v35 = vor.u32 %v12399_v26, %v9021_v27 }
 0x114   :  { %v8603_v44 = vld [vmem:[#allocation2 + $0x418] sm:$0xf]  ;;  %v8348_v59 = vor.u32 %v12235_v43, %v8347_v42  ;;  %v8768_v31 = vor.u32 %v12335_v24, %v8765_v25  ;;  %v12263_v33 = vld [vmem:[#allocation2 + $0x31c] sm:$0xf] }
 0x115   :  { %2039 = vmatpush.bf16.msra.mxu3 %v8924_v29  ;;  %v12299_v48 = vld [vmem:[#allocation2 + $0x434] sm:$0xf0]  ;;  %2014 = vmatpush.bf16.msra.mxu1 %v8380_v40  ;;  %v12199_v29 = vld [vmem:[#allocation2 + $0x11c] sm:$0xf] }
 0x116   :  { %v8859_v49 = vld [vmem:[#allocation2 + $0x618] sm:$0xf]  ;;  %v8604_v60 = vor.u32 %v12299_v48, %v8603_v44  ;;  %v8477_v36 = vld [vmem:[#allocation2 + $0x338] sm:$0xf0]  ;;  %v8224_v43 = vor.u32 %v12199_v29, %v8221_v32 }
 0x117   :  { %v12363_v50 = vld [vmem:[#allocation2 + $0x634] sm:$0xf0]  ;;  %2027 = vmatpush.bf16.msra.mxu2 %v8636_v41  ;;  %2002 = vmatpush.bf16.msra.mxu0 %v8092_v55  ;;  %v12327_v37 = vld [vmem:[#allocation2 + $0x51c] sm:$0xf]  ;;  %v1796_v44 = vpop.f32.mrf.mxu0  ;;  %v8480_v46 = vor.u32 %v12263_v33, %v8477_v36 }
 0x118   :  { %v8860_v63 = vor.u32 %v12363_v50, %v8859_v49  ;;  %v8733_v40 = vld [vmem:[#allocation2 + $0x538] sm:$0xf0]  ;;  %v1797_v51 = vadd.f32 %v1796_v44, %v389_v34 }
 0x119   :  { %2040 = vmatpush.bf16.msra.mxu3 %v8892_v47  ;;  %2015 = vmatpush.bf16.msra.mxu1 %v8348_v59  ;;  %v12391_v41 = vld [vmem:[#allocation2 + $0x71c] sm:$0xf]  ;;  %v8736_v47 = vor.u32 %v12327_v37, %v8733_v40  ;;  %v1809_v52 = vpop.f32.mrf.mxu1 }
 0x11a   :  { %2003 = vmatmul.bf16.vlgmr.msra.gmra.mxu0 %v13473_v4  ;;  %v8989_v42 = vld [vmem:[#allocation2 + $0x738] sm:$0xf0]  ;;  %v1810_v59 = vadd.f32 %v1809_v52, %v1797_v51 }
 0x11b   :  { %2028 = vmatpush.bf16.msra.mxu2 %v8604_v60  ;;  %2047 = vmatpush.bf16.msrb.mxu0 %v8320_v0  ;;  %v12191_v48 = vld [vmem:[#allocation2 + $0xdc] sm:$0xf]  ;;  %v8992_v53 = vor.u32 %v12391_v41, %v8989_v42 }
 0x11c   :  { %2016 = vmatmul.bf16.vlgmr.msra.gmra.mxu1 %v13475_v5  ;;  %v8189_v49 = vld [vmem:[#allocation2 + $0xf8] sm:$0xf0] }
 0x11d   :  { %2041 = vmatpush.bf16.msra.mxu3 %v8860_v63  ;;  %2060 = vmatpush.bf16.msrb.mxu1 %v8576_v1  ;;  %v12255_v50 = vld [vmem:[#allocation2 + $0x2dc] sm:$0xf]  ;;  %v8192_v60 = vor.u32 %v12191_v48, %v8189_v49 }
 0x11e   :  { %2029 = vmatmul.bf16.vlgmr.msra.gmra.mxu2 %v13477_v6  ;;  %v8445_v54 = vld [vmem:[#allocation2 + $0x2f8] sm:$0xf0] }
 0x11f   :  { %2073 = vmatpush.bf16.msrb.mxu2 %v8832_v2  ;;  %2048 = vmatpush.bf16.msrb.mxu0 %v8288_v16  ;;  %v12319_v55 = vld [vmem:[#allocation2 + $0x4dc] sm:$0xf]  ;;  %v8448_v61 = vor.u32 %v12255_v50, %v8445_v54 }
 0x120   :  { %2042 = vmatmul.bf16.vlgmr.msra.gmra.mxu3 %v13479_v7  ;;  %v8701_v56 = vld [vmem:[#allocation2 + $0x4f8] sm:$0xf0] }
 0x121   :  { %2086 = vmatpush.bf16.msrb.mxu3 %v9088_v10  ;;  %2061 = vmatpush.bf16.msrb.mxu1 %v8544_v17  ;;  %v12383_v57 = vld [vmem:[#allocation2 + $0x6dc] sm:$0xf]  ;;  %v8704_v62 = vor.u32 %v12319_v55, %v8701_v56  ;;  %v1822_v2 = vpop.f32.mrf.mxu2  ;;  %v1811_v24 = vpop.f32.mrf.mxu1 }
 0x122   :  { %v8957_v58 = vld [vmem:[#allocation2 + $0x6f8] sm:$0xf0]  ;;  %v1823_v11 = vadd.f32 %v1822_v2, %v1810_v59 }
 0x123   :  { %2074 = vmatpush.bf16.msrb.mxu2 %v8800_v18  ;;  %2049 = vmatpush.bf16.msrb.mxu0 %v8256_v28  ;;  %v12183_v63 = vld [vmem:[#allocation2 + $0x9c] sm:$0xf]  ;;  %v8960_v3 = vor.u32 %v12383_v57, %v8957_v58  ;;  %v1835_v12 = vpop.f32.mrf.mxu3  ;;  %v1798_v18 = vpop.f32.mrf.mxu0 }
 0x124   :  { %v8157_v0 = vld [vmem:[#allocation2 + $0xb8] sm:$0xf0]  ;;  %v1836_v17 = vadd.f32 %v1835_v12, %v1823_v11 }
 0x125   :  { %2087 = vmatpush.bf16.msrb.mxu3 %v9056_v22  ;;  %2062 = vmatpush.bf16.msrb.mxu1 %v8512_v30  ;;  %v12247_v1 = vld [vmem:[#allocation2 + $0x29c] sm:$0xf]  ;;  %v8160_v15 = vor.u32 %v12183_v63, %v8157_v0 }
 0x126   :  { %v8413_v8 = vld [vmem:[#allocation2 + $0x2b8] sm:$0xf0]  ;;  %v2101_v28 = vmax.f32 %v1836_v17, 0.0 }
 0x127   :  { %2075 = vmatpush.bf16.msrb.mxu2 %v8768_v31  ;;  %2050 = vmatpush.bf16.msrb.mxu0 %v8224_v43  ;;  %v12311_v9 = vld [vmem:[#allocation2 + $0x49c] sm:$0xf]  ;;  %v8416_v19 = vor.u32 %v12247_v1, %v8413_v8 }
 0x128   :  { %v8669_v10 = vld [vmem:[#allocation2 + $0x4b8] sm:$0xf0]  ;;  %v13518_v32 = vpack.c.bf16 %v2101_v28, %v2101_v28 }
 0x129   :  { %2088 = vmatpush.bf16.msrb.mxu3 %v9024_v35  ;;  %2063 = vmatpush.bf16.msrb.mxu1 %v8480_v46  ;;  %v12375_v13 = vld [vmem:[#allocation2 + $0x69c] sm:$0xf]  ;;  %v8672_v20 = vor.u32 %v12311_v9, %v8669_v10  ;;  %v1824_v40 = vpop.f32.mrf.mxu2 }
 0x12a   :  { %v8925_v14 = vld [vmem:[#allocation2 + $0x6b8] sm:$0xf0] }
 0x12b   :  { %2076 = vmatpush.bf16.msrb.mxu2 %v8736_v47  ;;  %2051 = vmatpush.bf16.msrb.mxu0 %v8192_v60  ;;  %v12175_v16 = vld [vmem:[#allocation2 + $0x5c] sm:$0xf]  ;;  %v8928_v25 = vor.u32 %v12375_v13, %v8925_v14  ;;  %v1837_v46 = vpop.f32.mrf.mxu3 }
 0x12c   :  { %v8125_v21 = vld [vmem:[#allocation2 + $0x78] sm:$0xf0] }
 0x12d   :  { %2089 = vmatpush.bf16.msrb.mxu3 %v8992_v53  ;;  %2064 = vmatpush.bf16.msrb.mxu1 %v8448_v61  ;;  %v12239_v22 = vld [vmem:[#allocation2 + $0x25c] sm:$0xf]  ;;  %v8128_v31 = vor.u32 %v12175_v16, %v8125_v21  ;;  %v390_v53 = vperm.slane %v13498_v38, 3 }
 0x12e   :  { %v8381_v23 = vld [vmem:[#allocation2 + $0x278] sm:$0xf0] }
 0x12f   :  { %2077 = vmatpush.bf16.msrb.mxu2 %v8704_v62  ;;  %v12303_v26 = vld [vmem:[#allocation2 + $0x45c] sm:$0xf]  ;;  %2052 = vmatpush.bf16.msrb.mxu0 %v8160_v15  ;;  %v8384_v33 = vor.u32 %v12239_v22, %v8381_v23 }
 0x130   :  { %v8637_v27 = vld [vmem:[#allocation2 + $0x478] sm:$0xf0] }
 0x131   :  { %2090 = vmatpush.bf16.msrb.mxu3 %v8960_v3  ;;  %v12367_v29 = vld [vmem:[#allocation2 + $0x65c] sm:$0xf]  ;;  %2065 = vmatpush.bf16.msrb.mxu1 %v8416_v19  ;;  %v8640_v34 = vor.u32 %v12303_v26, %v8637_v27  ;;  %v392_v19 = vperm.slane %v13498_v38, 5 }
 0x132   :  { %v8893_v30 = vld [vmem:[#allocation2 + $0x678] sm:$0xf0] }
 0x133   :  { %2078 = vmatpush.bf16.msrb.mxu2 %v8672_v20  ;;  %v12167_v35 = vld [vmem:[#allocation2 + $0x1c] sm:$0xf]  ;;  %v8896_v41 = vor.u32 %v12367_v29, %v8893_v30  ;;  %2053 = vmatpush.bf16.msrb.mxu0 %v8128_v31 }
 0x134   :  { %v8093_v36 = vld [vmem:[#allocation2 + $0x38] sm:$0xf0] }
 0x135   :  { %v12231_v37 = vld [vmem:[#allocation2 + $0x21c] sm:$0xf]  ;;  %2091 = vmatpush.bf16.msrb.mxu3 %v8928_v25  ;;  %v8096_v49 = vor.u32 %v12167_v35, %v8093_v36  ;;  %2066 = vmatpush.bf16.msrb.mxu1 %v8384_v33  ;;  %v393_v35 = vperm.slane %v13498_v38, 6 }
 0x136   :  { %v8349_v42 = vld [vmem:[#allocation2 + $0x238] sm:$0xf0] }
 0x137   :  { %v12295_v43 = vld [vmem:[#allocation2 + $0x41c] sm:$0xf]  ;;  %2079 = vmatpush.bf16.msrb.mxu2 %v8640_v34  ;;  %v8352_v50 = vor.u32 %v12231_v37, %v8349_v42  ;;  %2054 = vmatpush.bf16.msrb.mxu0 %v8096_v49  ;;  %v1848_v54 = vpop.f32.mrf.mxu0 }
 0x138   :  { %v8605_v44 = vld [vmem:[#allocation2 + $0x438] sm:$0xf0]  ;;  %v1849_v55 = vadd.f32 %v1848_v54, %v390_v53  ;;  %v394_v53 = vperm.slane %v13498_v38, 7 }
 0x139   :  { %v12359_v47 = vld [vmem:[#allocation2 + $0x61c] sm:$0xf]  ;;  %v8608_v51 = vor.u32 %v12295_v43, %v8605_v44  ;;  %2092 = vmatpush.bf16.msrb.mxu3 %v8896_v41  ;;  %2067 = vmatpush.bf16.msrb.mxu1 %v8352_v50  ;;  %v1861_v56 = vpop.f32.mrf.mxu1 }
 0x13a   :  { %v8861_v48 = vld [vmem:[#allocation2 + $0x638] sm:$0xf0]  ;;  %2055 = vmatmul.bf16.vlgmr.msrb.gmra.mxu0 %v13473_v4  ;;  %v1862_v57 = vadd.f32 %v1861_v56, %v1849_v55 }
 0x13b   :  { %v8864_v52 = vor.u32 %v12359_v47, %v8861_v48  ;;  %2080 = vmatpush.bf16.msrb.mxu2 %v8608_v51 }
 0x13c   :  { %2068 = vmatmul.bf16.vlgmr.msrb.gmra.mxu1 %v13475_v5 }
 0x13d   :  { %2093 = vmatpush.bf16.msrb.mxu3 %v8864_v52 }
 0x13e   :  { %2081 = vmatmul.bf16.vlgmr.msrb.gmra.mxu2 %v13477_v6  ;;  %v391_v6 = vperm.slane %v13498_v38, 4 }
 0x13f   :  { %v1850_v62 = vpop.f32.mrf.mxu0 }
 0x140   :  { %2094 = vmatmul.bf16.vlgmr.msrb.gmra.mxu3 %v13479_v7 }
 0x141   :  { %v1874_v58 = vpop.f32.mrf.mxu2  ;;  %v1863_v63 = vpop.f32.mrf.mxu1 }
 0x142   :  { %v1875_v59 = vadd.f32 %v1874_v58, %v1862_v57 }
 0x143   :  { %v1887_v60 = vpop.f32.mrf.mxu3 }
 0x144   :  { %v1888_v61 = vadd.f32 %v1887_v60, %v1875_v59 }
 0x146   :  { %v2102_v0 = vmax.f32 %v1888_v61, 0.0 }
 0x148   :  { %v13525_v4 = vpack.c.bf16 %v2102_v0, %v2102_v0 }
 0x149   :  { %v1876_v5 = vpop.f32.mrf.mxu2 }
 0x14b   :  { %v1889_v1 = vpop.f32.mrf.mxu3 }
 0x157   :  { %v1900_v7 = vpop.f32.mrf.mxu0 }
 0x158   :  { %v1901_v2 = vadd.f32 %v1900_v7, %v391_v6 }
 0x159   :  { %v1913_v3 = vpop.f32.mrf.mxu1 }
 0x15a   :  { %v1914_v8 = vadd.f32 %v1913_v3, %v1901_v2 }
 0x15f   :  { %v1902_v13 = vpop.f32.mrf.mxu0 }
 0x161   :  { %v1926_v9 = vpop.f32.mrf.mxu2  ;;  %v1915_v14 = vpop.f32.mrf.mxu1 }
 0x162   :  { %v1927_v10 = vadd.f32 %v1926_v9, %v1914_v8 }
 0x163   :  { %v1939_v11 = vpop.f32.mrf.mxu3 }
 0x164   :  { %v1940_v12 = vadd.f32 %v1939_v11, %v1927_v10 }
 0x166   :  { %v2103_v15 = vmax.f32 %v1940_v12, 0.0 }
 0x168   :  { %v13528_v16 = vpack.c.bf16 %v2103_v15, %v2103_v15 }
 0x169   :  { %v1928_v17 = vpop.f32.mrf.mxu2 }
 0x16b   :  { %v1941_v18 = vpop.f32.mrf.mxu3 }
 0x177   :  { %v1952_v20 = vpop.f32.mrf.mxu0 }
 0x178   :  { %v1953_v21 = vadd.f32 %v1952_v20, %v392_v19 }
 0x179   :  { %v1965_v22 = vpop.f32.mrf.mxu1 }
 0x17a   :  { %v1966_v23 = vadd.f32 %v1965_v22, %v1953_v21 }
 0x17f   :  { %v1954_v28 = vpop.f32.mrf.mxu0 }
 0x181   :  { %v1978_v24 = vpop.f32.mrf.mxu2  ;;  %v1967_v29 = vpop.f32.mrf.mxu1 }
 0x182   :  { %v1979_v25 = vadd.f32 %v1978_v24, %v1966_v23 }
 0x183   :  { %v1991_v26 = vpop.f32.mrf.mxu3 }
 0x184   :  { %v1992_v27 = vadd.f32 %v1991_v26, %v1979_v25 }
 0x186   :  { %v2104_v30 = vmax.f32 %v1992_v27, 0.0 }
 0x188   :  { %v13531_v31 = vpack.c.bf16 %v2104_v30, %v2104_v30 }
 0x189   :  { %v1980_v33 = vpop.f32.mrf.mxu2 }
 0x18b   :  { %v1993_v34 = vpop.f32.mrf.mxu3 }
 0x197   :  { %v2004_v36 = vpop.f32.mrf.mxu0 }
 0x198   :  { %v2005_v37 = vadd.f32 %v2004_v36, %v393_v35 }
 0x199   :  { %v2017_v40 = vpop.f32.mrf.mxu1 }
 0x19a   :  { %v2018_v41 = vadd.f32 %v2017_v40, %v2005_v37 }
 0x19f   :  { %v2006_v47 = vpop.f32.mrf.mxu0 }
 0x1a1   :  { %v2030_v42 = vpop.f32.mrf.mxu2  ;;  %v2019_v48 = vpop.f32.mrf.mxu1 }
 0x1a2   :  { %v2031_v43 = vadd.f32 %v2030_v42, %v2018_v41 }
 0x1a3   :  { %v2043_v44 = vpop.f32.mrf.mxu3 }
 0x1a4   :  { %v2044_v46 = vadd.f32 %v2043_v44, %v2031_v43 }
 0x1a6   :  { %v2105_v49 = vmax.f32 %v2044_v46, 0.0 }
 0x1a8   :  { %v13534_v50 = vpack.c.bf16 %v2105_v49, %v2105_v49 }
 0x1a9   :  { %v2032_v51 = vpop.f32.mrf.mxu2 }
 0x1ab   :  { %v2045_v52 = vpop.f32.mrf.mxu3 }
 0x1b7   :  { %v2056_v54 = vpop.f32.mrf.mxu0 }
 0x1b8   :  { %v2057_v55 = vadd.f32 %v2056_v54, %v394_v53 }
 0x1b9   :  { %v2069_v56 = vpop.f32.mrf.mxu1 }
 0x1ba   :  { %v2070_v57 = vadd.f32 %v2069_v56, %v2057_v55 }
 0x1bf   :  { %v2058_v61 = vpop.f32.mrf.mxu0 }
 0x1c1   :  { %v2082_v58 = vpop.f32.mrf.mxu2  ;;  %v2071_v62 = vpop.f32.mrf.mxu1 }
 0x1c2   :  { %v2083_v59 = vadd.f32 %v2082_v58, %v2070_v57 }
 0x1c3   :  { %v2095_v60 = vpop.f32.mrf.mxu3 }
 0x1c4   :  { %v2096_v63 = vadd.f32 %v2095_v60, %v2083_v59 }
 0x1c6   :  { %v2106_v0 = vmax.f32 %v2096_v63, 0.0 }
 0x1c8   :  { %v13537_v5 = vpack.c.bf16 %v2106_v0, %v2106_v0 }
 0x1c9   :  { %v2084_v1 = vpop.f32.mrf.mxu2 }
 0x1cb   :  { %v2097_v6 = vpop.f32.mrf.mxu3 }
 0x1cc   :  { %13398 = dma.done.wait [#allocation5 + $0x1], 65536 }
 0x1cd   :  { %13399 = vsyncadd [#allocation5 + $0x1], 4294901760  ;;  %v9315_v7 = vld [vmem:[#allocation3 + $0x1c0] sm:$0xf] }
 0x1ce   :  { %v12480_v2 = vld [vmem:[#allocation3 + $0x1dc] sm:$0xf0] }
 0x1cf   :  { %v9571_v38 = vld [vmem:[#allocation3 + $0x3c0] sm:$0xf]  ;;  %v9316_v3 = vor.u32 %v12480_v2, %v9315_v7 }
 0x1d0   :  { %v12544_v8 = vld [vmem:[#allocation3 + $0x3dc] sm:$0xf0] }
 0x1d1   :  { %v9827_v9 = vld [vmem:[#allocation3 + $0x5c0] sm:$0xf]  ;;  %v9572_v11 = vor.u32 %v12544_v8, %v9571_v38  ;;  %5209 = vmatpush.bf16.msra.mxu0 %v9316_v3 }
 0x1d2   :  { %v12608_v10 = vld [vmem:[#allocation3 + $0x5dc] sm:$0xf0] }
 0x1d3   :  { %v9828_v12 = vor.u32 %v12608_v10, %v9827_v9  ;;  %v10083_v13 = vld [vmem:[#allocation3 + $0x7c0] sm:$0xf]  ;;  %5222 = vmatpush.bf16.msra.mxu1 %v9572_v11 }
 0x1d4   :  { %v12672_v14 = vld [vmem:[#allocation3 + $0x7dc] sm:$0xf0] }
 0x1d5   :  { %v9283_v15 = vld [vmem:[#allocation3 + $0x180] sm:$0xf]  ;;  %v10084_v17 = vor.u32 %v12672_v14, %v10083_v13  ;;  %5235 = vmatpush.bf16.msra.mxu2 %v9828_v12 }
 0x1d6   :  { %v12472_v18 = vld [vmem:[#allocation3 + $0x19c] sm:$0xf0] }
 0x1d7   :  { %v9539_v19 = vld [vmem:[#allocation3 + $0x380] sm:$0xf]  ;;  %v9284_v21 = vor.u32 %v12472_v18, %v9283_v15  ;;  %5248 = vmatpush.bf16.msra.mxu3 %v10084_v17 }
 0x1d8   :  { %v12536_v20 = vld [vmem:[#allocation3 + $0x39c] sm:$0xf0] }
 0x1d9   :  { %v9540_v22 = vor.u32 %v12536_v20, %v9539_v19  ;;  %v9795_v23 = vld [vmem:[#allocation3 + $0x580] sm:$0xf]  ;;  %5210 = vmatpush.bf16.msra.mxu0 %v9284_v21 }
 0x1da   :  { %v12600_v24 = vld [vmem:[#allocation3 + $0x59c] sm:$0xf0] }
 0x1db   :  { %v10051_v25 = vld [vmem:[#allocation3 + $0x780] sm:$0xf]  ;;  %v9796_v26 = vor.u32 %v12600_v24, %v9795_v23  ;;  %5223 = vmatpush.bf16.msra.mxu1 %v9540_v22 }
 0x1dc   :  { %v12664_v27 = vld [vmem:[#allocation3 + $0x79c] sm:$0xf0] }
 0x1dd   :  { %v9251_v28 = vld [vmem:[#allocation3 + $0x140] sm:$0xf]  ;;  %v10052_v30 = vor.u32 %v12664_v27, %v10051_v25  ;;  %5236 = vmatpush.bf16.msra.mxu2 %v9796_v26 }
 0x1de   :  { %v12464_v29 = vld [vmem:[#allocation3 + $0x15c] sm:$0xf0] }
 0x1df   :  { %v9507_v33 = vld [vmem:[#allocation3 + $0x340] sm:$0xf]  ;;  %v9252_v36 = vor.u32 %v12464_v29, %v9251_v28  ;;  %5249 = vmatpush.bf16.msra.mxu3 %v10052_v30 }
 0x1e0   :  { %v12528_v34 = vld [vmem:[#allocation3 + $0x35c] sm:$0xf0] }
 0x1e1   :  { %v9763_v35 = vld [vmem:[#allocation3 + $0x540] sm:$0xf]  ;;  %v9508_v42 = vor.u32 %v12528_v34, %v9507_v33  ;;  %5211 = vmatpush.bf16.msra.mxu0 %v9252_v36 }
 0x1e2   :  { %v12592_v37 = vld [vmem:[#allocation3 + $0x55c] sm:$0xf0] }
 0x1e3   :  { %v10019_v40 = vld [vmem:[#allocation3 + $0x740] sm:$0xf]  ;;  %v9764_v43 = vor.u32 %v12592_v37, %v9763_v35  ;;  %5224 = vmatpush.bf16.msra.mxu1 %v9508_v42 }
 0x1e4   :  { %v12656_v41 = vld [vmem:[#allocation3 + $0x75c] sm:$0xf0] }
 0x1e5   :  { %v9219_v44 = vld [vmem:[#allocation3 + $0x100] sm:$0xf]  ;;  %v10020_v48 = vor.u32 %v12656_v41, %v10019_v40  ;;  %5237 = vmatpush.bf16.msra.mxu2 %v9764_v43 }
 0x1e6   :  { %v12456_v46 = vld [vmem:[#allocation3 + $0x11c] sm:$0xf0] }
 0x1e7   :  { %v9475_v47 = vld [vmem:[#allocation3 + $0x300] sm:$0xf]  ;;  %v9220_v55 = vor.u32 %v12456_v46, %v9219_v44  ;;  %5250 = vmatpush.bf16.msra.mxu3 %v10020_v48 }
 0x1e8   :  { %v12520_v49 = vld [vmem:[#allocation3 + $0x31c] sm:$0xf0] }
 0x1e9   :  { %v9731_v51 = vld [vmem:[#allocation3 + $0x500] sm:$0xf]  ;;  %v9476_v56 = vor.u32 %v12520_v49, %v9475_v47  ;;  %5212 = vmatpush.bf16.msra.mxu0 %v9220_v55 }
 0x1ea   :  { %v12584_v52 = vld [vmem:[#allocation3 + $0x51c] sm:$0xf0] }
 0x1eb   :  { %v9987_v53 = vld [vmem:[#allocation3 + $0x700] sm:$0xf]  ;;  %v9732_v57 = vor.u32 %v12584_v52, %v9731_v51  ;;  %5225 = vmatpush.bf16.msra.mxu1 %v9476_v56 }
 0x1ec   :  { %v12648_v54 = vld [vmem:[#allocation3 + $0x71c] sm:$0xf0] }
 0x1ed   :  { %v9187_v58 = vld [vmem:[#allocation3 + $0xc0] sm:$0xf]  ;;  %v9988_v61 = vor.u32 %v12648_v54, %v9987_v53  ;;  %5238 = vmatpush.bf16.msra.mxu2 %v9732_v57 }
 0x1ee   :  { %v12448_v59 = vld [vmem:[#allocation3 + $0xdc] sm:$0xf0] }
 0x1ef   :  { %v9443_v60 = vld [vmem:[#allocation3 + $0x2c0] sm:$0xf]  ;;  %v9188_v7 = vor.u32 %v12448_v59, %v9187_v58  ;;  %5251 = vmatpush.bf16.msra.mxu3 %v9988_v61 }
 0x1f0   :  { %v12512_v62 = vld [vmem:[#allocation3 + $0x2dc] sm:$0xf0] }
 0x1f1   :  { %v9699_v63 = vld [vmem:[#allocation3 + $0x4c0] sm:$0xf]  ;;  %v9444_v2 = vor.u32 %v12512_v62, %v9443_v60  ;;  %5213 = vmatpush.bf16.msra.mxu0 %v9188_v7 }
 0x1f2   :  { %v12576_v0 = vld [vmem:[#allocation3 + $0x4dc] sm:$0xf0] }
 0x1f3   :  { %v9955_v1 = vld [vmem:[#allocation3 + $0x6c0] sm:$0xf]  ;;  %v9700_v38 = vor.u32 %v12576_v0, %v9699_v63  ;;  %5226 = vmatpush.bf16.msra.mxu1 %v9444_v2 }
 0x1f4   :  { %v12640_v6 = vld [vmem:[#allocation3 + $0x6dc] sm:$0xf0] }
 0x1f5   :  { %v9155_v3 = vld [vmem:[#allocation3 + $0x80] sm:$0xf]  ;;  %v9956_v10 = vor.u32 %v12640_v6, %v9955_v1  ;;  %5239 = vmatpush.bf16.msra.mxu2 %v9700_v38 }
 0x1f6   :  { %v12440_v8 = vld [vmem:[#allocation3 + $0x9c] sm:$0xf0] }
 0x1f7   :  { %v9411_v9 = vld [vmem:[#allocation3 + $0x280] sm:$0xf]  ;;  %v9156_v17 = vor.u32 %v12440_v8, %v9155_v3  ;;  %5252 = vmatpush.bf16.msra.mxu3 %v9956_v10 }
 0x1f8   :  { %v12504_v11 = vld [vmem:[#allocation3 + $0x29c] sm:$0xf0] }
 0x1f9   :  { %v9667_v12 = vld [vmem:[#allocation3 + $0x480] sm:$0xf]  ;;  %v9412_v18 = vor.u32 %v12504_v11, %v9411_v9  ;;  %5214 = vmatpush.bf16.msra.mxu0 %v9156_v17 }
 0x1fa   :  { %v12568_v13 = vld [vmem:[#allocation3 + $0x49c] sm:$0xf0] }
 0x1fb   :  { %v9923_v14 = vld [vmem:[#allocation3 + $0x680] sm:$0xf]  ;;  %v9668_v19 = vor.u32 %v12568_v13, %v9667_v12  ;;  %5227 = vmatpush.bf16.msra.mxu1 %v9412_v18 }
 0x1fc   :  { %v12632_v15 = vld [vmem:[#allocation3 + $0x69c] sm:$0xf0] }
 0x1fd   :  { %v9123_v20 = vld [vmem:[#allocation3 + $0x40] sm:$0xf]  ;;  %v9924_v23 = vor.u32 %v12632_v15, %v9923_v14  ;;  %5240 = vmatpush.bf16.msra.mxu2 %v9668_v19 }
 0x1fe   :  { %v12432_v21 = vld [vmem:[#allocation3 + $0x5c] sm:$0xf0] }
 0x1ff   :  { %v9379_v22 = vld [vmem:[#allocation3 + $0x240] sm:$0xf]  ;;  %v9124_v29 = vor.u32 %v12432_v21, %v9123_v20  ;;  %5253 = vmatpush.bf16.msra.mxu3 %v9924_v23 }
 0x200   :  { %v12496_v24 = vld [vmem:[#allocation3 + $0x25c] sm:$0xf0] }
 0x201   :  { %v9635_v25 = vld [vmem:[#allocation3 + $0x440] sm:$0xf]  ;;  %v9380_v34 = vor.u32 %v12496_v24, %v9379_v22  ;;  %5215 = vmatpush.bf16.msra.mxu0 %v9124_v29 }
 0x202   :  { %v12560_v26 = vld [vmem:[#allocation3 + $0x45c] sm:$0xf0] }
 0x203   :  { %v9891_v27 = vld [vmem:[#allocation3 + $0x640] sm:$0xf]  ;;  %v9636_v35 = vor.u32 %v12560_v26, %v9635_v25  ;;  %5228 = vmatpush.bf16.msra.mxu1 %v9380_v34 }
 0x204   :  { %v12624_v28 = vld [vmem:[#allocation3 + $0x65c] sm:$0xf0] }
 0x205   :  { %v9091_v30 = vld [vmem:[#allocation3] sm:$0xf]  ;;  %v9892_v41 = vor.u32 %v12624_v28, %v9891_v27  ;;  %5241 = vmatpush.bf16.msra.mxu2 %v9636_v35 }
 0x206   :  { %v12424_v33 = vld [vmem:[#allocation3 + $0x1c] sm:$0xf0] }
 0x207   :  { %v9347_v36 = vld [vmem:[#allocation3 + $0x200] sm:$0xf]  ;;  %v9092_v49 = vor.u32 %v12424_v33, %v9091_v30  ;;  %5254 = vmatpush.bf16.msra.mxu3 %v9892_v41 }
 0x208   :  { %v12488_v37 = vld [vmem:[#allocation3 + $0x21c] sm:$0xf0] }
 0x209   :  { %v9603_v40 = vld [vmem:[#allocation3 + $0x400] sm:$0xf]  ;;  %v9348_v54 = vor.u32 %v12488_v37, %v9347_v36  ;;  %5216 = vmatpush.bf16.msra.mxu0 %v9092_v49 }
 0x20a   :  { %v12552_v42 = vld [vmem:[#allocation3 + $0x41c] sm:$0xf0] }
 0x20b   :  { %v9859_v43 = vld [vmem:[#allocation3 + $0x600] sm:$0xf]  ;;  %v9604_v55 = vor.u32 %v12552_v42, %v9603_v40  ;;  %5229 = vmatpush.bf16.msra.mxu1 %v9348_v54 }
 0x20c   :  { %v12616_v44 = vld [vmem:[#allocation3 + $0x61c] sm:$0xf0]  ;;  %5217 = vmatmul.bf16.vlgmr.msra.gmra.mxu0 %v13504_v45 }
 0x20d   :  { %v10339_v46 = vld [vmem:[#allocation3 + $0x9c0] sm:$0xf]  ;;  %v9860_v58 = vor.u32 %v12616_v44, %v9859_v43  ;;  %5242 = vmatpush.bf16.msra.mxu2 %v9604_v55 }
 0x20e   :  { %v12736_v47 = vld [vmem:[#allocation3 + $0x9dc] sm:$0xf0]  ;;  %5230 = vmatmul.bf16.vlgmr.msra.gmra.mxu1 %v13511_v39 }
 0x20f   :  { %v10595_v48 = vld [vmem:[#allocation3 + $0xbc0] sm:$0xf]  ;;  %v10340_v59 = vor.u32 %v12736_v47, %v10339_v46  ;;  %5255 = vmatpush.bf16.msra.mxu3 %v9860_v58 }
 0x210   :  { %v12800_v51 = vld [vmem:[#allocation3 + $0xbdc] sm:$0xf0]  ;;  %5243 = vmatmul.bf16.vlgmr.msra.gmra.mxu2 %v13518_v32 }
 0x211   :  { %v10851_v52 = vld [vmem:[#allocation3 + $0xdc0] sm:$0xf]  ;;  %v10596_v60 = vor.u32 %v12800_v51, %v10595_v48  ;;  %5261 = vmatpush.bf16.msrb.mxu0 %v10340_v59 }
 0x212   :  { %v12864_v53 = vld [vmem:[#allocation3 + $0xddc] sm:$0xf0]  ;;  %5256 = vmatmul.bf16.vlgmr.msra.gmra.mxu3 %v13525_v4 }
 0x213   :  { %v11107_v56 = vld [vmem:[#allocation3 + $0xfc0] sm:$0xf]  ;;  %v10852_v61 = vor.u32 %v12864_v53, %v10851_v52  ;;  %5274 = vmatpush.bf16.msrb.mxu1 %v10596_v60 }
 0x214   :  { %v12928_v57 = vld [vmem:[#allocation3 + $0xfdc] sm:$0xf0] }
 0x215   :  { %v10307_v62 = vld [vmem:[#allocation3 + $0x980] sm:$0xf]  ;;  %v11108_v1 = vor.u32 %v12928_v57, %v11107_v56  ;;  %5287 = vmatpush.bf16.msrb.mxu2 %v10852_v61 }
 0x216   :  { %v12728_v63 = vld [vmem:[#allocation3 + $0x99c] sm:$0xf0] }
 0x217   :  { %v10563_v0 = vld [vmem:[#allocation3 + $0xb80] sm:$0xf]  ;;  %v10308_v8 = vor.u32 %v12728_v63, %v10307_v62  ;;  %5300 = vmatpush.bf16.msrb.mxu3 %v11108_v1 }
 0x218   :  { %v12792_v6 = vld [vmem:[#allocation3 + $0xb9c] sm:$0xf0] }
 0x219   :  { %v10819_v7 = vld [vmem:[#allocation3 + $0xd80] sm:$0xf]  ;;  %v10564_v9 = vor.u32 %v12792_v6, %v10563_v0  ;;  %5262 = vmatpush.bf16.msrb.mxu0 %v10308_v8 }
 0x21a   :  { %v12856_v2 = vld [vmem:[#allocation3 + $0xd9c] sm:$0xf0] }
 0x21b   :  { %v11075_v38 = vld [vmem:[#allocation3 + $0xf80] sm:$0xf]  ;;  %v10820_v10 = vor.u32 %v12856_v2, %v10819_v7  ;;  %5275 = vmatpush.bf16.msrb.mxu1 %v10564_v9 }
 0x21c   :  { %v12920_v3 = vld [vmem:[#allocation3 + $0xf9c] sm:$0xf0] }
 0x21d   :  { %v10275_v11 = vld [vmem:[#allocation3 + $0x940] sm:$0xf]  ;;  %v11076_v14 = vor.u32 %v12920_v3, %v11075_v38  ;;  %5288 = vmatpush.bf16.msrb.mxu2 %v10820_v10 }
 0x21e   :  { %v12720_v12 = vld [vmem:[#allocation3 + $0x95c] sm:$0xf0] }
 0x21f   :  { %v10531_v13 = vld [vmem:[#allocation3 + $0xb40] sm:$0xf]  ;;  %v10276_v21 = vor.u32 %v12720_v12, %v10275_v11  ;;  %5301 = vmatpush.bf16.msrb.mxu3 %v11076_v14 }
 0x220   :  { %v12784_v15 = vld [vmem:[#allocation3 + $0xb5c] sm:$0xf0] }
 0x221   :  { %v10787_v17 = vld [vmem:[#allocation3 + $0xd40] sm:$0xf]  ;;  %v10532_v22 = vor.u32 %v12784_v15, %v10531_v13  ;;  %5263 = vmatpush.bf16.msrb.mxu0 %v10276_v21 }
 0x222   :  { %v12848_v18 = vld [vmem:[#allocation3 + $0xd5c] sm:$0xf0] }
 0x223   :  { %v11043_v19 = vld [vmem:[#allocation3 + $0xf40] sm:$0xf]  ;;  %v10788_v23 = vor.u32 %v12848_v18, %v10787_v17  ;;  %5276 = vmatpush.bf16.msrb.mxu1 %v10532_v22 }
 0x224   :  { %v12912_v20 = vld [vmem:[#allocation3 + $0xf5c] sm:$0xf0] }
 0x225   :  { %v10243_v24 = vld [vmem:[#allocation3 + $0x900] sm:$0xf]  ;;  %v11044_v27 = vor.u32 %v12912_v20, %v11043_v19  ;;  %5289 = vmatpush.bf16.msrb.mxu2 %v10788_v23 }
 0x226   :  { %v12712_v25 = vld [vmem:[#allocation3 + $0x91c] sm:$0xf0] }
 0x227   :  { %v10499_v26 = vld [vmem:[#allocation3 + $0xb00] sm:$0xf]  ;;  %v10244_v35 = vor.u32 %v12712_v25, %v10243_v24  ;;  %5302 = vmatpush.bf16.msrb.mxu3 %v11044_v27  ;;  %v12476_v25 = vld [vmem:[#allocation3 + $0x1c4] sm:$0xf] }
 0x228   :  { %v12776_v28 = vld [vmem:[#allocation3 + $0xb1c] sm:$0xf0]  ;;  %v12540_v27 = vld [vmem:[#allocation3 + $0x3c4] sm:$0xf] }
 0x229   :  { %v10755_v29 = vld [vmem:[#allocation3 + $0xd00] sm:$0xf]  ;;  %v10500_v36 = vor.u32 %v12776_v28, %v10499_v26  ;;  %5264 = vmatpush.bf16.msrb.mxu0 %v10244_v35  ;;  %v9317_v26 = vld [vmem:[#allocation3 + $0x1e0] sm:$0xf0] }
 0x22a   :  { %v12840_v30 = vld [vmem:[#allocation3 + $0xd1c] sm:$0xf0] }
 0x22b   :  { %v11011_v33 = vld [vmem:[#allocation3 + $0xf00] sm:$0xf]  ;;  %v10756_v37 = vor.u32 %v12840_v30, %v10755_v29  ;;  %5277 = vmatpush.bf16.msrb.mxu1 %v10500_v36  ;;  %v9573_v29 = vld [vmem:[#allocation3 + $0x3e0] sm:$0xf0] }
 0x22c   :  { %v12904_v34 = vld [vmem:[#allocation3 + $0xf1c] sm:$0xf0]  ;;  %v12604_v30 = vld [vmem:[#allocation3 + $0x5c4] sm:$0xf] }
 0x22d   :  { %v10211_v40 = vld [vmem:[#allocation3 + $0x8c0] sm:$0xf]  ;;  %v11012_v43 = vor.u32 %v12904_v34, %v11011_v33  ;;  %5290 = vmatpush.bf16.msrb.mxu2 %v10756_v37  ;;  %v9829_v33 = vld [vmem:[#allocation3 + $0x5e0] sm:$0xf0] }
 0x22e   :  { %v12704_v41 = vld [vmem:[#allocation3 + $0x8dc] sm:$0xf0]  ;;  %v12668_v36 = vld [vmem:[#allocation3 + $0x7c4] sm:$0xf] }
 0x22f   :  { %v10467_v42 = vld [vmem:[#allocation3 + $0xac0] sm:$0xf]  ;;  %v10212_v51 = vor.u32 %v12704_v41, %v10211_v40  ;;  %5303 = vmatpush.bf16.msrb.mxu3 %v11012_v43  ;;  %v10085_v37 = vld [vmem:[#allocation3 + $0x7e0] sm:$0xf0]  ;;  %v9320_v41 = vor.u32 %v12476_v25, %v9317_v26  ;;  %v9832_v43 = vor.u32 %v12604_v30, %v9829_v33 }
 0x230   :  { %v12768_v44 = vld [vmem:[#allocation3 + $0xadc] sm:$0xf0]  ;;  %v12572_v25 = vld [vmem:[#allocation3 + $0x4c4] sm:$0xf] }
 0x231   :  { %v10723_v46 = vld [vmem:[#allocation3 + $0xcc0] sm:$0xf]  ;;  %v10468_v52 = vor.u32 %v12768_v44, %v10467_v42  ;;  %5265 = vmatpush.bf16.msrb.mxu0 %v10212_v51  ;;  %v9576_v42 = vor.u32 %v12540_v27, %v9573_v29  ;;  %v12468_v44 = vld [vmem:[#allocation3 + $0x184] sm:$0xf] }
 0x232   :  { %v12832_v47 = vld [vmem:[#allocation3 + $0xcdc] sm:$0xf0]  ;;  %v12596_v51 = vld [vmem:[#allocation3 + $0x584] sm:$0xf] }
 0x233   :  { %v10979_v48 = vld [vmem:[#allocation3 + $0xec0] sm:$0xf]  ;;  %v10724_v53 = vor.u32 %v12832_v47, %v10723_v46  ;;  %5278 = vmatpush.bf16.msrb.mxu1 %v10468_v52  ;;  %v9285_v46 = vld [vmem:[#allocation3 + $0x1a0] sm:$0xf0] }
 0x234   :  { %v12896_v49 = vld [vmem:[#allocation3 + $0xedc] sm:$0xf0]  ;;  %v12532_v47 = vld [vmem:[#allocation3 + $0x384] sm:$0xf] }
 0x235   :  { %v10179_v54 = vld [vmem:[#allocation3 + $0x880] sm:$0xf]  ;;  %v10980_v57 = vor.u32 %v12896_v49, %v10979_v48  ;;  %5291 = vmatpush.bf16.msrb.mxu2 %v10724_v53  ;;  %v10088_v48 = vor.u32 %v12668_v36, %v10085_v37  ;;  %v9541_v49 = vld [vmem:[#allocation3 + $0x3a0] sm:$0xf0] }
 0x236   :  { %v12696_v55 = vld [vmem:[#allocation3 + $0x89c] sm:$0xf0]  ;;  %v9797_v52 = vld [vmem:[#allocation3 + $0x5a0] sm:$0xf0] }
 0x237   :  { %v10435_v56 = vld [vmem:[#allocation3 + $0xa80] sm:$0xf]  ;;  %v10180_v63 = vor.u32 %v12696_v55, %v10179_v54  ;;  %5304 = vmatpush.bf16.msrb.mxu3 %v10980_v57  ;;  %v12660_v53 = vld [vmem:[#allocation3 + $0x784] sm:$0xf]  ;;  %v9288_v55 = vor.u32 %v12468_v44, %v9285_v46  ;;  %v9800_v57 = vor.u32 %v12596_v51, %v9797_v52 }
 0x238   :  { %v12760_v58 = vld [vmem:[#allocation3 + $0xa9c] sm:$0xf0]  ;;  %v10053_v54 = vld [vmem:[#allocation3 + $0x7a0] sm:$0xf0] }
 0x239   :  { %v10691_v59 = vld [vmem:[#allocation3 + $0xc80] sm:$0xf]  ;;  %v10436_v0 = vor.u32 %v12760_v58, %v10435_v56  ;;  %5266 = vmatpush.bf16.msrb.mxu0 %v10180_v63  ;;  %v9544_v56 = vor.u32 %v12532_v47, %v9541_v49  ;;  %v12460_v58 = vld [vmem:[#allocation3 + $0x144] sm:$0xf] }
 0x23a   :  { %v12824_v60 = vld [vmem:[#allocation3 + $0xc9c] sm:$0xf0]  ;;  %v12588_v63 = vld [vmem:[#allocation3 + $0x544] sm:$0xf] }
 0x23b   :  { %v10947_v61 = vld [vmem:[#allocation3 + $0xe80] sm:$0xf]  ;;  %v10692_v1 = vor.u32 %v12824_v60, %v10691_v59  ;;  %5279 = vmatpush.bf16.msrb.mxu1 %v10436_v0  ;;  %v9253_v59 = vld [vmem:[#allocation3 + $0x160] sm:$0xf0] }
 0x23c   :  { %v12888_v62 = vld [vmem:[#allocation3 + $0xe9c] sm:$0xf0]  ;;  %v12524_v60 = vld [vmem:[#allocation3 + $0x344] sm:$0xf] }
 0x23d   :  { %v10147_v6 = vld [vmem:[#allocation3 + $0x840] sm:$0xf]  ;;  %v10948_v38 = vor.u32 %v12888_v62, %v10947_v61  ;;  %5292 = vmatpush.bf16.msrb.mxu2 %v10692_v1  ;;  %v10056_v61 = vor.u32 %v12660_v53, %v10053_v54  ;;  %v9509_v62 = vld [vmem:[#allocation3 + $0x360] sm:$0xf0] }
 0x23e   :  { %v12688_v7 = vld [vmem:[#allocation3 + $0x85c] sm:$0xf0]  ;;  %v9765_v0 = vld [vmem:[#allocation3 + $0x560] sm:$0xf0] }
 0x23f   :  { %v10403_v2 = vld [vmem:[#allocation3 + $0xa40] sm:$0xf]  ;;  %v10148_v12 = vor.u32 %v12688_v7, %v10147_v6  ;;  %5305 = vmatpush.bf16.msrb.mxu3 %v10948_v38  ;;  %v12652_v1 = vld [vmem:[#allocation3 + $0x744] sm:$0xf]  ;;  %v9256_v7 = vor.u32 %v12460_v58, %v9253_v59  ;;  %v9768_v38 = vor.u32 %v12588_v63, %v9765_v0 }
 0x240   :  { %v12752_v3 = vld [vmem:[#allocation3 + $0xa5c] sm:$0xf0]  ;;  %v10021_v6 = vld [vmem:[#allocation3 + $0x760] sm:$0xf0] }
 0x241   :  { %v10659_v8 = vld [vmem:[#allocation3 + $0xc40] sm:$0xf]  ;;  %v10404_v15 = vor.u32 %v12752_v3, %v10403_v2  ;;  %5267 = vmatpush.bf16.msrb.mxu0 %v10148_v12  ;;  %v9512_v2 = vor.u32 %v12524_v60, %v9509_v62  ;;  %v12452_v3 = vld [vmem:[#allocation3 + $0x104] sm:$0xf] }
 0x242   :  { %v12816_v9 = vld [vmem:[#allocation3 + $0xc5c] sm:$0xf0]  ;;  %v12580_v12 = vld [vmem:[#allocation3 + $0x504] sm:$0xf] }
 0x243   :  { %v10915_v10 = vld [vmem:[#allocation3 + $0xe40] sm:$0xf]  ;;  %v10660_v17 = vor.u32 %v12816_v9, %v10659_v8  ;;  %5280 = vmatpush.bf16.msrb.mxu1 %v10404_v15  ;;  %v9221_v8 = vld [vmem:[#allocation3 + $0x120] sm:$0xf0] }
 0x244   :  { %v12880_v11 = vld [vmem:[#allocation3 + $0xe5c] sm:$0xf0]  ;;  %v12516_v9 = vld [vmem:[#allocation3 + $0x304] sm:$0xf] }
 0x245   :  { %v10115_v13 = vld [vmem:[#allocation3 + $0x800] sm:$0xf]  ;;  %v10916_v21 = vor.u32 %v12880_v11, %v10915_v10  ;;  %5293 = vmatpush.bf16.msrb.mxu2 %v10660_v17  ;;  %v10024_v10 = vor.u32 %v12652_v1, %v10021_v6  ;;  %v9477_v11 = vld [vmem:[#allocation3 + $0x320] sm:$0xf0]  ;;  %v9224_v17 = vor.u32 %v12452_v3, %v9221_v8 }
 0x246   :  { %v12680_v14 = vld [vmem:[#allocation3 + $0x81c] sm:$0xf0]  ;;  %v9989_v15 = vld [vmem:[#allocation3 + $0x720] sm:$0xf0] }
 0x247   :  { %v10371_v18 = vld [vmem:[#allocation3 + $0xa00] sm:$0xf]  ;;  %v10116_v28 = vor.u32 %v12680_v14, %v10115_v13  ;;  %5306 = vmatpush.bf16.msrb.mxu3 %v10916_v21  ;;  %v9733_v13 = vld [vmem:[#allocation3 + $0x520] sm:$0xf0] }
 0x248   :  { %v12744_v19 = vld [vmem:[#allocation3 + $0xa1c] sm:$0xf0]  ;;  %v12644_v14 = vld [vmem:[#allocation3 + $0x704] sm:$0xf] }
 0x249   :  { %v10627_v20 = vld [vmem:[#allocation3 + $0xc00] sm:$0xf]  ;;  %v10372_v34 = vor.u32 %v12744_v19, %v10371_v18  ;;  %5268 = vmatpush.bf16.msrb.mxu0 %v10116_v28  ;;  %v9480_v18 = vor.u32 %v12516_v9, %v9477_v11  ;;  %v9736_v19 = vor.u32 %v12580_v12, %v9733_v13  ;;  %v9189_v21 = vld [vmem:[#allocation3 + $0xe0] sm:$0xf0] }
 0x24a   :  { %v12808_v22 = vld [vmem:[#allocation3 + $0xc1c] sm:$0xf0]  ;;  %v9701_v26 = vld [vmem:[#allocation3 + $0x4e0] sm:$0xf0] }
 0x24b   :  { %v10883_v23 = vld [vmem:[#allocation3 + $0xe00] sm:$0xf]  ;;  %v10628_v35 = vor.u32 %v12808_v22, %v10627_v20  ;;  %5281 = vmatpush.bf16.msrb.mxu1 %v10372_v34  ;;  %v12444_v20 = vld [vmem:[#allocation3 + $0xc4] sm:$0xf]  ;;  %v9704_v33 = vor.u32 %v12572_v25, %v9701_v26 }
 0x24c   :  { %v12872_v24 = vld [vmem:[#allocation3 + $0xe1c] sm:$0xf0]  ;;  %5269 = vmatmul.bf16.vlgmr.msrb.gmra.mxu0 %v13528_v16  ;;  %v12508_v22 = vld [vmem:[#allocation3 + $0x2c4] sm:$0xf]  ;;  %v9192_v29 = vor.u32 %v12444_v20, %v9189_v21 }
 0x24d   :  { %v10884_v40 = vor.u32 %v12872_v24, %v10883_v23  ;;  %5294 = vmatpush.bf16.msrb.mxu2 %v10628_v35  ;;  %5313 = vmatpush.bf16.msra.mxu0 %v9320_v41  ;;  %v9992_v23 = vor.u32 %v12644_v14, %v9989_v15  ;;  %v9445_v24 = vld [vmem:[#allocation3 + $0x2e0] sm:$0xf0] }
 0x24e   :  { %5282 = vmatmul.bf16.vlgmr.msrb.gmra.mxu1 %v13531_v31  ;;  %v12636_v27 = vld [vmem:[#allocation3 + $0x6c4] sm:$0xf]  ;;  %v9448_v30 = vor.u32 %v12508_v22, %v9445_v24 }
 0x24f   :  { %5307 = vmatpush.bf16.msrb.mxu3 %v10884_v40  ;;  %5326 = vmatpush.bf16.msra.mxu1 %v9576_v42  ;;  %v9957_v28 = vld [vmem:[#allocation3 + $0x6e0] sm:$0xf0] }
 0x250   :  { %5295 = vmatmul.bf16.vlgmr.msrb.gmra.mxu2 %v13534_v50  ;;  %v12436_v34 = vld [vmem:[#allocation3 + $0x84] sm:$0xf]  ;;  %v9960_v37 = vor.u32 %v12636_v27, %v9957_v28 }
 0x251   :  { %5339 = vmatpush.bf16.msra.mxu2 %v9832_v43  ;;  %5314 = vmatpush.bf16.msra.mxu0 %v9288_v55  ;;  %v9157_v35 = vld [vmem:[#allocation3 + $0xa0] sm:$0xf0] }
 0x252   :  { %5308 = vmatmul.bf16.vlgmr.msrb.gmra.mxu3 %v13537_v5  ;;  %v12500_v36 = vld [vmem:[#allocation3 + $0x284] sm:$0xf]  ;;  %v9160_v46 = vor.u32 %v12436_v34, %v9157_v35 }
 0x253   :  { %5352 = vmatpush.bf16.msra.mxu3 %v10088_v48  ;;  %5327 = vmatpush.bf16.msra.mxu1 %v9544_v56  ;;  %v9413_v40 = vld [vmem:[#allocation3 + $0x2a0] sm:$0xf0] }
 0x254   :  { %v12564_v41 = vld [vmem:[#allocation3 + $0x484] sm:$0xf]  ;;  %v9416_v47 = vor.u32 %v12500_v36, %v9413_v40 }
 0x255   :  { %5340 = vmatpush.bf16.msra.mxu2 %v9800_v57  ;;  %5315 = vmatpush.bf16.msra.mxu0 %v9256_v7  ;;  %v9669_v42 = vld [vmem:[#allocation3 + $0x4a0] sm:$0xf0] }
 0x256   :  { %v12628_v43 = vld [vmem:[#allocation3 + $0x684] sm:$0xf]  ;;  %v9672_v48 = vor.u32 %v12564_v41, %v9669_v42 }
 0x257   :  { %5353 = vmatpush.bf16.msra.mxu3 %v10056_v61  ;;  %5328 = vmatpush.bf16.msra.mxu1 %v9512_v2  ;;  %v9925_v44 = vld [vmem:[#allocation3 + $0x6a0] sm:$0xf0] }
 0x258   :  { %v12428_v49 = vld [vmem:[#allocation3 + $0x44] sm:$0xf]  ;;  %v9928_v53 = vor.u32 %v12628_v43, %v9925_v44 }
 0x259   :  { %5341 = vmatpush.bf16.msra.mxu2 %v9768_v38  ;;  %5316 = vmatpush.bf16.msra.mxu0 %v9224_v17  ;;  %v9125_v51 = vld [vmem:[#allocation3 + $0x60] sm:$0xf0] }
 0x25a   :  { %v12492_v52 = vld [vmem:[#allocation3 + $0x244] sm:$0xf]  ;;  %v9128_v59 = vor.u32 %v12428_v49, %v9125_v51 }
 0x25b   :  { %5354 = vmatpush.bf16.msra.mxu3 %v10024_v10  ;;  %5329 = vmatpush.bf16.msra.mxu1 %v9480_v18  ;;  %v9381_v54 = vld [vmem:[#allocation3 + $0x260] sm:$0xf0] }
 0x25c   :  { %v12556_v55 = vld [vmem:[#allocation3 + $0x444] sm:$0xf]  ;;  %v9384_v62 = vor.u32 %v12492_v52, %v9381_v54 }
 0x25d   :  { %5342 = vmatpush.bf16.msra.mxu2 %v9736_v19  ;;  %5317 = vmatpush.bf16.msra.mxu0 %v9192_v29  ;;  %v9637_v56 = vld [vmem:[#allocation3 + $0x460] sm:$0xf0] }
 0x25e   :  { %v12620_v57 = vld [vmem:[#allocation3 + $0x644] sm:$0xf]  ;;  %v9640_v63 = vor.u32 %v12556_v55, %v9637_v56 }
 0x25f   :  { %5355 = vmatpush.bf16.msra.mxu3 %v9992_v23  ;;  %5330 = vmatpush.bf16.msra.mxu1 %v9448_v30  ;;  %v9893_v58 = vld [vmem:[#allocation3 + $0x660] sm:$0xf0] }
 0x260   :  { %v12420_v60 = vld [vmem:[#allocation3 + $0x4] sm:$0xf]  ;;  %v9896_v7 = vor.u32 %v12620_v57, %v9893_v58 }
 0x261   :  { %5343 = vmatpush.bf16.msra.mxu2 %v9704_v33  ;;  %5318 = vmatpush.bf16.msra.mxu0 %v9160_v46  ;;  %v9093_v61 = vld [vmem:[#allocation3 + $0x20] sm:$0xf0] }
 0x262   :  { %v12484_v0 = vld [vmem:[#allocation3 + $0x204] sm:$0xf]  ;;  %v9096_v11 = vor.u32 %v12420_v60, %v9093_v61 }
 0x263   :  { %5356 = vmatpush.bf16.msra.mxu3 %v9960_v37  ;;  %5331 = vmatpush.bf16.msra.mxu1 %v9416_v47  ;;  %v9349_v1 = vld [vmem:[#allocation3 + $0x220] sm:$0xf0] }
 0x264   :  { %v12548_v6 = vld [vmem:[#allocation3 + $0x404] sm:$0xf]  ;;  %v9352_v15 = vor.u32 %v12484_v0, %v9349_v1 }
 0x265   :  { %5344 = vmatpush.bf16.msra.mxu2 %v9672_v48  ;;  %v9605_v2 = vld [vmem:[#allocation3 + $0x420] sm:$0xf0]  ;;  %5319 = vmatpush.bf16.msra.mxu0 %v9128_v59 }
 0x266   :  { %v12612_v38 = vld [vmem:[#allocation3 + $0x604] sm:$0xf]  ;;  %v9608_v17 = vor.u32 %v12548_v6, %v9605_v2 }
 0x267   :  { %5357 = vmatpush.bf16.msra.mxu3 %v9928_v53  ;;  %v9861_v3 = vld [vmem:[#allocation3 + $0x620] sm:$0xf0]  ;;  %5332 = vmatpush.bf16.msra.mxu1 %v9384_v62 }
 0x268   :  { %v12732_v8 = vld [vmem:[#allocation3 + $0x9c4] sm:$0xf]  ;;  %v9864_v20 = vor.u32 %v12612_v38, %v9861_v3 }
 0x269   :  { %v10341_v9 = vld [vmem:[#allocation3 + $0x9e0] sm:$0xf0]  ;;  %5345 = vmatpush.bf16.msra.mxu2 %v9640_v63  ;;  %5320 = vmatpush.bf16.msra.mxu0 %v9096_v11 }
 0x26a   :  { %v12796_v10 = vld [vmem:[#allocation3 + $0xbc4] sm:$0xf]  ;;  %v10344_v21 = vor.u32 %v12732_v8, %v10341_v9 }
 0x26b   :  { %v10597_v12 = vld [vmem:[#allocation3 + $0xbe0] sm:$0xf0]  ;;  %5358 = vmatpush.bf16.msra.mxu3 %v9896_v7  ;;  %5333 = vmatpush.bf16.msra.mxu1 %v9352_v15 }
 0x26c   :  { %v12860_v13 = vld [vmem:[#allocation3 + $0xdc4] sm:$0xf]  ;;  %v10600_v22 = vor.u32 %v12796_v10, %v10597_v12  ;;  %5321 = vmatmul.bf16.vlgmr.msra.gmra.mxu0 %v13504_v45 }
 0x26d   :  { %v10853_v14 = vld [vmem:[#allocation3 + $0xde0] sm:$0xf0]  ;;  %5346 = vmatpush.bf16.msra.mxu2 %v9608_v17  ;;  %5365 = vmatpush.bf16.msrb.mxu0 %v10344_v21 }
 0x26e   :  { %v12924_v18 = vld [vmem:[#allocation3 + $0xfc4] sm:$0xf]  ;;  %v10856_v23 = vor.u32 %v12860_v13, %v10853_v14  ;;  %5334 = vmatmul.bf16.vlgmr.msra.gmra.mxu1 %v13511_v39 }
 0x26f   :  { %v11109_v19 = vld [vmem:[#allocation3 + $0xfe0] sm:$0xf0]  ;;  %5359 = vmatpush.bf16.msra.mxu3 %v9864_v20  ;;  %5378 = vmatpush.bf16.msrb.mxu1 %v10600_v22 }
 0x270   :  { %v12724_v24 = vld [vmem:[#allocation3 + $0x984] sm:$0xf]  ;;  %v11112_v27 = vor.u32 %v12924_v18, %v11109_v19  ;;  %5347 = vmatmul.bf16.vlgmr.msra.gmra.mxu2 %v13518_v32 }
 0x271   :  { %v10309_v25 = vld [vmem:[#allocation3 + $0x9a0] sm:$0xf0]  ;;  %5391 = vmatpush.bf16.msrb.mxu2 %v10856_v23 }
 0x272   :  { %v12788_v26 = vld [vmem:[#allocation3 + $0xb84] sm:$0xf]  ;;  %v10312_v35 = vor.u32 %v12724_v24, %v10309_v25  ;;  %5360 = vmatmul.bf16.vlgmr.msra.gmra.mxu3 %v13525_v4 }
 0x273   :  { %v10565_v28 = vld [vmem:[#allocation3 + $0xba0] sm:$0xf0]  ;;  %5404 = vmatpush.bf16.msrb.mxu3 %v11112_v27 }
 0x274   :  { %v12852_v29 = vld [vmem:[#allocation3 + $0xd84] sm:$0xf]  ;;  %v10568_v36 = vor.u32 %v12788_v26, %v10565_v28  ;;  %5366 = vmatpush.bf16.msrb.mxu0 %v10312_v35 }
 0x275   :  { %v10821_v30 = vld [vmem:[#allocation3 + $0xda0] sm:$0xf0] }
 0x276   :  { %v12916_v33 = vld [vmem:[#allocation3 + $0xf84] sm:$0xf]  ;;  %v10824_v37 = vor.u32 %v12852_v29, %v10821_v30  ;;  %5379 = vmatpush.bf16.msrb.mxu1 %v10568_v36 }
 0x277   :  { %v11077_v34 = vld [vmem:[#allocation3 + $0xfa0] sm:$0xf0] }
 0x278   :  { %v12716_v40 = vld [vmem:[#allocation3 + $0x944] sm:$0xf]  ;;  %v11080_v43 = vor.u32 %v12916_v33, %v11077_v34  ;;  %5392 = vmatpush.bf16.msrb.mxu2 %v10824_v37 }
 0x279   :  { %v10277_v41 = vld [vmem:[#allocation3 + $0x960] sm:$0xf0] }
 0x27a   :  { %v12780_v42 = vld [vmem:[#allocation3 + $0xb44] sm:$0xf]  ;;  %v10280_v51 = vor.u32 %v12716_v40, %v10277_v41  ;;  %5405 = vmatpush.bf16.msrb.mxu3 %v11080_v43 }
 0x27b   :  { %v10533_v44 = vld [vmem:[#allocation3 + $0xb60] sm:$0xf0] }
 0x27c   :  { %v12844_v46 = vld [vmem:[#allocation3 + $0xd44] sm:$0xf]  ;;  %v10536_v52 = vor.u32 %v12780_v42, %v10533_v44  ;;  %5367 = vmatpush.bf16.msrb.mxu0 %v10280_v51 }
 0x27d   :  { %v10789_v47 = vld [vmem:[#allocation3 + $0xd60] sm:$0xf0] }
 0x27e   :  { %v12908_v48 = vld [vmem:[#allocation3 + $0xf44] sm:$0xf]  ;;  %v10792_v53 = vor.u32 %v12844_v46, %v10789_v47  ;;  %5380 = vmatpush.bf16.msrb.mxu1 %v10536_v52 }
 0x27f   :  { %v11045_v49 = vld [vmem:[#allocation3 + $0xf60] sm:$0xf0] }
 0x280   :  { %v12708_v54 = vld [vmem:[#allocation3 + $0x904] sm:$0xf]  ;;  %v11048_v57 = vor.u32 %v12908_v48, %v11045_v49  ;;  %5393 = vmatpush.bf16.msrb.mxu2 %v10792_v53 }
 0x281   :  { %v10245_v55 = vld [vmem:[#allocation3 + $0x920] sm:$0xf0] }
 0x282   :  { %v12772_v56 = vld [vmem:[#allocation3 + $0xb04] sm:$0xf]  ;;  %v10248_v63 = vor.u32 %v12708_v54, %v10245_v55  ;;  %5406 = vmatpush.bf16.msrb.mxu3 %v11048_v57  ;;  %v9323_v55 = vld [vmem:[#allocation3 + $0x1c8] sm:$0xf] }
 0x283   :  { %v10501_v58 = vld [vmem:[#allocation3 + $0xb20] sm:$0xf0]  ;;  %v9579_v57 = vld [vmem:[#allocation3 + $0x3c8] sm:$0xf] }
 0x284   :  { %v12836_v59 = vld [vmem:[#allocation3 + $0xd04] sm:$0xf]  ;;  %v10504_v0 = vor.u32 %v12772_v56, %v10501_v58  ;;  %5368 = vmatpush.bf16.msrb.mxu0 %v10248_v63  ;;  %v12481_v56 = vld [vmem:[#allocation3 + $0x1e4] sm:$0xf0] }
 0x285   :  { %v10757_v60 = vld [vmem:[#allocation3 + $0xd20] sm:$0xf0] }
 0x286   :  { %v12900_v61 = vld [vmem:[#allocation3 + $0xf04] sm:$0xf]  ;;  %v10760_v1 = vor.u32 %v12836_v59, %v10757_v60  ;;  %5381 = vmatpush.bf16.msrb.mxu1 %v10504_v0  ;;  %v12545_v59 = vld [vmem:[#allocation3 + $0x3e4] sm:$0xf0] }
 0x287   :  { %v11013_v62 = vld [vmem:[#allocation3 + $0xf20] sm:$0xf0]  ;;  %v9835_v60 = vld [vmem:[#allocation3 + $0x5c8] sm:$0xf] }
 0x288   :  { %v12700_v6 = vld [vmem:[#allocation3 + $0x8c4] sm:$0xf]  ;;  %v11016_v38 = vor.u32 %v12900_v61, %v11013_v62  ;;  %5394 = vmatpush.bf16.msrb.mxu2 %v10760_v1  ;;  %v12609_v61 = vld [vmem:[#allocation3 + $0x5e4] sm:$0xf0] }
 0x289   :  { %v10213_v7 = vld [vmem:[#allocation3 + $0x8e0] sm:$0xf0]  ;;  %v10091_v0 = vld [vmem:[#allocation3 + $0x7c8] sm:$0xf] }
 0x28a   :  { %v12764_v2 = vld [vmem:[#allocation3 + $0xac4] sm:$0xf]  ;;  %v10216_v12 = vor.u32 %v12700_v6, %v10213_v7  ;;  %5407 = vmatpush.bf16.msrb.mxu3 %v11016_v38  ;;  %v12673_v1 = vld [vmem:[#allocation3 + $0x7e4] sm:$0xf0]  ;;  %v9324_v7 = vor.u32 %v12481_v56, %v9323_v55  ;;  %v9836_v38 = vor.u32 %v12609_v61, %v9835_v60 }
 0x28b   :  { %v10469_v3 = vld [vmem:[#allocation3 + $0xae0] sm:$0xf0]  ;;  %v9707_v55 = vld [vmem:[#allocation3 + $0x4c8] sm:$0xf] }
 0x28c   :  { %v12828_v8 = vld [vmem:[#allocation3 + $0xcc4] sm:$0xf]  ;;  %v10472_v13 = vor.u32 %v12764_v2, %v10469_v3  ;;  %5369 = vmatpush.bf16.msrb.mxu0 %v10216_v12  ;;  %v9580_v2 = vor.u32 %v12545_v59, %v9579_v57  ;;  %v9291_v3 = vld [vmem:[#allocation3 + $0x188] sm:$0xf] }
 0x28d   :  { %v10725_v9 = vld [vmem:[#allocation3 + $0xce0] sm:$0xf0]  ;;  %v9803_v12 = vld [vmem:[#allocation3 + $0x588] sm:$0xf] }
 0x28e   :  { %v12892_v10 = vld [vmem:[#allocation3 + $0xec4] sm:$0xf]  ;;  %v10728_v14 = vor.u32 %v12828_v8, %v10725_v9  ;;  %5382 = vmatpush.bf16.msrb.mxu1 %v10472_v13  ;;  %v12473_v8 = vld [vmem:[#allocation3 + $0x1a4] sm:$0xf0] }
 0x28f   :  { %v10981_v11 = vld [vmem:[#allocation3 + $0xee0] sm:$0xf0]  ;;  %v9547_v9 = vld [vmem:[#allocation3 + $0x388] sm:$0xf] }
 0x290   :  { %v12692_v15 = vld [vmem:[#allocation3 + $0x884] sm:$0xf]  ;;  %v10984_v19 = vor.u32 %v12892_v10, %v10981_v11  ;;  %5395 = vmatpush.bf16.msrb.mxu2 %v10728_v14  ;;  %v10092_v10 = vor.u32 %v12673_v1, %v10091_v0  ;;  %v12537_v11 = vld [vmem:[#allocation3 + $0x3a4] sm:$0xf0] }
 0x291   :  { %v10181_v17 = vld [vmem:[#allocation3 + $0x8a0] sm:$0xf0]  ;;  %v12601_v13 = vld [vmem:[#allocation3 + $0x5a4] sm:$0xf0] }
 0x292   :  { %v12756_v18 = vld [vmem:[#allocation3 + $0xa84] sm:$0xf]  ;;  %v10184_v25 = vor.u32 %v12692_v15, %v10181_v17  ;;  %5408 = vmatpush.bf16.msrb.mxu3 %v10984_v19  ;;  %v10059_v14 = vld [vmem:[#allocation3 + $0x788] sm:$0xf]  ;;  %v9292_v17 = vor.u32 %v12473_v8, %v9291_v3  ;;  %v9804_v19 = vor.u32 %v12601_v13, %v9803_v12 }
 0x293   :  { %v10437_v20 = vld [vmem:[#allocation3 + $0xaa0] sm:$0xf0]  ;;  %v12665_v15 = vld [vmem:[#allocation3 + $0x7a4] sm:$0xf0] }
 0x294   :  { %v12820_v21 = vld [vmem:[#allocation3 + $0xc84] sm:$0xf]  ;;  %v10440_v26 = vor.u32 %v12756_v18, %v10437_v20  ;;  %5370 = vmatpush.bf16.msrb.mxu0 %v10184_v25  ;;  %v9548_v18 = vor.u32 %v12537_v11, %v9547_v9  ;;  %v9259_v20 = vld [vmem:[#allocation3 + $0x148] sm:$0xf] }
 0x295   :  { %v10693_v22 = vld [vmem:[#allocation3 + $0xca0] sm:$0xf0]  ;;  %v9771_v25 = vld [vmem:[#allocation3 + $0x548] sm:$0xf] }
 0x296   :  { %v12884_v23 = vld [vmem:[#allocation3 + $0xe84] sm:$0xf]  ;;  %v10696_v27 = vor.u32 %v12820_v21, %v10693_v22  ;;  %5383 = vmatpush.bf16.msrb.mxu1 %v10440_v26  ;;  %v12465_v21 = vld [vmem:[#allocation3 + $0x164] sm:$0xf0] }
 0x297   :  { %v10949_v24 = vld [vmem:[#allocation3 + $0xea0] sm:$0xf0]  ;;  %v9515_v22 = vld [vmem:[#allocation3 + $0x348] sm:$0xf] }
 0x298   :  { %v12684_v28 = vld [vmem:[#allocation3 + $0x844] sm:$0xf]  ;;  %v10952_v33 = vor.u32 %v12884_v23, %v10949_v24  ;;  %5396 = vmatpush.bf16.msrb.mxu2 %v10696_v27  ;;  %v10060_v23 = vor.u32 %v12665_v15, %v10059_v14  ;;  %v12529_v24 = vld [vmem:[#allocation3 + $0x364] sm:$0xf0] }
 0x299   :  { %v10149_v29 = vld [vmem:[#allocation3 + $0x860] sm:$0xf0]  ;;  %v12593_v26 = vld [vmem:[#allocation3 + $0x564] sm:$0xf0] }
 0x29a   :  { %v12748_v30 = vld [vmem:[#allocation3 + $0xa44] sm:$0xf]  ;;  %v10152_v41 = vor.u32 %v12684_v28, %v10149_v29  ;;  %5409 = vmatpush.bf16.msrb.mxu3 %v10952_v33  ;;  %v10027_v27 = vld [vmem:[#allocation3 + $0x748] sm:$0xf]  ;;  %v9260_v29 = vor.u32 %v12465_v21, %v9259_v20  ;;  %v9772_v33 = vor.u32 %v12593_v26, %v9771_v25 }
 0x29b   :  { %v10405_v34 = vld [vmem:[#allocation3 + $0xa60] sm:$0xf0]  ;;  %v12657_v28 = vld [vmem:[#allocation3 + $0x764] sm:$0xf0] }
 0x29c   :  { %v12812_v35 = vld [vmem:[#allocation3 + $0xc44] sm:$0xf]  ;;  %v10408_v44 = vor.u32 %v12748_v30, %v10405_v34  ;;  %5371 = vmatpush.bf16.msrb.mxu0 %v10152_v41  ;;  %v9516_v30 = vor.u32 %v12529_v24, %v9515_v22  ;;  %v9227_v34 = vld [vmem:[#allocation3 + $0x108] sm:$0xf] }
 0x29d   :  { %v10661_v36 = vld [vmem:[#allocation3 + $0xc60] sm:$0xf0]  ;;  %v9739_v41 = vld [vmem:[#allocation3 + $0x508] sm:$0xf] }
 0x29e   :  { %v12876_v37 = vld [vmem:[#allocation3 + $0xe44] sm:$0xf]  ;;  %v10664_v46 = vor.u32 %v12812_v35, %v10661_v36  ;;  %5384 = vmatpush.bf16.msrb.mxu1 %v10408_v44  ;;  %v12457_v35 = vld [vmem:[#allocation3 + $0x124] sm:$0xf0] }
 0x29f   :  { %v10917_v40 = vld [vmem:[#allocation3 + $0xe60] sm:$0xf0]  ;;  %v9483_v36 = vld [vmem:[#allocation3 + $0x308] sm:$0xf] }
 0x2a0   :  { %v12676_v42 = vld [vmem:[#allocation3 + $0x804] sm:$0xf]  ;;  %v10920_v51 = vor.u32 %v12876_v37, %v10917_v40  ;;  %5397 = vmatpush.bf16.msrb.mxu2 %v10664_v46  ;;  %v10028_v37 = vor.u32 %v12657_v28, %v10027_v27  ;;  %v12521_v40 = vld [vmem:[#allocation3 + $0x324] sm:$0xf0]  ;;  %v9228_v46 = vor.u32 %v12457_v35, %v9227_v34 }
 0x2a1   :  { %v10117_v43 = vld [vmem:[#allocation3 + $0x820] sm:$0xf0]  ;;  %v12649_v44 = vld [vmem:[#allocation3 + $0x724] sm:$0xf0] }
 0x2a2   :  { %v12740_v47 = vld [vmem:[#allocation3 + $0xa04] sm:$0xf]  ;;  %v10120_v58 = vor.u32 %v12676_v42, %v10117_v43  ;;  %5410 = vmatpush.bf16.msrb.mxu3 %v10920_v51  ;;  %v12585_v42 = vld [vmem:[#allocation3 + $0x524] sm:$0xf0] }
 0x2a3   :  { %v10373_v48 = vld [vmem:[#allocation3 + $0xa20] sm:$0xf0]  ;;  %v9995_v43 = vld [vmem:[#allocation3 + $0x708] sm:$0xf] }
 0x2a4   :  { %v12804_v49 = vld [vmem:[#allocation3 + $0xc04] sm:$0xf]  ;;  %v10376_v62 = vor.u32 %v12740_v47, %v10373_v48  ;;  %5372 = vmatpush.bf16.msrb.mxu0 %v10120_v58  ;;  %v9484_v47 = vor.u32 %v12521_v40, %v9483_v36  ;;  %v9740_v48 = vor.u32 %v12585_v42, %v9739_v41  ;;  %v12449_v51 = vld [vmem:[#allocation3 + $0xe4] sm:$0xf0] }
 0x2a5   :  { %v10629_v52 = vld [vmem:[#allocation3 + $0xc20] sm:$0xf0]  ;;  %v12577_v56 = vld [vmem:[#allocation3 + $0x4e4] sm:$0xf0] }
 0x2a6   :  { %v12868_v53 = vld [vmem:[#allocation3 + $0xe04] sm:$0xf]  ;;  %v10632_v63 = vor.u32 %v12804_v49, %v10629_v52  ;;  %5385 = vmatpush.bf16.msrb.mxu1 %v10376_v62  ;;  %v9195_v49 = vld [vmem:[#allocation3 + $0xc8] sm:$0xf]  ;;  %v9708_v61 = vor.u32 %v12577_v56, %v9707_v55 }
 0x2a7   :  { %v10885_v54 = vld [vmem:[#allocation3 + $0xe20] sm:$0xf0]  ;;  %5373 = vmatmul.bf16.vlgmr.msrb.gmra.mxu0 %v13528_v16  ;;  %v9451_v52 = vld [vmem:[#allocation3 + $0x2c8] sm:$0xf]  ;;  %v9196_v59 = vor.u32 %v12449_v51, %v9195_v49 }
 0x2a8   :  { %v10888_v6 = vor.u32 %v12868_v53, %v10885_v54  ;;  %5398 = vmatpush.bf16.msrb.mxu2 %v10632_v63  ;;  %5417 = vmatpush.bf16.msra.mxu0 %v9324_v7  ;;  %v9996_v53 = vor.u32 %v12649_v44, %v9995_v43  ;;  %v12513_v54 = vld [vmem:[#allocation3 + $0x2e4] sm:$0xf0] }
 0x2a9   :  { %5386 = vmatmul.bf16.vlgmr.msrb.gmra.mxu1 %v13531_v31  ;;  %v9963_v57 = vld [vmem:[#allocation3 + $0x6c8] sm:$0xf]  ;;  %v9452_v60 = vor.u32 %v12513_v54, %v9451_v52 }
 0x2aa   :  { %5411 = vmatpush.bf16.msrb.mxu3 %v10888_v6  ;;  %5430 = vmatpush.bf16.msra.mxu1 %v9580_v2  ;;  %v12641_v58 = vld [vmem:[#allocation3 + $0x6e4] sm:$0xf0] }
 0x2ab   :  { %5399 = vmatmul.bf16.vlgmr.msrb.gmra.mxu2 %v13534_v50  ;;  %v9163_v62 = vld [vmem:[#allocation3 + $0x88] sm:$0xf]  ;;  %v9964_v1 = vor.u32 %v12641_v58, %v9963_v57 }
 0x2ac   :  { %5443 = vmatpush.bf16.msra.mxu2 %v9836_v38  ;;  %5418 = vmatpush.bf16.msra.mxu0 %v9292_v17  ;;  %v12441_v63 = vld [vmem:[#allocation3 + $0xa4] sm:$0xf0] }
 0x2ad   :  { %5412 = vmatmul.bf16.vlgmr.msrb.gmra.mxu3 %v13537_v5  ;;  %v9419_v0 = vld [vmem:[#allocation3 + $0x288] sm:$0xf]  ;;  %v9164_v8 = vor.u32 %v12441_v63, %v9163_v62 }
 0x2ae   :  { %5456 = vmatpush.bf16.msra.mxu3 %v10092_v10  ;;  %5431 = vmatpush.bf16.msra.mxu1 %v9548_v18  ;;  %v12505_v6 = vld [vmem:[#allocation3 + $0x2a4] sm:$0xf0] }
 0x2af   :  { %v9675_v7 = vld [vmem:[#allocation3 + $0x488] sm:$0xf]  ;;  %v9420_v9 = vor.u32 %v12505_v6, %v9419_v0 }
 0x2b0   :  { %5444 = vmatpush.bf16.msra.mxu2 %v9804_v19  ;;  %5419 = vmatpush.bf16.msra.mxu0 %v9260_v29  ;;  %v12569_v2 = vld [vmem:[#allocation3 + $0x4a4] sm:$0xf0] }
 0x2b1   :  { %v9931_v38 = vld [vmem:[#allocation3 + $0x688] sm:$0xf]  ;;  %v9676_v10 = vor.u32 %v12569_v2, %v9675_v7 }
 0x2b2   :  { %5457 = vmatpush.bf16.msra.mxu3 %v10060_v23  ;;  %5432 = vmatpush.bf16.msra.mxu1 %v9516_v30  ;;  %v12633_v3 = vld [vmem:[#allocation3 + $0x6a4] sm:$0xf0] }
 0x2b3   :  { %v9131_v11 = vld [vmem:[#allocation3 + $0x48] sm:$0xf]  ;;  %v9932_v14 = vor.u32 %v12633_v3, %v9931_v38 }
 0x2b4   :  { %5445 = vmatpush.bf16.msra.mxu2 %v9772_v33  ;;  %5420 = vmatpush.bf16.msra.mxu0 %v9228_v46  ;;  %v12433_v12 = vld [vmem:[#allocation3 + $0x64] sm:$0xf0] }
 0x2b5   :  { %v9387_v13 = vld [vmem:[#allocation3 + $0x248] sm:$0xf]  ;;  %v9132_v21 = vor.u32 %v12433_v12, %v9131_v11 }
 0x2b6   :  { %5458 = vmatpush.bf16.msra.mxu3 %v10028_v37  ;;  %5433 = vmatpush.bf16.msra.mxu1 %v9484_v47  ;;  %v12497_v15 = vld [vmem:[#allocation3 + $0x264] sm:$0xf0] }
 0x2b7   :  { %v9643_v17 = vld [vmem:[#allocation3 + $0x448] sm:$0xf]  ;;  %v9388_v24 = vor.u32 %v12497_v15, %v9387_v13 }
 0x2b8   :  { %5446 = vmatpush.bf16.msra.mxu2 %v9740_v48  ;;  %5421 = vmatpush.bf16.msra.mxu0 %v9196_v59  ;;  %v12561_v18 = vld [vmem:[#allocation3 + $0x464] sm:$0xf0] }
 0x2b9   :  { %v9899_v19 = vld [vmem:[#allocation3 + $0x648] sm:$0xf]  ;;  %v9644_v25 = vor.u32 %v12561_v18, %v9643_v17 }
 0x2ba   :  { %5459 = vmatpush.bf16.msra.mxu3 %v9996_v53  ;;  %5434 = vmatpush.bf16.msra.mxu1 %v9452_v60  ;;  %v12625_v20 = vld [vmem:[#allocation3 + $0x664] sm:$0xf0] }
 0x2bb   :  { %v9099_v22 = vld [vmem:[#allocation3 + $0x8] sm:$0xf]  ;;  %v9900_v29 = vor.u32 %v12625_v20, %v9899_v19 }
 0x2bc   :  { %5447 = vmatpush.bf16.msra.mxu2 %v9708_v61  ;;  %5422 = vmatpush.bf16.msra.mxu0 %v9164_v8  ;;  %v12425_v23 = vld [vmem:[#allocation3 + $0x24] sm:$0xf0] }
 0x2bd   :  { %v9355_v26 = vld [vmem:[#allocation3 + $0x208] sm:$0xf]  ;;  %v9100_v40 = vor.u32 %v12425_v23, %v9099_v22 }
 0x2be   :  { %5460 = vmatpush.bf16.msra.mxu3 %v9964_v1  ;;  %5435 = vmatpush.bf16.msra.mxu1 %v9420_v9  ;;  %v12489_v27 = vld [vmem:[#allocation3 + $0x224] sm:$0xf0] }
 0x2bf   :  { %v9611_v28 = vld [vmem:[#allocation3 + $0x408] sm:$0xf]  ;;  %v9356_v44 = vor.u32 %v12489_v27, %v9355_v26 }
 0x2c0   :  { %5448 = vmatpush.bf16.msra.mxu2 %v9676_v10  ;;  %v12553_v30 = vld [vmem:[#allocation3 + $0x424] sm:$0xf0]  ;;  %5423 = vmatpush.bf16.msra.mxu0 %v9132_v21 }
 0x2c1   :  { %v9867_v33 = vld [vmem:[#allocation3 + $0x608] sm:$0xf]  ;;  %v9612_v46 = vor.u32 %v12553_v30, %v9611_v28  ;;  %v5218_v28 = vpop.f32.mrf.mxu0 }
 0x2c2   :  { %5461 = vmatpush.bf16.msra.mxu3 %v9932_v14  ;;  %v12617_v34 = vld [vmem:[#allocation3 + $0x624] sm:$0xf0]  ;;  %5436 = vmatpush.bf16.msra.mxu1 %v9388_v24 }
 0x2c3   :  { %v10347_v35 = vld [vmem:[#allocation3 + $0x9c8] sm:$0xf]  ;;  %v9868_v49 = vor.u32 %v12617_v34, %v9867_v33 }
 0x2c4   :  { %v12737_v36 = vld [vmem:[#allocation3 + $0x9e4] sm:$0xf0]  ;;  %5449 = vmatpush.bf16.msra.mxu2 %v9644_v25  ;;  %5424 = vmatpush.bf16.msra.mxu0 %v9100_v40 }
 0x2c5   :  { %v10603_v37 = vld [vmem:[#allocation3 + $0xbc8] sm:$0xf]  ;;  %v10348_v51 = vor.u32 %v12737_v36, %v10347_v35 }
 0x2c6   :  { %v12801_v41 = vld [vmem:[#allocation3 + $0xbe4] sm:$0xf0]  ;;  %5462 = vmatpush.bf16.msra.mxu3 %v9900_v29  ;;  %5437 = vmatpush.bf16.msra.mxu1 %v9356_v44 }
 0x2c7   :  { %v10859_v42 = vld [vmem:[#allocation3 + $0xdc8] sm:$0xf]  ;;  %v10604_v52 = vor.u32 %v12801_v41, %v10603_v37  ;;  %5425 = vmatmul.bf16.vlgmr.msra.gmra.mxu0 %v13504_v45  ;;  %v5231_v37 = vpop.f32.mrf.mxu1 }
 0x2c8   :  { %v12865_v43 = vld [vmem:[#allocation3 + $0xde4] sm:$0xf0]  ;;  %5450 = vmatpush.bf16.msra.mxu2 %v9612_v46  ;;  %5469 = vmatpush.bf16.msrb.mxu0 %v10348_v51 }
 0x2c9   :  { %v11115_v47 = vld [vmem:[#allocation3 + $0xfc8] sm:$0xf]  ;;  %v10860_v53 = vor.u32 %v12865_v43, %v10859_v42  ;;  %5438 = vmatmul.bf16.vlgmr.msra.gmra.mxu1 %v13511_v39 }
 0x2ca   :  { %v12929_v48 = vld [vmem:[#allocation3 + $0xfe4] sm:$0xf0]  ;;  %5463 = vmatpush.bf16.msra.mxu3 %v9868_v49  ;;  %5482 = vmatpush.bf16.msrb.mxu1 %v10604_v52 }
 0x2cb   :  { %v10315_v54 = vld [vmem:[#allocation3 + $0x988] sm:$0xf]  ;;  %v11116_v57 = vor.u32 %v12929_v48, %v11115_v47  ;;  %5451 = vmatmul.bf16.vlgmr.msra.gmra.mxu2 %v13518_v32 }
 0x2cc   :  { %v12729_v55 = vld [vmem:[#allocation3 + $0x9a4] sm:$0xf0]  ;;  %5495 = vmatpush.bf16.msrb.mxu2 %v10860_v53 }
 0x2cd   :  { %v10571_v56 = vld [vmem:[#allocation3 + $0xb88] sm:$0xf]  ;;  %v10316_v63 = vor.u32 %v12729_v55, %v10315_v54  ;;  %5464 = vmatmul.bf16.vlgmr.msra.gmra.mxu3 %v13525_v4  ;;  %v5244_v55 = vpop.f32.mrf.mxu2 }
 0x2ce   :  { %v12793_v58 = vld [vmem:[#allocation3 + $0xba4] sm:$0xf0]  ;;  %5508 = vmatpush.bf16.msrb.mxu3 %v11116_v57 }
 0x2cf   :  { %v10827_v59 = vld [vmem:[#allocation3 + $0xd88] sm:$0xf]  ;;  %v10572_v1 = vor.u32 %v12793_v58, %v10571_v56  ;;  %5470 = vmatpush.bf16.msrb.mxu0 %v10316_v63 }
 0x2d0   :  { %v12857_v60 = vld [vmem:[#allocation3 + $0xda4] sm:$0xf0] }
 0x2d1   :  { %v11083_v61 = vld [vmem:[#allocation3 + $0xf88] sm:$0xf]  ;;  %v10828_v6 = vor.u32 %v12857_v60, %v10827_v59  ;;  %5483 = vmatpush.bf16.msrb.mxu1 %v10572_v1 }
 0x2d2   :  { %v12921_v62 = vld [vmem:[#allocation3 + $0xfa4] sm:$0xf0] }
 0x2d3   :  { %v10283_v0 = vld [vmem:[#allocation3 + $0x948] sm:$0xf]  ;;  %v11084_v3 = vor.u32 %v12921_v62, %v11083_v61  ;;  %5496 = vmatpush.bf16.msrb.mxu2 %v10828_v6  ;;  %v5257_v61 = vpop.f32.mrf.mxu3  ;;  %v5220_v6 = vpop.f32.mrf.mxu0 }
 0x2d4   :  { %v12721_v7 = vld [vmem:[#allocation3 + $0x964] sm:$0xf0]  ;;  %v12461_v6 = vld [vmem:[#allocation3 + $0x14c] sm:$0xf] }
 0x2d5   :  { %v10539_v2 = vld [vmem:[#allocation3 + $0xb48] sm:$0xf]  ;;  %v10284_v13 = vor.u32 %v12721_v7, %v10283_v0  ;;  %5509 = vmatpush.bf16.msrb.mxu3 %v11084_v3 }
 0x2d6   :  { %v12785_v38 = vld [vmem:[#allocation3 + $0xb64] sm:$0xf0] }
 0x2d7   :  { %v10795_v8 = vld [vmem:[#allocation3 + $0xd48] sm:$0xf]  ;;  %v10540_v15 = vor.u32 %v12785_v38, %v10539_v2  ;;  %5471 = vmatpush.bf16.msrb.mxu0 %v10284_v13 }
 0x2d8   :  { %v12849_v9 = vld [vmem:[#allocation3 + $0xd64] sm:$0xf0] }
 0x2d9   :  { %v13556_v10 = vld [vmem:[#allocation11] sm:$0xff]  ;;  %v10796_v17 = vor.u32 %v12849_v9, %v10795_v8  ;;  %5484 = vmatpush.bf16.msrb.mxu1 %v10540_v15  ;;  %v5233_v9 = vpop.f32.mrf.mxu1 }
 0x2da   :  { %v11051_v11 = vld [vmem:[#allocation3 + $0xf48] sm:$0xf]  ;;  %v2633_v20 = vperm.slane %v13556_v10, 0  ;;  %v9773_v9 = vld [vmem:[#allocation3 + $0x568] sm:$0xf0] }
 0x2db   :  { %v12913_v12 = vld [vmem:[#allocation3 + $0xf64] sm:$0xf0]  ;;  %5497 = vmatpush.bf16.msrb.mxu2 %v10796_v17 }
 0x2dc   :  { %v10251_v14 = vld [vmem:[#allocation3 + $0x908] sm:$0xf]  ;;  %v11052_v21 = vor.u32 %v12913_v12, %v11051_v11  ;;  %v5219_v36 = vadd.f32 %v5218_v28, %v2633_v20 }
 0x2dd   :  { %v12713_v18 = vld [vmem:[#allocation3 + $0x924] sm:$0xf0] }
 0x2de   :  { %v10507_v19 = vld [vmem:[#allocation3 + $0xb08] sm:$0xf]  ;;  %v10252_v27 = vor.u32 %v12713_v18, %v10251_v14  ;;  %5510 = vmatpush.bf16.msrb.mxu3 %v11052_v21  ;;  %v5232_v47 = vadd.f32 %v5231_v37, %v5219_v36  ;;  %v12541_v36 = vld [vmem:[#allocation3 + $0x3cc] sm:$0xf] }
 0x2df   :  { %v12777_v22 = vld [vmem:[#allocation3 + $0xb24] sm:$0xf0] }
 0x2e0   :  { %v10763_v23 = vld [vmem:[#allocation3 + $0xd08] sm:$0xf]  ;;  %v10508_v29 = vor.u32 %v12777_v22, %v10507_v19  ;;  %5472 = vmatpush.bf16.msrb.mxu0 %v10252_v27  ;;  %v5245_v60 = vadd.f32 %v5244_v55, %v5232_v47  ;;  %v10093_v47 = vld [vmem:[#allocation3 + $0x7e8] sm:$0xf0] }
 0x2e1   :  { %v12841_v24 = vld [vmem:[#allocation3 + $0xd24] sm:$0xf0]  ;;  %v12533_v55 = vld [vmem:[#allocation3 + $0x38c] sm:$0xf] }
 0x2e2   :  { %v11019_v25 = vld [vmem:[#allocation3 + $0xf08] sm:$0xf]  ;;  %v10764_v30 = vor.u32 %v12841_v24, %v10763_v23  ;;  %5485 = vmatpush.bf16.msrb.mxu1 %v10508_v29  ;;  %v13562_v1 = vadd.f32 %v5257_v61, %v5245_v60  ;;  %v12661_v60 = vld [vmem:[#allocation3 + $0x78c] sm:$0xf] }
 0x2e3   :  { %v12905_v26 = vld [vmem:[#allocation3 + $0xf24] sm:$0xf0]  ;;  %v10061_v61 = vld [vmem:[#allocation3 + $0x7a8] sm:$0xf0] }
 0x2e4   :  { %v10219_v33 = vld [vmem:[#allocation3 + $0x8c8] sm:$0xf]  ;;  %v11020_v40 = vor.u32 %v12905_v26, %v11019_v25  ;;  %5498 = vmatpush.bf16.msrb.mxu2 %v10764_v30  ;;  %v5246_v26 = vpop.f32.mrf.mxu2 }
 0x2e5   :  { %v12705_v34 = vld [vmem:[#allocation3 + $0x8e4] sm:$0xf0] }
 0x2e6   :  { %v10475_v35 = vld [vmem:[#allocation3 + $0xac8] sm:$0xf]  ;;  %v10220_v48 = vor.u32 %v12705_v34, %v10219_v33  ;;  %5511 = vmatpush.bf16.msrb.mxu3 %v11020_v40  ;;  %v5259_v33 = vpop.f32.mrf.mxu3  ;;  %v12477_v34 = vld [vmem:[#allocation3 + $0x1cc] sm:$0xf] }
 0x2e7   :  { %v12769_v41 = vld [vmem:[#allocation3 + $0xae4] sm:$0xf0]  ;;  %v9581_v40 = vld [vmem:[#allocation3 + $0x3e8] sm:$0xf0] }
 0x2e8   :  { %v10731_v42 = vld [vmem:[#allocation3 + $0xcc8] sm:$0xf]  ;;  %v10476_v49 = vor.u32 %v12769_v41, %v10475_v35  ;;  %5473 = vmatpush.bf16.msrb.mxu0 %v10220_v48  ;;  %v9325_v35 = vld [vmem:[#allocation3 + $0x1e8] sm:$0xf0] }
 0x2e9   :  { %v12833_v43 = vld [vmem:[#allocation3 + $0xce4] sm:$0xf0]  ;;  %v12605_v41 = vld [vmem:[#allocation3 + $0x5cc] sm:$0xf] }
 0x2ea   :  { %v10987_v44 = vld [vmem:[#allocation3 + $0xec8] sm:$0xf]  ;;  %v10732_v51 = vor.u32 %v12833_v43, %v10731_v42  ;;  %5486 = vmatpush.bf16.msrb.mxu1 %v10476_v49  ;;  %v9837_v42 = vld [vmem:[#allocation3 + $0x5e8] sm:$0xf0]  ;;  %v9328_v49 = vor.u32 %v12477_v34, %v9325_v35 }
 0x2eb   :  { %v12897_v46 = vld [vmem:[#allocation3 + $0xee4] sm:$0xf0]  ;;  %v9197_v33 = vld [vmem:[#allocation3 + $0xe8] sm:$0xf0] }
 0x2ec   :  { %v10187_v52 = vld [vmem:[#allocation3 + $0x888] sm:$0xf]  ;;  %v10988_v56 = vor.u32 %v12897_v46, %v10987_v44  ;;  %5499 = vmatpush.bf16.msrb.mxu2 %v10732_v51  ;;  %v12669_v46 = vld [vmem:[#allocation3 + $0x7cc] sm:$0xf]  ;;  %v9584_v51 = vor.u32 %v12541_v36, %v9581_v40  ;;  %v5283_v36 = vpop.f32.mrf.mxu1 }
 0x2ed   :  { %v12697_v53 = vld [vmem:[#allocation3 + $0x8a4] sm:$0xf0]  ;;  %v12509_v34 = vld [vmem:[#allocation3 + $0x2cc] sm:$0xf] }
 0x2ee   :  { %v10443_v54 = vld [vmem:[#allocation3 + $0xa88] sm:$0xf]  ;;  %v10188_v0 = vor.u32 %v12697_v53, %v10187_v52  ;;  %5512 = vmatpush.bf16.msrb.mxu3 %v10988_v56  ;;  %v9840_v52 = vor.u32 %v12605_v41, %v9837_v42  ;;  %v12469_v53 = vld [vmem:[#allocation3 + $0x18c] sm:$0xf]  ;;  %v10096_v56 = vor.u32 %v12669_v46, %v10093_v47 }
 0x2ef   :  { %v12761_v57 = vld [vmem:[#allocation3 + $0xaa4] sm:$0xf0]  ;;  %v9453_v40 = vld [vmem:[#allocation3 + $0x2e8] sm:$0xf0] }
 0x2f0   :  { %v10699_v58 = vld [vmem:[#allocation3 + $0xc88] sm:$0xf]  ;;  %v10444_v7 = vor.u32 %v12761_v57, %v10443_v54  ;;  %5474 = vmatpush.bf16.msrb.mxu0 %v10188_v0  ;;  %v9293_v54 = vld [vmem:[#allocation3 + $0x1a8] sm:$0xf0] }
 0x2f1   :  { %v12825_v59 = vld [vmem:[#allocation3 + $0xca4] sm:$0xf0]  ;;  %v9549_v57 = vld [vmem:[#allocation3 + $0x3a8] sm:$0xf0] }
 0x2f2   :  { %v10955_v62 = vld [vmem:[#allocation3 + $0xe88] sm:$0xf]  ;;  %v10700_v2 = vor.u32 %v12825_v59, %v10699_v58  ;;  %5487 = vmatpush.bf16.msrb.mxu1 %v10444_v7  ;;  %v12597_v58 = vld [vmem:[#allocation3 + $0x58c] sm:$0xf] }
 0x2f3   :  { %v12889_v63 = vld [vmem:[#allocation3 + $0xea4] sm:$0xf0]  ;;  %v9805_v59 = vld [vmem:[#allocation3 + $0x5a8] sm:$0xf0] }
 0x2f4   :  { %v10155_v38 = vld [vmem:[#allocation3 + $0x848] sm:$0xf]  ;;  %v10956_v11 = vor.u32 %v12889_v63, %v10955_v62  ;;  %5500 = vmatpush.bf16.msrb.mxu2 %v10700_v2  ;;  %v9296_v62 = vor.u32 %v12469_v53, %v9293_v54  ;;  %v9552_v63 = vor.u32 %v12533_v55, %v9549_v57  ;;  %v9808_v0 = vor.u32 %v12597_v58, %v9805_v59  ;;  %v9261_v7 = vld [vmem:[#allocation3 + $0x168] sm:$0xf0]  ;;  %v5296_v54 = vpop.f32.mrf.mxu2  ;;  %v5309_v59 = vpop.f32.mrf.mxu3 }
 0x2f5   :  { %v12689_v3 = vld [vmem:[#allocation3 + $0x864] sm:$0xf0]  ;;  %v12525_v2 = vld [vmem:[#allocation3 + $0x34c] sm:$0xf] }
 0x2f6   :  { %v10411_v8 = vld [vmem:[#allocation3 + $0xa48] sm:$0xf]  ;;  %v10156_v18 = vor.u32 %v12689_v3, %v10155_v38  ;;  %5513 = vmatpush.bf16.msrb.mxu3 %v10956_v11  ;;  %v10064_v38 = vor.u32 %v12661_v60, %v10061_v61  ;;  %v9517_v3 = vld [vmem:[#allocation3 + $0x368] sm:$0xf0] }
 0x2f7   :  { %v12753_v12 = vld [vmem:[#allocation3 + $0xa64] sm:$0xf0]  ;;  %v12653_v11 = vld [vmem:[#allocation3 + $0x74c] sm:$0xf] }
 0x2f8   :  { %v10667_v13 = vld [vmem:[#allocation3 + $0xc48] sm:$0xf]  ;;  %v10412_v21 = vor.u32 %v12753_v12, %v10411_v8  ;;  %5475 = vmatpush.bf16.msrb.mxu0 %v10156_v18  ;;  %v12589_v8 = vld [vmem:[#allocation3 + $0x54c] sm:$0xf] }
 0x2f9   :  { %v12817_v14 = vld [vmem:[#allocation3 + $0xc64] sm:$0xf0]  ;;  %v10029_v12 = vld [vmem:[#allocation3 + $0x768] sm:$0xf0] }
 0x2fa   :  { %v10923_v15 = vld [vmem:[#allocation3 + $0xe48] sm:$0xf]  ;;  %v10668_v22 = vor.u32 %v12817_v14, %v10667_v13  ;;  %5488 = vmatpush.bf16.msrb.mxu1 %v10412_v21  ;;  %v9264_v13 = vor.u32 %v12461_v6, %v9261_v7  ;;  %v9520_v14 = vor.u32 %v12525_v2, %v9517_v3  ;;  %v9229_v18 = vld [vmem:[#allocation3 + $0x128] sm:$0xf0] }
 0x2fb   :  { %v12881_v17 = vld [vmem:[#allocation3 + $0xe64] sm:$0xf0]  ;;  %v9485_v21 = vld [vmem:[#allocation3 + $0x328] sm:$0xf0] }
 0x2fc   :  { %v10123_v19 = vld [vmem:[#allocation3 + $0x808] sm:$0xf]  ;;  %v10924_v27 = vor.u32 %v12881_v17, %v10923_v15  ;;  %5501 = vmatpush.bf16.msrb.mxu2 %v10668_v22  ;;  %v9776_v15 = vor.u32 %v12589_v8, %v9773_v9  ;;  %v12453_v17 = vld [vmem:[#allocation3 + $0x10c] sm:$0xf]  ;;  %v5285_v9 = vpop.f32.mrf.mxu1 }
 0x2fd   :  { %v12681_v20 = vld [vmem:[#allocation3 + $0x824] sm:$0xf0]  ;;  %v12581_v22 = vld [vmem:[#allocation3 + $0x50c] sm:$0xf]  ;;  %v9232_v26 = vor.u32 %v12453_v17, %v9229_v18 }
 0x2fe   :  { %v10379_v23 = vld [vmem:[#allocation3 + $0xa08] sm:$0xf]  ;;  %v10124_v37 = vor.u32 %v12681_v20, %v10123_v19  ;;  %5514 = vmatpush.bf16.msrb.mxu3 %v10924_v27  ;;  %v12517_v19 = vld [vmem:[#allocation3 + $0x30c] sm:$0xf]  ;;  %v10032_v20 = vor.u32 %v12653_v11, %v10029_v12  ;;  %v5270_v27 = vpop.f32.mrf.mxu0 }
 0x2ff   :  { %v12745_v24 = vld [vmem:[#allocation3 + $0xa24] sm:$0xf0]  ;;  %v5271_v35 = vadd.f32 %v5270_v27, %v13562_v1  ;;  %v12573_v41 = vld [vmem:[#allocation3 + $0x4cc] sm:$0xf]  ;;  %v5298_v27 = vpop.f32.mrf.mxu2 }
 0x300   :  { %v10635_v25 = vld [vmem:[#allocation3 + $0xc08] sm:$0xf]  ;;  %v10380_v43 = vor.u32 %v12745_v24, %v10379_v23  ;;  %5476 = vmatpush.bf16.msrb.mxu0 %v10124_v37  ;;  %v9741_v23 = vld [vmem:[#allocation3 + $0x528] sm:$0xf0] }
 0x301   :  { %v12809_v28 = vld [vmem:[#allocation3 + $0xc24] sm:$0xf0]  ;;  %v12645_v24 = vld [vmem:[#allocation3 + $0x70c] sm:$0xf]  ;;  %v5284_v46 = vadd.f32 %v5283_v36, %v5271_v35 }
 0x302   :  { %v10891_v29 = vld [vmem:[#allocation3 + $0xe08] sm:$0xf]  ;;  %v10636_v44 = vor.u32 %v12809_v28, %v10635_v25  ;;  %5489 = vmatpush.bf16.msrb.mxu1 %v10380_v43  ;;  %v9997_v25 = vld [vmem:[#allocation3 + $0x728] sm:$0xf0]  ;;  %v9488_v28 = vor.u32 %v12517_v19, %v9485_v21 }
 0x303   :  { %v12873_v30 = vld [vmem:[#allocation3 + $0xe24] sm:$0xf0]  ;;  %5477 = vmatmul.bf16.vlgmr.msrb.gmra.mxu0 %v13528_v16  ;;  %v10000_v37 = vor.u32 %v12645_v24, %v9997_v25  ;;  %v9709_v42 = vld [vmem:[#allocation3 + $0x4e8] sm:$0xf0]  ;;  %v5297_v58 = vadd.f32 %v5296_v54, %v5284_v46 }
 0x304   :  { %v10892_v48 = vor.u32 %v12873_v30, %v10891_v29  ;;  %5502 = vmatpush.bf16.msrb.mxu2 %v10636_v44  ;;  %5521 = vmatpush.bf16.msra.mxu0 %v9328_v49  ;;  %v9744_v29 = vor.u32 %v12581_v22, %v9741_v23  ;;  %v12445_v30 = vld [vmem:[#allocation3 + $0xcc] sm:$0xf]  ;;  %v9712_v49 = vor.u32 %v12573_v41, %v9709_v42 }
 0x305   :  { %5490 = vmatmul.bf16.vlgmr.msrb.gmra.mxu1 %v13531_v31  ;;  %v12637_v43 = vld [vmem:[#allocation3 + $0x6cc] sm:$0xf]  ;;  %v9200_v47 = vor.u32 %v12445_v30, %v9197_v33 }
 0x306   :  { %5515 = vmatpush.bf16.msrb.mxu3 %v10892_v48  ;;  %5534 = vmatpush.bf16.msra.mxu1 %v9584_v51  ;;  %v9965_v44 = vld [vmem:[#allocation3 + $0x6e8] sm:$0xf0]  ;;  %v9456_v48 = vor.u32 %v12509_v34, %v9453_v40  ;;  %v5272_v6 = vpop.f32.mrf.mxu0  ;;  %v5311_v34 = vpop.f32.mrf.mxu3 }
 0x307   :  { %5503 = vmatmul.bf16.vlgmr.msrb.gmra.mxu2 %v13534_v50  ;;  %v12437_v51 = vld [vmem:[#allocation3 + $0x8c] sm:$0xf]  ;;  %v9968_v1 = vor.u32 %v12637_v43, %v9965_v44 }
 0x308   :  { %5547 = vmatpush.bf16.msra.mxu2 %v9840_v52  ;;  %5522 = vmatpush.bf16.msra.mxu0 %v9296_v62  ;;  %v9165_v52 = vld [vmem:[#allocation3 + $0xa8] sm:$0xf0] }
 0x309   :  { %5516 = vmatmul.bf16.vlgmr.msrb.gmra.mxu3 %v13537_v5  ;;  %v12501_v53 = vld [vmem:[#allocation3 + $0x28c] sm:$0xf]  ;;  %v9168_v62 = vor.u32 %v12437_v51, %v9165_v52 }
 0x30a   :  { %5560 = vmatpush.bf16.msra.mxu3 %v10096_v56  ;;  %5535 = vmatpush.bf16.msra.mxu1 %v9552_v63  ;;  %v9421_v55 = vld [vmem:[#allocation3 + $0x2a8] sm:$0xf0]  ;;  %v5310_v63 = vadd.f32 %v5309_v59, %v5297_v58 }
 0x30b   :  { %v12565_v56 = vld [vmem:[#allocation3 + $0x48c] sm:$0xf]  ;;  %v9424_v7 = vor.u32 %v12501_v53, %v9421_v55 }
 0x30c   :  { %5548 = vmatpush.bf16.msra.mxu2 %v9808_v0  ;;  %5523 = vmatpush.bf16.msra.mxu0 %v9264_v13  ;;  %v9677_v57 = vld [vmem:[#allocation3 + $0x4a8] sm:$0xf0]  ;;  %v6041_v12 = vmax.f32 %v5310_v63, 0.0 }
 0x30d   :  { %v12629_v60 = vld [vmem:[#allocation3 + $0x68c] sm:$0xf]  ;;  %v9680_v2 = vor.u32 %v12565_v56, %v9677_v57 }
 0x30e   :  { %5561 = vmatpush.bf16.msra.mxu3 %v10064_v38  ;;  %5536 = vmatpush.bf16.msra.mxu1 %v9520_v14  ;;  %v9933_v61 = vld [vmem:[#allocation3 + $0x6a8] sm:$0xf0]  ;;  %v13569_v18 = vpack.c.bf16 %v6041_v12, %v6041_v12 }
 0x30f   :  { %v12429_v0 = vld [vmem:[#allocation3 + $0x4c] sm:$0xf]  ;;  %v9936_v11 = vor.u32 %v12629_v60, %v9933_v61 }
 0x310   :  { %5549 = vmatpush.bf16.msra.mxu2 %v9776_v15  ;;  %5524 = vmatpush.bf16.msra.mxu0 %v9232_v26  ;;  %v9133_v38 = vld [vmem:[#allocation3 + $0x68] sm:$0xf0] }
 0x311   :  { %v12493_v3 = vld [vmem:[#allocation3 + $0x24c] sm:$0xf]  ;;  %v9136_v19 = vor.u32 %v12429_v0, %v9133_v38 }
 0x312   :  { %5562 = vmatpush.bf16.msra.mxu3 %v10032_v20  ;;  %5537 = vmatpush.bf16.msra.mxu1 %v9488_v28  ;;  %v9389_v8 = vld [vmem:[#allocation3 + $0x268] sm:$0xf0] }
 0x313   :  { %v12557_v13 = vld [vmem:[#allocation3 + $0x44c] sm:$0xf]  ;;  %v9392_v22 = vor.u32 %v12493_v3, %v9389_v8 }
 0x314   :  { %5550 = vmatpush.bf16.msra.mxu2 %v9744_v29  ;;  %5525 = vmatpush.bf16.msra.mxu0 %v9200_v47  ;;  %v9645_v14 = vld [vmem:[#allocation3 + $0x468] sm:$0xf0] }
 0x315   :  { %v12621_v15 = vld [vmem:[#allocation3 + $0x64c] sm:$0xf]  ;;  %v9648_v23 = vor.u32 %v12557_v13, %v9645_v14 }
 0x316   :  { %5563 = vmatpush.bf16.msra.mxu3 %v10000_v37  ;;  %5538 = vmatpush.bf16.msra.mxu1 %v9456_v48  ;;  %v9901_v17 = vld [vmem:[#allocation3 + $0x668] sm:$0xf0] }
 0x317   :  { %v12421_v20 = vld [vmem:[#allocation3 + $0xc] sm:$0xf]  ;;  %v9904_v28 = vor.u32 %v12621_v15, %v9901_v17 }
 0x318   :  { %5551 = vmatpush.bf16.msra.mxu2 %v9712_v49  ;;  %5526 = vmatpush.bf16.msra.mxu0 %v9168_v62  ;;  %v9101_v21 = vld [vmem:[#allocation3 + $0x28] sm:$0xf0] }
 0x319   :  { %v12485_v24 = vld [vmem:[#allocation3 + $0x20c] sm:$0xf]  ;;  %v9104_v40 = vor.u32 %v12421_v20, %v9101_v21  ;;  %v2634_v21 = vperm.slane %v13556_v10, 1 }
 0x31a   :  { %5564 = vmatpush.bf16.msra.mxu3 %v9968_v1  ;;  %5539 = vmatpush.bf16.msra.mxu1 %v9424_v7  ;;  %v9357_v25 = vld [vmem:[#allocation3 + $0x228] sm:$0xf0] }
 0x31b   :  { %v12549_v26 = vld [vmem:[#allocation3 + $0x40c] sm:$0xf]  ;;  %v9360_v44 = vor.u32 %v12485_v24, %v9357_v25 }
 0x31c   :  { %5552 = vmatpush.bf16.msra.mxu2 %v9680_v2  ;;  %v9613_v29 = vld [vmem:[#allocation3 + $0x428] sm:$0xf0]  ;;  %5527 = vmatpush.bf16.msra.mxu0 %v9136_v19 }
 0x31d   :  { %v12613_v30 = vld [vmem:[#allocation3 + $0x60c] sm:$0xf]  ;;  %v9616_v46 = vor.u32 %v12549_v26, %v9613_v29  ;;  %v5322_v29 = vpop.f32.mrf.mxu0 }
 0x31e   :  { %5565 = vmatpush.bf16.msra.mxu3 %v9936_v11  ;;  %v9869_v33 = vld [vmem:[#allocation3 + $0x628] sm:$0xf0]  ;;  %5540 = vmatpush.bf16.msra.mxu1 %v9392_v22 }
 0x31f   :  { %v12733_v35 = vld [vmem:[#allocation3 + $0x9cc] sm:$0xf]  ;;  %v9872_v49 = vor.u32 %v12613_v30, %v9869_v33 }
 0x320   :  { %v10349_v36 = vld [vmem:[#allocation3 + $0x9e8] sm:$0xf0]  ;;  %5553 = vmatpush.bf16.msra.mxu2 %v9648_v23  ;;  %5528 = vmatpush.bf16.msra.mxu0 %v9104_v40  ;;  %v5335_v40 = vpop.f32.mrf.mxu1 }
 0x321   :  { %v12797_v37 = vld [vmem:[#allocation3 + $0xbcc] sm:$0xf]  ;;  %v10352_v51 = vor.u32 %v12733_v35, %v10349_v36 }
 0x322   :  { %v10605_v41 = vld [vmem:[#allocation3 + $0xbe8] sm:$0xf0]  ;;  %5566 = vmatpush.bf16.msra.mxu3 %v9904_v28  ;;  %5541 = vmatpush.bf16.msra.mxu1 %v9360_v44 }
 0x323   :  { %v12861_v42 = vld [vmem:[#allocation3 + $0xdcc] sm:$0xf]  ;;  %v10608_v52 = vor.u32 %v12797_v37, %v10605_v41  ;;  %5529 = vmatmul.bf16.vlgmr.msra.gmra.mxu0 %v13504_v45  ;;  %v5323_v37 = vadd.f32 %v5322_v29, %v2634_v21 }
 0x324   :  { %v10861_v43 = vld [vmem:[#allocation3 + $0xde8] sm:$0xf0]  ;;  %5554 = vmatpush.bf16.msra.mxu2 %v9616_v46  ;;  %5573 = vmatpush.bf16.msrb.mxu0 %v10352_v51 }
 0x325   :  { %v12925_v47 = vld [vmem:[#allocation3 + $0xfcc] sm:$0xf]  ;;  %v10864_v53 = vor.u32 %v12861_v42, %v10861_v43  ;;  %5542 = vmatmul.bf16.vlgmr.msra.gmra.mxu1 %v13511_v39 }
 0x326   :  { %v11117_v48 = vld [vmem:[#allocation3 + $0xfe8] sm:$0xf0]  ;;  %5567 = vmatpush.bf16.msra.mxu3 %v9872_v49  ;;  %5586 = vmatpush.bf16.msrb.mxu1 %v10608_v52 }
 0x327   :  { %v12725_v54 = vld [vmem:[#allocation3 + $0x98c] sm:$0xf]  ;;  %v11120_v56 = vor.u32 %v12925_v47, %v11117_v48  ;;  %5555 = vmatmul.bf16.vlgmr.msra.gmra.mxu2 %v13518_v32  ;;  %v5336_v47 = vadd.f32 %v5335_v40, %v5323_v37  ;;  %v9587_v37 = vld [vmem:[#allocation3 + $0x3d0] sm:$0xf] }
 0x328   :  { %v10317_v1 = vld [vmem:[#allocation3 + $0x9a8] sm:$0xf0]  ;;  %5599 = vmatpush.bf16.msrb.mxu2 %v10864_v53 }
 0x329   :  { %v12789_v55 = vld [vmem:[#allocation3 + $0xb8c] sm:$0xf]  ;;  %v10320_v62 = vor.u32 %v12725_v54, %v10317_v1  ;;  %5568 = vmatmul.bf16.vlgmr.msra.gmra.mxu3 %v13525_v4  ;;  %v5348_v1 = vpop.f32.mrf.mxu2 }
 0x32a   :  { %v10573_v57 = vld [vmem:[#allocation3 + $0xba8] sm:$0xf0]  ;;  %5612 = vmatpush.bf16.msrb.mxu3 %v11120_v56 }
 0x32b   :  { %v12853_v58 = vld [vmem:[#allocation3 + $0xd8c] sm:$0xf]  ;;  %v10576_v63 = vor.u32 %v12789_v55, %v10573_v57  ;;  %5574 = vmatpush.bf16.msrb.mxu0 %v10320_v62 }
 0x32c   :  { %v10829_v59 = vld [vmem:[#allocation3 + $0xda8] sm:$0xf0] }
 0x32d   :  { %v12917_v60 = vld [vmem:[#allocation3 + $0xf8c] sm:$0xf]  ;;  %v10832_v0 = vor.u32 %v12853_v58, %v10829_v59  ;;  %5587 = vmatpush.bf16.msrb.mxu1 %v10576_v63  ;;  %v5349_v59 = vadd.f32 %v5348_v1, %v5336_v47  ;;  %v12674_v47 = vld [vmem:[#allocation3 + $0x7ec] sm:$0xf0] }
 0x32e   :  { %v11085_v61 = vld [vmem:[#allocation3 + $0xfa8] sm:$0xf0]  ;;  %v9555_v1 = vld [vmem:[#allocation3 + $0x390] sm:$0xf] }
 0x32f   :  { %v12717_v6 = vld [vmem:[#allocation3 + $0x94c] sm:$0xf]  ;;  %v11088_v38 = vor.u32 %v12917_v60, %v11085_v61  ;;  %5600 = vmatpush.bf16.msrb.mxu2 %v10832_v0  ;;  %v5361_v60 = vpop.f32.mrf.mxu3 }
 0x330   :  { %v10285_v7 = vld [vmem:[#allocation3 + $0x968] sm:$0xf0]  ;;  %v13576_v0 = vadd.f32 %v5361_v60, %v5349_v59  ;;  %v10067_v59 = vld [vmem:[#allocation3 + $0x790] sm:$0xf] }
 0x331   :  { %v12781_v2 = vld [vmem:[#allocation3 + $0xb4c] sm:$0xf]  ;;  %v10288_v13 = vor.u32 %v12717_v6, %v10285_v7  ;;  %5613 = vmatpush.bf16.msrb.mxu3 %v11088_v38  ;;  %v5324_v6 = vpop.f32.mrf.mxu0  ;;  %v12666_v60 = vld [vmem:[#allocation3 + $0x7ac] sm:$0xf0] }
 0x332   :  { %v10541_v3 = vld [vmem:[#allocation3 + $0xb68] sm:$0xf0]  ;;  %v9267_v6 = vld [vmem:[#allocation3 + $0x150] sm:$0xf] }
 0x333   :  { %v12845_v8 = vld [vmem:[#allocation3 + $0xd4c] sm:$0xf]  ;;  %v10544_v15 = vor.u32 %v12781_v2, %v10541_v3  ;;  %5575 = vmatpush.bf16.msrb.mxu0 %v10288_v13 }
 0x334   :  { %v10797_v9 = vld [vmem:[#allocation3 + $0xd68] sm:$0xf0] }
 0x335   :  { %v12909_v11 = vld [vmem:[#allocation3 + $0xf4c] sm:$0xf]  ;;  %v10800_v17 = vor.u32 %v12845_v8, %v10797_v9  ;;  %5588 = vmatpush.bf16.msrb.mxu1 %v10544_v15  ;;  %v5337_v9 = vpop.f32.mrf.mxu1 }
 0x336   :  { %v11053_v12 = vld [vmem:[#allocation3 + $0xf68] sm:$0xf0]  ;;  %v12594_v9 = vld [vmem:[#allocation3 + $0x56c] sm:$0xf0] }
 0x337   :  { %v12709_v14 = vld [vmem:[#allocation3 + $0x90c] sm:$0xf]  ;;  %v11056_v22 = vor.u32 %v12909_v11, %v11053_v12  ;;  %5601 = vmatpush.bf16.msrb.mxu2 %v10800_v17 }
 0x338   :  { %v10253_v19 = vld [vmem:[#allocation3 + $0x928] sm:$0xf0] }
 0x339   :  { %v12773_v20 = vld [vmem:[#allocation3 + $0xb0c] sm:$0xf]  ;;  %v10256_v28 = vor.u32 %v12709_v14, %v10253_v19  ;;  %5614 = vmatpush.bf16.msrb.mxu3 %v11056_v22 }
 0x33a   :  { %v10509_v23 = vld [vmem:[#allocation3 + $0xb28] sm:$0xf0] }
 0x33b   :  { %v12837_v24 = vld [vmem:[#allocation3 + $0xd0c] sm:$0xf]  ;;  %v10512_v30 = vor.u32 %v12773_v20, %v10509_v23  ;;  %5576 = vmatpush.bf16.msrb.mxu0 %v10256_v28 }
 0x33c   :  { %v10765_v25 = vld [vmem:[#allocation3 + $0xd28] sm:$0xf0] }
 0x33d   :  { %v12901_v26 = vld [vmem:[#allocation3 + $0xf0c] sm:$0xf]  ;;  %v10768_v33 = vor.u32 %v12837_v24, %v10765_v25  ;;  %5589 = vmatpush.bf16.msrb.mxu1 %v10512_v30 }
 0x33e   :  { %v11021_v27 = vld [vmem:[#allocation3 + $0xf28] sm:$0xf0] }
 0x33f   :  { %v12701_v34 = vld [vmem:[#allocation3 + $0x8cc] sm:$0xf]  ;;  %v11024_v10 = vor.u32 %v12901_v26, %v11021_v27  ;;  %5602 = vmatpush.bf16.msrb.mxu2 %v10768_v33  ;;  %v5350_v27 = vpop.f32.mrf.mxu2 }
 0x340   :  { %v10221_v35 = vld [vmem:[#allocation3 + $0x8e8] sm:$0xf0] }
 0x341   :  { %v12765_v36 = vld [vmem:[#allocation3 + $0xacc] sm:$0xf]  ;;  %v10224_v48 = vor.u32 %v12701_v34, %v10221_v35  ;;  %5615 = vmatpush.bf16.msrb.mxu3 %v11024_v10  ;;  %v5363_v34 = vpop.f32.mrf.mxu3  ;;  %v9331_v35 = vld [vmem:[#allocation3 + $0x1d0] sm:$0xf] }
 0x342   :  { %v10477_v41 = vld [vmem:[#allocation3 + $0xae8] sm:$0xf0]  ;;  %v12546_v10 = vld [vmem:[#allocation3 + $0x3ec] sm:$0xf0] }
 0x343   :  { %v12829_v42 = vld [vmem:[#allocation3 + $0xccc] sm:$0xf]  ;;  %v10480_v49 = vor.u32 %v12765_v36, %v10477_v41  ;;  %5577 = vmatpush.bf16.msrb.mxu0 %v10224_v48  ;;  %v12482_v36 = vld [vmem:[#allocation3 + $0x1ec] sm:$0xf0] }
 0x344   :  { %v10733_v43 = vld [vmem:[#allocation3 + $0xce8] sm:$0xf0]  ;;  %v9843_v41 = vld [vmem:[#allocation3 + $0x5d0] sm:$0xf] }
 0x345   :  { %v12893_v44 = vld [vmem:[#allocation3 + $0xecc] sm:$0xf]  ;;  %v10736_v51 = vor.u32 %v12829_v42, %v10733_v43  ;;  %5590 = vmatpush.bf16.msrb.mxu1 %v10480_v49  ;;  %v12610_v42 = vld [vmem:[#allocation3 + $0x5ec] sm:$0xf0]  ;;  %v9332_v49 = vor.u32 %v12482_v36, %v9331_v35 }
 0x346   :  { %v10989_v46 = vld [vmem:[#allocation3 + $0xee8] sm:$0xf0]  ;;  %v12450_v34 = vld [vmem:[#allocation3 + $0xec] sm:$0xf0] }
 0x347   :  { %v12693_v52 = vld [vmem:[#allocation3 + $0x88c] sm:$0xf]  ;;  %v10992_v55 = vor.u32 %v12893_v44, %v10989_v46  ;;  %5603 = vmatpush.bf16.msrb.mxu2 %v10736_v51  ;;  %v10099_v46 = vld [vmem:[#allocation3 + $0x7d0] sm:$0xf]  ;;  %v9588_v51 = vor.u32 %v12546_v10, %v9587_v37  ;;  %v5387_v37 = vpop.f32.mrf.mxu1 }
 0x348   :  { %v10189_v53 = vld [vmem:[#allocation3 + $0x8a8] sm:$0xf0]  ;;  %v9459_v35 = vld [vmem:[#allocation3 + $0x2d0] sm:$0xf] }
 0x349   :  { %v12757_v54 = vld [vmem:[#allocation3 + $0xa8c] sm:$0xf]  ;;  %v10192_v63 = vor.u32 %v12693_v52, %v10189_v53  ;;  %5616 = vmatpush.bf16.msrb.mxu3 %v10992_v55  ;;  %v9844_v52 = vor.u32 %v12610_v42, %v9843_v41  ;;  %v9299_v53 = vld [vmem:[#allocation3 + $0x190] sm:$0xf]  ;;  %v10100_v55 = vor.u32 %v12674_v47, %v10099_v46 }
 0x34a   :  { %v10445_v56 = vld [vmem:[#allocation3 + $0xaa8] sm:$0xf0]  ;;  %v12514_v10 = vld [vmem:[#allocation3 + $0x2ec] sm:$0xf0] }
 0x34b   :  { %v12821_v57 = vld [vmem:[#allocation3 + $0xc8c] sm:$0xf]  ;;  %v10448_v7 = vor.u32 %v12757_v54, %v10445_v56  ;;  %5578 = vmatpush.bf16.msrb.mxu0 %v10192_v63  ;;  %v12474_v54 = vld [vmem:[#allocation3 + $0x1ac] sm:$0xf0] }
 0x34c   :  { %v10701_v58 = vld [vmem:[#allocation3 + $0xca8] sm:$0xf0]  ;;  %v12538_v56 = vld [vmem:[#allocation3 + $0x3ac] sm:$0xf0] }
 0x34d   :  { %v12885_v61 = vld [vmem:[#allocation3 + $0xe8c] sm:$0xf]  ;;  %v10704_v2 = vor.u32 %v12821_v57, %v10701_v58  ;;  %5591 = vmatpush.bf16.msrb.mxu1 %v10448_v7  ;;  %v9811_v57 = vld [vmem:[#allocation3 + $0x590] sm:$0xf] }
 0x34e   :  { %v10957_v62 = vld [vmem:[#allocation3 + $0xea8] sm:$0xf0]  ;;  %v12602_v58 = vld [vmem:[#allocation3 + $0x5ac] sm:$0xf0] }
 0x34f   :  { %v12685_v38 = vld [vmem:[#allocation3 + $0x84c] sm:$0xf]  ;;  %v10960_v11 = vor.u32 %v12885_v61, %v10957_v62  ;;  %5604 = vmatpush.bf16.msrb.mxu2 %v10704_v2  ;;  %v9300_v61 = vor.u32 %v12474_v54, %v9299_v53  ;;  %v9556_v62 = vor.u32 %v12538_v56, %v9555_v1  ;;  %v9812_v63 = vor.u32 %v12602_v58, %v9811_v57  ;;  %v12466_v7 = vld [vmem:[#allocation3 + $0x16c] sm:$0xf0]  ;;  %v5400_v54 = vpop.f32.mrf.mxu2  ;;  %v5413_v58 = vpop.f32.mrf.mxu3 }
 0x350   :  { %v10157_v3 = vld [vmem:[#allocation3 + $0x868] sm:$0xf0]  ;;  %v9523_v2 = vld [vmem:[#allocation3 + $0x350] sm:$0xf] }
 0x351   :  { %v12749_v8 = vld [vmem:[#allocation3 + $0xa4c] sm:$0xf]  ;;  %v10160_v19 = vor.u32 %v12685_v38, %v10157_v3  ;;  %5617 = vmatpush.bf16.msrb.mxu3 %v10960_v11  ;;  %v10068_v38 = vor.u32 %v12666_v60, %v10067_v59  ;;  %v12530_v3 = vld [vmem:[#allocation3 + $0x36c] sm:$0xf0] }
 0x352   :  { %v10413_v12 = vld [vmem:[#allocation3 + $0xa68] sm:$0xf0]  ;;  %v10035_v11 = vld [vmem:[#allocation3 + $0x750] sm:$0xf] }
 0x353   :  { %v12813_v13 = vld [vmem:[#allocation3 + $0xc4c] sm:$0xf]  ;;  %v10416_v22 = vor.u32 %v12749_v8, %v10413_v12  ;;  %5579 = vmatpush.bf16.msrb.mxu0 %v10160_v19  ;;  %v9779_v8 = vld [vmem:[#allocation3 + $0x550] sm:$0xf] }
 0x354   :  { %v10669_v14 = vld [vmem:[#allocation3 + $0xc68] sm:$0xf0]  ;;  %v12658_v12 = vld [vmem:[#allocation3 + $0x76c] sm:$0xf0] }
 0x355   :  { %v12877_v15 = vld [vmem:[#allocation3 + $0xe4c] sm:$0xf]  ;;  %v10672_v23 = vor.u32 %v12813_v13, %v10669_v14  ;;  %5592 = vmatpush.bf16.msrb.mxu1 %v10416_v22  ;;  %v9268_v13 = vor.u32 %v12466_v7, %v9267_v6  ;;  %v9524_v14 = vor.u32 %v12530_v3, %v9523_v2  ;;  %v12458_v19 = vld [vmem:[#allocation3 + $0x12c] sm:$0xf0] }
 0x356   :  { %v10925_v17 = vld [vmem:[#allocation3 + $0xe68] sm:$0xf0]  ;;  %v12522_v22 = vld [vmem:[#allocation3 + $0x32c] sm:$0xf0] }
 0x357   :  { %v12677_v20 = vld [vmem:[#allocation3 + $0x80c] sm:$0xf]  ;;  %v10928_v28 = vor.u32 %v12877_v15, %v10925_v17  ;;  %5605 = vmatpush.bf16.msrb.mxu2 %v10672_v23  ;;  %v9780_v15 = vor.u32 %v12594_v9, %v9779_v8  ;;  %v9235_v17 = vld [vmem:[#allocation3 + $0x110] sm:$0xf]  ;;  %v5389_v9 = vpop.f32.mrf.mxu1 }
 0x358   :  { %v10125_v21 = vld [vmem:[#allocation3 + $0x828] sm:$0xf0]  ;;  %v9747_v23 = vld [vmem:[#allocation3 + $0x510] sm:$0xf]  ;;  %v9236_v27 = vor.u32 %v12458_v19, %v9235_v17 }
 0x359   :  { %v12741_v24 = vld [vmem:[#allocation3 + $0xa0c] sm:$0xf]  ;;  %v10128_v40 = vor.u32 %v12677_v20, %v10125_v21  ;;  %5618 = vmatpush.bf16.msrb.mxu3 %v10928_v28  ;;  %v9491_v20 = vld [vmem:[#allocation3 + $0x310] sm:$0xf]  ;;  %v10036_v21 = vor.u32 %v12658_v12, %v10035_v11  ;;  %v5374_v28 = vpop.f32.mrf.mxu0 }
 0x35a   :  { %v10381_v25 = vld [vmem:[#allocation3 + $0xa28] sm:$0xf0]  ;;  %v5375_v36 = vadd.f32 %v5374_v28, %v13576_v0  ;;  %v9715_v41 = vld [vmem:[#allocation3 + $0x4d0] sm:$0xf]  ;;  %v5402_v28 = vpop.f32.mrf.mxu2 }
 0x35b   :  { %v12805_v26 = vld [vmem:[#allocation3 + $0xc0c] sm:$0xf]  ;;  %v10384_v43 = vor.u32 %v12741_v24, %v10381_v25  ;;  %5580 = vmatpush.bf16.msrb.mxu0 %v10128_v40  ;;  %v12586_v24 = vld [vmem:[#allocation3 + $0x52c] sm:$0xf0] }
 0x35c   :  { %v10637_v29 = vld [vmem:[#allocation3 + $0xc28] sm:$0xf0]  ;;  %v10003_v25 = vld [vmem:[#allocation3 + $0x710] sm:$0xf]  ;;  %v5388_v46 = vadd.f32 %v5387_v37, %v5375_v36 }
 0x35d   :  { %v12869_v30 = vld [vmem:[#allocation3 + $0xe0c] sm:$0xf]  ;;  %v10640_v44 = vor.u32 %v12805_v26, %v10637_v29  ;;  %5593 = vmatpush.bf16.msrb.mxu1 %v10384_v43  ;;  %v12650_v26 = vld [vmem:[#allocation3 + $0x72c] sm:$0xf0]  ;;  %v9492_v29 = vor.u32 %v12522_v22, %v9491_v20 }
 0x35e   :  { %v10893_v33 = vld [vmem:[#allocation3 + $0xe28] sm:$0xf0]  ;;  %5581 = vmatmul.bf16.vlgmr.msrb.gmra.mxu0 %v13528_v16  ;;  %v10004_v40 = vor.u32 %v12650_v26, %v10003_v25  ;;  %v12578_v42 = vld [vmem:[#allocation3 + $0x4ec] sm:$0xf0]  ;;  %v5401_v57 = vadd.f32 %v5400_v54, %v5388_v46 }
 0x35f   :  { %v10896_v48 = vor.u32 %v12869_v30, %v10893_v33  ;;  %5606 = vmatpush.bf16.msrb.mxu2 %v10640_v44  ;;  %5625 = vmatpush.bf16.msra.mxu0 %v9332_v49  ;;  %v9748_v30 = vor.u32 %v12586_v24, %v9747_v23  ;;  %v9203_v33 = vld [vmem:[#allocation3 + $0xd0] sm:$0xf]  ;;  %v9716_v49 = vor.u32 %v12578_v42, %v9715_v41 }
 0x360   :  { %5594 = vmatmul.bf16.vlgmr.msrb.gmra.mxu1 %v13531_v31  ;;  %v9971_v43 = vld [vmem:[#allocation3 + $0x6d0] sm:$0xf]  ;;  %v9204_v47 = vor.u32 %v12450_v34, %v9203_v33 }
 0x361   :  { %5619 = vmatpush.bf16.msrb.mxu3 %v10896_v48  ;;  %5638 = vmatpush.bf16.msra.mxu1 %v9588_v51  ;;  %v12642_v44 = vld [vmem:[#allocation3 + $0x6ec] sm:$0xf0]  ;;  %v9460_v48 = vor.u32 %v12514_v10, %v9459_v35  ;;  %v5376_v6 = vpop.f32.mrf.mxu0  ;;  %v5415_v35 = vpop.f32.mrf.mxu3 }
 0x362   :  { %5607 = vmatmul.bf16.vlgmr.msrb.gmra.mxu2 %v13534_v50  ;;  %v9171_v51 = vld [vmem:[#allocation3 + $0x90] sm:$0xf]  ;;  %v9972_v0 = vor.u32 %v12642_v44, %v9971_v43 }
 0x363   :  { %5651 = vmatpush.bf16.msra.mxu2 %v9844_v52  ;;  %5626 = vmatpush.bf16.msra.mxu0 %v9300_v61  ;;  %v12442_v52 = vld [vmem:[#allocation3 + $0xac] sm:$0xf0] }
 0x364   :  { %5620 = vmatmul.bf16.vlgmr.msrb.gmra.mxu3 %v13537_v5  ;;  %v9427_v53 = vld [vmem:[#allocation3 + $0x290] sm:$0xf]  ;;  %v9172_v61 = vor.u32 %v12442_v52, %v9171_v51 }
 0x365   :  { %5664 = vmatpush.bf16.msra.mxu3 %v10100_v55  ;;  %5639 = vmatpush.bf16.msra.mxu1 %v9556_v62  ;;  %v12506_v1 = vld [vmem:[#allocation3 + $0x2ac] sm:$0xf0]  ;;  %v5414_v62 = vadd.f32 %v5413_v58, %v5401_v57 }
 0x366   :  { %v9683_v55 = vld [vmem:[#allocation3 + $0x490] sm:$0xf]  ;;  %v9428_v7 = vor.u32 %v12506_v1, %v9427_v53 }
 0x367   :  { %5652 = vmatpush.bf16.msra.mxu2 %v9812_v63  ;;  %5627 = vmatpush.bf16.msra.mxu0 %v9268_v13  ;;  %v12570_v56 = vld [vmem:[#allocation3 + $0x4ac] sm:$0xf0]  ;;  %v6042_v12 = vmax.f32 %v5414_v62, 0.0 }
 0x368   :  { %v9939_v59 = vld [vmem:[#allocation3 + $0x690] sm:$0xf]  ;;  %v9684_v2 = vor.u32 %v12570_v56, %v9683_v55 }
 0x369   :  { %5665 = vmatpush.bf16.msra.mxu3 %v10068_v38  ;;  %5640 = vmatpush.bf16.msra.mxu1 %v9524_v14  ;;  %v12634_v60 = vld [vmem:[#allocation3 + $0x6ac] sm:$0xf0]  ;;  %v13583_v19 = vpack.c.bf16 %v6042_v12, %v6042_v12 }
 0x36a   :  { %v9139_v63 = vld [vmem:[#allocation3 + $0x50] sm:$0xf]  ;;  %v9940_v11 = vor.u32 %v12634_v60, %v9939_v59 }
 0x36b   :  { %5653 = vmatpush.bf16.msra.mxu2 %v9780_v15  ;;  %5628 = vmatpush.bf16.msra.mxu0 %v9236_v27  ;;  %v12434_v38 = vld [vmem:[#allocation3 + $0x6c] sm:$0xf0] }
 0x36c   :  { %v9395_v3 = vld [vmem:[#allocation3 + $0x250] sm:$0xf]  ;;  %v9140_v20 = vor.u32 %v12434_v38, %v9139_v63 }
 0x36d   :  { %5666 = vmatpush.bf16.msra.mxu3 %v10036_v21  ;;  %5641 = vmatpush.bf16.msra.mxu1 %v9492_v29  ;;  %v12498_v8 = vld [vmem:[#allocation3 + $0x26c] sm:$0xf0] }
 0x36e   :  { %v9651_v13 = vld [vmem:[#allocation3 + $0x450] sm:$0xf]  ;;  %v9396_v23 = vor.u32 %v12498_v8, %v9395_v3 }
 0x36f   :  { %5654 = vmatpush.bf16.msra.mxu2 %v9748_v30  ;;  %5629 = vmatpush.bf16.msra.mxu0 %v9204_v47  ;;  %v12562_v14 = vld [vmem:[#allocation3 + $0x46c] sm:$0xf0] }
 0x370   :  { %v9907_v15 = vld [vmem:[#allocation3 + $0x650] sm:$0xf]  ;;  %v9652_v24 = vor.u32 %v12562_v14, %v9651_v13 }
 0x371   :  { %5667 = vmatpush.bf16.msra.mxu3 %v10004_v40  ;;  %5642 = vmatpush.bf16.msra.mxu1 %v9460_v48  ;;  %v12626_v17 = vld [vmem:[#allocation3 + $0x66c] sm:$0xf0] }
 0x372   :  { %v9107_v21 = vld [vmem:[#allocation3 + $0x10] sm:$0xf]  ;;  %v9908_v29 = vor.u32 %v12626_v17, %v9907_v15 }
 0x373   :  { %5655 = vmatpush.bf16.msra.mxu2 %v9716_v49  ;;  %5630 = vmatpush.bf16.msra.mxu0 %v9172_v61  ;;  %v12426_v22 = vld [vmem:[#allocation3 + $0x2c] sm:$0xf0] }
 0x374   :  { %v9363_v25 = vld [vmem:[#allocation3 + $0x210] sm:$0xf]  ;;  %v9108_v10 = vor.u32 %v12426_v22, %v9107_v21  ;;  %v13589_v22 = vld [vmem:[#allocation11] sm:$0xff] }
 0x375   :  { %5668 = vmatpush.bf16.msra.mxu3 %v9972_v0  ;;  %5643 = vmatpush.bf16.msra.mxu1 %v9428_v7  ;;  %v12490_v26 = vld [vmem:[#allocation3 + $0x22c] sm:$0xf0] }
 0x376   :  { %v9619_v27 = vld [vmem:[#allocation3 + $0x410] sm:$0xf]  ;;  %v9364_v44 = vor.u32 %v12490_v26, %v9363_v25 }
 0x377   :  { %5656 = vmatpush.bf16.msra.mxu2 %v9684_v2  ;;  %v12554_v30 = vld [vmem:[#allocation3 + $0x42c] sm:$0xf0]  ;;  %5631 = vmatpush.bf16.msra.mxu0 %v9140_v20 }
 0x378   :  { %v9875_v33 = vld [vmem:[#allocation3 + $0x610] sm:$0xf]  ;;  %v9620_v46 = vor.u32 %v12554_v30, %v9619_v27 }
 0x379   :  { %5669 = vmatpush.bf16.msra.mxu3 %v9940_v11  ;;  %v12618_v34 = vld [vmem:[#allocation3 + $0x62c] sm:$0xf0]  ;;  %5644 = vmatpush.bf16.msra.mxu1 %v9396_v23  ;;  %v2635_v23 = vperm.slane %v13589_v22, 2 }
 0x37a   :  { %v10355_v36 = vld [vmem:[#allocation3 + $0x9d0] sm:$0xf]  ;;  %v9876_v49 = vor.u32 %v12618_v34, %v9875_v33  ;;  %v5426_v33 = vpop.f32.mrf.mxu0 }
 0x37b   :  { %v12738_v37 = vld [vmem:[#allocation3 + $0x9ec] sm:$0xf0]  ;;  %5657 = vmatpush.bf16.msra.mxu2 %v9652_v24  ;;  %5632 = vmatpush.bf16.msra.mxu0 %v9108_v10  ;;  %v5427_v10 = vadd.f32 %v5426_v33, %v2635_v23 }
 0x37c   :  { %v10611_v40 = vld [vmem:[#allocation3 + $0xbd0] sm:$0xf]  ;;  %v10356_v51 = vor.u32 %v12738_v37, %v10355_v36 }
 0x37d   :  { %v12802_v41 = vld [vmem:[#allocation3 + $0xbec] sm:$0xf0]  ;;  %5670 = vmatpush.bf16.msra.mxu3 %v9908_v29  ;;  %5645 = vmatpush.bf16.msra.mxu1 %v9364_v44 }
 0x37e   :  { %v10867_v42 = vld [vmem:[#allocation3 + $0xdd0] sm:$0xf]  ;;  %v10612_v52 = vor.u32 %v12802_v41, %v10611_v40  ;;  %5633 = vmatmul.bf16.vlgmr.msra.gmra.mxu0 %v13504_v45  ;;  %v5439_v41 = vpop.f32.mrf.mxu1 }
 0x37f   :  { %v12866_v43 = vld [vmem:[#allocation3 + $0xdec] sm:$0xf0]  ;;  %5658 = vmatpush.bf16.msra.mxu2 %v9620_v46  ;;  %5677 = vmatpush.bf16.msrb.mxu0 %v10356_v51 }
 0x380   :  { %v11123_v47 = vld [vmem:[#allocation3 + $0xfd0] sm:$0xf]  ;;  %v10868_v53 = vor.u32 %v12866_v43, %v10867_v42  ;;  %5646 = vmatmul.bf16.vlgmr.msra.gmra.mxu1 %v13511_v39 }
 0x381   :  { %v12930_v48 = vld [vmem:[#allocation3 + $0xfec] sm:$0xf0]  ;;  %5671 = vmatpush.bf16.msra.mxu3 %v9876_v49  ;;  %5690 = vmatpush.bf16.msrb.mxu1 %v10612_v52  ;;  %v5440_v49 = vadd.f32 %v5439_v41, %v5427_v10  ;;  %v12478_v10 = vld [vmem:[#allocation3 + $0x1d4] sm:$0xf] }
 0x382   :  { %v10323_v54 = vld [vmem:[#allocation3 + $0x990] sm:$0xf]  ;;  %v11124_v55 = vor.u32 %v12930_v48, %v11123_v47  ;;  %5659 = vmatmul.bf16.vlgmr.msra.gmra.mxu2 %v13518_v32  ;;  %v9333_v41 = vld [vmem:[#allocation3 + $0x1f0] sm:$0xf0] }
 0x383   :  { %v12730_v0 = vld [vmem:[#allocation3 + $0x9ac] sm:$0xf0]  ;;  %5703 = vmatpush.bf16.msrb.mxu2 %v10868_v53 }
 0x384   :  { %v10579_v1 = vld [vmem:[#allocation3 + $0xb90] sm:$0xf]  ;;  %v10324_v61 = vor.u32 %v12730_v0, %v10323_v54  ;;  %5672 = vmatmul.bf16.vlgmr.msra.gmra.mxu3 %v13525_v4 }
 0x385   :  { %v12794_v56 = vld [vmem:[#allocation3 + $0xbac] sm:$0xf0]  ;;  %5716 = vmatpush.bf16.msrb.mxu3 %v11124_v55  ;;  %v5452_v55 = vpop.f32.mrf.mxu2 }
 0x386   :  { %v10835_v57 = vld [vmem:[#allocation3 + $0xd90] sm:$0xf]  ;;  %v10580_v62 = vor.u32 %v12794_v56, %v10579_v1  ;;  %5678 = vmatpush.bf16.msrb.mxu0 %v10324_v61  ;;  %v5465_v61 = vpop.f32.mrf.mxu3 }
 0x387   :  { %v12858_v58 = vld [vmem:[#allocation3 + $0xdac] sm:$0xf0] }
 0x388   :  { %v11091_v59 = vld [vmem:[#allocation3 + $0xf90] sm:$0xf]  ;;  %v10836_v63 = vor.u32 %v12858_v58, %v10835_v57  ;;  %5691 = vmatpush.bf16.msrb.mxu1 %v10580_v62 }
 0x389   :  { %v12922_v60 = vld [vmem:[#allocation3 + $0xfac] sm:$0xf0] }
 0x38a   :  { %v10291_v6 = vld [vmem:[#allocation3 + $0x950] sm:$0xf]  ;;  %v11092_v38 = vor.u32 %v12922_v60, %v11091_v59  ;;  %5704 = vmatpush.bf16.msrb.mxu2 %v10836_v63  ;;  %v5453_v60 = vadd.f32 %v5452_v55, %v5440_v49  ;;  %v12470_v55 = vld [vmem:[#allocation3 + $0x194] sm:$0xf] }
 0x38b   :  { %v12722_v7 = vld [vmem:[#allocation3 + $0x96c] sm:$0xf0] }
 0x38c   :  { %v10547_v2 = vld [vmem:[#allocation3 + $0xb50] sm:$0xf]  ;;  %v10292_v13 = vor.u32 %v12722_v7, %v10291_v6  ;;  %5717 = vmatpush.bf16.msrb.mxu3 %v11092_v38  ;;  %v13592_v7 = vadd.f32 %v5465_v61, %v5453_v60  ;;  %v12598_v60 = vld [vmem:[#allocation3 + $0x594] sm:$0xf] }
 0x38d   :  { %v12786_v3 = vld [vmem:[#allocation3 + $0xb6c] sm:$0xf0]  ;;  %v5454_v33 = vpop.f32.mrf.mxu2  ;;  %v9813_v61 = vld [vmem:[#allocation3 + $0x5b0] sm:$0xf0] }
 0x38e   :  { %v10803_v8 = vld [vmem:[#allocation3 + $0xd50] sm:$0xf]  ;;  %v10548_v15 = vor.u32 %v12786_v3, %v10547_v2  ;;  %5679 = vmatpush.bf16.msrb.mxu0 %v10292_v13  ;;  %v5428_v2 = vpop.f32.mrf.mxu0  ;;  %v12646_v33 = vld [vmem:[#allocation3 + $0x714] sm:$0xf] }
 0x38f   :  { %v12850_v9 = vld [vmem:[#allocation3 + $0xd6c] sm:$0xf0] }
 0x390   :  { %v11059_v11 = vld [vmem:[#allocation3 + $0xf50] sm:$0xf]  ;;  %v10804_v17 = vor.u32 %v12850_v9, %v10803_v8  ;;  %5692 = vmatpush.bf16.msrb.mxu1 %v10548_v15 }
 0x391   :  { %v12914_v12 = vld [vmem:[#allocation3 + $0xf6c] sm:$0xf0] }
 0x392   :  { %v10259_v14 = vld [vmem:[#allocation3 + $0x910] sm:$0xf]  ;;  %v11060_v24 = vor.u32 %v12914_v12, %v11059_v11  ;;  %5705 = vmatpush.bf16.msrb.mxu2 %v10804_v17  ;;  %v5441_v12 = vpop.f32.mrf.mxu1 }
 0x393   :  { %v12714_v20 = vld [vmem:[#allocation3 + $0x92c] sm:$0xf0]  ;;  %v9525_v12 = vld [vmem:[#allocation3 + $0x370] sm:$0xf0] }
 0x394   :  { %v10515_v21 = vld [vmem:[#allocation3 + $0xb10] sm:$0xf]  ;;  %v10260_v30 = vor.u32 %v12714_v20, %v10259_v14  ;;  %5718 = vmatpush.bf16.msrb.mxu3 %v11060_v24 }
 0x395   :  { %v12778_v25 = vld [vmem:[#allocation3 + $0xb2c] sm:$0xf0] }
 0x396   :  { %v10771_v26 = vld [vmem:[#allocation3 + $0xd10] sm:$0xf]  ;;  %v10516_v34 = vor.u32 %v12778_v25, %v10515_v21  ;;  %5680 = vmatpush.bf16.msrb.mxu0 %v10260_v30 }
 0x397   :  { %v12842_v27 = vld [vmem:[#allocation3 + $0xd2c] sm:$0xf0] }
 0x398   :  { %v11027_v28 = vld [vmem:[#allocation3 + $0xf10] sm:$0xf]  ;;  %v10772_v35 = vor.u32 %v12842_v27, %v10771_v26  ;;  %5693 = vmatpush.bf16.msrb.mxu1 %v10516_v34 }
 0x399   :  { %v12906_v29 = vld [vmem:[#allocation3 + $0xf2c] sm:$0xf0] }
 0x39a   :  { %v10227_v36 = vld [vmem:[#allocation3 + $0x8d0] sm:$0xf]  ;;  %v11028_v42 = vor.u32 %v12906_v29, %v11027_v28  ;;  %5706 = vmatpush.bf16.msrb.mxu2 %v10772_v35 }
 0x39b   :  { %v12706_v37 = vld [vmem:[#allocation3 + $0x8ec] sm:$0xf0] }
 0x39c   :  { %v10483_v40 = vld [vmem:[#allocation3 + $0xad0] sm:$0xf]  ;;  %v10228_v51 = vor.u32 %v12706_v37, %v10227_v36  ;;  %5719 = vmatpush.bf16.msrb.mxu3 %v11028_v42  ;;  %v12542_v42 = vld [vmem:[#allocation3 + $0x3d4] sm:$0xf] }
 0x39d   :  { %v12770_v43 = vld [vmem:[#allocation3 + $0xaec] sm:$0xf0] }
 0x39e   :  { %v10739_v44 = vld [vmem:[#allocation3 + $0xcd0] sm:$0xf]  ;;  %v10484_v52 = vor.u32 %v12770_v43, %v10483_v40  ;;  %5681 = vmatpush.bf16.msrb.mxu0 %v10228_v51  ;;  %v5467_v40 = vpop.f32.mrf.mxu3  ;;  %v12670_v51 = vld [vmem:[#allocation3 + $0x7d4] sm:$0xf] }
 0x39f   :  { %v12834_v46 = vld [vmem:[#allocation3 + $0xcec] sm:$0xf0] }
 0x3a0   :  { %v10995_v47 = vld [vmem:[#allocation3 + $0xed0] sm:$0xf]  ;;  %v10740_v53 = vor.u32 %v12834_v46, %v10739_v44  ;;  %5694 = vmatpush.bf16.msrb.mxu1 %v10484_v52  ;;  %v9589_v44 = vld [vmem:[#allocation3 + $0x3f0] sm:$0xf0] }
 0x3a1   :  { %v12898_v48 = vld [vmem:[#allocation3 + $0xeec] sm:$0xf0]  ;;  %v12606_v46 = vld [vmem:[#allocation3 + $0x5d4] sm:$0xf] }
 0x3a2   :  { %v10195_v54 = vld [vmem:[#allocation3 + $0x890] sm:$0xf]  ;;  %v10996_v56 = vor.u32 %v12898_v48, %v10995_v47  ;;  %5707 = vmatpush.bf16.msrb.mxu2 %v10740_v53  ;;  %v9845_v47 = vld [vmem:[#allocation3 + $0x5f0] sm:$0xf0] }
 0x3a3   :  { %v12698_v0 = vld [vmem:[#allocation3 + $0x8ac] sm:$0xf0]  ;;  %v10101_v52 = vld [vmem:[#allocation3 + $0x7f0] sm:$0xf0] }
 0x3a4   :  { %v10451_v1 = vld [vmem:[#allocation3 + $0xa90] sm:$0xf]  ;;  %v10196_v6 = vor.u32 %v12698_v0, %v10195_v54  ;;  %5720 = vmatpush.bf16.msrb.mxu3 %v10996_v56  ;;  %v9336_v54 = vor.u32 %v12478_v10, %v9333_v41  ;;  %v9592_v0 = vor.u32 %v12542_v42, %v9589_v44  ;;  %v9301_v56 = vld [vmem:[#allocation3 + $0x1b0] sm:$0xf0]  ;;  %v5491_v44 = vpop.f32.mrf.mxu1 }
 0x3a5   :  { %v12762_v57 = vld [vmem:[#allocation3 + $0xaac] sm:$0xf0]  ;;  %v12446_v10 = vld [vmem:[#allocation3 + $0xd4] sm:$0xf] }
 0x3a6   :  { %v10707_v58 = vld [vmem:[#allocation3 + $0xc90] sm:$0xf]  ;;  %v10452_v38 = vor.u32 %v12762_v57, %v10451_v1  ;;  %5682 = vmatpush.bf16.msrb.mxu0 %v10196_v6  ;;  %v9848_v1 = vor.u32 %v12606_v46, %v9845_v47  ;;  %v12534_v57 = vld [vmem:[#allocation3 + $0x394] sm:$0xf]  ;;  %v9304_v6 = vor.u32 %v12470_v55, %v9301_v56 }
 0x3a7   :  { %v12826_v59 = vld [vmem:[#allocation3 + $0xcac] sm:$0xf0]  ;;  %v9205_v41 = vld [vmem:[#allocation3 + $0xf0] sm:$0xf0] }
 0x3a8   :  { %v10963_v62 = vld [vmem:[#allocation3 + $0xe90] sm:$0xf]  ;;  %v10708_v3 = vor.u32 %v12826_v59, %v10707_v58  ;;  %5695 = vmatpush.bf16.msrb.mxu1 %v10452_v38  ;;  %v10104_v58 = vor.u32 %v12670_v51, %v10101_v52  ;;  %v9557_v59 = vld [vmem:[#allocation3 + $0x3b0] sm:$0xf0]  ;;  %v9816_v38 = vor.u32 %v12598_v60, %v9813_v61 }
 0x3a9   :  { %v12890_v63 = vld [vmem:[#allocation3 + $0xeac] sm:$0xf0]  ;;  %v9560_v2 = vor.u32 %v12534_v57, %v9557_v59  ;;  %v12510_v42 = vld [vmem:[#allocation3 + $0x2d4] sm:$0xf] }
 0x3aa   :  { %v10163_v8 = vld [vmem:[#allocation3 + $0x850] sm:$0xf]  ;;  %v10964_v13 = vor.u32 %v12890_v63, %v10963_v62  ;;  %5708 = vmatpush.bf16.msrb.mxu2 %v10708_v3  ;;  %v12662_v62 = vld [vmem:[#allocation3 + $0x794] sm:$0xf] }
 0x3ab   :  { %v12690_v9 = vld [vmem:[#allocation3 + $0x86c] sm:$0xf0]  ;;  %v10069_v63 = vld [vmem:[#allocation3 + $0x7b0] sm:$0xf0] }
 0x3ac   :  { %v10419_v11 = vld [vmem:[#allocation3 + $0xa50] sm:$0xf]  ;;  %v10164_v23 = vor.u32 %v12690_v9, %v10163_v8  ;;  %5721 = vmatpush.bf16.msrb.mxu3 %v10964_v13  ;;  %v12462_v3 = vld [vmem:[#allocation3 + $0x154] sm:$0xf] }
 0x3ad   :  { %v12754_v14 = vld [vmem:[#allocation3 + $0xa6c] sm:$0xf0]  ;;  %v9269_v8 = vld [vmem:[#allocation3 + $0x170] sm:$0xf0] }
 0x3ae   :  { %v10675_v15 = vld [vmem:[#allocation3 + $0xc50] sm:$0xf]  ;;  %v10420_v26 = vor.u32 %v12754_v14, %v10419_v11  ;;  %5683 = vmatpush.bf16.msrb.mxu0 %v10164_v23  ;;  %v12526_v9 = vld [vmem:[#allocation3 + $0x354] sm:$0xf]  ;;  %v10072_v11 = vor.u32 %v12662_v62, %v10069_v63  ;;  %v5517_v63 = vpop.f32.mrf.mxu3 }
 0x3af   :  { %v12818_v17 = vld [vmem:[#allocation3 + $0xc6c] sm:$0xf0]  ;;  %v12590_v13 = vld [vmem:[#allocation3 + $0x554] sm:$0xf] }
 0x3b0   :  { %v10931_v20 = vld [vmem:[#allocation3 + $0xe50] sm:$0xf]  ;;  %v10676_v27 = vor.u32 %v12818_v17, %v10675_v15  ;;  %5696 = vmatpush.bf16.msrb.mxu1 %v10420_v26  ;;  %v9781_v14 = vld [vmem:[#allocation3 + $0x570] sm:$0xf0] }
 0x3b1   :  { %v12882_v21 = vld [vmem:[#allocation3 + $0xe6c] sm:$0xf0]  ;;  %v12654_v15 = vld [vmem:[#allocation3 + $0x754] sm:$0xf]  ;;  %v9784_v23 = vor.u32 %v12590_v13, %v9781_v14 }
 0x3b2   :  { %v10131_v24 = vld [vmem:[#allocation3 + $0x810] sm:$0xf]  ;;  %v10932_v34 = vor.u32 %v12882_v21, %v10931_v20  ;;  %5709 = vmatpush.bf16.msrb.mxu2 %v10676_v27  ;;  %v10037_v17 = vld [vmem:[#allocation3 + $0x770] sm:$0xf0]  ;;  %v9272_v20 = vor.u32 %v12462_v3, %v9269_v8  ;;  %v9528_v21 = vor.u32 %v12526_v9, %v9525_v12 }
 0x3b3   :  { %v12682_v25 = vld [vmem:[#allocation3 + $0x82c] sm:$0xf0]  ;;  %v12518_v26 = vld [vmem:[#allocation3 + $0x314] sm:$0xf]  ;;  %v10040_v27 = vor.u32 %v12654_v15, %v10037_v17  ;;  %v5493_v17 = vpop.f32.mrf.mxu1 }
 0x3b4   :  { %v10387_v28 = vld [vmem:[#allocation3 + $0xa10] sm:$0xf]  ;;  %v10132_v43 = vor.u32 %v12682_v25, %v10131_v24  ;;  %5722 = vmatpush.bf16.msrb.mxu3 %v10932_v34  ;;  %v12454_v24 = vld [vmem:[#allocation3 + $0x114] sm:$0xf] }
 0x3b5   :  { %v12746_v29 = vld [vmem:[#allocation3 + $0xa2c] sm:$0xf0]  ;;  %v9237_v25 = vld [vmem:[#allocation3 + $0x130] sm:$0xf0] }
 0x3b6   :  { %v10643_v30 = vld [vmem:[#allocation3 + $0xc10] sm:$0xf]  ;;  %v10388_v48 = vor.u32 %v12746_v29, %v10387_v28  ;;  %5684 = vmatpush.bf16.msrb.mxu0 %v10132_v43  ;;  %v9493_v28 = vld [vmem:[#allocation3 + $0x330] sm:$0xf0] }
 0x3b7   :  { %v12810_v35 = vld [vmem:[#allocation3 + $0xc2c] sm:$0xf0]  ;;  %v12582_v29 = vld [vmem:[#allocation3 + $0x514] sm:$0xf] }
 0x3b8   :  { %v10899_v36 = vld [vmem:[#allocation3 + $0xe10] sm:$0xf]  ;;  %v10644_v49 = vor.u32 %v12810_v35, %v10643_v30  ;;  %5697 = vmatpush.bf16.msrb.mxu1 %v10388_v48  ;;  %v9749_v30 = vld [vmem:[#allocation3 + $0x530] sm:$0xf0]  ;;  %v9240_v35 = vor.u32 %v12454_v24, %v9237_v25 }
 0x3b9   :  { %v12874_v37 = vld [vmem:[#allocation3 + $0xe2c] sm:$0xf0]  ;;  %5685 = vmatmul.bf16.vlgmr.msrb.gmra.mxu0 %v13528_v16  ;;  %v10005_v34 = vld [vmem:[#allocation3 + $0x730] sm:$0xf0]  ;;  %v9752_v40 = vor.u32 %v12582_v29, %v9749_v30 }
 0x3ba   :  { %v10900_v53 = vor.u32 %v12874_v37, %v10899_v36  ;;  %5710 = vmatpush.bf16.msrb.mxu2 %v10644_v49  ;;  %5729 = vmatpush.bf16.msra.mxu0 %v9336_v54  ;;  %v5478_v36 = vpop.f32.mrf.mxu0  ;;  %v9496_v37 = vor.u32 %v12518_v26, %v9493_v28  ;;  %v10008_v46 = vor.u32 %v12646_v33, %v10005_v34  ;;  %v9461_v47 = vld [vmem:[#allocation3 + $0x2f0] sm:$0xf0] }
 0x3bb   :  { %5698 = vmatmul.bf16.vlgmr.msrb.gmra.mxu1 %v13531_v31  ;;  %v5479_v43 = vadd.f32 %v5478_v36, %v13592_v7  ;;  %v12574_v48 = vld [vmem:[#allocation3 + $0x4d4] sm:$0xf]  ;;  %v9208_v54 = vor.u32 %v12446_v10, %v9205_v41 }
 0x3bc   :  { %5723 = vmatpush.bf16.msrb.mxu3 %v10900_v53  ;;  %5742 = vmatpush.bf16.msra.mxu1 %v9592_v0  ;;  %v9717_v49 = vld [vmem:[#allocation3 + $0x4f0] sm:$0xf0]  ;;  %v9464_v0 = vor.u32 %v12510_v42, %v9461_v47 }
 0x3bd   :  { %5711 = vmatmul.bf16.vlgmr.msrb.gmra.mxu2 %v13534_v50  ;;  %v12638_v51 = vld [vmem:[#allocation3 + $0x6d4] sm:$0xf]  ;;  %v5492_v53 = vadd.f32 %v5491_v44, %v5479_v43  ;;  %v5519_v44 = vpop.f32.mrf.mxu3 }
 0x3be   :  { %5755 = vmatpush.bf16.msra.mxu2 %v9848_v1  ;;  %5730 = vmatpush.bf16.msra.mxu0 %v9304_v6  ;;  %v9973_v52 = vld [vmem:[#allocation3 + $0x6f0] sm:$0xf0]  ;;  %v9720_v1 = vor.u32 %v12574_v48, %v9717_v49 }
 0x3bf   :  { %5724 = vmatmul.bf16.vlgmr.msrb.gmra.mxu3 %v13537_v5  ;;  %v12438_v55 = vld [vmem:[#allocation3 + $0x94] sm:$0xf]  ;;  %v9976_v7 = vor.u32 %v12638_v51, %v9973_v52 }
 0x3c0   :  { %5768 = vmatpush.bf16.msra.mxu3 %v10104_v58  ;;  %5743 = vmatpush.bf16.msra.mxu1 %v9560_v2  ;;  %v9173_v56 = vld [vmem:[#allocation3 + $0xb0] sm:$0xf0]  ;;  %v5504_v58 = vpop.f32.mrf.mxu2 }
 0x3c1   :  { %v12502_v57 = vld [vmem:[#allocation3 + $0x294] sm:$0xf]  ;;  %v5505_v62 = vadd.f32 %v5504_v58, %v5492_v53 }
 0x3c2   :  { %5756 = vmatpush.bf16.msra.mxu2 %v9816_v38  ;;  %5731 = vmatpush.bf16.msra.mxu0 %v9272_v20  ;;  %v9429_v59 = vld [vmem:[#allocation3 + $0x2b0] sm:$0xf0]  ;;  %v9176_v38 = vor.u32 %v12438_v55, %v9173_v56  ;;  %v5480_v9 = vpop.f32.mrf.mxu0 }
 0x3c3   :  { %v12566_v60 = vld [vmem:[#allocation3 + $0x494] sm:$0xf]  ;;  %v5518_v3 = vadd.f32 %v5517_v63, %v5505_v62 }
 0x3c4   :  { %5769 = vmatpush.bf16.msra.mxu3 %v10072_v11  ;;  %5744 = vmatpush.bf16.msra.mxu1 %v9528_v21  ;;  %v9685_v61 = vld [vmem:[#allocation3 + $0x4b0] sm:$0xf0]  ;;  %v9432_v11 = vor.u32 %v12502_v57, %v9429_v59 }
 0x3c5   :  { %v12630_v6 = vld [vmem:[#allocation3 + $0x694] sm:$0xf]  ;;  %v9688_v12 = vor.u32 %v12566_v60, %v9685_v61  ;;  %v6043_v21 = vmax.f32 %v5518_v3, 0.0 }
 0x3c6   :  { %5757 = vmatpush.bf16.msra.mxu2 %v9784_v23  ;;  %5732 = vmatpush.bf16.msra.mxu0 %v9240_v35  ;;  %v9941_v2 = vld [vmem:[#allocation3 + $0x6b0] sm:$0xf0] }
 0x3c7   :  { %v12430_v8 = vld [vmem:[#allocation3 + $0x54] sm:$0xf]  ;;  %v9944_v20 = vor.u32 %v12630_v6, %v9941_v2 }
 0x3c8   :  { %5770 = vmatpush.bf16.msra.mxu3 %v10040_v27  ;;  %5745 = vmatpush.bf16.msra.mxu1 %v9496_v37  ;;  %v9141_v13 = vld [vmem:[#allocation3 + $0x70] sm:$0xf0]  ;;  %v13599_v27 = vpack.c.bf16 %v6043_v21, %v6043_v21 }
 0x3c9   :  { %v12494_v14 = vld [vmem:[#allocation3 + $0x254] sm:$0xf]  ;;  %v9144_v28 = vor.u32 %v12430_v8, %v9141_v13 }
 0x3ca   :  { %5758 = vmatpush.bf16.msra.mxu2 %v9752_v40  ;;  %5733 = vmatpush.bf16.msra.mxu0 %v9208_v54  ;;  %v9397_v15 = vld [vmem:[#allocation3 + $0x270] sm:$0xf0]  ;;  %v5506_v40 = vpop.f32.mrf.mxu2 }
 0x3cb   :  { %v12558_v23 = vld [vmem:[#allocation3 + $0x454] sm:$0xf]  ;;  %v9400_v33 = vor.u32 %v12494_v14, %v9397_v15 }
 0x3cc   :  { %5771 = vmatpush.bf16.msra.mxu3 %v10008_v46  ;;  %5746 = vmatpush.bf16.msra.mxu1 %v9464_v0  ;;  %v9653_v24 = vld [vmem:[#allocation3 + $0x470] sm:$0xf0] }
 0x3cd   :  { %v12622_v25 = vld [vmem:[#allocation3 + $0x654] sm:$0xf]  ;;  %v9656_v34 = vor.u32 %v12558_v23, %v9653_v24 }
 0x3ce   :  { %5759 = vmatpush.bf16.msra.mxu2 %v9720_v1  ;;  %v9909_v26 = vld [vmem:[#allocation3 + $0x670] sm:$0xf0]  ;;  %5734 = vmatpush.bf16.msra.mxu0 %v9176_v38 }
 0x3cf   :  { %v12422_v29 = vld [vmem:[#allocation3 + $0x14] sm:$0xf]  ;;  %v9912_v10 = vor.u32 %v12622_v25, %v9909_v26 }
 0x3d0   :  { %5772 = vmatpush.bf16.msra.mxu3 %v9976_v7  ;;  %v9109_v30 = vld [vmem:[#allocation3 + $0x30] sm:$0xf0]  ;;  %5747 = vmatpush.bf16.msra.mxu1 %v9432_v11 }
 0x3d1   :  { %v12486_v35 = vld [vmem:[#allocation3 + $0x214] sm:$0xf]  ;;  %v9112_v49 = vor.u32 %v12422_v29, %v9109_v30 }
 0x3d2   :  { %5760 = vmatpush.bf16.msra.mxu2 %v9688_v12  ;;  %v9365_v36 = vld [vmem:[#allocation3 + $0x230] sm:$0xf0]  ;;  %5735 = vmatpush.bf16.msra.mxu0 %v9144_v28 }
 0x3d3   :  { %v12550_v37 = vld [vmem:[#allocation3 + $0x414] sm:$0xf]  ;;  %v9368_v54 = vor.u32 %v12486_v35, %v9365_v36 }
 0x3d4   :  { %5773 = vmatpush.bf16.msra.mxu3 %v9944_v20  ;;  %v9621_v41 = vld [vmem:[#allocation3 + $0x430] sm:$0xf0]  ;;  %5748 = vmatpush.bf16.msra.mxu1 %v9400_v33 }
 0x3d5   :  { %v12614_v42 = vld [vmem:[#allocation3 + $0x614] sm:$0xf]  ;;  %v9624_v0 = vor.u32 %v12550_v37, %v9621_v41 }
 0x3d6   :  { %v9877_v43 = vld [vmem:[#allocation3 + $0x630] sm:$0xf0]  ;;  %5761 = vmatpush.bf16.msra.mxu2 %v9656_v34  ;;  %5736 = vmatpush.bf16.msra.mxu0 %v9112_v49  ;;  %v2636_v34 = vperm.slane %v13589_v22, 3 }
 0x3d7   :  { %v12734_v46 = vld [vmem:[#allocation3 + $0x9d4] sm:$0xf]  ;;  %v9880_v56 = vor.u32 %v12614_v42, %v9877_v43  ;;  %v5530_v43 = vpop.f32.mrf.mxu0 }
 0x3d8   :  { %v10357_v47 = vld [vmem:[#allocation3 + $0x9f0] sm:$0xf0]  ;;  %5774 = vmatpush.bf16.msra.mxu3 %v9912_v10  ;;  %5749 = vmatpush.bf16.msra.mxu1 %v9368_v54 }
 0x3d9   :  { %v12798_v48 = vld [vmem:[#allocation3 + $0xbd4] sm:$0xf]  ;;  %v10360_v57 = vor.u32 %v12734_v46, %v10357_v47  ;;  %5737 = vmatmul.bf16.vlgmr.msra.gmra.mxu0 %v13504_v45 }
 0x3da   :  { %v10613_v51 = vld [vmem:[#allocation3 + $0xbf0] sm:$0xf0]  ;;  %5762 = vmatpush.bf16.msra.mxu2 %v9624_v0 }
 0x3db   :  { %v12862_v52 = vld [vmem:[#allocation3 + $0xdd4] sm:$0xf]  ;;  %v10616_v58 = vor.u32 %v12798_v48, %v10613_v51  ;;  %5781 = vmatpush.bf16.msrb.mxu0 %v10360_v57  ;;  %5750 = vmatmul.bf16.vlgmr.msra.gmra.mxu1 %v13511_v39  ;;  %v5531_v51 = vadd.f32 %v5530_v43, %v2636_v34 }
 0x3dc   :  { %v10869_v53 = vld [vmem:[#allocation3 + $0xdf0] sm:$0xf0]  ;;  %5775 = vmatpush.bf16.msra.mxu3 %v9880_v56 }
 0x3dd   :  { %v12926_v1 = vld [vmem:[#allocation3 + $0xfd4] sm:$0xf]  ;;  %v10872_v7 = vor.u32 %v12862_v52, %v10869_v53  ;;  %5794 = vmatpush.bf16.msrb.mxu1 %v10616_v58  ;;  %5763 = vmatmul.bf16.vlgmr.msra.gmra.mxu2 %v13518_v32  ;;  %v5543_v52 = vpop.f32.mrf.mxu1 }
 0x3de   :  { %v11125_v55 = vld [vmem:[#allocation3 + $0xff0] sm:$0xf0]  ;;  %v5544_v56 = vadd.f32 %v5543_v52, %v5531_v51  ;;  %v9339_v51 = vld [vmem:[#allocation3 + $0x1d8] sm:$0xf] }
 0x3df   :  { %v12726_v59 = vld [vmem:[#allocation3 + $0x994] sm:$0xf]  ;;  %v11128_v62 = vor.u32 %v12926_v1, %v11125_v55  ;;  %5807 = vmatpush.bf16.msrb.mxu2 %v10872_v7  ;;  %5776 = vmatmul.bf16.vlgmr.msra.gmra.mxu3 %v13525_v4  ;;  %v12483_v52 = vld [vmem:[#allocation3 + $0x1f4] sm:$0xf0] }
 0x3e0   :  { %v10325_v60 = vld [vmem:[#allocation3 + $0x9b0] sm:$0xf0] }
 0x3e1   :  { %v12790_v61 = vld [vmem:[#allocation3 + $0xb94] sm:$0xf]  ;;  %v10328_v8 = vor.u32 %v12726_v59, %v10325_v60  ;;  %5820 = vmatpush.bf16.msrb.mxu3 %v11128_v62  ;;  %v5556_v62 = vpop.f32.mrf.mxu2 }
 0x3e2   :  { %v10581_v63 = vld [vmem:[#allocation3 + $0xbb0] sm:$0xf0] }
 0x3e3   :  { %v12854_v6 = vld [vmem:[#allocation3 + $0xd94] sm:$0xf]  ;;  %v10584_v9 = vor.u32 %v12790_v61, %v10581_v63  ;;  %5782 = vmatpush.bf16.msrb.mxu0 %v10328_v8  ;;  %v5569_v8 = vpop.f32.mrf.mxu3 }
 0x3e4   :  { %v10837_v2 = vld [vmem:[#allocation3 + $0xdb0] sm:$0xf0] }
 0x3e5   :  { %v12918_v38 = vld [vmem:[#allocation3 + $0xf94] sm:$0xf]  ;;  %v10840_v11 = vor.u32 %v12854_v6, %v10837_v2  ;;  %5795 = vmatpush.bf16.msrb.mxu1 %v10584_v9 }
 0x3e6   :  { %v11093_v3 = vld [vmem:[#allocation3 + $0xfb0] sm:$0xf0] }
 0x3e7   :  { %v12718_v12 = vld [vmem:[#allocation3 + $0x954] sm:$0xf]  ;;  %v11096_v15 = vor.u32 %v12918_v38, %v11093_v3  ;;  %5808 = vmatpush.bf16.msrb.mxu2 %v10840_v11  ;;  %v5557_v3 = vadd.f32 %v5556_v62, %v5544_v56  ;;  %v9307_v62 = vld [vmem:[#allocation3 + $0x198] sm:$0xf] }
 0x3e8   :  { %v10293_v13 = vld [vmem:[#allocation3 + $0x970] sm:$0xf0] }
 0x3e9   :  { %v12782_v14 = vld [vmem:[#allocation3 + $0xb54] sm:$0xf]  ;;  %v10296_v25 = vor.u32 %v12718_v12, %v10293_v13  ;;  %5821 = vmatpush.bf16.msrb.mxu3 %v11096_v15  ;;  %v13606_v13 = vadd.f32 %v5569_v8, %v5557_v3  ;;  %v5558_v43 = vpop.f32.mrf.mxu2  ;;  %v9819_v3 = vld [vmem:[#allocation3 + $0x598] sm:$0xf] }
 0x3ea   :  { %v10549_v17 = vld [vmem:[#allocation3 + $0xb70] sm:$0xf0]  ;;  %v12603_v8 = vld [vmem:[#allocation3 + $0x5b4] sm:$0xf0] }
 0x3eb   :  { %v12846_v20 = vld [vmem:[#allocation3 + $0xd54] sm:$0xf]  ;;  %v10552_v28 = vor.u32 %v12782_v14, %v10549_v17  ;;  %5783 = vmatpush.bf16.msrb.mxu0 %v10296_v25  ;;  %v5532_v14 = vpop.f32.mrf.mxu0  ;;  %v10011_v43 = vld [vmem:[#allocation3 + $0x718] sm:$0xf] }
 0x3ec   :  { %v10805_v21 = vld [vmem:[#allocation3 + $0xd70] sm:$0xf0] }
 0x3ed   :  { %v12910_v23 = vld [vmem:[#allocation3 + $0xf54] sm:$0xf]  ;;  %v10808_v29 = vor.u32 %v12846_v20, %v10805_v21  ;;  %5796 = vmatpush.bf16.msrb.mxu1 %v10552_v28 }
 0x3ee   :  { %v11061_v24 = vld [vmem:[#allocation3 + $0xf70] sm:$0xf0] }
 0x3ef   :  { %v12710_v26 = vld [vmem:[#allocation3 + $0x914] sm:$0xf]  ;;  %v11064_v35 = vor.u32 %v12910_v23, %v11061_v24  ;;  %5809 = vmatpush.bf16.msrb.mxu2 %v10808_v29  ;;  %v5545_v24 = vpop.f32.mrf.mxu1 }
 0x3f0   :  { %v10261_v30 = vld [vmem:[#allocation3 + $0x930] sm:$0xf0]  ;;  %v12531_v24 = vld [vmem:[#allocation3 + $0x374] sm:$0xf0] }
 0x3f1   :  { %v12774_v33 = vld [vmem:[#allocation3 + $0xb14] sm:$0xf]  ;;  %v10264_v42 = vor.u32 %v12710_v26, %v10261_v30  ;;  %5822 = vmatpush.bf16.msrb.mxu3 %v11064_v35 }
 0x3f2   :  { %v10517_v36 = vld [vmem:[#allocation3 + $0xb30] sm:$0xf0] }
 0x3f3   :  { %v12838_v37 = vld [vmem:[#allocation3 + $0xd14] sm:$0xf]  ;;  %v10520_v44 = vor.u32 %v12774_v33, %v10517_v36  ;;  %5784 = vmatpush.bf16.msrb.mxu0 %v10264_v42 }
 0x3f4   :  { %v10773_v40 = vld [vmem:[#allocation3 + $0xd30] sm:$0xf0] }
 0x3f5   :  { %v12902_v10 = vld [vmem:[#allocation3 + $0xf14] sm:$0xf]  ;;  %v10776_v46 = vor.u32 %v12838_v37, %v10773_v40  ;;  %5797 = vmatpush.bf16.msrb.mxu1 %v10520_v44 }
 0x3f6   :  { %v11029_v41 = vld [vmem:[#allocation3 + $0xf30] sm:$0xf0] }
 0x3f7   :  { %v12702_v47 = vld [vmem:[#allocation3 + $0x8d4] sm:$0xf]  ;;  %v11032_v22 = vor.u32 %v12902_v10, %v11029_v41  ;;  %5810 = vmatpush.bf16.msrb.mxu2 %v10776_v46 }
 0x3f8   :  { %v10229_v48 = vld [vmem:[#allocation3 + $0x8f0] sm:$0xf0] }
 0x3f9   :  { %v12766_v49 = vld [vmem:[#allocation3 + $0xad4] sm:$0xf]  ;;  %v10232_v57 = vor.u32 %v12702_v47, %v10229_v48  ;;  %5823 = vmatpush.bf16.msrb.mxu3 %v11032_v22  ;;  %v9595_v22 = vld [vmem:[#allocation3 + $0x3d8] sm:$0xf] }
 0x3fa   :  { %v10485_v53 = vld [vmem:[#allocation3 + $0xaf0] sm:$0xf0] }
 0x3fb   :  { %v12830_v54 = vld [vmem:[#allocation3 + $0xcd4] sm:$0xf]  ;;  %v10488_v58 = vor.u32 %v12766_v49, %v10485_v53  ;;  %5785 = vmatpush.bf16.msrb.mxu0 %v10232_v57  ;;  %v5571_v49 = vpop.f32.mrf.mxu3  ;;  %v10107_v57 = vld [vmem:[#allocation3 + $0x7d8] sm:$0xf] }
 0x3fc   :  { %v10741_v0 = vld [vmem:[#allocation3 + $0xcf0] sm:$0xf0] }
 0x3fd   :  { %v12894_v1 = vld [vmem:[#allocation3 + $0xed4] sm:$0xf]  ;;  %v10744_v7 = vor.u32 %v12830_v54, %v10741_v0  ;;  %5798 = vmatpush.bf16.msrb.mxu1 %v10488_v58  ;;  %v12547_v54 = vld [vmem:[#allocation3 + $0x3f4] sm:$0xf0] }
 0x3fe   :  { %v10997_v55 = vld [vmem:[#allocation3 + $0xef0] sm:$0xf0]  ;;  %v9851_v0 = vld [vmem:[#allocation3 + $0x5d8] sm:$0xf] }
 0x3ff   :  { %v12694_v59 = vld [vmem:[#allocation3 + $0x894] sm:$0xf]  ;;  %v11000_v63 = vor.u32 %v12894_v1, %v10997_v55  ;;  %5811 = vmatpush.bf16.msrb.mxu2 %v10744_v7  ;;  %v12611_v1 = vld [vmem:[#allocation3 + $0x5f4] sm:$0xf0] }
 0x400   :  { %v10197_v60 = vld [vmem:[#allocation3 + $0x8b0] sm:$0xf0]  ;;  %v12675_v58 = vld [vmem:[#allocation3 + $0x7f4] sm:$0xf0] }
 0x401   :  { %v12758_v61 = vld [vmem:[#allocation3 + $0xa94] sm:$0xf]  ;;  %v10200_v12 = vor.u32 %v12694_v59, %v10197_v60  ;;  %5824 = vmatpush.bf16.msrb.mxu3 %v11000_v63  ;;  %v9340_v59 = vor.u32 %v12483_v52, %v9339_v51  ;;  %v9596_v60 = vor.u32 %v12547_v54, %v9595_v22  ;;  %v12475_v63 = vld [vmem:[#allocation3 + $0x1b4] sm:$0xf0]  ;;  %v5595_v54 = vpop.f32.mrf.mxu1 }
 0x402   :  { %v10453_v6 = vld [vmem:[#allocation3 + $0xab0] sm:$0xf0]  ;;  %v9211_v51 = vld [vmem:[#allocation3 + $0xd8] sm:$0xf] }
 0x403   :  { %v12822_v2 = vld [vmem:[#allocation3 + $0xc94] sm:$0xf]  ;;  %v10456_v15 = vor.u32 %v12758_v61, %v10453_v6  ;;  %5786 = vmatpush.bf16.msrb.mxu0 %v10200_v12  ;;  %v9852_v61 = vor.u32 %v12611_v1, %v9851_v0  ;;  %v9563_v6 = vld [vmem:[#allocation3 + $0x398] sm:$0xf]  ;;  %v9308_v12 = vor.u32 %v12475_v63, %v9307_v62 }
 0x404   :  { %v10709_v38 = vld [vmem:[#allocation3 + $0xcb0] sm:$0xf0]  ;;  %v12451_v52 = vld [vmem:[#allocation3 + $0xf4] sm:$0xf0] }
 0x405   :  { %v12886_v9 = vld [vmem:[#allocation3 + $0xe94] sm:$0xf]  ;;  %v10712_v17 = vor.u32 %v12822_v2, %v10709_v38  ;;  %5799 = vmatpush.bf16.msrb.mxu1 %v10456_v15  ;;  %v10108_v2 = vor.u32 %v12675_v58, %v10107_v57  ;;  %v12539_v38 = vld [vmem:[#allocation3 + $0x3b4] sm:$0xf0]  ;;  %v9820_v15 = vor.u32 %v12603_v8, %v9819_v3 }
 0x406   :  { %v10965_v11 = vld [vmem:[#allocation3 + $0xeb0] sm:$0xf0]  ;;  %v9564_v14 = vor.u32 %v12539_v38, %v9563_v6  ;;  %v9467_v22 = vld [vmem:[#allocation3 + $0x2d8] sm:$0xf] }
 0x407   :  { %v12686_v20 = vld [vmem:[#allocation3 + $0x854] sm:$0xf]  ;;  %v10968_v25 = vor.u32 %v12886_v9, %v10965_v11  ;;  %5812 = vmatpush.bf16.msrb.mxu2 %v10712_v17  ;;  %v10075_v9 = vld [vmem:[#allocation3 + $0x798] sm:$0xf] }
 0x408   :  { %v10165_v21 = vld [vmem:[#allocation3 + $0x870] sm:$0xf0]  ;;  %v12667_v11 = vld [vmem:[#allocation3 + $0x7b4] sm:$0xf0] }
 0x409   :  { %v12750_v23 = vld [vmem:[#allocation3 + $0xa54] sm:$0xf]  ;;  %v10168_v34 = vor.u32 %v12686_v20, %v10165_v21  ;;  %5825 = vmatpush.bf16.msrb.mxu3 %v10968_v25  ;;  %v9275_v17 = vld [vmem:[#allocation3 + $0x158] sm:$0xf] }
 0x40a   :  { %v10421_v26 = vld [vmem:[#allocation3 + $0xa70] sm:$0xf0]  ;;  %v12467_v20 = vld [vmem:[#allocation3 + $0x174] sm:$0xf0] }
 0x40b   :  { %v12814_v28 = vld [vmem:[#allocation3 + $0xc54] sm:$0xf]  ;;  %v10424_v37 = vor.u32 %v12750_v23, %v10421_v26  ;;  %5787 = vmatpush.bf16.msrb.mxu0 %v10168_v34  ;;  %v9531_v21 = vld [vmem:[#allocation3 + $0x358] sm:$0xf]  ;;  %v10076_v23 = vor.u32 %v12667_v11, %v10075_v9  ;;  %v5621_v11 = vpop.f32.mrf.mxu3 }
 0x40c   :  { %v10677_v29 = vld [vmem:[#allocation3 + $0xc70] sm:$0xf0]  ;;  %v9787_v25 = vld [vmem:[#allocation3 + $0x558] sm:$0xf] }
 0x40d   :  { %v12878_v30 = vld [vmem:[#allocation3 + $0xe54] sm:$0xf]  ;;  %v10680_v40 = vor.u32 %v12814_v28, %v10677_v29  ;;  %5800 = vmatpush.bf16.msrb.mxu1 %v10424_v37  ;;  %v12595_v26 = vld [vmem:[#allocation3 + $0x574] sm:$0xf0] }
 0x40e   :  { %v10933_v33 = vld [vmem:[#allocation3 + $0xe70] sm:$0xf0]  ;;  %v10043_v28 = vld [vmem:[#allocation3 + $0x758] sm:$0xf]  ;;  %v9788_v34 = vor.u32 %v12595_v26, %v9787_v25 }
 0x40f   :  { %v12678_v35 = vld [vmem:[#allocation3 + $0x814] sm:$0xf]  ;;  %v10936_v44 = vor.u32 %v12878_v30, %v10933_v33  ;;  %5813 = vmatpush.bf16.msrb.mxu2 %v10680_v40  ;;  %v12659_v29 = vld [vmem:[#allocation3 + $0x774] sm:$0xf0]  ;;  %v9276_v30 = vor.u32 %v12467_v20, %v9275_v17  ;;  %v9532_v33 = vor.u32 %v12531_v24, %v9531_v21 }
 0x410   :  { %v10133_v36 = vld [vmem:[#allocation3 + $0x830] sm:$0xf0]  ;;  %v9499_v37 = vld [vmem:[#allocation3 + $0x318] sm:$0xf]  ;;  %v10044_v40 = vor.u32 %v12659_v29, %v10043_v28  ;;  %v5597_v29 = vpop.f32.mrf.mxu1 }
 0x411   :  { %v12742_v10 = vld [vmem:[#allocation3 + $0xa14] sm:$0xf]  ;;  %v10136_v53 = vor.u32 %v12678_v35, %v10133_v36  ;;  %5826 = vmatpush.bf16.msrb.mxu3 %v10936_v44  ;;  %v9243_v35 = vld [vmem:[#allocation3 + $0x118] sm:$0xf] }
 0x412   :  { %v10389_v41 = vld [vmem:[#allocation3 + $0xa30] sm:$0xf0]  ;;  %v12459_v36 = vld [vmem:[#allocation3 + $0x134] sm:$0xf0] }
 0x413   :  { %v12806_v42 = vld [vmem:[#allocation3 + $0xc14] sm:$0xf]  ;;  %v10392_v55 = vor.u32 %v12742_v10, %v10389_v41  ;;  %5788 = vmatpush.bf16.msrb.mxu0 %v10136_v53  ;;  %v12523_v10 = vld [vmem:[#allocation3 + $0x334] sm:$0xf0] }
 0x414   :  { %v10645_v46 = vld [vmem:[#allocation3 + $0xc30] sm:$0xf0]  ;;  %v9755_v41 = vld [vmem:[#allocation3 + $0x518] sm:$0xf] }
 0x415   :  { %v12870_v47 = vld [vmem:[#allocation3 + $0xe14] sm:$0xf]  ;;  %v10648_v56 = vor.u32 %v12806_v42, %v10645_v46  ;;  %5801 = vmatpush.bf16.msrb.mxu1 %v10392_v55  ;;  %v12587_v42 = vld [vmem:[#allocation3 + $0x534] sm:$0xf0]  ;;  %v9244_v46 = vor.u32 %v12459_v36, %v9243_v35 }
 0x416   :  { %v10901_v48 = vld [vmem:[#allocation3 + $0xe30] sm:$0xf0]  ;;  %5789 = vmatmul.bf16.vlgmr.msrb.gmra.mxu0 %v13528_v16  ;;  %v12651_v44 = vld [vmem:[#allocation3 + $0x734] sm:$0xf0]  ;;  %v9756_v49 = vor.u32 %v12587_v42, %v9755_v41 }
 0x417   :  { %v10904_v7 = vor.u32 %v12870_v47, %v10901_v48  ;;  %5814 = vmatpush.bf16.msrb.mxu2 %v10648_v56  ;;  %5833 = vmatpush.bf16.msra.mxu0 %v9340_v59  ;;  %v5582_v47 = vpop.f32.mrf.mxu0  ;;  %v9500_v48 = vor.u32 %v12523_v10, %v9499_v37  ;;  %v10012_v0 = vor.u32 %v12651_v44, %v10011_v43  ;;  %v12515_v1 = vld [vmem:[#allocation3 + $0x2f4] sm:$0xf0] }
 0x418   :  { %5802 = vmatmul.bf16.vlgmr.msrb.gmra.mxu1 %v13531_v31  ;;  %v5583_v53 = vadd.f32 %v5582_v47, %v13606_v13  ;;  %v9723_v55 = vld [vmem:[#allocation3 + $0x4d8] sm:$0xf]  ;;  %v9212_v59 = vor.u32 %v12451_v52, %v9211_v51 }
 0x419   :  { %5827 = vmatpush.bf16.msrb.mxu3 %v10904_v7  ;;  %5846 = vmatpush.bf16.msra.mxu1 %v9596_v60  ;;  %v12579_v56 = vld [vmem:[#allocation3 + $0x4f4] sm:$0xf0]  ;;  %v9468_v60 = vor.u32 %v12515_v1, %v9467_v22 }
 0x41a   :  { %5815 = vmatmul.bf16.vlgmr.msrb.gmra.mxu2 %v13534_v50  ;;  %v9979_v57 = vld [vmem:[#allocation3 + $0x6d8] sm:$0xf]  ;;  %v5596_v7 = vadd.f32 %v5595_v54, %v5583_v53  ;;  %v5623_v54 = vpop.f32.mrf.mxu3 }
 0x41b   :  { %5859 = vmatpush.bf16.msra.mxu2 %v9852_v61  ;;  %5834 = vmatpush.bf16.msra.mxu0 %v9308_v12  ;;  %v12643_v58 = vld [vmem:[#allocation3 + $0x6f4] sm:$0xf0]  ;;  %v9724_v61 = vor.u32 %v12579_v56, %v9723_v55 }
 0x41c   :  { %5828 = vmatmul.bf16.vlgmr.msrb.gmra.mxu3 %v13537_v5  ;;  %v9179_v62 = vld [vmem:[#allocation3 + $0x98] sm:$0xf]  ;;  %v9980_v13 = vor.u32 %v12643_v58, %v9979_v57 }
 0x41d   :  { %5872 = vmatpush.bf16.msra.mxu3 %v10108_v2  ;;  %5847 = vmatpush.bf16.msra.mxu1 %v9564_v14  ;;  %v12443_v63 = vld [vmem:[#allocation3 + $0xb4] sm:$0xf0]  ;;  %v5608_v2 = vpop.f32.mrf.mxu2 }
 0x41e   :  { %v9435_v6 = vld [vmem:[#allocation3 + $0x298] sm:$0xf]  ;;  %v5609_v9 = vadd.f32 %v5608_v2, %v5596_v7 }
 0x41f   :  { %5860 = vmatpush.bf16.msra.mxu2 %v9820_v15  ;;  %5835 = vmatpush.bf16.msra.mxu0 %v9276_v30  ;;  %v12507_v38 = vld [vmem:[#allocation3 + $0x2b4] sm:$0xf0]  ;;  %v9180_v15 = vor.u32 %v12443_v63, %v9179_v62  ;;  %v5584_v21 = vpop.f32.mrf.mxu0 }
 0x420   :  { %v9691_v3 = vld [vmem:[#allocation3 + $0x498] sm:$0xf]  ;;  %v5622_v17 = vadd.f32 %v5621_v11, %v5609_v9 }
 0x421   :  { %5873 = vmatpush.bf16.msra.mxu3 %v10076_v23  ;;  %5848 = vmatpush.bf16.msra.mxu1 %v9532_v33  ;;  %v12571_v8 = vld [vmem:[#allocation3 + $0x4b4] sm:$0xf0]  ;;  %v9436_v23 = vor.u32 %v12507_v38, %v9435_v6 }
 0x422   :  { %v9947_v12 = vld [vmem:[#allocation3 + $0x698] sm:$0xf]  ;;  %v9692_v24 = vor.u32 %v12571_v8, %v9691_v3  ;;  %v6044_v33 = vmax.f32 %v5622_v17, 0.0 }
 0x423   :  { %5861 = vmatpush.bf16.msra.mxu2 %v9788_v34  ;;  %5836 = vmatpush.bf16.msra.mxu0 %v9244_v46  ;;  %v12635_v14 = vld [vmem:[#allocation3 + $0x6b4] sm:$0xf0] }
 0x424   :  { %v9147_v20 = vld [vmem:[#allocation3 + $0x58] sm:$0xf]  ;;  %v9948_v30 = vor.u32 %v12635_v14, %v9947_v12 }
 0x425   :  { %5874 = vmatpush.bf16.msra.mxu3 %v10044_v40  ;;  %5849 = vmatpush.bf16.msra.mxu1 %v9500_v48  ;;  %v12435_v25 = vld [vmem:[#allocation3 + $0x74] sm:$0xf0]  ;;  %v13613_v40 = vpack.c.bf16 %v6044_v33, %v6044_v33 }
 0x426   :  { %v9403_v26 = vld [vmem:[#allocation3 + $0x258] sm:$0xf]  ;;  %v9148_v10 = vor.u32 %v12435_v25, %v9147_v20 }
 0x427   :  { %5862 = vmatpush.bf16.msra.mxu2 %v9756_v49  ;;  %5837 = vmatpush.bf16.msra.mxu0 %v9212_v59  ;;  %v12499_v28 = vld [vmem:[#allocation3 + $0x274] sm:$0xf0]  ;;  %v5610_v49 = vpop.f32.mrf.mxu2  ;;  %v5634_v54 = vpop.f32.mrf.mxu0 }
 0x428   :  { %v9659_v34 = vld [vmem:[#allocation3 + $0x458] sm:$0xf]  ;;  %v9404_v43 = vor.u32 %v12499_v28, %v9403_v26 }
 0x429   :  { %5875 = vmatpush.bf16.msra.mxu3 %v10012_v0  ;;  %5850 = vmatpush.bf16.msra.mxu1 %v9468_v60  ;;  %v12563_v35 = vld [vmem:[#allocation3 + $0x474] sm:$0xf0] }
 0x42a   :  { %v9915_v36 = vld [vmem:[#allocation3 + $0x658] sm:$0xf]  ;;  %v9660_v44 = vor.u32 %v12563_v35, %v9659_v34 }
 0x42b   :  { %5863 = vmatpush.bf16.msra.mxu2 %v9724_v61  ;;  %v12627_v37 = vld [vmem:[#allocation3 + $0x674] sm:$0xf0]  ;;  %5838 = vmatpush.bf16.msra.mxu0 %v9180_v15 }
 0x42c   :  { %v9115_v41 = vld [vmem:[#allocation3 + $0x18] sm:$0xf]  ;;  %v9916_v51 = vor.u32 %v12627_v37, %v9915_v36 }
 0x42d   :  { %5876 = vmatpush.bf16.msra.mxu3 %v9980_v13  ;;  %v12427_v42 = vld [vmem:[#allocation3 + $0x34] sm:$0xf0]  ;;  %5851 = vmatpush.bf16.msra.mxu1 %v9436_v23 }
 0x42e   :  { %v9371_v46 = vld [vmem:[#allocation3 + $0x218] sm:$0xf]  ;;  %v9116_v56 = vor.u32 %v12427_v42, %v9115_v41 }
 0x42f   :  { %5864 = vmatpush.bf16.msra.mxu2 %v9692_v24  ;;  %v12491_v47 = vld [vmem:[#allocation3 + $0x234] sm:$0xf0]  ;;  %5839 = vmatpush.bf16.msra.mxu0 %v9148_v10 }
 0x430   :  { %v9627_v48 = vld [vmem:[#allocation3 + $0x418] sm:$0xf]  ;;  %v9372_v59 = vor.u32 %v12491_v47, %v9371_v46 }
 0x431   :  { %5877 = vmatpush.bf16.msra.mxu3 %v9948_v30  ;;  %v12555_v52 = vld [vmem:[#allocation3 + $0x434] sm:$0xf0]  ;;  %5852 = vmatpush.bf16.msra.mxu1 %v9404_v43 }
 0x432   :  { %v9883_v22 = vld [vmem:[#allocation3 + $0x618] sm:$0xf]  ;;  %v9628_v60 = vor.u32 %v12555_v52, %v9627_v48 }
 0x433   :  { %v12619_v53 = vld [vmem:[#allocation3 + $0x634] sm:$0xf0]  ;;  %5865 = vmatpush.bf16.msra.mxu2 %v9660_v44  ;;  %5840 = vmatpush.bf16.msra.mxu0 %v9116_v56  ;;  %v13619_v44 = vld [vmem:[#allocation11] sm:$0xff] }
 0x434   :  { %v10363_v0 = vld [vmem:[#allocation3 + $0x9d8] sm:$0xf]  ;;  %v9884_v63 = vor.u32 %v12619_v53, %v9883_v22  ;;  %v2637_v46 = vperm.slane %v13619_v44, 4 }
 0x435   :  { %v12739_v1 = vld [vmem:[#allocation3 + $0x9f4] sm:$0xf0]  ;;  %5878 = vmatpush.bf16.msra.mxu3 %v9916_v51  ;;  %5853 = vmatpush.bf16.msra.mxu1 %v9372_v59 }
 0x436   :  { %v10619_v55 = vld [vmem:[#allocation3 + $0xbd8] sm:$0xf]  ;;  %v10364_v6 = vor.u32 %v12739_v1, %v10363_v0  ;;  %5841 = vmatmul.bf16.vlgmr.msra.gmra.mxu0 %v13504_v45 }
 0x437   :  { %v12803_v57 = vld [vmem:[#allocation3 + $0xbf4] sm:$0xf0]  ;;  %5866 = vmatpush.bf16.msra.mxu2 %v9628_v60 }
 0x438   :  { %v10875_v58 = vld [vmem:[#allocation3 + $0xdd8] sm:$0xf]  ;;  %v10620_v2 = vor.u32 %v12803_v57, %v10619_v55  ;;  %5885 = vmatpush.bf16.msrb.mxu0 %v10364_v6  ;;  %5854 = vmatmul.bf16.vlgmr.msra.gmra.mxu1 %v13511_v39 }
 0x439   :  { %v12867_v7 = vld [vmem:[#allocation3 + $0xdf4] sm:$0xf0]  ;;  %5879 = vmatpush.bf16.msra.mxu3 %v9884_v63 }
 0x43a   :  { %v11131_v61 = vld [vmem:[#allocation3 + $0xfd8] sm:$0xf]  ;;  %v10876_v13 = vor.u32 %v12867_v7, %v10875_v58  ;;  %5898 = vmatpush.bf16.msrb.mxu1 %v10620_v2  ;;  %5867 = vmatmul.bf16.vlgmr.msra.gmra.mxu2 %v13518_v32  ;;  %v5635_v58 = vadd.f32 %v5634_v54, %v2637_v46  ;;  %v5647_v7 = vpop.f32.mrf.mxu1 }
 0x43b   :  { %v12931_v62 = vld [vmem:[#allocation3 + $0xff4] sm:$0xf0] }
 0x43c   :  { %v10331_v38 = vld [vmem:[#allocation3 + $0x998] sm:$0xf]  ;;  %v11132_v9 = vor.u32 %v12931_v62, %v11131_v61  ;;  %5911 = vmatpush.bf16.msrb.mxu2 %v10876_v13  ;;  %5880 = vmatmul.bf16.vlgmr.msra.gmra.mxu3 %v13525_v4  ;;  %v5648_v2 = vadd.f32 %v5647_v7, %v5635_v58 }
 0x43d   :  { %v12731_v3 = vld [vmem:[#allocation3 + $0x9b4] sm:$0xf0] }
 0x43e   :  { %v10587_v8 = vld [vmem:[#allocation3 + $0xb98] sm:$0xf]  ;;  %v10332_v20 = vor.u32 %v12731_v3, %v10331_v38  ;;  %5924 = vmatpush.bf16.msrb.mxu3 %v11132_v9 }
 0x43f   :  { %v12795_v11 = vld [vmem:[#allocation3 + $0xbb4] sm:$0xf0] }
 0x440   :  { %v10843_v12 = vld [vmem:[#allocation3 + $0xd98] sm:$0xf]  ;;  %v10588_v21 = vor.u32 %v12795_v11, %v10587_v8  ;;  %5886 = vmatpush.bf16.msrb.mxu0 %v10332_v20 }
 0x441   :  { %v12859_v14 = vld [vmem:[#allocation3 + $0xdb4] sm:$0xf0] }
 0x442   :  { %v11099_v15 = vld [vmem:[#allocation3 + $0xf98] sm:$0xf]  ;;  %v10844_v23 = vor.u32 %v12859_v14, %v10843_v12  ;;  %5899 = vmatpush.bf16.msrb.mxu1 %v10588_v21  ;;  %v5660_v12 = vpop.f32.mrf.mxu2 }
 0x443   :  { %v12923_v17 = vld [vmem:[#allocation3 + $0xfb4] sm:$0xf0]  ;;  %v5661_v21 = vadd.f32 %v5660_v12, %v5648_v2  ;;  %v9853_v2 = vld [vmem:[#allocation3 + $0x5f8] sm:$0xf0] }
 0x444   :  { %v10299_v24 = vld [vmem:[#allocation3 + $0x958] sm:$0xf]  ;;  %v11100_v28 = vor.u32 %v12923_v17, %v11099_v15  ;;  %5912 = vmatpush.bf16.msrb.mxu2 %v10844_v23  ;;  %v5673_v23 = vpop.f32.mrf.mxu3 }
 0x445   :  { %v12723_v25 = vld [vmem:[#allocation3 + $0x974] sm:$0xf0] }
 0x446   :  { %v10555_v26 = vld [vmem:[#allocation3 + $0xb58] sm:$0xf]  ;;  %v10300_v36 = vor.u32 %v12723_v25, %v10299_v24  ;;  %5925 = vmatpush.bf16.msrb.mxu3 %v11100_v28  ;;  %v13622_v28 = vadd.f32 %v5673_v23, %v5661_v21  ;;  %v9565_v23 = vld [vmem:[#allocation3 + $0x3b8] sm:$0xf0] }
 0x447   :  { %v12787_v29 = vld [vmem:[#allocation3 + $0xb74] sm:$0xf0] }
 0x448   :  { %v10811_v30 = vld [vmem:[#allocation3 + $0xd58] sm:$0xf]  ;;  %v10556_v10 = vor.u32 %v12787_v29, %v10555_v26  ;;  %5887 = vmatpush.bf16.msrb.mxu0 %v10300_v36  ;;  %v5636_v29 = vpop.f32.mrf.mxu0 }
 0x449   :  { %v12851_v33 = vld [vmem:[#allocation3 + $0xd74] sm:$0xf0]  ;;  %v10077_v29 = vld [vmem:[#allocation3 + $0x7b8] sm:$0xf0] }
 0x44a   :  { %v11067_v34 = vld [vmem:[#allocation3 + $0xf58] sm:$0xf]  ;;  %v10812_v41 = vor.u32 %v12851_v33, %v10811_v30  ;;  %5900 = vmatpush.bf16.msrb.mxu1 %v10556_v10 }
 0x44b   :  { %v12915_v35 = vld [vmem:[#allocation3 + $0xf74] sm:$0xf0] }
 0x44c   :  { %v10267_v37 = vld [vmem:[#allocation3 + $0x918] sm:$0xf]  ;;  %v11068_v47 = vor.u32 %v12915_v35, %v11067_v34  ;;  %5913 = vmatpush.bf16.msrb.mxu2 %v10812_v41  ;;  %v5675_v7 = vpop.f32.mrf.mxu3 }
 0x44d   :  { %v12715_v42 = vld [vmem:[#allocation3 + $0x934] sm:$0xf0] }
 0x44e   :  { %v10523_v43 = vld [vmem:[#allocation3 + $0xb18] sm:$0xf]  ;;  %v10268_v53 = vor.u32 %v12715_v42, %v10267_v37  ;;  %5926 = vmatpush.bf16.msrb.mxu3 %v11068_v47  ;;  %v5649_v37 = vpop.f32.mrf.mxu1 }
 0x44f   :  { %v12779_v48 = vld [vmem:[#allocation3 + $0xb34] sm:$0xf0]  ;;  %v12527_v37 = vld [vmem:[#allocation3 + $0x35c] sm:$0xf] }
 0x450   :  { %v10779_v49 = vld [vmem:[#allocation3 + $0xd18] sm:$0xf]  ;;  %v10524_v0 = vor.u32 %v12779_v48, %v10523_v43  ;;  %5888 = vmatpush.bf16.msrb.mxu0 %v10268_v53  ;;  %v5686_v7 = vpop.f32.mrf.mxu0 }
 0x451   :  { %v12843_v51 = vld [vmem:[#allocation3 + $0xd34] sm:$0xf0] }
 0x452   :  { %v11035_v52 = vld [vmem:[#allocation3 + $0xf18] sm:$0xf]  ;;  %v10780_v1 = vor.u32 %v12843_v51, %v10779_v49  ;;  %5901 = vmatpush.bf16.msrb.mxu1 %v10524_v0 }
 0x453   :  { %v12907_v22 = vld [vmem:[#allocation3 + $0xf34] sm:$0xf0] }
 0x454   :  { %v10235_v55 = vld [vmem:[#allocation3 + $0x8d8] sm:$0xf]  ;;  %v11036_v59 = vor.u32 %v12907_v22, %v11035_v52  ;;  %5914 = vmatpush.bf16.msrb.mxu2 %v10780_v1  ;;  %v5662_v1 = vpop.f32.mrf.mxu2 }
 0x455   :  { %v12707_v56 = vld [vmem:[#allocation3 + $0x8f4] sm:$0xf0]  ;;  %v12583_v1 = vld [vmem:[#allocation3 + $0x51c] sm:$0xf] }
 0x456   :  { %v10491_v57 = vld [vmem:[#allocation3 + $0xad8] sm:$0xf]  ;;  %v10236_v13 = vor.u32 %v12707_v56, %v10235_v55  ;;  %5927 = vmatpush.bf16.msrb.mxu3 %v11036_v59  ;;  %v12479_v59 = vld [vmem:[#allocation3 + $0x1dc] sm:$0xf] }
 0x457   :  { %v12771_v60 = vld [vmem:[#allocation3 + $0xaf4] sm:$0xf0] }
 0x458   :  { %v10747_v61 = vld [vmem:[#allocation3 + $0xcd8] sm:$0xf]  ;;  %v10492_v38 = vor.u32 %v12771_v60, %v10491_v57  ;;  %5889 = vmatpush.bf16.msrb.mxu0 %v10236_v13  ;;  %v9341_v60 = vld [vmem:[#allocation3 + $0x1f8] sm:$0xf0] }
 0x459   :  { %v12835_v62 = vld [vmem:[#allocation3 + $0xcf4] sm:$0xf0] }
 0x45a   :  { %v11003_v63 = vld [vmem:[#allocation3 + $0xed8] sm:$0xf]  ;;  %v10748_v3 = vor.u32 %v12835_v62, %v10747_v61  ;;  %5902 = vmatpush.bf16.msrb.mxu1 %v10492_v38  ;;  %v12543_v61 = vld [vmem:[#allocation3 + $0x3dc] sm:$0xf] }
 0x45b   :  { %v12899_v6 = vld [vmem:[#allocation3 + $0xef4] sm:$0xf0] }
 0x45c   :  { %v10203_v8 = vld [vmem:[#allocation3 + $0x898] sm:$0xf]  ;;  %v11004_v14 = vor.u32 %v12899_v6, %v11003_v63  ;;  %5915 = vmatpush.bf16.msrb.mxu2 %v10748_v3  ;;  %v9597_v63 = vld [vmem:[#allocation3 + $0x3f8] sm:$0xf0] }
 0x45d   :  { %v12699_v9 = vld [vmem:[#allocation3 + $0x8b4] sm:$0xf0]  ;;  %v12607_v6 = vld [vmem:[#allocation3 + $0x5dc] sm:$0xf]  ;;  %v9600_v12 = vor.u32 %v12543_v61, %v9597_v63 }
 0x45e   :  { %v10459_v11 = vld [vmem:[#allocation3 + $0xa98] sm:$0xf]  ;;  %v10204_v26 = vor.u32 %v12699_v9, %v10203_v8  ;;  %5928 = vmatpush.bf16.msrb.mxu3 %v11004_v14  ;;  %v12671_v3 = vld [vmem:[#allocation3 + $0x7dc] sm:$0xf]  ;;  %v9856_v14 = vor.u32 %v12607_v6, %v9853_v2  ;;  %v5687_v6 = vadd.f32 %v5686_v7, %v13622_v28  ;;  %v5699_v2 = vpop.f32.mrf.mxu1 }
 0x45f   :  { %v12763_v15 = vld [vmem:[#allocation3 + $0xab4] sm:$0xf0]  ;;  %v10109_v8 = vld [vmem:[#allocation3 + $0x7f8] sm:$0xf0] }
 0x460   :  { %v10715_v17 = vld [vmem:[#allocation3 + $0xc98] sm:$0xf]  ;;  %v10460_v30 = vor.u32 %v12763_v15, %v10459_v11  ;;  %5890 = vmatpush.bf16.msrb.mxu0 %v10204_v26  ;;  %v9344_v11 = vor.u32 %v12479_v59, %v9341_v60  ;;  %v12471_v15 = vld [vmem:[#allocation3 + $0x19c] sm:$0xf]  ;;  %v10112_v21 = vor.u32 %v12671_v3, %v10109_v8 }
 0x461   :  { %v12827_v20 = vld [vmem:[#allocation3 + $0xcb4] sm:$0xf0]  ;;  %v12663_v26 = vld [vmem:[#allocation3 + $0x79c] sm:$0xf] }
 0x462   :  { %v10971_v24 = vld [vmem:[#allocation3 + $0xe98] sm:$0xf]  ;;  %v10716_v33 = vor.u32 %v12827_v20, %v10715_v17  ;;  %5903 = vmatpush.bf16.msrb.mxu1 %v10460_v30  ;;  %v9309_v17 = vld [vmem:[#allocation3 + $0x1b8] sm:$0xf0] }
 0x463   :  { %v12891_v25 = vld [vmem:[#allocation3 + $0xeb4] sm:$0xf0]  ;;  %v12535_v20 = vld [vmem:[#allocation3 + $0x39c] sm:$0xf]  ;;  %v9312_v30 = vor.u32 %v12471_v15, %v9309_v17 }
 0x464   :  { %v10171_v34 = vld [vmem:[#allocation3 + $0x858] sm:$0xf]  ;;  %v10972_v10 = vor.u32 %v12891_v25, %v10971_v24  ;;  %5916 = vmatpush.bf16.msrb.mxu2 %v10716_v33  ;;  %v12599_v24 = vld [vmem:[#allocation3 + $0x59c] sm:$0xf]  ;;  %v9568_v33 = vor.u32 %v12535_v20, %v9565_v23 }
 0x465   :  { %v12691_v35 = vld [vmem:[#allocation3 + $0x874] sm:$0xf0]  ;;  %v9821_v25 = vld [vmem:[#allocation3 + $0x5b8] sm:$0xf0] }
 0x466   :  { %v10427_v36 = vld [vmem:[#allocation3 + $0xa58] sm:$0xf]  ;;  %v10172_v48 = vor.u32 %v12691_v35, %v10171_v34  ;;  %5929 = vmatpush.bf16.msrb.mxu3 %v10972_v10  ;;  %v9824_v34 = vor.u32 %v12599_v24, %v9821_v25  ;;  %v12463_v35 = vld [vmem:[#allocation3 + $0x15c] sm:$0xf]  ;;  %v10080_v10 = vor.u32 %v12663_v26, %v10077_v29  ;;  %v5712_v24 = vpop.f32.mrf.mxu2 }
 0x467   :  { %v12755_v41 = vld [vmem:[#allocation3 + $0xa74] sm:$0xf0]  ;;  %v12447_v61 = vld [vmem:[#allocation3 + $0xdc] sm:$0xf] }
 0x468   :  { %v10683_v42 = vld [vmem:[#allocation3 + $0xc58] sm:$0xf]  ;;  %v10428_v52 = vor.u32 %v12755_v41, %v10427_v36  ;;  %5891 = vmatpush.bf16.msrb.mxu0 %v10172_v48  ;;  %v9277_v36 = vld [vmem:[#allocation3 + $0x178] sm:$0xf0] }
 0x469   :  { %v12819_v43 = vld [vmem:[#allocation3 + $0xc74] sm:$0xf0]  ;;  %v9533_v41 = vld [vmem:[#allocation3 + $0x378] sm:$0xf0]  ;;  %v9280_v48 = vor.u32 %v12463_v35, %v9277_v36 }
 0x46a   :  { %v10939_v46 = vld [vmem:[#allocation3 + $0xe58] sm:$0xf]  ;;  %v10684_v22 = vor.u32 %v12819_v43, %v10683_v42  ;;  %5904 = vmatpush.bf16.msrb.mxu1 %v10428_v52  ;;  %v12591_v42 = vld [vmem:[#allocation3 + $0x55c] sm:$0xf] }
 0x46b   :  { %v12883_v47 = vld [vmem:[#allocation3 + $0xe74] sm:$0xf0]  ;;  %v9789_v43 = vld [vmem:[#allocation3 + $0x578] sm:$0xf0] }
 0x46c   :  { %v10139_v49 = vld [vmem:[#allocation3 + $0x818] sm:$0xf]  ;;  %v10940_v55 = vor.u32 %v12883_v47, %v10939_v46  ;;  %5917 = vmatpush.bf16.msrb.mxu2 %v10684_v22  ;;  %v12655_v46 = vld [vmem:[#allocation3 + $0x75c] sm:$0xf] }
 0x46d   :  { %v12683_v51 = vld [vmem:[#allocation3 + $0x834] sm:$0xf0]  ;;  %v10045_v47 = vld [vmem:[#allocation3 + $0x778] sm:$0xf0] }
 0x46e   :  { %v10395_v53 = vld [vmem:[#allocation3 + $0xa18] sm:$0xf]  ;;  %v10140_v62 = vor.u32 %v12683_v51, %v10139_v49  ;;  %5930 = vmatpush.bf16.msrb.mxu3 %v10940_v55  ;;  %v9536_v49 = vor.u32 %v12527_v37, %v9533_v41  ;;  %v9792_v51 = vor.u32 %v12591_v42, %v9789_v43  ;;  %v12455_v52 = vld [vmem:[#allocation3 + $0x11c] sm:$0xf]  ;;  %v5688_v41 = vpop.f32.mrf.mxu0 }
 0x46f   :  { %v12747_v54 = vld [vmem:[#allocation3 + $0xa34] sm:$0xf0]  ;;  %v9245_v22 = vld [vmem:[#allocation3 + $0x138] sm:$0xf0] }
 0x470   :  { %v10651_v0 = vld [vmem:[#allocation3 + $0xc18] sm:$0xf]  ;;  %v10396_v13 = vor.u32 %v12747_v54, %v10395_v53  ;;  %5892 = vmatpush.bf16.msrb.mxu0 %v10140_v62  ;;  %v12519_v53 = vld [vmem:[#allocation3 + $0x31c] sm:$0xf]  ;;  %v10048_v54 = vor.u32 %v12655_v46, %v10045_v47 }
 0x471   :  { %v12811_v56 = vld [vmem:[#allocation3 + $0xc34] sm:$0xf0]  ;;  %v9757_v55 = vld [vmem:[#allocation3 + $0x538] sm:$0xf0] }
 0x472   :  { %v10907_v57 = vld [vmem:[#allocation3 + $0xe18] sm:$0xf]  ;;  %v10652_v38 = vor.u32 %v12811_v56, %v10651_v0  ;;  %5905 = vmatpush.bf16.msrb.mxu1 %v10396_v13  ;;  %v9501_v0 = vld [vmem:[#allocation3 + $0x338] sm:$0xf0]  ;;  %v9760_v60 = vor.u32 %v12583_v1, %v9757_v55 }
 0x473   :  { %v12875_v58 = vld [vmem:[#allocation3 + $0xe34] sm:$0xf0]  ;;  %5893 = vmatmul.bf16.vlgmr.msrb.gmra.mxu0 %v13528_v16  ;;  %v12647_v56 = vld [vmem:[#allocation3 + $0x71c] sm:$0xf]  ;;  %v9504_v59 = vor.u32 %v12519_v53, %v9501_v0 }
 0x474   :  { %v10908_v9 = vor.u32 %v12875_v58, %v10907_v57  ;;  %5918 = vmatpush.bf16.msrb.mxu2 %v10652_v38  ;;  %5937 = vmatpush.bf16.msra.mxu0 %v9344_v11  ;;  %v10013_v57 = vld [vmem:[#allocation3 + $0x738] sm:$0xf0]  ;;  %v9248_v58 = vor.u32 %v12455_v52, %v9245_v22 }
 0x475   :  { %5906 = vmatmul.bf16.vlgmr.msrb.gmra.mxu1 %v13531_v31  ;;  %v9213_v62 = vld [vmem:[#allocation3 + $0xf8] sm:$0xf0]  ;;  %v10016_v13 = vor.u32 %v12647_v56, %v10013_v57 }
 0x476   :  { %5931 = vmatpush.bf16.msrb.mxu3 %v10908_v9  ;;  %5950 = vmatpush.bf16.msra.mxu1 %v9600_v12  ;;  %v12511_v63 = vld [vmem:[#allocation3 + $0x2dc] sm:$0xf]  ;;  %v5700_v12 = vadd.f32 %v5699_v2, %v5687_v6 }
 0x477   :  { %5919 = vmatmul.bf16.vlgmr.msrb.gmra.mxu2 %v13534_v50  ;;  %v9469_v38 = vld [vmem:[#allocation3 + $0x2f8] sm:$0xf0] }
 0x478   :  { %5963 = vmatpush.bf16.msra.mxu2 %v9856_v14  ;;  %5938 = vmatpush.bf16.msra.mxu0 %v9312_v30  ;;  %v12575_v3 = vld [vmem:[#allocation3 + $0x4dc] sm:$0xf]  ;;  %v9216_v14 = vor.u32 %v12447_v61, %v9213_v62  ;;  %v9472_v15 = vor.u32 %v12511_v63, %v9469_v38  ;;  %v5713_v30 = vadd.f32 %v5712_v24, %v5700_v12  ;;  %v5714_v62 = vpop.f32.mrf.mxu2 }
 0x479   :  { %5932 = vmatmul.bf16.vlgmr.msrb.gmra.mxu3 %v13537_v5  ;;  %v9725_v8 = vld [vmem:[#allocation3 + $0x4f8] sm:$0xf0] }
 0x47a   :  { %5976 = vmatpush.bf16.msra.mxu3 %v10112_v21  ;;  %5951 = vmatpush.bf16.msra.mxu1 %v9568_v33  ;;  %v12639_v9 = vld [vmem:[#allocation3 + $0x6dc] sm:$0xf]  ;;  %v9728_v17 = vor.u32 %v12575_v3, %v9725_v8  ;;  %v5725_v33 = vpop.f32.mrf.mxu3 }
 0x47b   :  { %v9981_v11 = vld [vmem:[#allocation3 + $0x6f8] sm:$0xf0]  ;;  %v5726_v37 = vadd.f32 %v5725_v33, %v5713_v30 }
 0x47c   :  { %5964 = vmatpush.bf16.msra.mxu2 %v9824_v34  ;;  %5939 = vmatpush.bf16.msra.mxu0 %v9280_v48  ;;  %v12439_v20 = vld [vmem:[#allocation3 + $0x9c] sm:$0xf]  ;;  %v9984_v28 = vor.u32 %v12639_v9, %v9981_v11 }
 0x47d   :  { %v9181_v21 = vld [vmem:[#allocation3 + $0xb8] sm:$0xf0]  ;;  %v6045_v52 = vmax.f32 %v5726_v37, 0.0 }
 0x47e   :  { %5977 = vmatpush.bf16.msra.mxu3 %v10080_v10  ;;  %5952 = vmatpush.bf16.msra.mxu1 %v9536_v49  ;;  %v12503_v23 = vld [vmem:[#allocation3 + $0x29c] sm:$0xf]  ;;  %v9184_v36 = vor.u32 %v12439_v20, %v9181_v21  ;;  %v5701_v49 = vpop.f32.mrf.mxu1 }
 0x47f   :  { %v9437_v25 = vld [vmem:[#allocation3 + $0x2b8] sm:$0xf0]  ;;  %v13629_v1 = vpack.c.bf16 %v6045_v52, %v6045_v52 }
 0x480   :  { %5965 = vmatpush.bf16.msra.mxu2 %v9792_v51  ;;  %5940 = vmatpush.bf16.msra.mxu0 %v9248_v58  ;;  %v12567_v26 = vld [vmem:[#allocation3 + $0x49c] sm:$0xf]  ;;  %v9440_v42 = vor.u32 %v12503_v23, %v9437_v25 }
 0x481   :  { %v9693_v29 = vld [vmem:[#allocation3 + $0x4b8] sm:$0xf0] }
 0x482   :  { %5978 = vmatpush.bf16.msra.mxu3 %v10048_v54  ;;  %5953 = vmatpush.bf16.msra.mxu1 %v9504_v59  ;;  %v12631_v34 = vld [vmem:[#allocation3 + $0x69c] sm:$0xf]  ;;  %v9696_v43 = vor.u32 %v12567_v26, %v9693_v29  ;;  %v5727_v38 = vpop.f32.mrf.mxu3 }
 0x483   :  { %v9949_v35 = vld [vmem:[#allocation3 + $0x6b8] sm:$0xf0] }
 0x484   :  { %5966 = vmatpush.bf16.msra.mxu2 %v9760_v60  ;;  %5941 = vmatpush.bf16.msra.mxu0 %v9216_v14  ;;  %v12431_v10 = vld [vmem:[#allocation3 + $0x5c] sm:$0xf]  ;;  %v9952_v51 = vor.u32 %v12631_v34, %v9949_v35 }
 0x485   :  { %v9149_v46 = vld [vmem:[#allocation3 + $0x78] sm:$0xf0] }
 0x486   :  { %5979 = vmatpush.bf16.msra.mxu3 %v10016_v13  ;;  %5954 = vmatpush.bf16.msra.mxu1 %v9472_v15  ;;  %v12495_v47 = vld [vmem:[#allocation3 + $0x25c] sm:$0xf]  ;;  %v9152_v55 = vor.u32 %v12431_v10, %v9149_v46 }
 0x487   :  { %v9405_v48 = vld [vmem:[#allocation3 + $0x278] sm:$0xf0] }
 0x488   :  { %5967 = vmatpush.bf16.msra.mxu2 %v9728_v17  ;;  %v12559_v22 = vld [vmem:[#allocation3 + $0x45c] sm:$0xf]  ;;  %5942 = vmatpush.bf16.msra.mxu0 %v9184_v36  ;;  %v9408_v58 = vor.u32 %v12495_v47, %v9405_v48 }
 0x489   :  { %v9661_v53 = vld [vmem:[#allocation3 + $0x478] sm:$0xf0] }
 0x48a   :  { %5980 = vmatpush.bf16.msra.mxu3 %v9984_v28  ;;  %v12623_v54 = vld [vmem:[#allocation3 + $0x65c] sm:$0xf]  ;;  %5955 = vmatpush.bf16.msra.mxu1 %v9440_v42  ;;  %v9664_v7 = vor.u32 %v12559_v22, %v9661_v53 }
 0x48b   :  { %v9917_v0 = vld [vmem:[#allocation3 + $0x678] sm:$0xf0] }
 0x48c   :  { %v12423_v56 = vld [vmem:[#allocation3 + $0x1c] sm:$0xf]  ;;  %5968 = vmatpush.bf16.msra.mxu2 %v9696_v43  ;;  %v9920_v63 = vor.u32 %v12623_v54, %v9917_v0  ;;  %5943 = vmatpush.bf16.msra.mxu0 %v9152_v55 }
 0x48d   :  { %v9117_v57 = vld [vmem:[#allocation3 + $0x38] sm:$0xf0] }
 0x48e   :  { %v12487_v59 = vld [vmem:[#allocation3 + $0x21c] sm:$0xf]  ;;  %5981 = vmatpush.bf16.msra.mxu3 %v9952_v51  ;;  %v9120_v11 = vor.u32 %v12423_v56, %v9117_v57  ;;  %5956 = vmatpush.bf16.msra.mxu1 %v9408_v58 }
 0x48f   :  { %v9373_v60 = vld [vmem:[#allocation3 + $0x238] sm:$0xf0] }
 0x490   :  { %v12551_v61 = vld [vmem:[#allocation3 + $0x41c] sm:$0xf]  ;;  %5969 = vmatpush.bf16.msra.mxu2 %v9664_v7  ;;  %v9376_v17 = vor.u32 %v12487_v59, %v9373_v60  ;;  %5944 = vmatpush.bf16.msra.mxu0 %v9120_v11  ;;  %v2638_v59 = vperm.slane %v13619_v44, 5  ;;  %v5751_v11 = vpop.f32.mrf.mxu1 }
 0x491   :  { %v9629_v6 = vld [vmem:[#allocation3 + $0x438] sm:$0xf0] }
 0x492   :  { %v12615_v2 = vld [vmem:[#allocation3 + $0x61c] sm:$0xf]  ;;  %v9632_v20 = vor.u32 %v12551_v61, %v9629_v6  ;;  %5982 = vmatpush.bf16.msra.mxu3 %v9920_v63  ;;  %5957 = vmatpush.bf16.msra.mxu1 %v9376_v17 }
 0x493   :  { %v9885_v13 = vld [vmem:[#allocation3 + $0x638] sm:$0xf0]  ;;  %5945 = vmatmul.bf16.vlgmr.msra.gmra.mxu0 %v13504_v45 }
 0x494   :  { %v12735_v3 = vld [vmem:[#allocation3 + $0x9dc] sm:$0xf]  ;;  %v9888_v24 = vor.u32 %v12615_v2, %v9885_v13  ;;  %5970 = vmatpush.bf16.msra.mxu2 %v9632_v20  ;;  %v5738_v2 = vpop.f32.mrf.mxu0 }
 0x495   :  { %v10365_v8 = vld [vmem:[#allocation3 + $0x9f8] sm:$0xf0]  ;;  %5958 = vmatmul.bf16.vlgmr.msra.gmra.mxu1 %v13511_v39 }
 0x496   :  { %v12799_v9 = vld [vmem:[#allocation3 + $0xbdc] sm:$0xf]  ;;  %v10368_v28 = vor.u32 %v12735_v3, %v10365_v8  ;;  %5983 = vmatpush.bf16.msra.mxu3 %v9888_v24 }
 0x497   :  { %v10621_v12 = vld [vmem:[#allocation3 + $0xbf8] sm:$0xf0]  ;;  %5971 = vmatmul.bf16.vlgmr.msra.gmra.mxu2 %v13518_v32 }
 0x498   :  { %v12863_v14 = vld [vmem:[#allocation3 + $0xddc] sm:$0xf]  ;;  %v10624_v25 = vor.u32 %v12799_v9, %v10621_v12  ;;  %5989 = vmatpush.bf16.msrb.mxu0 %v10368_v28  ;;  %v5739_v9 = vadd.f32 %v5738_v2, %v2638_v59 }
 0x499   :  { %v10877_v15 = vld [vmem:[#allocation3 + $0xdf8] sm:$0xf0]  ;;  %5984 = vmatmul.bf16.vlgmr.msra.gmra.mxu3 %v13525_v4 }
 0x49a   :  { %v12927_v21 = vld [vmem:[#allocation3 + $0xfdc] sm:$0xf]  ;;  %v10880_v26 = vor.u32 %v12863_v14, %v10877_v15  ;;  %6002 = vmatpush.bf16.msrb.mxu1 %v10624_v25 }
 0x49b   :  { %v11133_v23 = vld [vmem:[#allocation3 + $0xff8] sm:$0xf0] }
 0x49c   :  { %v12727_v29 = vld [vmem:[#allocation3 + $0x99c] sm:$0xf]  ;;  %v11136_v34 = vor.u32 %v12927_v21, %v11133_v23  ;;  %6015 = vmatpush.bf16.msrb.mxu2 %v10880_v26  ;;  %v5752_v23 = vadd.f32 %v5751_v11, %v5739_v9 }
 0x49d   :  { %v10333_v30 = vld [vmem:[#allocation3 + $0x9b8] sm:$0xf0] }
 0x49e   :  { %v12791_v33 = vld [vmem:[#allocation3 + $0xb9c] sm:$0xf]  ;;  %v10336_v42 = vor.u32 %v12727_v29, %v10333_v30  ;;  %6028 = vmatpush.bf16.msrb.mxu3 %v11136_v34 }
 0x49f   :  { %v10589_v35 = vld [vmem:[#allocation3 + $0xbb8] sm:$0xf0] }
 0x4a0   :  { %v12855_v36 = vld [vmem:[#allocation3 + $0xd9c] sm:$0xf]  ;;  %v10592_v43 = vor.u32 %v12791_v33, %v10589_v35  ;;  %5990 = vmatpush.bf16.msrb.mxu0 %v10336_v42  ;;  %v5764_v33 = vpop.f32.mrf.mxu2 }
 0x4a1   :  { %v10845_v37 = vld [vmem:[#allocation3 + $0xdb8] sm:$0xf0] }
 0x4a2   :  { %v12919_v10 = vld [vmem:[#allocation3 + $0xf9c] sm:$0xf]  ;;  %v10848_v46 = vor.u32 %v12855_v36, %v10845_v37  ;;  %6003 = vmatpush.bf16.msrb.mxu1 %v10592_v43 }
 0x4a3   :  { %v11101_v41 = vld [vmem:[#allocation3 + $0xfb8] sm:$0xf0] }
 0x4a4   :  { %v12719_v47 = vld [vmem:[#allocation3 + $0x95c] sm:$0xf]  ;;  %v11104_v51 = vor.u32 %v12919_v10, %v11101_v41  ;;  %6016 = vmatpush.bf16.msrb.mxu2 %v10848_v46  ;;  %v5765_v10 = vadd.f32 %v5764_v33, %v5752_v23  ;;  %v5777_v41 = vpop.f32.mrf.mxu3 }
 0x4a5   :  { %v10301_v48 = vld [vmem:[#allocation3 + $0x978] sm:$0xf0] }
 0x4a6   :  { %v12783_v49 = vld [vmem:[#allocation3 + $0xb5c] sm:$0xf]  ;;  %v10304_v55 = vor.u32 %v12719_v47, %v10301_v48  ;;  %6029 = vmatpush.bf16.msrb.mxu3 %v11104_v51  ;;  %v5778_v47 = vadd.f32 %v5777_v41, %v5765_v10  ;;  %v5740_v48 = vpop.f32.mrf.mxu0 }
 0x4a7   :  { %v10557_v52 = vld [vmem:[#allocation3 + $0xb78] sm:$0xf0] }
 0x4a8   :  { %v12847_v22 = vld [vmem:[#allocation3 + $0xd5c] sm:$0xf]  ;;  %v10560_v57 = vor.u32 %v12783_v49, %v10557_v52  ;;  %5991 = vmatpush.bf16.msrb.mxu0 %v10304_v55 }
 0x4a9   :  { %v10813_v53 = vld [vmem:[#allocation3 + $0xd78] sm:$0xf0] }
 0x4aa   :  { %v12911_v54 = vld [vmem:[#allocation3 + $0xf5c] sm:$0xf]  ;;  %v10816_v58 = vor.u32 %v12847_v22, %v10813_v53  ;;  %6004 = vmatpush.bf16.msrb.mxu1 %v10560_v57 }
 0x4ab   :  { %v11069_v0 = vld [vmem:[#allocation3 + $0xf78] sm:$0xf0] }
 0x4ac   :  { %v12711_v56 = vld [vmem:[#allocation3 + $0x91c] sm:$0xf]  ;;  %v11072_v60 = vor.u32 %v12911_v54, %v11069_v0  ;;  %6017 = vmatpush.bf16.msrb.mxu2 %v10816_v58  ;;  %v5753_v54 = vpop.f32.mrf.mxu1 }
 0x4ad   :  { %v10269_v7 = vld [vmem:[#allocation3 + $0x938] sm:$0xf0] }
 0x4ae   :  { %v12775_v32 = vld [vmem:[#allocation3 + $0xb1c] sm:$0xf]  ;;  %v10272_v6 = vor.u32 %v12711_v56, %v10269_v7  ;;  %6030 = vmatpush.bf16.msrb.mxu3 %v11072_v60 }
 0x4af   :  { %v10525_v4 = vld [vmem:[#allocation3 + $0xb38] sm:$0xf0] }
 0x4b0   :  { %v12839_v61 = vld [vmem:[#allocation3 + $0xd1c] sm:$0xf]  ;;  %v10528_v39 = vor.u32 %v12775_v32, %v10525_v4  ;;  %5992 = vmatpush.bf16.msrb.mxu0 %v10272_v6 }
 0x4b1   :  { %v10781_v62 = vld [vmem:[#allocation3 + $0xd38] sm:$0xf0] }
 0x4b2   :  { %v12903_v63 = vld [vmem:[#allocation3 + $0xf1c] sm:$0xf]  ;;  %v10784_v13 = vor.u32 %v12839_v61, %v10781_v62  ;;  %6005 = vmatpush.bf16.msrb.mxu1 %v10528_v39 }
 0x4b3   :  { %v11037_v45 = vld [vmem:[#allocation3 + $0xf38] sm:$0xf0] }
 0x4b4   :  { %v12703_v38 = vld [vmem:[#allocation3 + $0x8dc] sm:$0xf]  ;;  %v11040_v12 = vor.u32 %v12903_v63, %v11037_v45  ;;  %6018 = vmatpush.bf16.msrb.mxu2 %v10784_v13  ;;  %v5766_v63 = vpop.f32.mrf.mxu2  ;;  %v5779_v13 = vpop.f32.mrf.mxu3 }
 0x4b5   :  { %v10237_v3 = vld [vmem:[#allocation3 + $0x8f8] sm:$0xf0] }
 0x4b6   :  { %v12767_v8 = vld [vmem:[#allocation3 + $0xadc] sm:$0xf]  ;;  %v10240_v24 = vor.u32 %v12703_v38, %v10237_v3  ;;  %6031 = vmatpush.bf16.msrb.mxu3 %v11040_v12 }
 0x4b7   :  { %v10493_v14 = vld [vmem:[#allocation3 + $0xaf8] sm:$0xf0] }
 0x4b8   :  { %v12831_v15 = vld [vmem:[#allocation3 + $0xcdc] sm:$0xf]  ;;  %v10496_v28 = vor.u32 %v12767_v8, %v10493_v14  ;;  %5993 = vmatpush.bf16.msrb.mxu0 %v10240_v24  ;;  %v5790_v14 = vpop.f32.mrf.mxu0 }
 0x4b9   :  { %v10749_v17 = vld [vmem:[#allocation3 + $0xcf8] sm:$0xf0] }
 0x4ba   :  { %v12895_v20 = vld [vmem:[#allocation3 + $0xedc] sm:$0xf]  ;;  %v10752_v25 = vor.u32 %v12831_v15, %v10749_v17  ;;  %6006 = vmatpush.bf16.msrb.mxu1 %v10496_v28  ;;  %v5791_v15 = vadd.f32 %v5790_v14, %v5778_v47  ;;  %v5803_v17 = vpop.f32.mrf.mxu1 }
 0x4bb   :  { %v11005_v21 = vld [vmem:[#allocation3 + $0xef8] sm:$0xf0] }
 0x4bc   :  { %v12695_v26 = vld [vmem:[#allocation3 + $0x89c] sm:$0xf]  ;;  %v11008_v34 = vor.u32 %v12895_v20, %v11005_v21  ;;  %6019 = vmatpush.bf16.msrb.mxu2 %v10752_v25  ;;  %v5804_v20 = vadd.f32 %v5803_v17, %v5791_v15  ;;  %v5816_v21 = vpop.f32.mrf.mxu2  ;;  %v5829_v24 = vpop.f32.mrf.mxu3 }
 0x4bd   :  { %v10205_v29 = vld [vmem:[#allocation3 + $0x8b8] sm:$0xf0] }
 0x4be   :  { %v12759_v30 = vld [vmem:[#allocation3 + $0xa9c] sm:$0xf]  ;;  %v10208_v46 = vor.u32 %v12695_v26, %v10205_v29  ;;  %6032 = vmatpush.bf16.msrb.mxu3 %v11008_v34  ;;  %v5817_v23 = vadd.f32 %v5816_v21, %v5804_v20 }
 0x4bf   :  { %v10461_v35 = vld [vmem:[#allocation3 + $0xab8] sm:$0xf0] }
 0x4c0   :  { %v12823_v36 = vld [vmem:[#allocation3 + $0xc9c] sm:$0xf]  ;;  %v10464_v49 = vor.u32 %v12759_v30, %v10461_v35  ;;  %5994 = vmatpush.bf16.msrb.mxu0 %v10208_v46  ;;  %v5830_v28 = vadd.f32 %v5829_v24, %v5817_v23  ;;  %v5792_v25 = vpop.f32.mrf.mxu0 }
 0x4c1   :  { %v10717_v37 = vld [vmem:[#allocation3 + $0xcb8] sm:$0xf0] }
 0x4c2   :  { %v12887_v42 = vld [vmem:[#allocation3 + $0xe9c] sm:$0xf]  ;;  %v10720_v51 = vor.u32 %v12823_v36, %v10717_v37  ;;  %6007 = vmatpush.bf16.msrb.mxu1 %v10464_v49  ;;  %v5805_v26 = vpop.f32.mrf.mxu1  ;;  %v6046_v29 = vmax.f32 %v5830_v28, 0.0 }
 0x4c3   :  { %v10973_v43 = vld [vmem:[#allocation3 + $0xeb8] sm:$0xf0] }
 0x4c4   :  { %v12687_v52 = vld [vmem:[#allocation3 + $0x85c] sm:$0xf]  ;;  %v10976_v0 = vor.u32 %v12887_v42, %v10973_v43  ;;  %6020 = vmatpush.bf16.msrb.mxu2 %v10720_v51  ;;  %v13640_v30 = vpack.c.bf16 %v6046_v29, %v6046_v29  ;;  %v5831_v33 = vpop.f32.mrf.mxu3 }
 0x4c5   :  { %v10173_v22 = vld [vmem:[#allocation3 + $0x878] sm:$0xf0] }
 0x4c6   :  { %v12751_v53 = vld [vmem:[#allocation3 + $0xa5c] sm:$0xf]  ;;  %v10176_v32 = vor.u32 %v12687_v52, %v10173_v22  ;;  %6033 = vmatpush.bf16.msrb.mxu3 %v10976_v0 }
 0x4c7   :  { %v10429_v55 = vld [vmem:[#allocation3 + $0xa78] sm:$0xf0] }
 0x4c8   :  { %v12815_v56 = vld [vmem:[#allocation3 + $0xc5c] sm:$0xf]  ;;  %v10432_v59 = vor.u32 %v12751_v53, %v10429_v55  ;;  %5995 = vmatpush.bf16.msrb.mxu0 %v10176_v32 }
 0x4c9   :  { %v10685_v57 = vld [vmem:[#allocation3 + $0xc78] sm:$0xf0] }
 0x4ca   :  { %v12879_v58 = vld [vmem:[#allocation3 + $0xe5c] sm:$0xf]  ;;  %v10688_v60 = vor.u32 %v12815_v56, %v10685_v57  ;;  %6008 = vmatpush.bf16.msrb.mxu1 %v10432_v59 }
 0x4cb   :  { %v10941_v7 = vld [vmem:[#allocation3 + $0xe78] sm:$0xf0] }
 0x4cc   :  { %v12679_v4 = vld [vmem:[#allocation3 + $0x81c] sm:$0xf]  ;;  %v10944_v45 = vor.u32 %v12879_v58, %v10941_v7  ;;  %6021 = vmatpush.bf16.msrb.mxu2 %v10688_v60  ;;  %v5881_v10 = vpop.f32.mrf.mxu3 }
 0x4cd   :  { %v10141_v61 = vld [vmem:[#allocation3 + $0x838] sm:$0xf0] }
 0x4ce   :  { %v12743_v62 = vld [vmem:[#allocation3 + $0xa1c] sm:$0xf]  ;;  %v10144_v8 = vor.u32 %v12679_v4, %v10141_v61  ;;  %6034 = vmatpush.bf16.msrb.mxu3 %v10944_v45  ;;  %v2640_v45 = vperm.slane %v13619_v44, 7 }
 0x4cf   :  { %v10397_v6 = vld [vmem:[#allocation3 + $0xa38] sm:$0xf0] }
 0x4d0   :  { %v12807_v2 = vld [vmem:[#allocation3 + $0xc1c] sm:$0xf]  ;;  %v10400_v9 = vor.u32 %v12743_v62, %v10397_v6  ;;  %5996 = vmatpush.bf16.msrb.mxu0 %v10144_v8 }
 0x4d1   :  { %v10653_v39 = vld [vmem:[#allocation3 + $0xc38] sm:$0xf0] }
 0x4d2   :  { %v12871_v38 = vld [vmem:[#allocation3 + $0xe1c] sm:$0xf]  ;;  %v10656_v11 = vor.u32 %v12807_v2, %v10653_v39  ;;  %6009 = vmatpush.bf16.msrb.mxu1 %v10400_v9 }
 0x4d3   :  { %v10909_v3 = vld [vmem:[#allocation3 + $0xe38] sm:$0xf0]  ;;  %5997 = vmatmul.bf16.vlgmr.msrb.gmra.mxu0 %v13528_v16  ;;  %v5818_v16 = vpop.f32.mrf.mxu2 }
 0x4d4   :  { %v10912_v12 = vor.u32 %v12871_v38, %v10909_v3  ;;  %6022 = vmatpush.bf16.msrb.mxu2 %v10656_v11  ;;  %v5883_v47 = vpop.f32.mrf.mxu3 }
 0x4d5   :  { %6010 = vmatmul.bf16.vlgmr.msrb.gmra.mxu1 %v13531_v31  ;;  %v2639_v31 = vperm.slane %v13619_v44, 6 }
 0x4d6   :  { %6035 = vmatpush.bf16.msrb.mxu3 %v10912_v12 }
 0x4d7   :  { %6023 = vmatmul.bf16.vlgmr.msrb.gmra.mxu2 %v13534_v50  ;;  %v5842_v50 = vpop.f32.mrf.mxu0 }
 0x4d8   :  { %v5843_v34 = vadd.f32 %v5842_v50, %v2639_v31 }
 0x4d9   :  { %6036 = vmatmul.bf16.vlgmr.msrb.gmra.mxu3 %v13537_v5  ;;  %v5855_v5 = vpop.f32.mrf.mxu1 }
 0x4da   :  { %v5856_v35 = vadd.f32 %v5855_v5, %v5843_v34 }
 0x4db   :  { %v5868_v36 = vpop.f32.mrf.mxu2 }
 0x4dc   :  { %v5869_v37 = vadd.f32 %v5868_v36, %v5856_v35 }
 0x4de   :  { %v5882_v41 = vadd.f32 %v5881_v10, %v5869_v37 }
 0x4df   :  { %v5844_v42 = vpop.f32.mrf.mxu0 }
 0x4e1   :  { %v5857_v43 = vpop.f32.mrf.mxu1 }
 0x4e3   :  { %v5870_v46 = vpop.f32.mrf.mxu2 }
 0x4f0   :  { %v5894_v48 = vpop.f32.mrf.mxu0 }
 0x4f1   :  { %v5895_v49 = vadd.f32 %v5894_v48, %v5882_v41 }
 0x4f2   :  { %v5907_v51 = vpop.f32.mrf.mxu1 }
 0x4f3   :  { %v5908_v52 = vadd.f32 %v5907_v51, %v5895_v49 }
 0x4f8   :  { %v5896_v55 = vpop.f32.mrf.mxu0 }
 0x4fa   :  { %v5920_v22 = vpop.f32.mrf.mxu2  ;;  %v5909_v56 = vpop.f32.mrf.mxu1 }
 0x4fb   :  { %v5921_v53 = vadd.f32 %v5920_v22, %v5908_v52 }
 0x4fc   :  { %v5933_v54 = vpop.f32.mrf.mxu3 }
 0x4fd   :  { %v5934_v0 = vadd.f32 %v5933_v54, %v5921_v53 }
 0x4ff   :  { %v6047_v57 = vmax.f32 %v5934_v0, 0.0 }
 0x501   :  { %v13643_v58 = vpack.c.bf16 %v6047_v57, %v6047_v57 }
 0x502   :  { %v5922_v7 = vpop.f32.mrf.mxu2 }
 0x504   :  { %v5935_v32 = vpop.f32.mrf.mxu3 }
 0x510   :  { %v5946_v59 = vpop.f32.mrf.mxu0 }
 0x511   :  { %v5947_v39 = vadd.f32 %v5946_v59, %v2640_v45 }
 0x512   :  { %v5959_v60 = vpop.f32.mrf.mxu1 }
 0x513   :  { %v5960_v13 = vadd.f32 %v5959_v60, %v5947_v39 }
 0x518   :  { %v5948_v62 = vpop.f32.mrf.mxu0 }
 0x51a   :  { %v5972_v4 = vpop.f32.mrf.mxu2  ;;  %v5961_v63 = vpop.f32.mrf.mxu1 }
 0x51b   :  { %v5973_v38 = vadd.f32 %v5972_v4, %v5960_v13 }
 0x51c   :  { %v5985_v61 = vpop.f32.mrf.mxu3 }
 0x51d   :  { %v5986_v3 = vadd.f32 %v5985_v61, %v5973_v38 }
 0x522   :  { %v5974_v6 = vpop.f32.mrf.mxu2 }
 0x524   :  { %v5987_v2 = vpop.f32.mrf.mxu3 }
 0x550   :  { %v5998_v8 = vpop.f32.mrf.mxu0 }
 0x551   :  { %v5999_v11 = vadd.f32 %v5998_v8, %v5986_v3 }
 0x552   :  { %v6011_v9 = vpop.f32.mrf.mxu1 }
 0x553   :  { %v6012_v12 = vadd.f32 %v6011_v9, %v5999_v11 }
 0x558   :  { %v6000_v20 = vpop.f32.mrf.mxu0 }
 0x55a   :  { %v6024_v14 = vpop.f32.mrf.mxu2  ;;  %v6013_v21 = vpop.f32.mrf.mxu1 }
 0x55b   :  { %v6025_v15 = vadd.f32 %v6024_v14, %v6012_v12 }
 0x55c   :  { %v6037_v17 = vpop.f32.mrf.mxu3 }
 0x55d   :  { %v6038_v23 = vadd.f32 %v6037_v17, %v6025_v15 }
 0x55f   :  { %v6048_v24 = vmax.f32 %v6038_v23, 0.0 }
 0x561   :  { %v13646_v28 = vpack.c.bf16 %v6048_v24, %v6048_v24 }
 0x562   :  { %v6026_v44 = vpop.f32.mrf.mxu2 }
 0x564   :  { %v6039_v25 = vpop.f32.mrf.mxu3 }
 0x565   :  { %13400 = dma.done.wait [#allocation5 + $0x2], 32768 }
 0x566   :  { %13401 = vsyncadd [#allocation5 + $0x2], 4294934528  ;;  %v11251_v26 = vld [vmem:[#allocation4 + $0xe0] sm:$0xf]  ;;  %v12962_v29 = vld [vmem:[#allocation4 + $0xec] sm:$0xf0] }
 0x567   :  { %v11379_v16 = vld [vmem:[#allocation4 + $0x1e0] sm:$0xf]  ;;  %v11252_v33 = vor.u32 %v12962_v29, %v11251_v26  ;;  %v12994_v31 = vld [vmem:[#allocation4 + $0x1ec] sm:$0xf0]  ;;  %s13411_s5 = smov [#allocation14]   ;;  %s8033_s10 = sshll.u32 %s13714_s7, 4  ;;  %s8034_s10 = int_to_ptr.hbm [resolvable:$true] %s8033_s10 }
 0x568   :  { %v11507_v50 = vld [vmem:[#allocation4 + $0x2e0] sm:$0xf]  ;;  %v13026_v34 = vld [vmem:[#allocation4 + $0x2ec] sm:$0xf0]  ;;  %v11380_v5 = vor.u32 %v12994_v31, %v11379_v16  ;;  %s8031_s30 = sshll.u32 %s13411_s5, 4  ;;  %s8032_s30 = int_to_ptr.vmem [resolvable:$true] %s8031_s30 }
 0x569   :  { %v11508_v35 = vor.u32 %v13026_v34, %v11507_v50  ;;  %v11635_v36 = vld [vmem:[#allocation4 + $0x3e0] sm:$0xf]  ;;  %v13058_v37 = vld [vmem:[#allocation4 + $0x3ec] sm:$0xf0]  ;;  %7606 = vmatpush.bf16.msra.mxu0 %v11252_v33 }
 0x56a   :  { %v11235_v10 = vld [vmem:[#allocation4 + $0xc0] sm:$0xf]  ;;  %v11636_v41 = vor.u32 %v13058_v37, %v11635_v36  ;;  %v12958_v42 = vld [vmem:[#allocation4 + $0xcc] sm:$0xf0]  ;;  %7619 = vmatpush.bf16.msra.mxu1 %v11380_v5 }
 0x56b   :  { %v11363_v43 = vld [vmem:[#allocation4 + $0x1c0] sm:$0xf]  ;;  %v12990_v46 = vld [vmem:[#allocation4 + $0x1cc] sm:$0xf0]  ;;  %7632 = vmatpush.bf16.msra.mxu2 %v11508_v35  ;;  %v11236_v47 = vor.u32 %v12958_v42, %v11235_v10 }
 0x56c   :  { %v11364_v48 = vor.u32 %v12990_v46, %v11363_v43  ;;  %v11491_v49 = vld [vmem:[#allocation4 + $0x2c0] sm:$0xf]  ;;  %v13022_v51 = vld [vmem:[#allocation4 + $0x2cc] sm:$0xf0]  ;;  %7645 = vmatpush.bf16.msra.mxu3 %v11636_v41 }
 0x56d   :  { %v11619_v52 = vld [vmem:[#allocation4 + $0x3c0] sm:$0xf]  ;;  %v11492_v22 = vor.u32 %v13022_v51, %v11491_v49  ;;  %v13054_v53 = vld [vmem:[#allocation4 + $0x3cc] sm:$0xf0]  ;;  %7607 = vmatpush.bf16.msra.mxu0 %v11236_v47 }
 0x56e   :  { %v11219_v54 = vld [vmem:[#allocation4 + $0xa0] sm:$0xf]  ;;  %v12954_v0 = vld [vmem:[#allocation4 + $0xac] sm:$0xf0]  ;;  %v11620_v55 = vor.u32 %v13054_v53, %v11619_v52  ;;  %7620 = vmatpush.bf16.msra.mxu1 %v11364_v48 }
 0x56f   :  { %v11347_v56 = vld [vmem:[#allocation4 + $0x1a0] sm:$0xf]  ;;  %v12986_v57 = vld [vmem:[#allocation4 + $0x1ac] sm:$0xf0]  ;;  %v11220_v32 = vor.u32 %v12954_v0, %v11219_v54  ;;  %7633 = vmatpush.bf16.msra.mxu2 %v11492_v22 }
 0x570   :  { %v11475_v7 = vld [vmem:[#allocation4 + $0x2a0] sm:$0xf]  ;;  %v13018_v59 = vld [vmem:[#allocation4 + $0x2ac] sm:$0xf0]  ;;  %v11348_v61 = vor.u32 %v12986_v57, %v11347_v56  ;;  %7646 = vmatpush.bf16.msra.mxu3 %v11620_v55 }
 0x571   :  { %v11603_v60 = vld [vmem:[#allocation4 + $0x3a0] sm:$0xf]  ;;  %v13050_v4 = vld [vmem:[#allocation4 + $0x3ac] sm:$0xf0]  ;;  %v11476_v62 = vor.u32 %v13018_v59, %v11475_v7  ;;  %7608 = vmatpush.bf16.msra.mxu0 %v11220_v32 }
 0x572   :  { %v11203_v63 = vld [vmem:[#allocation4 + $0x80] sm:$0xf]  ;;  %v12950_v45 = vld [vmem:[#allocation4 + $0x8c] sm:$0xf0]  ;;  %v11604_v2 = vor.u32 %v13050_v4, %v11603_v60  ;;  %7621 = vmatpush.bf16.msra.mxu1 %v11348_v61 }
 0x573   :  { %v11331_v6 = vld [vmem:[#allocation4 + $0x180] sm:$0xf]  ;;  %v12982_v39 = vld [vmem:[#allocation4 + $0x18c] sm:$0xf0]  ;;  %v11204_v9 = vor.u32 %v12950_v45, %v11203_v63  ;;  %7634 = vmatpush.bf16.msra.mxu2 %v11476_v62 }
 0x574   :  { %v11459_v13 = vld [vmem:[#allocation4 + $0x280] sm:$0xf]  ;;  %v13014_v38 = vld [vmem:[#allocation4 + $0x28c] sm:$0xf0]  ;;  %v11332_v11 = vor.u32 %v12982_v39, %v11331_v6  ;;  %7647 = vmatpush.bf16.msra.mxu3 %v11604_v2 }
 0x575   :  { %v11587_v3 = vld [vmem:[#allocation4 + $0x380] sm:$0xf]  ;;  %v13046_v8 = vld [vmem:[#allocation4 + $0x38c] sm:$0xf0]  ;;  %v11460_v12 = vor.u32 %v13014_v38, %v11459_v13  ;;  %7609 = vmatpush.bf16.msra.mxu0 %v11204_v9 }
 0x576   :  { %v11187_v14 = vld [vmem:[#allocation4 + $0x60] sm:$0xf]  ;;  %v12946_v15 = vld [vmem:[#allocation4 + $0x6c] sm:$0xf0]  ;;  %v11588_v20 = vor.u32 %v13046_v8, %v11587_v3  ;;  %7622 = vmatpush.bf16.msra.mxu1 %v11332_v11 }
 0x577   :  { %v11315_v17 = vld [vmem:[#allocation4 + $0x160] sm:$0xf]  ;;  %v12978_v21 = vld [vmem:[#allocation4 + $0x16c] sm:$0xf0]  ;;  %v11188_v26 = vor.u32 %v12946_v15, %v11187_v14  ;;  %7635 = vmatpush.bf16.msra.mxu2 %v11460_v12 }
 0x578   :  { %v11443_v23 = vld [vmem:[#allocation4 + $0x260] sm:$0xf]  ;;  %v13010_v24 = vld [vmem:[#allocation4 + $0x26c] sm:$0xf0]  ;;  %v11316_v29 = vor.u32 %v12978_v21, %v11315_v17  ;;  %7648 = vmatpush.bf16.msra.mxu3 %v11588_v20 }
 0x579   :  { %v11571_v44 = vld [vmem:[#allocation4 + $0x360] sm:$0xf]  ;;  %v13042_v25 = vld [vmem:[#allocation4 + $0x36c] sm:$0xf0]  ;;  %v11444_v16 = vor.u32 %v13010_v24, %v11443_v23  ;;  %7610 = vmatpush.bf16.msra.mxu0 %v11188_v26 }
 0x57a   :  { %v11171_v33 = vld [vmem:[#allocation4 + $0x40] sm:$0xf]  ;;  %v12942_v31 = vld [vmem:[#allocation4 + $0x4c] sm:$0xf0]  ;;  %v11572_v34 = vor.u32 %v13042_v25, %v11571_v44  ;;  %7623 = vmatpush.bf16.msra.mxu1 %v11316_v29 }
 0x57b   :  { %v11299_v50 = vld [vmem:[#allocation4 + $0x140] sm:$0xf]  ;;  %v12974_v5 = vld [vmem:[#allocation4 + $0x14c] sm:$0xf0]  ;;  %v11172_v41 = vor.u32 %v12942_v31, %v11171_v33  ;;  %7636 = vmatpush.bf16.msra.mxu2 %v11444_v16 }
 0x57c   :  { %v11427_v35 = vld [vmem:[#allocation4 + $0x240] sm:$0xf]  ;;  %v13006_v36 = vld [vmem:[#allocation4 + $0x24c] sm:$0xf0]  ;;  %v11300_v42 = vor.u32 %v12974_v5, %v11299_v50  ;;  %7649 = vmatpush.bf16.msra.mxu3 %v11572_v34 }
 0x57d   :  { %v11555_v37 = vld [vmem:[#allocation4 + $0x340] sm:$0xf]  ;;  %v13038_v10 = vld [vmem:[#allocation4 + $0x34c] sm:$0xf0]  ;;  %v11428_v43 = vor.u32 %v13006_v36, %v11427_v35  ;;  %7611 = vmatpush.bf16.msra.mxu0 %v11172_v41 }
 0x57e   :  { %v11155_v46 = vld [vmem:[#allocation4 + $0x20] sm:$0xf]  ;;  %v12938_v47 = vld [vmem:[#allocation4 + $0x2c] sm:$0xf0]  ;;  %v11556_v49 = vor.u32 %v13038_v10, %v11555_v37  ;;  %7624 = vmatpush.bf16.msra.mxu1 %v11300_v42 }
 0x57f   :  { %v11283_v48 = vld [vmem:[#allocation4 + $0x120] sm:$0xf]  ;;  %v12970_v51 = vld [vmem:[#allocation4 + $0x12c] sm:$0xf0]  ;;  %v11156_v0 = vor.u32 %v12938_v47, %v11155_v46  ;;  %7637 = vmatpush.bf16.msra.mxu2 %v11428_v43 }
 0x580   :  { %v11411_v52 = vld [vmem:[#allocation4 + $0x220] sm:$0xf]  ;;  %v13002_v22 = vld [vmem:[#allocation4 + $0x22c] sm:$0xf0]  ;;  %v11284_v57 = vor.u32 %v12970_v51, %v11283_v48  ;;  %7650 = vmatpush.bf16.msra.mxu3 %v11556_v49 }
 0x581   :  { %v11539_v53 = vld [vmem:[#allocation4 + $0x320] sm:$0xf]  ;;  %v13034_v54 = vld [vmem:[#allocation4 + $0x32c] sm:$0xf0]  ;;  %v11412_v7 = vor.u32 %v13002_v22, %v11411_v52  ;;  %7612 = vmatpush.bf16.msra.mxu0 %v11156_v0 }
 0x582   :  { %v11139_v55 = vld [vmem:[#allocation4] sm:$0xf]  ;;  %v12934_v56 = vld [vmem:[#allocation4 + $0xc] sm:$0xf0]  ;;  %v11540_v4 = vor.u32 %v13034_v54, %v11539_v53  ;;  %7625 = vmatpush.bf16.msra.mxu1 %v11284_v57 }
 0x583   :  { %v11267_v32 = vld [vmem:[#allocation4 + $0x100] sm:$0xf]  ;;  %v12966_v59 = vld [vmem:[#allocation4 + $0x10c] sm:$0xf0]  ;;  %v11140_v39 = vor.u32 %v12934_v56, %v11139_v55  ;;  %7638 = vmatpush.bf16.msra.mxu2 %v11412_v7 }
 0x584   :  { %v11395_v60 = vld [vmem:[#allocation4 + $0x200] sm:$0xf]  ;;  %v12998_v61 = vld [vmem:[#allocation4 + $0x20c] sm:$0xf0]  ;;  %v11268_v8 = vor.u32 %v12966_v59, %v11267_v32  ;;  %7651 = vmatpush.bf16.msra.mxu3 %v11540_v4 }
 0x585   :  { %v11523_v62 = vld [vmem:[#allocation4 + $0x300] sm:$0xf]  ;;  %v13030_v63 = vld [vmem:[#allocation4 + $0x30c] sm:$0xf0]  ;;  %v11396_v9 = vor.u32 %v12998_v61, %v11395_v60  ;;  %7613 = vmatpush.bf16.msra.mxu0 %v11140_v39 }
 0x586   :  { %v11763_v45 = vld [vmem:[#allocation4 + $0x4e0] sm:$0xf]  ;;  %v13090_v6 = vld [vmem:[#allocation4 + $0x4ec] sm:$0xf0]  ;;  %v11524_v14 = vor.u32 %v13030_v63, %v11523_v62  ;;  %7626 = vmatpush.bf16.msra.mxu1 %v11268_v8 }
 0x587   :  { %v11891_v2 = vld [vmem:[#allocation4 + $0x5e0] sm:$0xf]  ;;  %v13122_v13 = vld [vmem:[#allocation4 + $0x5ec] sm:$0xf0]  ;;  %v11764_v15 = vor.u32 %v13090_v6, %v11763_v45  ;;  %7639 = vmatpush.bf16.msra.mxu2 %v11396_v9 }
 0x588   :  { %v12019_v38 = vld [vmem:[#allocation4 + $0x6e0] sm:$0xf]  ;;  %v13154_v3 = vld [vmem:[#allocation4 + $0x6ec] sm:$0xf0]  ;;  %v11892_v17 = vor.u32 %v13122_v13, %v11891_v2  ;;  %7652 = vmatpush.bf16.msra.mxu3 %v11524_v14  ;;  %7614 = vmatmul.bf16.vlgmr.msra.gmra.mxu0 %v13569_v18 }
 0x589   :  { %v12147_v11 = vld [vmem:[#allocation4 + $0x7e0] sm:$0xf]  ;;  %v13186_v12 = vld [vmem:[#allocation4 + $0x7ec] sm:$0xf0]  ;;  %v12020_v20 = vor.u32 %v13154_v3, %v12019_v38  ;;  %7658 = vmatpush.bf16.msrb.mxu0 %v11764_v15  ;;  %7627 = vmatmul.bf16.vlgmr.msra.gmra.mxu1 %v13583_v19 }
 0x58a   :  { %v11747_v21 = vld [vmem:[#allocation4 + $0x4c0] sm:$0xf]  ;;  %v13086_v23 = vld [vmem:[#allocation4 + $0x4cc] sm:$0xf0]  ;;  %v12148_v44 = vor.u32 %v13186_v12, %v12147_v11  ;;  %7671 = vmatpush.bf16.msrb.mxu1 %v11892_v17  ;;  %7640 = vmatmul.bf16.vlgmr.msra.gmra.mxu2 %v13599_v27 }
 0x58b   :  { %v11875_v24 = vld [vmem:[#allocation4 + $0x5c0] sm:$0xf]  ;;  %v13118_v25 = vld [vmem:[#allocation4 + $0x5cc] sm:$0xf0]  ;;  %v11748_v31 = vor.u32 %v13086_v23, %v11747_v21  ;;  %7684 = vmatpush.bf16.msrb.mxu2 %v12020_v20  ;;  %7653 = vmatmul.bf16.vlgmr.msra.gmra.mxu3 %v13613_v40 }
 0x58c   :  { %v12003_v26 = vld [vmem:[#allocation4 + $0x6c0] sm:$0xf]  ;;  %v13150_v29 = vld [vmem:[#allocation4 + $0x6cc] sm:$0xf0]  ;;  %v11876_v50 = vor.u32 %v13118_v25, %v11875_v24  ;;  %7697 = vmatpush.bf16.msrb.mxu3 %v12148_v44 }
 0x58d   :  { %v12131_v16 = vld [vmem:[#allocation4 + $0x7c0] sm:$0xf]  ;;  %v13182_v33 = vld [vmem:[#allocation4 + $0x7cc] sm:$0xf0]  ;;  %v12004_v34 = vor.u32 %v13150_v29, %v12003_v26  ;;  %7659 = vmatpush.bf16.msrb.mxu0 %v11748_v31 }
 0x58e   :  { %v11731_v5 = vld [vmem:[#allocation4 + $0x4a0] sm:$0xf]  ;;  %v13082_v35 = vld [vmem:[#allocation4 + $0x4ac] sm:$0xf0]  ;;  %v12132_v37 = vor.u32 %v13182_v33, %v12131_v16  ;;  %7672 = vmatpush.bf16.msrb.mxu1 %v11876_v50 }
 0x58f   :  { %v11859_v36 = vld [vmem:[#allocation4 + $0x5a0] sm:$0xf]  ;;  %v13114_v10 = vld [vmem:[#allocation4 + $0x5ac] sm:$0xf0]  ;;  %v11732_v47 = vor.u32 %v13082_v35, %v11731_v5  ;;  %7685 = vmatpush.bf16.msrb.mxu2 %v12004_v34 }
 0x590   :  { %v11987_v41 = vld [vmem:[#allocation4 + $0x6a0] sm:$0xf]  ;;  %v13146_v42 = vld [vmem:[#allocation4 + $0x6ac] sm:$0xf0]  ;;  %v11860_v48 = vor.u32 %v13114_v10, %v11859_v36  ;;  %7698 = vmatpush.bf16.msrb.mxu3 %v12132_v37 }
 0x591   :  { %v12115_v43 = vld [vmem:[#allocation4 + $0x7a0] sm:$0xf]  ;;  %v13178_v46 = vld [vmem:[#allocation4 + $0x7ac] sm:$0xf0]  ;;  %v11988_v49 = vor.u32 %v13146_v42, %v11987_v41  ;;  %7660 = vmatpush.bf16.msrb.mxu0 %v11732_v47 }
 0x592   :  { %v11715_v51 = vld [vmem:[#allocation4 + $0x480] sm:$0xf]  ;;  %v13078_v52 = vld [vmem:[#allocation4 + $0x48c] sm:$0xf0]  ;;  %v12116_v53 = vor.u32 %v13178_v46, %v12115_v43  ;;  %7673 = vmatpush.bf16.msrb.mxu1 %v11860_v48 }
 0x593   :  { %v11843_v22 = vld [vmem:[#allocation4 + $0x580] sm:$0xf]  ;;  %v13110_v54 = vld [vmem:[#allocation4 + $0x58c] sm:$0xf0]  ;;  %v11716_v7 = vor.u32 %v13078_v52, %v11715_v51  ;;  %7686 = vmatpush.bf16.msrb.mxu2 %v11988_v49  ;;  %v12960_v52 = vld [vmem:[#allocation4 + $0xe4] sm:$0xf] }
 0x594   :  { %v11971_v0 = vld [vmem:[#allocation4 + $0x680] sm:$0xf]  ;;  %v13142_v55 = vld [vmem:[#allocation4 + $0x68c] sm:$0xf0]  ;;  %v11844_v32 = vor.u32 %v13110_v54, %v11843_v22  ;;  %7699 = vmatpush.bf16.msrb.mxu3 %v12116_v53  ;;  %v11253_v22 = vld [vmem:[#allocation4 + $0xf0] sm:$0xf0] }
 0x595   :  { %v12099_v56 = vld [vmem:[#allocation4 + $0x780] sm:$0xf]  ;;  %v13174_v57 = vld [vmem:[#allocation4 + $0x78c] sm:$0xf0]  ;;  %v11972_v59 = vor.u32 %v13142_v55, %v11971_v0  ;;  %7661 = vmatpush.bf16.msrb.mxu0 %v11716_v7  ;;  %v12992_v53 = vld [vmem:[#allocation4 + $0x1e4] sm:$0xf] }
 0x596   :  { %v11699_v60 = vld [vmem:[#allocation4 + $0x460] sm:$0xf]  ;;  %v13074_v4 = vld [vmem:[#allocation4 + $0x46c] sm:$0xf0]  ;;  %v12100_v62 = vor.u32 %v13174_v57, %v12099_v56  ;;  %7674 = vmatpush.bf16.msrb.mxu1 %v11844_v32  ;;  %v11381_v0 = vld [vmem:[#allocation4 + $0x1f0] sm:$0xf0] }
 0x597   :  { %v11827_v61 = vld [vmem:[#allocation4 + $0x560] sm:$0xf]  ;;  %v13106_v63 = vld [vmem:[#allocation4 + $0x56c] sm:$0xf0]  ;;  %v11700_v13 = vor.u32 %v13074_v4, %v11699_v60  ;;  %7687 = vmatpush.bf16.msrb.mxu2 %v11972_v59  ;;  %v13024_v55 = vld [vmem:[#allocation4 + $0x2e4] sm:$0xf]  ;;  %v11256_v4 = vor.u32 %v12960_v52, %v11253_v22 }
 0x598   :  { %v11955_v45 = vld [vmem:[#allocation4 + $0x660] sm:$0xf]  ;;  %v13138_v6 = vld [vmem:[#allocation4 + $0x66c] sm:$0xf0]  ;;  %v11828_v38 = vor.u32 %v13106_v63, %v11827_v61  ;;  %7700 = vmatpush.bf16.msrb.mxu3 %v12100_v62  ;;  %v11509_v56 = vld [vmem:[#allocation4 + $0x2f0] sm:$0xf0]  ;;  %v11384_v61 = vor.u32 %v12992_v53, %v11381_v0 }
 0x599   :  { %v12083_v2 = vld [vmem:[#allocation4 + $0x760] sm:$0xf]  ;;  %v13170_v39 = vld [vmem:[#allocation4 + $0x76c] sm:$0xf0]  ;;  %v11956_v3 = vor.u32 %v13138_v6, %v11955_v45  ;;  %7662 = vmatpush.bf16.msrb.mxu0 %v11700_v13  ;;  %v13056_v32 = vld [vmem:[#allocation4 + $0x3e4] sm:$0xf]  ;;  %v11512_v62 = vor.u32 %v13024_v55, %v11509_v56 }
 0x59a   :  { %v11683_v8 = vld [vmem:[#allocation4 + $0x440] sm:$0xf]  ;;  %v13070_v9 = vld [vmem:[#allocation4 + $0x44c] sm:$0xf0]  ;;  %v12084_v12 = vor.u32 %v13170_v39, %v12083_v2  ;;  %7675 = vmatpush.bf16.msrb.mxu1 %v11828_v38  ;;  %v11637_v59 = vld [vmem:[#allocation4 + $0x3f0] sm:$0xf0] }
 0x59b   :  { %v11811_v11 = vld [vmem:[#allocation4 + $0x540] sm:$0xf]  ;;  %v13102_v14 = vld [vmem:[#allocation4 + $0x54c] sm:$0xf0]  ;;  %v11684_v23 = vor.u32 %v13070_v9, %v11683_v8  ;;  %7688 = vmatpush.bf16.msrb.mxu2 %v11956_v3  ;;  %v12956_v63 = vld [vmem:[#allocation4 + $0xc4] sm:$0xf]  ;;  %v11640_v2 = vor.u32 %v13056_v32, %v11637_v59 }
 0x59c   :  { %v11939_v15 = vld [vmem:[#allocation4 + $0x640] sm:$0xf]  ;;  %v13134_v17 = vld [vmem:[#allocation4 + $0x64c] sm:$0xf0]  ;;  %v11812_v24 = vor.u32 %v13102_v14, %v11811_v11  ;;  %7701 = vmatpush.bf16.msrb.mxu3 %v12084_v12  ;;  %v11237_v45 = vld [vmem:[#allocation4 + $0xd0] sm:$0xf0] }
 0x59d   :  { %v12067_v20 = vld [vmem:[#allocation4 + $0x740] sm:$0xf]  ;;  %v13166_v21 = vld [vmem:[#allocation4 + $0x74c] sm:$0xf0]  ;;  %v11940_v44 = vor.u32 %v13134_v17, %v11939_v15  ;;  %7663 = vmatpush.bf16.msrb.mxu0 %v11684_v23  ;;  %v12988_v6 = vld [vmem:[#allocation4 + $0x1c4] sm:$0xf]  ;;  %v11240_v9 = vor.u32 %v12956_v63, %v11237_v45 }
 0x59e   :  { %v11667_v25 = vld [vmem:[#allocation4 + $0x420] sm:$0xf]  ;;  %v13066_v26 = vld [vmem:[#allocation4 + $0x42c] sm:$0xf0]  ;;  %v12068_v16 = vor.u32 %v13166_v21, %v12067_v20  ;;  %7676 = vmatpush.bf16.msrb.mxu1 %v11812_v24  ;;  %v11365_v39 = vld [vmem:[#allocation4 + $0x1d0] sm:$0xf0] }
 0x59f   :  { %v11795_v29 = vld [vmem:[#allocation4 + $0x520] sm:$0xf]  ;;  %v13098_v33 = vld [vmem:[#allocation4 + $0x52c] sm:$0xf0]  ;;  %v11668_v35 = vor.u32 %v13066_v26, %v11667_v25  ;;  %7689 = vmatpush.bf16.msrb.mxu2 %v11940_v44  ;;  %v13020_v13 = vld [vmem:[#allocation4 + $0x2c4] sm:$0xf]  ;;  %v11368_v11 = vor.u32 %v12988_v6, %v11365_v39 }
 0x5a0   :  { %v11923_v31 = vld [vmem:[#allocation4 + $0x620] sm:$0xf]  ;;  %v13130_v50 = vld [vmem:[#allocation4 + $0x62c] sm:$0xf0]  ;;  %v11796_v10 = vor.u32 %v13098_v33, %v11795_v29  ;;  %7702 = vmatpush.bf16.msrb.mxu3 %v12068_v16  ;;  %v11493_v38 = vld [vmem:[#allocation4 + $0x2d0] sm:$0xf0] }
 0x5a1   :  { %v12051_v34 = vld [vmem:[#allocation4 + $0x720] sm:$0xf]  ;;  %v13162_v5 = vld [vmem:[#allocation4 + $0x72c] sm:$0xf0]  ;;  %v11924_v41 = vor.u32 %v13130_v50, %v11923_v31  ;;  %7664 = vmatpush.bf16.msrb.mxu0 %v11668_v35  ;;  %v13052_v3 = vld [vmem:[#allocation4 + $0x3c4] sm:$0xf]  ;;  %v11496_v12 = vor.u32 %v13020_v13, %v11493_v38 }
 0x5a2   :  { %v11651_v36 = vld [vmem:[#allocation4 + $0x400] sm:$0xf]  ;;  %v13062_v37 = vld [vmem:[#allocation4 + $0x40c] sm:$0xf0]  ;;  %v12052_v47 = vor.u32 %v13162_v5, %v12051_v34  ;;  %7677 = vmatpush.bf16.msrb.mxu1 %v11796_v10  ;;  %v11621_v8 = vld [vmem:[#allocation4 + $0x3d0] sm:$0xf0] }
 0x5a3   :  { %v11779_v42 = vld [vmem:[#allocation4 + $0x500] sm:$0xf]  ;;  %v13094_v43 = vld [vmem:[#allocation4 + $0x50c] sm:$0xf0]  ;;  %v11652_v54 = vor.u32 %v13062_v37, %v11651_v36  ;;  %7690 = vmatpush.bf16.msrb.mxu2 %v11924_v41  ;;  %v12952_v14 = vld [vmem:[#allocation4 + $0xa4] sm:$0xf]  ;;  %v11624_v20 = vor.u32 %v13052_v3, %v11621_v8 }
 0x5a4   :  { %v11907_v46 = vld [vmem:[#allocation4 + $0x600] sm:$0xf]  ;;  %v13126_v48 = vld [vmem:[#allocation4 + $0x60c] sm:$0xf0]  ;;  %v11780_v57 = vor.u32 %v13094_v43, %v11779_v42  ;;  %7703 = vmatpush.bf16.msrb.mxu3 %v12052_v47  ;;  %v11221_v15 = vld [vmem:[#allocation4 + $0xb0] sm:$0xf0] }
 0x5a5   :  { %v12035_v49 = vld [vmem:[#allocation4 + $0x700] sm:$0xf]  ;;  %v13158_v51 = vld [vmem:[#allocation4 + $0x70c] sm:$0xf0]  ;;  %v11908_v7 = vor.u32 %v13126_v48, %v11907_v46  ;;  %7665 = vmatpush.bf16.msrb.mxu0 %v11652_v54  ;;  %v12984_v17 = vld [vmem:[#allocation4 + $0x1a4] sm:$0xf]  ;;  %v11224_v26 = vor.u32 %v12952_v14, %v11221_v15 }
 0x5a6   :  { %v12036_v60 = vor.u32 %v13158_v51, %v12035_v49  ;;  %7678 = vmatpush.bf16.msrb.mxu1 %v11780_v57  ;;  %v11349_v21 = vld [vmem:[#allocation4 + $0x1b0] sm:$0xf0]  ;;  %v13016_v23 = vld [vmem:[#allocation4 + $0x2a4] sm:$0xf] }
 0x5a7   :  { %7691 = vmatpush.bf16.msrb.mxu2 %v11908_v7  ;;  %v11477_v24 = vld [vmem:[#allocation4 + $0x2b0] sm:$0xf0]  ;;  %v13048_v44 = vld [vmem:[#allocation4 + $0x3a4] sm:$0xf]  ;;  %v11352_v29 = vor.u32 %v12984_v17, %v11349_v21 }
 0x5a8   :  { %7704 = vmatpush.bf16.msrb.mxu3 %v12036_v60  ;;  %7666 = vmatmul.bf16.vlgmr.msrb.gmra.mxu0 %v13629_v1  ;;  %v11605_v25 = vld [vmem:[#allocation4 + $0x3b0] sm:$0xf0]  ;;  %v11480_v16 = vor.u32 %v13016_v23, %v11477_v24  ;;  %v12948_v33 = vld [vmem:[#allocation4 + $0x84] sm:$0xf] }
 0x5a9   :  { %7710 = vmatpush.bf16.msra.mxu0 %v11256_v4  ;;  %7679 = vmatmul.bf16.vlgmr.msrb.gmra.mxu1 %v13640_v30  ;;  %v11205_v31 = vld [vmem:[#allocation4 + $0x90] sm:$0xf0]  ;;  %v12980_v50 = vld [vmem:[#allocation4 + $0x184] sm:$0xf]  ;;  %v11608_v34 = vor.u32 %v13048_v44, %v11605_v25 }
 0x5aa   :  { %7723 = vmatpush.bf16.msra.mxu1 %v11384_v61  ;;  %7692 = vmatmul.bf16.vlgmr.msrb.gmra.mxu2 %v13643_v58  ;;  %v11333_v5 = vld [vmem:[#allocation4 + $0x190] sm:$0xf0]  ;;  %v13012_v35 = vld [vmem:[#allocation4 + $0x284] sm:$0xf]  ;;  %v11208_v41 = vor.u32 %v12948_v33, %v11205_v31 }
 0x5ab   :  { %7736 = vmatpush.bf16.msra.mxu2 %v11512_v62  ;;  %7705 = vmatmul.bf16.vlgmr.msrb.gmra.mxu3 %v13646_v28  ;;  %v11461_v36 = vld [vmem:[#allocation4 + $0x290] sm:$0xf0]  ;;  %v13044_v37 = vld [vmem:[#allocation4 + $0x384] sm:$0xf]  ;;  %v11336_v42 = vor.u32 %v12980_v50, %v11333_v5 }
 0x5ac   :  { %7749 = vmatpush.bf16.msra.mxu3 %v11640_v2  ;;  %v11589_v10 = vld [vmem:[#allocation4 + $0x390] sm:$0xf0]  ;;  %v11464_v43 = vor.u32 %v13012_v35, %v11461_v36  ;;  %v12944_v46 = vld [vmem:[#allocation4 + $0x64] sm:$0xf] }
 0x5ad   :  { %7711 = vmatpush.bf16.msra.mxu0 %v11240_v9  ;;  %v11189_v47 = vld [vmem:[#allocation4 + $0x70] sm:$0xf0]  ;;  %v12976_v48 = vld [vmem:[#allocation4 + $0x164] sm:$0xf]  ;;  %v11592_v49 = vor.u32 %v13044_v37, %v11589_v10 }
 0x5ae   :  { %7724 = vmatpush.bf16.msra.mxu1 %v11368_v11  ;;  %v11317_v51 = vld [vmem:[#allocation4 + $0x170] sm:$0xf0]  ;;  %v13008_v52 = vld [vmem:[#allocation4 + $0x264] sm:$0xf]  ;;  %v11192_v0 = vor.u32 %v12944_v46, %v11189_v47 }
 0x5af   :  { %7737 = vmatpush.bf16.msra.mxu2 %v11496_v12  ;;  %v11445_v22 = vld [vmem:[#allocation4 + $0x270] sm:$0xf0]  ;;  %v13040_v53 = vld [vmem:[#allocation4 + $0x364] sm:$0xf]  ;;  %v11320_v55 = vor.u32 %v12976_v48, %v11317_v51 }
 0x5b0   :  { %7750 = vmatpush.bf16.msra.mxu3 %v11624_v20  ;;  %v11573_v54 = vld [vmem:[#allocation4 + $0x370] sm:$0xf0]  ;;  %v11448_v56 = vor.u32 %v13008_v52, %v11445_v22  ;;  %v12940_v57 = vld [vmem:[#allocation4 + $0x44] sm:$0xf] }
 0x5b1   :  { %7712 = vmatpush.bf16.msra.mxu0 %v11224_v26  ;;  %v11173_v7 = vld [vmem:[#allocation4 + $0x50] sm:$0xf0]  ;;  %v12972_v32 = vld [vmem:[#allocation4 + $0x144] sm:$0xf]  ;;  %v11576_v59 = vor.u32 %v13040_v53, %v11573_v54 }
 0x5b2   :  { %7725 = vmatpush.bf16.msra.mxu1 %v11352_v29  ;;  %v11301_v60 = vld [vmem:[#allocation4 + $0x150] sm:$0xf0]  ;;  %v13004_v4 = vld [vmem:[#allocation4 + $0x244] sm:$0xf]  ;;  %v11176_v45 = vor.u32 %v12940_v57, %v11173_v7 }
 0x5b3   :  { %7738 = vmatpush.bf16.msra.mxu2 %v11480_v16  ;;  %v11429_v61 = vld [vmem:[#allocation4 + $0x250] sm:$0xf0]  ;;  %v13036_v62 = vld [vmem:[#allocation4 + $0x344] sm:$0xf]  ;;  %v11304_v6 = vor.u32 %v12972_v32, %v11301_v60 }
 0x5b4   :  { %7751 = vmatpush.bf16.msra.mxu3 %v11608_v34  ;;  %v11557_v63 = vld [vmem:[#allocation4 + $0x350] sm:$0xf0]  ;;  %v11432_v2 = vor.u32 %v13004_v4, %v11429_v61  ;;  %v12936_v39 = vld [vmem:[#allocation4 + $0x24] sm:$0xf] }
 0x5b5   :  { %7713 = vmatpush.bf16.msra.mxu0 %v11208_v41  ;;  %v11157_v13 = vld [vmem:[#allocation4 + $0x30] sm:$0xf0]  ;;  %v12968_v38 = vld [vmem:[#allocation4 + $0x124] sm:$0xf]  ;;  %v11560_v3 = vor.u32 %v13036_v62, %v11557_v63 }
 0x5b6   :  { %7726 = vmatpush.bf16.msra.mxu1 %v11336_v42  ;;  %v11285_v8 = vld [vmem:[#allocation4 + $0x130] sm:$0xf0]  ;;  %v13000_v9 = vld [vmem:[#allocation4 + $0x224] sm:$0xf]  ;;  %v11160_v15 = vor.u32 %v12936_v39, %v11157_v13 }
 0x5b7   :  { %7739 = vmatpush.bf16.msra.mxu2 %v11464_v43  ;;  %v11413_v11 = vld [vmem:[#allocation4 + $0x230] sm:$0xf0]  ;;  %v13032_v12 = vld [vmem:[#allocation4 + $0x324] sm:$0xf]  ;;  %v11288_v21 = vor.u32 %v12968_v38, %v11285_v8 }
 0x5b8   :  { %7752 = vmatpush.bf16.msra.mxu3 %v11592_v49  ;;  %v11541_v14 = vld [vmem:[#allocation4 + $0x330] sm:$0xf0]  ;;  %v12932_v17 = vld [vmem:[#allocation4 + $0x4] sm:$0xf]  ;;  %v11416_v23 = vor.u32 %v13000_v9, %v11413_v11 }
 0x5b9   :  { %7714 = vmatpush.bf16.msra.mxu0 %v11192_v0  ;;  %v11141_v20 = vld [vmem:[#allocation4 + $0x10] sm:$0xf0]  ;;  %v12964_v24 = vld [vmem:[#allocation4 + $0x104] sm:$0xf]  ;;  %v11544_v26 = vor.u32 %v13032_v12, %v11541_v14 }
 0x5ba   :  { %7727 = vmatpush.bf16.msra.mxu1 %v11320_v55  ;;  %v11269_v44 = vld [vmem:[#allocation4 + $0x110] sm:$0xf0]  ;;  %v12996_v25 = vld [vmem:[#allocation4 + $0x204] sm:$0xf]  ;;  %v11144_v5 = vor.u32 %v12932_v17, %v11141_v20 }
 0x5bb   :  { %7740 = vmatpush.bf16.msra.mxu2 %v11448_v56  ;;  %v11397_v29 = vld [vmem:[#allocation4 + $0x210] sm:$0xf0]  ;;  %v13028_v16 = vld [vmem:[#allocation4 + $0x304] sm:$0xf]  ;;  %v11272_v10 = vor.u32 %v12964_v24, %v11269_v44 }
 0x5bc   :  { %7753 = vmatpush.bf16.msra.mxu3 %v11576_v59  ;;  %v11525_v33 = vld [vmem:[#allocation4 + $0x310] sm:$0xf0]  ;;  %v13088_v31 = vld [vmem:[#allocation4 + $0x4e4] sm:$0xf]  ;;  %v11400_v41 = vor.u32 %v12996_v25, %v11397_v29 }
 0x5bd   :  { %7715 = vmatpush.bf16.msra.mxu0 %v11176_v45  ;;  %v11765_v50 = vld [vmem:[#allocation4 + $0x4f0] sm:$0xf0]  ;;  %v13120_v34 = vld [vmem:[#allocation4 + $0x5e4] sm:$0xf]  ;;  %v11528_v46 = vor.u32 %v13028_v16, %v11525_v33 }
 0x5be   :  { %7728 = vmatpush.bf16.msra.mxu1 %v11304_v6  ;;  %v11893_v35 = vld [vmem:[#allocation4 + $0x5f0] sm:$0xf0]  ;;  %v13152_v36 = vld [vmem:[#allocation4 + $0x6e4] sm:$0xf]  ;;  %v11768_v47 = vor.u32 %v13088_v31, %v11765_v50 }
 0x5bf   :  { %7741 = vmatpush.bf16.msra.mxu2 %v11432_v2  ;;  %v12021_v37 = vld [vmem:[#allocation4 + $0x6f0] sm:$0xf0]  ;;  %v13184_v42 = vld [vmem:[#allocation4 + $0x7e4] sm:$0xf]  ;;  %v11896_v48 = vor.u32 %v13120_v34, %v11893_v35 }
 0x5c0   :  { %7754 = vmatpush.bf16.msra.mxu3 %v11560_v3  ;;  %v12149_v43 = vld [vmem:[#allocation4 + $0x7f0] sm:$0xf0]  ;;  %v12024_v49 = vor.u32 %v13152_v36, %v12021_v37  ;;  %v13084_v51 = vld [vmem:[#allocation4 + $0x4c4] sm:$0xf] }
 0x5c1   :  { %7716 = vmatpush.bf16.msra.mxu0 %v11160_v15  ;;  %v11749_v52 = vld [vmem:[#allocation4 + $0x4d0] sm:$0xf0]  ;;  %v13116_v22 = vld [vmem:[#allocation4 + $0x5c4] sm:$0xf]  ;;  %v12152_v53 = vor.u32 %v13184_v42, %v12149_v43 }
 0x5c2   :  { %7729 = vmatpush.bf16.msra.mxu1 %v11288_v21  ;;  %v11877_v54 = vld [vmem:[#allocation4 + $0x5d0] sm:$0xf0]  ;;  %v13148_v0 = vld [vmem:[#allocation4 + $0x6c4] sm:$0xf]  ;;  %v11752_v7 = vor.u32 %v13084_v51, %v11749_v52 }
 0x5c3   :  { %7742 = vmatpush.bf16.msra.mxu2 %v11416_v23  ;;  %v12005_v55 = vld [vmem:[#allocation4 + $0x6d0] sm:$0xf0]  ;;  %v13180_v56 = vld [vmem:[#allocation4 + $0x7c4] sm:$0xf]  ;;  %v11880_v32 = vor.u32 %v13116_v22, %v11877_v54 }
 0x5c4   :  { %7755 = vmatpush.bf16.msra.mxu3 %v11544_v26  ;;  %v12133_v57 = vld [vmem:[#allocation4 + $0x7d0] sm:$0xf0]  ;;  %v12008_v59 = vor.u32 %v13148_v0, %v12005_v55  ;;  %v13080_v60 = vld [vmem:[#allocation4 + $0x4a4] sm:$0xf] }
 0x5c5   :  { %7717 = vmatpush.bf16.msra.mxu0 %v11144_v5  ;;  %v11733_v4 = vld [vmem:[#allocation4 + $0x4b0] sm:$0xf0]  ;;  %v13112_v61 = vld [vmem:[#allocation4 + $0x5a4] sm:$0xf]  ;;  %v12136_v62 = vor.u32 %v13180_v56, %v12133_v57 }
 0x5c6   :  { %7730 = vmatpush.bf16.msra.mxu1 %v11272_v10  ;;  %v11861_v63 = vld [vmem:[#allocation4 + $0x5b0] sm:$0xf0]  ;;  %v13144_v45 = vld [vmem:[#allocation4 + $0x6a4] sm:$0xf]  ;;  %v11736_v13 = vor.u32 %v13080_v60, %v11733_v4 }
 0x5c7   :  { %7743 = vmatpush.bf16.msra.mxu2 %v11400_v41  ;;  %v11989_v6 = vld [vmem:[#allocation4 + $0x6b0] sm:$0xf0]  ;;  %v13176_v2 = vld [vmem:[#allocation4 + $0x7a4] sm:$0xf]  ;;  %v11864_v38 = vor.u32 %v13112_v61, %v11861_v63 }
 0x5c8   :  { %7756 = vmatpush.bf16.msra.mxu3 %v11528_v46  ;;  %v12117_v39 = vld [vmem:[#allocation4 + $0x7b0] sm:$0xf0]  ;;  %7718 = vmatmul.bf16.vlgmr.msra.gmra.mxu0 %v13569_v18  ;;  %v11992_v3 = vor.u32 %v13144_v45, %v11989_v6  ;;  %v13076_v8 = vld [vmem:[#allocation4 + $0x484] sm:$0xf] }
 0x5c9   :  { %7762 = vmatpush.bf16.msrb.mxu0 %v11768_v47  ;;  %7731 = vmatmul.bf16.vlgmr.msra.gmra.mxu1 %v13583_v19  ;;  %v11717_v9 = vld [vmem:[#allocation4 + $0x490] sm:$0xf0]  ;;  %v13108_v11 = vld [vmem:[#allocation4 + $0x584] sm:$0xf]  ;;  %v12120_v12 = vor.u32 %v13176_v2, %v12117_v39 }
 0x5ca   :  { %7775 = vmatpush.bf16.msrb.mxu1 %v11896_v48  ;;  %7744 = vmatmul.bf16.vlgmr.msra.gmra.mxu2 %v13599_v27  ;;  %v11845_v14 = vld [vmem:[#allocation4 + $0x590] sm:$0xf0]  ;;  %v13140_v15 = vld [vmem:[#allocation4 + $0x684] sm:$0xf]  ;;  %v11720_v23 = vor.u32 %v13076_v8, %v11717_v9  ;;  %v11259_v9 = vld [vmem:[#allocation4 + $0xe8] sm:$0xf] }
 0x5cb   :  { %7788 = vmatpush.bf16.msrb.mxu2 %v12024_v49  ;;  %7757 = vmatmul.bf16.vlgmr.msra.gmra.mxu3 %v13613_v40  ;;  %v11973_v17 = vld [vmem:[#allocation4 + $0x690] sm:$0xf0]  ;;  %v13172_v20 = vld [vmem:[#allocation4 + $0x784] sm:$0xf]  ;;  %v11848_v24 = vor.u32 %v13108_v11, %v11845_v14  ;;  %v12963_v11 = vld [vmem:[#allocation4 + $0xf4] sm:$0xf0] }
 0x5cc   :  { %7801 = vmatpush.bf16.msrb.mxu3 %v12152_v53  ;;  %v12101_v21 = vld [vmem:[#allocation4 + $0x790] sm:$0xf0]  ;;  %v11976_v44 = vor.u32 %v13140_v15, %v11973_v17  ;;  %v13072_v25 = vld [vmem:[#allocation4 + $0x464] sm:$0xf]  ;;  %v12995_v15 = vld [vmem:[#allocation4 + $0x1f4] sm:$0xf0] }
 0x5cd   :  { %7763 = vmatpush.bf16.msrb.mxu0 %v11752_v7  ;;  %v11701_v26 = vld [vmem:[#allocation4 + $0x470] sm:$0xf0]  ;;  %v13104_v29 = vld [vmem:[#allocation4 + $0x564] sm:$0xf]  ;;  %v12104_v16 = vor.u32 %v13172_v20, %v12101_v21  ;;  %v11515_v17 = vld [vmem:[#allocation4 + $0x2e8] sm:$0xf] }
 0x5ce   :  { %7776 = vmatpush.bf16.msrb.mxu1 %v11880_v32  ;;  %v11829_v33 = vld [vmem:[#allocation4 + $0x570] sm:$0xf0]  ;;  %v13136_v31 = vld [vmem:[#allocation4 + $0x664] sm:$0xf]  ;;  %v11704_v35 = vor.u32 %v13072_v25, %v11701_v26  ;;  %v13027_v20 = vld [vmem:[#allocation4 + $0x2f4] sm:$0xf0]  ;;  %v11260_v26 = vor.u32 %v12963_v11, %v11259_v9 }
 0x5cf   :  { %7789 = vmatpush.bf16.msrb.mxu2 %v12008_v59  ;;  %v11957_v50 = vld [vmem:[#allocation4 + $0x670] sm:$0xf0]  ;;  %v13168_v34 = vld [vmem:[#allocation4 + $0x764] sm:$0xf]  ;;  %v11832_v36 = vor.u32 %v13104_v29, %v11829_v33  ;;  %v11243_v33 = vld [vmem:[#allocation4 + $0xc8] sm:$0xf] }
 0x5d0   :  { %7802 = vmatpush.bf16.msrb.mxu3 %v12136_v62  ;;  %v12085_v5 = vld [vmem:[#allocation4 + $0x770] sm:$0xf0]  ;;  %v11960_v37 = vor.u32 %v13136_v31, %v11957_v50  ;;  %v13068_v10 = vld [vmem:[#allocation4 + $0x444] sm:$0xf]  ;;  %v12959_v31 = vld [vmem:[#allocation4 + $0xd4] sm:$0xf0] }
 0x5d1   :  { %7764 = vmatpush.bf16.msrb.mxu0 %v11736_v13  ;;  %v11685_v41 = vld [vmem:[#allocation4 + $0x450] sm:$0xf0]  ;;  %v13100_v42 = vld [vmem:[#allocation4 + $0x544] sm:$0xf]  ;;  %v12088_v43 = vor.u32 %v13168_v34, %v12085_v5  ;;  %v11371_v50 = vld [vmem:[#allocation4 + $0x1c8] sm:$0xf] }
 0x5d2   :  { %7777 = vmatpush.bf16.msrb.mxu1 %v11864_v38  ;;  %v11813_v46 = vld [vmem:[#allocation4 + $0x550] sm:$0xf0]  ;;  %v13132_v47 = vld [vmem:[#allocation4 + $0x644] sm:$0xf]  ;;  %v11688_v52 = vor.u32 %v13068_v10, %v11685_v41  ;;  %v12991_v5 = vld [vmem:[#allocation4 + $0x1d4] sm:$0xf0]  ;;  %v11244_v41 = vor.u32 %v12959_v31, %v11243_v33 }
 0x5d3   :  { %7790 = vmatpush.bf16.msrb.mxu2 %v11992_v3  ;;  %v11941_v48 = vld [vmem:[#allocation4 + $0x650] sm:$0xf0]  ;;  %v13164_v49 = vld [vmem:[#allocation4 + $0x744] sm:$0xf]  ;;  %v11816_v22 = vor.u32 %v13100_v42, %v11813_v46  ;;  %v13055_v10 = vld [vmem:[#allocation4 + $0x3d4] sm:$0xf0]  ;;  %v11372_v42 = vor.u32 %v12991_v5, %v11371_v50 }
 0x5d4   :  { %7803 = vmatpush.bf16.msrb.mxu3 %v12120_v12  ;;  %v12069_v51 = vld [vmem:[#allocation4 + $0x750] sm:$0xf0]  ;;  %v11944_v53 = vor.u32 %v13132_v47, %v11941_v48  ;;  %v13064_v54 = vld [vmem:[#allocation4 + $0x424] sm:$0xf]  ;;  %v11387_v12 = vld [vmem:[#allocation4 + $0x1e8] sm:$0xf] }
 0x5d5   :  { %7765 = vmatpush.bf16.msrb.mxu0 %v11720_v23  ;;  %v11669_v0 = vld [vmem:[#allocation4 + $0x430] sm:$0xf0]  ;;  %v13096_v55 = vld [vmem:[#allocation4 + $0x524] sm:$0xf]  ;;  %v12072_v56 = vor.u32 %v13164_v49, %v12069_v51  ;;  %v11388_v29 = vor.u32 %v12995_v15, %v11387_v12  ;;  %v11227_v46 = vld [vmem:[#allocation4 + $0xa8] sm:$0xf] }
 0x5d6   :  { %7778 = vmatpush.bf16.msrb.mxu1 %v11848_v24  ;;  %v11797_v57 = vld [vmem:[#allocation4 + $0x530] sm:$0xf0]  ;;  %v13128_v7 = vld [vmem:[#allocation4 + $0x624] sm:$0xf]  ;;  %v11672_v4 = vor.u32 %v13064_v54, %v11669_v0  ;;  %v11643_v24 = vld [vmem:[#allocation4 + $0x3e8] sm:$0xf] }
 0x5d7   :  { %7791 = vmatpush.bf16.msrb.mxu2 %v11976_v44  ;;  %v11925_v32 = vld [vmem:[#allocation4 + $0x630] sm:$0xf0]  ;;  %v13160_v59 = vld [vmem:[#allocation4 + $0x724] sm:$0xf]  ;;  %v11800_v63 = vor.u32 %v13096_v55, %v11797_v57  ;;  %v13059_v44 = vld [vmem:[#allocation4 + $0x3f4] sm:$0xf0] }
 0x5d8   :  { %7804 = vmatpush.bf16.msrb.mxu3 %v12104_v16  ;;  %v12053_v60 = vld [vmem:[#allocation4 + $0x730] sm:$0xf0]  ;;  %v13060_v61 = vld [vmem:[#allocation4 + $0x404] sm:$0xf]  ;;  %v11928_v45 = vor.u32 %v13128_v7, %v11925_v32  ;;  %v11516_v16 = vor.u32 %v13027_v20, %v11515_v17  ;;  %v11644_v34 = vor.u32 %v13059_v44, %v11643_v24  ;;  %v12955_v47 = vld [vmem:[#allocation4 + $0xb4] sm:$0xf0] }
 0x5d9   :  { %7766 = vmatpush.bf16.msrb.mxu0 %v11704_v35  ;;  %v11653_v62 = vld [vmem:[#allocation4 + $0x410] sm:$0xf0]  ;;  %v13092_v6 = vld [vmem:[#allocation4 + $0x504] sm:$0xf]  ;;  %v12056_v13 = vor.u32 %v13160_v59, %v12053_v60  ;;  %v11499_v35 = vld [vmem:[#allocation4 + $0x2c8] sm:$0xf]  ;;  %v11228_v0 = vor.u32 %v12955_v47, %v11227_v46 }
 0x5da   :  { %7779 = vmatpush.bf16.msrb.mxu1 %v11832_v36  ;;  %v11781_v2 = vld [vmem:[#allocation4 + $0x510] sm:$0xf0]  ;;  %v13124_v39 = vld [vmem:[#allocation4 + $0x604] sm:$0xf]  ;;  %v11656_v14 = vor.u32 %v13060_v61, %v11653_v62  ;;  %v13023_v36 = vld [vmem:[#allocation4 + $0x2d4] sm:$0xf0] }
 0x5db   :  { %7792 = vmatpush.bf16.msrb.mxu2 %v11960_v37  ;;  %v11909_v38 = vld [vmem:[#allocation4 + $0x610] sm:$0xf0]  ;;  %v13156_v3 = vld [vmem:[#allocation4 + $0x704] sm:$0xf]  ;;  %v11784_v21 = vor.u32 %v13092_v6, %v11781_v2  ;;  %v11627_v37 = vld [vmem:[#allocation4 + $0x3c8] sm:$0xf] }
 0x5dc   :  { %7805 = vmatpush.bf16.msrb.mxu3 %v12088_v43  ;;  %v12037_v8 = vld [vmem:[#allocation4 + $0x710] sm:$0xf0]  ;;  %v11912_v23 = vor.u32 %v13124_v39, %v11909_v38  ;;  %v11500_v43 = vor.u32 %v13023_v36, %v11499_v35  ;;  %v11355_v48 = vld [vmem:[#allocation4 + $0x1a8] sm:$0xf]  ;;  %v11628_v49 = vor.u32 %v13055_v10, %v11627_v37  ;;  %v12987_v51 = vld [vmem:[#allocation4 + $0x1b4] sm:$0xf0] }
 0x5dd   :  { %7767 = vmatpush.bf16.msrb.mxu0 %v11688_v52  ;;  %v12040_v25 = vor.u32 %v13156_v3, %v12037_v8  ;;  %v11483_v52 = vld [vmem:[#allocation4 + $0x2a8] sm:$0xf]  ;;  %v13051_v54 = vld [vmem:[#allocation4 + $0x3b4] sm:$0xf0]  ;;  %v11356_v55 = vor.u32 %v12987_v51, %v11355_v48 }
 0x5de   :  { %7780 = vmatpush.bf16.msrb.mxu1 %v11816_v22  ;;  %v13019_v22 = vld [vmem:[#allocation4 + $0x2b4] sm:$0xf0]  ;;  %v11211_v57 = vld [vmem:[#allocation4 + $0x88] sm:$0xf] }
 0x5df   :  { %7793 = vmatpush.bf16.msrb.mxu2 %v11944_v53  ;;  %v11611_v53 = vld [vmem:[#allocation4 + $0x3a8] sm:$0xf]  ;;  %v12951_v7 = vld [vmem:[#allocation4 + $0x94] sm:$0xf0] }
 0x5e0   :  { %7806 = vmatpush.bf16.msrb.mxu3 %v12072_v56  ;;  %v11484_v56 = vor.u32 %v13019_v22, %v11483_v52  ;;  %v11339_v32 = vld [vmem:[#allocation4 + $0x188] sm:$0xf]  ;;  %v11612_v59 = vor.u32 %v13051_v54, %v11611_v53  ;;  %v12983_v60 = vld [vmem:[#allocation4 + $0x194] sm:$0xf0] }
 0x5e1   :  { %7768 = vmatpush.bf16.msrb.mxu0 %v11672_v4  ;;  %v11467_v4 = vld [vmem:[#allocation4 + $0x288] sm:$0xf]  ;;  %v13015_v61 = vld [vmem:[#allocation4 + $0x294] sm:$0xf0]  ;;  %v11340_v6 = vor.u32 %v12983_v60, %v11339_v32 }
 0x5e2   :  { %7781 = vmatpush.bf16.msrb.mxu1 %v11800_v63  ;;  %v11595_v62 = vld [vmem:[#allocation4 + $0x388] sm:$0xf]  ;;  %v13047_v63 = vld [vmem:[#allocation4 + $0x394] sm:$0xf0]  ;;  %v11468_v2 = vor.u32 %v13015_v61, %v11467_v4 }
 0x5e3   :  { %7794 = vmatpush.bf16.msrb.mxu2 %v11928_v45  ;;  %v11212_v45 = vor.u32 %v12951_v7, %v11211_v57  ;;  %v11195_v39 = vld [vmem:[#allocation4 + $0x68] sm:$0xf]  ;;  %v11596_v3 = vor.u32 %v13047_v63, %v11595_v62  ;;  %v12979_v8 = vld [vmem:[#allocation4 + $0x174] sm:$0xf0] }
 0x5e4   :  { %7807 = vmatpush.bf16.msrb.mxu3 %v12056_v13  ;;  %v12947_v13 = vld [vmem:[#allocation4 + $0x74] sm:$0xf0]  ;;  %v11323_v38 = vld [vmem:[#allocation4 + $0x168] sm:$0xf] }
 0x5e5   :  { %7769 = vmatpush.bf16.msrb.mxu0 %v11656_v14  ;;  %v11451_v9 = vld [vmem:[#allocation4 + $0x268] sm:$0xf]  ;;  %v13011_v11 = vld [vmem:[#allocation4 + $0x274] sm:$0xf0]  ;;  %v11196_v15 = vor.u32 %v12947_v13, %v11195_v39  ;;  %v11324_v17 = vor.u32 %v12979_v8, %v11323_v38 }
 0x5e6   :  { %7782 = vmatpush.bf16.msrb.mxu1 %v11784_v21  ;;  %v11579_v12 = vld [vmem:[#allocation4 + $0x368] sm:$0xf]  ;;  %v13043_v14 = vld [vmem:[#allocation4 + $0x374] sm:$0xf0]  ;;  %v11452_v20 = vor.u32 %v13011_v11, %v11451_v9 }
 0x5e7   :  { %7795 = vmatpush.bf16.msrb.mxu2 %v11912_v23  ;;  %v11179_v21 = vld [vmem:[#allocation4 + $0x48] sm:$0xf]  ;;  %v12943_v23 = vld [vmem:[#allocation4 + $0x54] sm:$0xf0]  ;;  %v11580_v44 = vor.u32 %v13043_v14, %v11579_v12 }
 0x5e8   :  { %7808 = vmatpush.bf16.msrb.mxu3 %v12040_v25  ;;  %7770 = vmatmul.bf16.vlgmr.msrb.gmra.mxu0 %v13629_v1  ;;  %v11307_v24 = vld [vmem:[#allocation4 + $0x148] sm:$0xf]  ;;  %v12975_v25 = vld [vmem:[#allocation4 + $0x154] sm:$0xf0]  ;;  %v11180_v31 = vor.u32 %v12943_v23, %v11179_v21 }
 0x5e9   :  { %7814 = vmatpush.bf16.msra.mxu0 %v11260_v26  ;;  %7783 = vmatmul.bf16.vlgmr.msrb.gmra.mxu1 %v13640_v30  ;;  %v11435_v26 = vld [vmem:[#allocation4 + $0x248] sm:$0xf]  ;;  %v13039_v33 = vld [vmem:[#allocation4 + $0x354] sm:$0xf0]  ;;  %v11308_v50 = vor.u32 %v12975_v25, %v11307_v24 }
 0x5ea   :  { %7827 = vmatpush.bf16.msra.mxu1 %v11388_v29  ;;  %7796 = vmatmul.bf16.vlgmr.msrb.gmra.mxu2 %v13643_v58  ;;  %v13007_v29 = vld [vmem:[#allocation4 + $0x254] sm:$0xf0]  ;;  %v11163_v5 = vld [vmem:[#allocation4 + $0x28] sm:$0xf] }
 0x5eb   :  { %7840 = vmatpush.bf16.msra.mxu2 %v11516_v16  ;;  %7809 = vmatmul.bf16.vlgmr.msrb.gmra.mxu3 %v13646_v28  ;;  %v11563_v16 = vld [vmem:[#allocation4 + $0x348] sm:$0xf]  ;;  %v12939_v35 = vld [vmem:[#allocation4 + $0x34] sm:$0xf0] }
 0x5ec   :  { %7853 = vmatpush.bf16.msra.mxu3 %v11644_v34  ;;  %v11436_v34 = vor.u32 %v13007_v29, %v11435_v26  ;;  %v11291_v36 = vld [vmem:[#allocation4 + $0x128] sm:$0xf]  ;;  %v11564_v37 = vor.u32 %v13039_v33, %v11563_v16  ;;  %v12971_v10 = vld [vmem:[#allocation4 + $0x134] sm:$0xf0]  ;;  %v11164_v47 = vor.u32 %v12939_v35, %v11163_v5 }
 0x5ed   :  { %7815 = vmatpush.bf16.msra.mxu0 %v11244_v41  ;;  %v11419_v41 = vld [vmem:[#allocation4 + $0x228] sm:$0xf]  ;;  %v13035_v46 = vld [vmem:[#allocation4 + $0x334] sm:$0xf0]  ;;  %v11292_v51 = vor.u32 %v12971_v10, %v11291_v36 }
 0x5ee   :  { %7828 = vmatpush.bf16.msra.mxu1 %v11372_v42  ;;  %v13003_v42 = vld [vmem:[#allocation4 + $0x234] sm:$0xf0]  ;;  %v11147_v48 = vld [vmem:[#allocation4 + $0x8] sm:$0xf] }
 0x5ef   :  { %7841 = vmatpush.bf16.msra.mxu2 %v11500_v43  ;;  %v11547_v43 = vld [vmem:[#allocation4 + $0x328] sm:$0xf]  ;;  %v11420_v52 = vor.u32 %v13003_v42, %v11419_v41  ;;  %v12967_v53 = vld [vmem:[#allocation4 + $0x114] sm:$0xf0] }
 0x5f0   :  { %7854 = vmatpush.bf16.msra.mxu3 %v11628_v49  ;;  %v12935_v49 = vld [vmem:[#allocation4 + $0x14] sm:$0xf0]  ;;  %v11275_v22 = vld [vmem:[#allocation4 + $0x108] sm:$0xf] }
 0x5f1   :  { %7816 = vmatpush.bf16.msra.mxu0 %v11228_v0  ;;  %v11403_v54 = vld [vmem:[#allocation4 + $0x208] sm:$0xf]  ;;  %v11548_v0 = vor.u32 %v13035_v46, %v11547_v43  ;;  %v13031_v57 = vld [vmem:[#allocation4 + $0x314] sm:$0xf0]  ;;  %v11148_v60 = vor.u32 %v12935_v49, %v11147_v48  ;;  %v11276_v63 = vor.u32 %v12967_v53, %v11275_v22 }
 0x5f2   :  { %7829 = vmatpush.bf16.msra.mxu1 %v11356_v55  ;;  %v12999_v55 = vld [vmem:[#allocation4 + $0x214] sm:$0xf0]  ;;  %v11771_v7 = vld [vmem:[#allocation4 + $0x4e8] sm:$0xf] }
 0x5f3   :  { %7842 = vmatpush.bf16.msra.mxu2 %v11484_v56  ;;  %v11531_v56 = vld [vmem:[#allocation4 + $0x308] sm:$0xf]  ;;  %v13091_v32 = vld [vmem:[#allocation4 + $0x4f4] sm:$0xf0] }
 0x5f4   :  { %7855 = vmatpush.bf16.msra.mxu3 %v11612_v59  ;;  %v11899_v59 = vld [vmem:[#allocation4 + $0x5e8] sm:$0xf]  ;;  %v13123_v4 = vld [vmem:[#allocation4 + $0x5f4] sm:$0xf0]  ;;  %v11532_v39 = vor.u32 %v13031_v57, %v11531_v56  ;;  %v11772_v13 = vor.u32 %v13091_v32, %v11771_v7 }
 0x5f5   :  { %7817 = vmatpush.bf16.msra.mxu0 %v11212_v45  ;;  %v12027_v61 = vld [vmem:[#allocation4 + $0x6e8] sm:$0xf]  ;;  %v13155_v62 = vld [vmem:[#allocation4 + $0x6f4] sm:$0xf0]  ;;  %v11404_v45 = vor.u32 %v12999_v55, %v11403_v54  ;;  %v11900_v38 = vor.u32 %v13123_v4, %v11899_v59 }
 0x5f6   :  { %7830 = vmatpush.bf16.msra.mxu1 %v11340_v6  ;;  %v12155_v6 = vld [vmem:[#allocation4 + $0x7e8] sm:$0xf]  ;;  %v13087_v9 = vld [vmem:[#allocation4 + $0x4d4] sm:$0xf0] }
 0x5f7   :  { %7843 = vmatpush.bf16.msra.mxu2 %v11468_v2  ;;  %v13187_v2 = vld [vmem:[#allocation4 + $0x7f4] sm:$0xf0]  ;;  %v11755_v8 = vld [vmem:[#allocation4 + $0x4c8] sm:$0xf] }
 0x5f8   :  { %7856 = vmatpush.bf16.msra.mxu3 %v11596_v3  ;;  %v12028_v3 = vor.u32 %v13155_v62, %v12027_v61  ;;  %v11883_v11 = vld [vmem:[#allocation4 + $0x5c8] sm:$0xf]  ;;  %v12156_v12 = vor.u32 %v13187_v2, %v12155_v6  ;;  %v13119_v14 = vld [vmem:[#allocation4 + $0x5d4] sm:$0xf0]  ;;  %v11756_v23 = vor.u32 %v13087_v9, %v11755_v8 }
 0x5f9   :  { %7818 = vmatpush.bf16.msra.mxu0 %v11196_v15  ;;  %v12011_v15 = vld [vmem:[#allocation4 + $0x6c8] sm:$0xf]  ;;  %v13183_v21 = vld [vmem:[#allocation4 + $0x7d4] sm:$0xf0]  ;;  %v11884_v24 = vor.u32 %v13119_v14, %v11883_v11 }
 0x5fa   :  { %7831 = vmatpush.bf16.msra.mxu1 %v11324_v17  ;;  %v13151_v17 = vld [vmem:[#allocation4 + $0x6d4] sm:$0xf0]  ;;  %v11739_v25 = vld [vmem:[#allocation4 + $0x4a8] sm:$0xf] }
 0x5fb   :  { %7844 = vmatpush.bf16.msra.mxu2 %v11452_v20  ;;  %v12139_v20 = vld [vmem:[#allocation4 + $0x7c8] sm:$0xf]  ;;  %v13083_v26 = vld [vmem:[#allocation4 + $0x4b4] sm:$0xf0] }
 0x5fc   :  { %7857 = vmatpush.bf16.msra.mxu3 %v11580_v44  ;;  %v12012_v44 = vor.u32 %v13151_v17, %v12011_v15  ;;  %v11867_v29 = vld [vmem:[#allocation4 + $0x5a8] sm:$0xf]  ;;  %v12140_v16 = vor.u32 %v13183_v21, %v12139_v20  ;;  %v13115_v33 = vld [vmem:[#allocation4 + $0x5b4] sm:$0xf0]  ;;  %v11740_v35 = vor.u32 %v13083_v26, %v11739_v25  ;;  %v13676_v17 = vld [vmem:[#allocation12] sm:$0xf] }
 0x5fd   :  { %7819 = vmatpush.bf16.msra.mxu0 %v11180_v31  ;;  %v11995_v31 = vld [vmem:[#allocation4 + $0x6a8] sm:$0xf]  ;;  %v13179_v5 = vld [vmem:[#allocation4 + $0x7b4] sm:$0xf0]  ;;  %v11868_v36 = vor.u32 %v13115_v33, %v11867_v29 }
 0x5fe   :  { %7832 = vmatpush.bf16.msra.mxu1 %v11308_v50  ;;  %v13147_v50 = vld [vmem:[#allocation4 + $0x6b4] sm:$0xf0]  ;;  %v11723_v10 = vld [vmem:[#allocation4 + $0x488] sm:$0xf] }
 0x5ff   :  { %7845 = vmatpush.bf16.msra.mxu2 %v11436_v34  ;;  %v12123_v34 = vld [vmem:[#allocation4 + $0x7a8] sm:$0xf]  ;;  %v13079_v41 = vld [vmem:[#allocation4 + $0x494] sm:$0xf0] }
 0x600   :  { %7858 = vmatpush.bf16.msra.mxu3 %v11564_v37  ;;  %v11996_v37 = vor.u32 %v13147_v50, %v11995_v31  ;;  %v11851_v42 = vld [vmem:[#allocation4 + $0x588] sm:$0xf]  ;;  %v12124_v43 = vor.u32 %v13179_v5, %v12123_v34  ;;  %v13111_v46 = vld [vmem:[#allocation4 + $0x594] sm:$0xf0]  ;;  %v6318_v5 = vperm.slane %v13676_v17, 0 }
 0x601   :  { %7820 = vmatpush.bf16.msra.mxu0 %v11164_v47  ;;  %v11979_v47 = vld [vmem:[#allocation4 + $0x688] sm:$0xf]  ;;  %v13143_v48 = vld [vmem:[#allocation4 + $0x694] sm:$0xf0]  ;;  %v11852_v53 = vor.u32 %v13111_v46, %v11851_v42 }
 0x602   :  { %7833 = vmatpush.bf16.msra.mxu1 %v11292_v51  ;;  %v12107_v49 = vld [vmem:[#allocation4 + $0x788] sm:$0xf]  ;;  %v13175_v51 = vld [vmem:[#allocation4 + $0x794] sm:$0xf0]  ;;  %v11980_v54 = vor.u32 %v13143_v48, %v11979_v47 }
 0x603   :  { %7846 = vmatpush.bf16.msra.mxu2 %v11420_v52  ;;  %v11724_v52 = vor.u32 %v13079_v41, %v11723_v10  ;;  %v13075_v55 = vld [vmem:[#allocation4 + $0x474] sm:$0xf0]  ;;  %v11835_v56 = vld [vmem:[#allocation4 + $0x568] sm:$0xf]  ;;  %v12108_v7 = vor.u32 %v13175_v51, %v12107_v49 }
 0x604   :  { %7859 = vmatpush.bf16.msra.mxu3 %v11548_v0  ;;  %v11707_v0 = vld [vmem:[#allocation4 + $0x468] sm:$0xf]  ;;  %v13107_v32 = vld [vmem:[#allocation4 + $0x574] sm:$0xf0] }
 0x605   :  { %7821 = vmatpush.bf16.msra.mxu0 %v11148_v60  ;;  %v13668_v22 = vpop.f32.mrf.mxu0  ;;  %v11963_v59 = vld [vmem:[#allocation4 + $0x668] sm:$0xf]  ;;  %v13139_v60 = vld [vmem:[#allocation4 + $0x674] sm:$0xf0]  ;;  %v11708_v62 = vor.u32 %v13075_v55, %v11707_v0  ;;  %v11261_v0 = vld [vmem:[#allocation4 + $0xf8] sm:$0xf0] }
 0x606   :  { %7834 = vmatpush.bf16.msra.mxu1 %v11276_v63  ;;  %v13670_v57 = vpop.f32.mrf.mxu1  ;;  %v12091_v4 = vld [vmem:[#allocation4 + $0x768] sm:$0xf]  ;;  %v13171_v61 = vld [vmem:[#allocation4 + $0x774] sm:$0xf0]  ;;  %v11836_v63 = vor.u32 %v13107_v32, %v11835_v56  ;;  %v12993_v55 = vld [vmem:[#allocation4 + $0x1ec] sm:$0xf]  ;;  %v7616_v56 = vadd.f32 %v13668_v22, %v6318_v5 }
 0x607   :  { %7847 = vmatpush.bf16.msra.mxu2 %v11404_v45  ;;  %v11964_v45 = vor.u32 %v13139_v60, %v11963_v59  ;;  %v11691_v6 = vld [vmem:[#allocation4 + $0x448] sm:$0xf]  ;;  %v13071_v2 = vld [vmem:[#allocation4 + $0x454] sm:$0xf0]  ;;  %v11389_v32 = vld [vmem:[#allocation4 + $0x1f8] sm:$0xf0] }
 0x608   :  { %7860 = vmatpush.bf16.msra.mxu3 %v11532_v39  ;;  %7822 = vmatmul.bf16.vlgmr.msra.gmra.mxu0 %v13569_v18  ;;  %v11819_v39 = vld [vmem:[#allocation4 + $0x548] sm:$0xf]  ;;  %v13135_v9 = vld [vmem:[#allocation4 + $0x654] sm:$0xf0]  ;;  %v11692_v15 = vor.u32 %v13071_v2, %v11691_v6  ;;  %v13025_v59 = vld [vmem:[#allocation4 + $0x2ec] sm:$0xf]  ;;  %v11392_v2 = vor.u32 %v12993_v55, %v11389_v32 }
 0x609   :  { %7866 = vmatpush.bf16.msrb.mxu0 %v11772_v13  ;;  %7835 = vmatmul.bf16.vlgmr.msra.gmra.mxu1 %v13583_v19  ;;  %v11947_v8 = vld [vmem:[#allocation4 + $0x648] sm:$0xf]  ;;  %v13167_v14 = vld [vmem:[#allocation4 + $0x754] sm:$0xf0]  ;;  %v11517_v60 = vld [vmem:[#allocation4 + $0x2f8] sm:$0xf0] }
 0x60a   :  { %7879 = vmatpush.bf16.msrb.mxu1 %v11900_v38  ;;  %7848 = vmatmul.bf16.vlgmr.msra.gmra.mxu2 %v13599_v27  ;;  %v12092_v38 = vor.u32 %v13171_v61, %v12091_v4  ;;  %v11803_v25 = vld [vmem:[#allocation4 + $0x528] sm:$0xf]  ;;  %v13131_v31 = vld [vmem:[#allocation4 + $0x634] sm:$0xf0]  ;;  %v11245_v22 = vld [vmem:[#allocation4 + $0xd8] sm:$0xf0] }
 0x60b   :  { %7892 = vmatpush.bf16.msrb.mxu2 %v12028_v3  ;;  %7861 = vmatmul.bf16.vlgmr.msra.gmra.mxu3 %v13613_v40  ;;  %v13103_v3 = vld [vmem:[#allocation4 + $0x554] sm:$0xf0]  ;;  %v11931_v33 = vld [vmem:[#allocation4 + $0x628] sm:$0xf]  ;;  %v11613_v5 = vld [vmem:[#allocation4 + $0x3b8] sm:$0xf0] }
 0x60c   :  { %7905 = vmatpush.bf16.msrb.mxu3 %v12156_v12  ;;  %v12075_v12 = vld [vmem:[#allocation4 + $0x748] sm:$0xf]  ;;  %v11820_v21 = vor.u32 %v13103_v3, %v11819_v39  ;;  %v13163_v34 = vld [vmem:[#allocation4 + $0x734] sm:$0xf0]  ;;  %v11932_v41 = vor.u32 %v13131_v31, %v11931_v33  ;;  %v11520_v39 = vor.u32 %v13025_v59, %v11517_v60  ;;  %v12957_v3 = vld [vmem:[#allocation4 + $0xcc] sm:$0xf] }
 0x60d   :  { %7867 = vmatpush.bf16.msrb.mxu0 %v11756_v23  ;;  %v13672_v13 = vpop.f32.mrf.mxu2  ;;  %v7617_v20 = vpop.f32.mrf.mxu0  ;;  %v11948_v23 = vor.u32 %v13135_v9, %v11947_v8  ;;  %v12076_v29 = vor.u32 %v13167_v14, %v12075_v12  ;;  %v12059_v50 = vld [vmem:[#allocation4 + $0x728] sm:$0xf]  ;;  %v13127_v49 = vld [vmem:[#allocation4 + $0x614] sm:$0xf0]  ;;  %v12989_v8 = vld [vmem:[#allocation4 + $0x1cc] sm:$0xf] }
 0x60e   :  { %7880 = vmatpush.bf16.msrb.mxu1 %v11884_v24  ;;  %v13674_v11 = vpop.f32.mrf.mxu3  ;;  %v11675_v24 = vld [vmem:[#allocation4 + $0x428] sm:$0xf]  ;;  %v7630_v26 = vpop.f32.mrf.mxu1  ;;  %v12060_v48 = vor.u32 %v13163_v34, %v12059_v50  ;;  %v11373_v12 = vld [vmem:[#allocation4 + $0x1d8] sm:$0xf0]  ;;  %v13021_v14 = vld [vmem:[#allocation4 + $0x2cc] sm:$0xf] }
 0x60f   :  { %7893 = vmatpush.bf16.msrb.mxu2 %v12012_v44  ;;  %v13067_v44 = vld [vmem:[#allocation4 + $0x434] sm:$0xf0]  ;;  %v11787_v42 = vld [vmem:[#allocation4 + $0x508] sm:$0xf]  ;;  %v13053_v20 = vld [vmem:[#allocation4 + $0x3cc] sm:$0xf] }
 0x610   :  { %7906 = vmatpush.bf16.msrb.mxu3 %v12140_v16  ;;  %v13099_v16 = vld [vmem:[#allocation4 + $0x534] sm:$0xf0]  ;;  %v11915_v46 = vld [vmem:[#allocation4 + $0x608] sm:$0xf]  ;;  %v11229_v26 = vld [vmem:[#allocation4 + $0xb8] sm:$0xf0] }
 0x611   :  { %7868 = vmatpush.bf16.msrb.mxu0 %v11740_v35  ;;  %v11676_v35 = vor.u32 %v13067_v44, %v11675_v24  ;;  %v11804_v10 = vor.u32 %v13099_v16, %v11803_v25  ;;  %v12043_v51 = vld [vmem:[#allocation4 + $0x708] sm:$0xf]  ;;  %v11916_v61 = vor.u32 %v13127_v49, %v11915_v46  ;;  %v11376_v24 = vor.u32 %v12989_v8, %v11373_v12  ;;  %v12953_v25 = vld [vmem:[#allocation4 + $0xac] sm:$0xf]  ;;  %v11357_v33 = vld [vmem:[#allocation4 + $0x1b8] sm:$0xf0] }
 0x612   :  { %7881 = vmatpush.bf16.msrb.mxu1 %v11868_v36  ;;  %v11659_v36 = vld [vmem:[#allocation4 + $0x408] sm:$0xf]  ;;  %v13017_v31 = vld [vmem:[#allocation4 + $0x2ac] sm:$0xf]  ;;  %v11485_v50 = vld [vmem:[#allocation4 + $0x2b8] sm:$0xf0] }
 0x613   :  { %7894 = vmatpush.bf16.msrb.mxu2 %v11996_v37  ;;  %v13063_v37 = vld [vmem:[#allocation4 + $0x414] sm:$0xf0]  ;;  %v13049_v34 = vld [vmem:[#allocation4 + $0x3ac] sm:$0xf]  ;;  %v11341_v46 = vld [vmem:[#allocation4 + $0x198] sm:$0xf0] }
 0x614   :  { %7907 = vmatpush.bf16.msrb.mxu3 %v12124_v43  ;;  %v13095_v43 = vld [vmem:[#allocation4 + $0x514] sm:$0xf0]  ;;  %v13045_v49 = vld [vmem:[#allocation4 + $0x38c] sm:$0xf]  ;;  %v11197_v55 = vld [vmem:[#allocation4 + $0x78] sm:$0xf0] }
 0x615   :  { %7869 = vmatpush.bf16.msrb.mxu0 %v11724_v52  ;;  %v7643_v47 = vpop.f32.mrf.mxu2  ;;  %v13159_v52 = vld [vmem:[#allocation4 + $0x714] sm:$0xf0]  ;;  %v11788_v4 = vor.u32 %v13095_v43, %v11787_v42  ;;  %v12981_v42 = vld [vmem:[#allocation4 + $0x18c] sm:$0xf]  ;;  %v11616_v43 = vor.u32 %v13049_v34, %v11613_v5  ;;  %v11325_v60 = vld [vmem:[#allocation4 + $0x178] sm:$0xf0] }
 0x616   :  { %7882 = vmatpush.bf16.msrb.mxu1 %v11852_v53  ;;  %v7656_v53 = vpop.f32.mrf.mxu3  ;;  %v13013_v47 = vld [vmem:[#allocation4 + $0x28c] sm:$0xf]  ;;  %v11309_v12 = vld [vmem:[#allocation4 + $0x158] sm:$0xf0] }
 0x617   :  { %7895 = vmatpush.bf16.msrb.mxu2 %v11980_v54  ;;  %v12961_v54 = vld [vmem:[#allocation4 + $0xec] sm:$0xf] }
 0x618   :  { %7908 = vmatpush.bf16.msrb.mxu3 %v12108_v7  ;;  %v11660_v7 = vor.u32 %v13063_v37, %v11659_v36  ;;  %v11264_v6 = vor.u32 %v12961_v54, %v11261_v0  ;;  %v11488_v37 = vor.u32 %v13017_v31, %v11485_v50  ;;  %v11344_v54 = vor.u32 %v12981_v42, %v11341_v46  ;;  %v12969_v31 = vld [vmem:[#allocation4 + $0x12c] sm:$0xf]  ;;  %v11293_v50 = vld [vmem:[#allocation4 + $0x138] sm:$0xf0] }
 0x619   :  { %7870 = vmatpush.bf16.msrb.mxu0 %v11708_v62  ;;  %v13057_v62 = vld [vmem:[#allocation4 + $0x3ec] sm:$0xf]  ;;  %v11149_v42 = vld [vmem:[#allocation4 + $0x18] sm:$0xf0] }
 0x61a   :  { %7883 = vmatpush.bf16.msrb.mxu1 %v11836_v63  ;;  %v11645_v63 = vld [vmem:[#allocation4 + $0x3f8] sm:$0xf0] }
 0x61b   :  { %7896 = vmatpush.bf16.msrb.mxu2 %v11964_v45  ;;  %v12044_v45 = vor.u32 %v13159_v52, %v12043_v51  ;;  %v11648_v9 = vor.u32 %v13057_v62, %v11645_v63  ;;  %v11597_v51 = vld [vmem:[#allocation4 + $0x398] sm:$0xf0]  ;;  %v13041_v62 = vld [vmem:[#allocation4 + $0x36c] sm:$0xf] }
 0x61c   :  { %7909 = vmatpush.bf16.msrb.mxu3 %v12092_v38  ;;  %v7629_v38 = vadd.f32 %v13670_v57, %v7616_v56  ;;  %v12977_v56 = vld [vmem:[#allocation4 + $0x16c] sm:$0xf]  ;;  %v11600_v59 = vor.u32 %v13045_v49, %v11597_v51  ;;  %v11581_v63 = vld [vmem:[#allocation4 + $0x378] sm:$0xf0] }
 0x61d   :  { %7871 = vmatpush.bf16.msrb.mxu0 %v11692_v15  ;;  %v11501_v15 = vld [vmem:[#allocation4 + $0x2d8] sm:$0xf0]  ;;  %v12997_v49 = vld [vmem:[#allocation4 + $0x20c] sm:$0xf] }
 0x61e   :  { %7884 = vmatpush.bf16.msrb.mxu1 %v11820_v21  ;;  %v11629_v21 = vld [vmem:[#allocation4 + $0x3d8] sm:$0xf0]  ;;  %v11504_v44 = vor.u32 %v13021_v14, %v11501_v15  ;;  %v7642_v57 = vadd.f32 %v13672_v13, %v7629_v38  ;;  %v12941_v38 = vld [vmem:[#allocation4 + $0x4c] sm:$0xf] }
 0x61f   :  { %7897 = vmatpush.bf16.msrb.mxu2 %v11948_v23  ;;  %v11248_v23 = vor.u32 %v12957_v3, %v11245_v22  ;;  %v11632_v16 = vor.u32 %v13053_v20, %v11629_v21  ;;  %v11181_v3 = vld [vmem:[#allocation4 + $0x58] sm:$0xf0]  ;;  %v12973_v22 = vld [vmem:[#allocation4 + $0x14c] sm:$0xf] }
 0x620   :  { %7910 = vmatpush.bf16.msrb.mxu3 %v12076_v29  ;;  %v12985_v29 = vld [vmem:[#allocation4 + $0x1ac] sm:$0xf]  ;;  %v7655_v13 = vadd.f32 %v13674_v11, %v7642_v57  ;;  %v11437_v15 = vld [vmem:[#allocation4 + $0x258] sm:$0xf0] }
 0x621   :  { %7872 = vmatpush.bf16.msrb.mxu0 %v11676_v35  ;;  %v11232_v35 = vor.u32 %v12953_v25, %v11229_v26  ;;  %v11360_v36 = vor.u32 %v12985_v29, %v11357_v33  ;;  %v12945_v11 = vld [vmem:[#allocation4 + $0x6c] sm:$0xf]  ;;  %v11312_v29 = vor.u32 %v12973_v22, %v11309_v12  ;;  %v11165_v33 = vld [vmem:[#allocation4 + $0x38] sm:$0xf0] }
 0x622   :  { %7885 = vmatpush.bf16.msrb.mxu1 %v11804_v10  ;;  %v12949_v10 = vld [vmem:[#allocation4 + $0x8c] sm:$0xf]  ;;  %v11757_v22 = vld [vmem:[#allocation4 + $0x4d8] sm:$0xf0] }
 0x623   :  { %7898 = vmatpush.bf16.msrb.mxu2 %v11932_v41  ;;  %v11213_v41 = vld [vmem:[#allocation4 + $0x98] sm:$0xf0]  ;;  %v13005_v14 = vld [vmem:[#allocation4 + $0x24c] sm:$0xf] }
 0x624   :  { %7911 = vmatpush.bf16.msrb.mxu3 %v12060_v48  ;;  %v11469_v48 = vld [vmem:[#allocation4 + $0x298] sm:$0xf0]  ;;  %v11216_v52 = vor.u32 %v12949_v10, %v11213_v41  ;;  %v12937_v25 = vld [vmem:[#allocation4 + $0x2c] sm:$0xf] }
 0x625   :  { %7873 = vmatpush.bf16.msrb.mxu0 %v11660_v7  ;;  %v7667_v53 = vpop.f32.mrf.mxu0  ;;  %v11472_v0 = vor.u32 %v13013_v47, %v11469_v48  ;;  %v11168_v10 = vor.u32 %v12937_v25, %v11165_v33  ;;  %v12933_v41 = vld [vmem:[#allocation4 + $0xc] sm:$0xf]  ;;  %v11277_v48 = vld [vmem:[#allocation4 + $0x118] sm:$0xf0] }
 0x626   :  { %7886 = vmatpush.bf16.msrb.mxu1 %v11788_v4  ;;  %v7668_v7 = vadd.f32 %v7667_v53, %v7655_v13  ;;  %v7680_v32 = vpop.f32.mrf.mxu1  ;;  %v13009_v4 = vld [vmem:[#allocation4 + $0x26c] sm:$0xf]  ;;  %v11421_v13 = vld [vmem:[#allocation4 + $0x238] sm:$0xf0] }
 0x627   :  { %7899 = vmatpush.bf16.msrb.mxu2 %v11916_v61  ;;  %v11453_v61 = vld [vmem:[#allocation4 + $0x278] sm:$0xf0]  ;;  %v12965_v47 = vld [vmem:[#allocation4 + $0x10c] sm:$0xf] }
 0x628   :  { %7912 = vmatpush.bf16.msrb.mxu3 %v12044_v45  ;;  %7874 = vmatmul.bf16.vlgmr.msrb.gmra.mxu0 %v13629_v1  ;;  %v7681_v45 = vadd.f32 %v7680_v32, %v7668_v7  ;;  %v11405_v53 = vld [vmem:[#allocation4 + $0x218] sm:$0xf0]  ;;  %v13121_v7 = vld [vmem:[#allocation4 + $0x5ec] sm:$0xf]  ;;  %v11152_v32 = vor.u32 %v12933_v41, %v11149_v42 }
 0x629   :  { %7918 = vmatpush.bf16.msra.mxu0 %v11264_v6  ;;  %7887 = vmatmul.bf16.vlgmr.msrb.gmra.mxu1 %v13640_v30  ;;  %v11200_v6 = vor.u32 %v12945_v11, %v11197_v55  ;;  %v13089_v55 = vld [vmem:[#allocation4 + $0x4ec] sm:$0xf]  ;;  %v11885_v12 = vld [vmem:[#allocation4 + $0x5d8] sm:$0xf0] }
 0x62a   :  { %7931 = vmatpush.bf16.msra.mxu1 %v11392_v2  ;;  %7900 = vmatmul.bf16.vlgmr.msrb.gmra.mxu2 %v13643_v58  ;;  %v11328_v2 = vor.u32 %v12977_v56, %v11325_v60  ;;  %v11773_v56 = vld [vmem:[#allocation4 + $0x4f8] sm:$0xf0]  ;;  %v13153_v60 = vld [vmem:[#allocation4 + $0x6ec] sm:$0xf] }
 0x62b   :  { %7944 = vmatpush.bf16.msra.mxu2 %v11520_v39  ;;  %7913 = vmatmul.bf16.vlgmr.msrb.gmra.mxu3 %v13646_v28  ;;  %v11456_v39 = vor.u32 %v13009_v4, %v11453_v61  ;;  %v12029_v4 = vld [vmem:[#allocation4 + $0x6f8] sm:$0xf0]  ;;  %v11280_v61 = vor.u32 %v12965_v47, %v11277_v48  ;;  %v13145_v33 = vld [vmem:[#allocation4 + $0x6ac] sm:$0xf] }
 0x62c   :  { %7957 = vmatpush.bf16.msra.mxu3 %v11648_v9  ;;  %v11584_v9 = vor.u32 %v13041_v62, %v11581_v63  ;;  %v11408_v62 = vor.u32 %v12997_v49, %v11405_v53  ;;  %v13185_v63 = vld [vmem:[#allocation4 + $0x7ec] sm:$0xf]  ;;  %v11741_v25 = vld [vmem:[#allocation4 + $0x4b8] sm:$0xf0] }
 0x62d   :  { %7919 = vmatpush.bf16.msra.mxu0 %v11248_v23  ;;  %v7693_v8 = vpop.f32.mrf.mxu2  ;;  %v13037_v23 = vld [vmem:[#allocation4 + $0x34c] sm:$0xf]  ;;  %v7669_v26 = vpop.f32.mrf.mxu0  ;;  %v11853_v41 = vld [vmem:[#allocation4 + $0x598] sm:$0xf0] }
 0x62e   :  { %7932 = vmatpush.bf16.msra.mxu1 %v11376_v24  ;;  %v7694_v20 = vadd.f32 %v7693_v8, %v7681_v45  ;;  %v7706_v21 = vpop.f32.mrf.mxu3  ;;  %v11565_v24 = vld [vmem:[#allocation4 + $0x358] sm:$0xf0]  ;;  %v7682_v34 = vpop.f32.mrf.mxu1  ;;  %v13117_v8 = vld [vmem:[#allocation4 + $0x5cc] sm:$0xf] }
 0x62f   :  { %7945 = vmatpush.bf16.msra.mxu2 %v11504_v44  ;;  %v11184_v44 = vor.u32 %v12941_v38, %v11181_v3  ;;  %v11568_v5 = vor.u32 %v13037_v23, %v11565_v24  ;;  %v12157_v45 = vld [vmem:[#allocation4 + $0x7f8] sm:$0xf0]  ;;  %v12032_v38 = vor.u32 %v13153_v60, %v12029_v4  ;;  %v13085_v3 = vld [vmem:[#allocation4 + $0x4cc] sm:$0xf]  ;;  %v11888_v24 = vor.u32 %v13117_v8, %v11885_v12 }
 0x630   :  { %7958 = vmatpush.bf16.msra.mxu3 %v11632_v16  ;;  %v7707_v57 = vadd.f32 %v7706_v21, %v7694_v20  ;;  %v11440_v16 = vor.u32 %v13005_v14, %v11437_v15  ;;  %v13149_v14 = vld [vmem:[#allocation4 + $0x6cc] sm:$0xf]  ;;  %v12013_v15 = vld [vmem:[#allocation4 + $0x6d8] sm:$0xf0]  ;;  %v11760_v23 = vor.u32 %v13085_v3, %v11757_v22 }
 0x631   :  { %7920 = vmatpush.bf16.msra.mxu0 %v11232_v35  ;;  %v13001_v35 = vld [vmem:[#allocation4 + $0x22c] sm:$0xf]  ;;  %v12141_v21 = vld [vmem:[#allocation4 + $0x7d8] sm:$0xf0] }
 0x632   :  { %7933 = vmatpush.bf16.msra.mxu1 %v11360_v36  ;;  %8022 = vst [vmem:[#allocation14] sm:$0xff] %v7707_v57  ;;  %v13033_v36 = vld [vmem:[#allocation4 + $0x32c] sm:$0xf]  ;;  %v11424_v46 = vor.u32 %v13001_v35, %v11421_v13  ;;  %v12125_v34 = vld [vmem:[#allocation4 + $0x7b8] sm:$0xf0] }
 0x633   :  { %7946 = vmatpush.bf16.msra.mxu2 %v11488_v37  ;;  %v11549_v37 = vld [vmem:[#allocation4 + $0x338] sm:$0xf0]  ;;  %v13181_v20 = vld [vmem:[#allocation4 + $0x7cc] sm:$0xf] }
 0x634   :  { %7959 = vmatpush.bf16.msra.mxu3 %v11616_v43  ;;  %v11296_v43 = vor.u32 %v12969_v31, %v11293_v50  ;;  %v13081_v57 = vld [vmem:[#allocation4 + $0x4ac] sm:$0xf]  ;;  %v11997_v31 = vld [vmem:[#allocation4 + $0x6b8] sm:$0xf0] }
 0x635   :  { %7921 = vmatpush.bf16.msra.mxu0 %v11216_v52  ;;  %v7695_v51 = vpop.f32.mrf.mxu2  ;;  %v11552_v52 = vor.u32 %v13033_v36, %v11549_v37  ;;  %v13113_v26 = vld [vmem:[#allocation4 + $0x5ac] sm:$0xf]  ;;  %v12000_v13 = vor.u32 %v13145_v33, %v11997_v31  ;;  %v11725_v37 = vld [vmem:[#allocation4 + $0x498] sm:$0xf0] }
 0x636   :  { %7934 = vmatpush.bf16.msra.mxu1 %v11344_v54  ;;  %v13029_v54 = vld [vmem:[#allocation4 + $0x30c] sm:$0xf]  ;;  %v7708_v11 = vpop.f32.mrf.mxu3  ;;  %v11709_v51 = vld [vmem:[#allocation4 + $0x478] sm:$0xf0] }
 0x637   :  { %7947 = vmatpush.bf16.msra.mxu2 %v11472_v0  ;;  %v11533_v0 = vld [vmem:[#allocation4 + $0x318] sm:$0xf0]  ;;  %v13177_v50 = vld [vmem:[#allocation4 + $0x7ac] sm:$0xf] }
 0x638   :  { %7960 = vmatpush.bf16.msra.mxu3 %v11600_v59  ;;  %v11901_v59 = vld [vmem:[#allocation4 + $0x5f8] sm:$0xf0]  ;;  %v13077_v36 = vld [vmem:[#allocation4 + $0x48c] sm:$0xf] }
 0x639   :  { %7922 = vmatpush.bf16.msra.mxu0 %v11200_v6  ;;  %v11536_v6 = vor.u32 %v13029_v54, %v11533_v0  ;;  %v13141_v42 = vld [vmem:[#allocation4 + $0x68c] sm:$0xf]  ;;  %v11837_v0 = vld [vmem:[#allocation4 + $0x578] sm:$0xf0] }
 0x63a   :  { %7935 = vmatpush.bf16.msra.mxu1 %v11328_v2  ;;  %v11776_v2 = vor.u32 %v13089_v55, %v11773_v56  ;;  %v13073_v49 = vld [vmem:[#allocation4 + $0x46c] sm:$0xf]  ;;  %v11965_v55 = vld [vmem:[#allocation4 + $0x678] sm:$0xf0] }
 0x63b   :  { %7948 = vmatpush.bf16.msra.mxu2 %v11456_v39  ;;  %v11904_v39 = vor.u32 %v13121_v7, %v11901_v59  ;;  %v13137_v11 = vld [vmem:[#allocation4 + $0x66c] sm:$0xf]  ;;  %v12093_v7 = vld [vmem:[#allocation4 + $0x778] sm:$0xf0] }
 0x63c   :  { %7961 = vmatpush.bf16.msra.mxu3 %v11584_v9  ;;  %v12160_v9 = vor.u32 %v13185_v63, %v12157_v45  ;;  %v13169_v56 = vld [vmem:[#allocation4 + $0x76c] sm:$0xf]  ;;  %v11968_v60 = vor.u32 %v13137_v11, %v11965_v55  ;;  %v12077_v22 = vld [vmem:[#allocation4 + $0x758] sm:$0xf0] }
 0x63d   :  { %7923 = vmatpush.bf16.msra.mxu0 %v11184_v44  ;;  %v12016_v44 = vor.u32 %v13149_v14, %v12013_v15  ;;  %v13069_v4 = vld [vmem:[#allocation4 + $0x44c] sm:$0xf]  ;;  %v12096_v45 = vor.u32 %v13169_v56, %v12093_v7 }
 0x63e   :  { %7936 = vmatpush.bf16.msra.mxu1 %v11312_v29  ;;  %v12144_v29 = vor.u32 %v13181_v20, %v12141_v21  ;;  %v13165_v3 = vld [vmem:[#allocation4 + $0x74c] sm:$0xf]  ;;  %v11677_v20 = vld [vmem:[#allocation4 + $0x438] sm:$0xf0] }
 0x63f   :  { %7949 = vmatpush.bf16.msra.mxu2 %v11440_v16  ;;  %v11869_v16 = vld [vmem:[#allocation4 + $0x5b8] sm:$0xf0]  ;;  %v13065_v15 = vld [vmem:[#allocation4 + $0x42c] sm:$0xf] }
 0x640   :  { %7962 = vmatpush.bf16.msra.mxu3 %v11568_v5  ;;  %v11744_v5 = vor.u32 %v13081_v57, %v11741_v25  ;;  %v11872_v35 = vor.u32 %v13113_v26, %v11869_v16  ;;  %v13097_v21 = vld [vmem:[#allocation4 + $0x52c] sm:$0xf]  ;;  %v11933_v25 = vld [vmem:[#allocation4 + $0x638] sm:$0xf0]  ;;  %v6319_v16 = vperm.slane %v13676_v17, 1  ;;  %v11680_v33 = vor.u32 %v13065_v15, %v11677_v20 }
 0x641   :  { %7924 = vmatpush.bf16.msra.mxu0 %v11168_v10  ;;  %v12128_v10 = vor.u32 %v13177_v50, %v12125_v34  ;;  %v13129_v57 = vld [vmem:[#allocation4 + $0x62c] sm:$0xf] }
 0x642   :  { %7937 = vmatpush.bf16.msra.mxu1 %v11296_v43  ;;  %v13173_v43 = vld [vmem:[#allocation4 + $0x78c] sm:$0xf]  ;;  %v11936_v50 = vor.u32 %v13129_v57, %v11933_v25 }
 0x643   :  { %7950 = vmatpush.bf16.msra.mxu2 %v11424_v46  ;;  %v12109_v46 = vld [vmem:[#allocation4 + $0x798] sm:$0xf0]  ;;  %v13161_v26 = vld [vmem:[#allocation4 + $0x72c] sm:$0xf] }
 0x644   :  { %7963 = vmatpush.bf16.msra.mxu3 %v11552_v52  ;;  %v13105_v52 = vld [vmem:[#allocation4 + $0x56c] sm:$0xf]  ;;  %v12112_v54 = vor.u32 %v13173_v43, %v12109_v46 }
 0x645   :  { %7925 = vmatpush.bf16.msra.mxu0 %v11152_v32  ;;  %v13691_v47 = vpop.f32.mrf.mxu0  ;;  %v11712_v32 = vor.u32 %v13073_v49, %v11709_v51  ;;  %v11840_v59 = vor.u32 %v13105_v52, %v11837_v0  ;;  %v13061_v34 = vld [vmem:[#allocation4 + $0x40c] sm:$0xf] }
 0x646   :  { %7938 = vmatpush.bf16.msra.mxu1 %v11280_v61  ;;  %v13693_v53 = vpop.f32.mrf.mxu1  ;;  %v11693_v61 = vld [vmem:[#allocation4 + $0x458] sm:$0xf0]  ;;  %v7720_v43 = vadd.f32 %v13691_v47, %v6319_v16 }
 0x647   :  { %7951 = vmatpush.bf16.msra.mxu2 %v11408_v62  ;;  %v13101_v62 = vld [vmem:[#allocation4 + $0x54c] sm:$0xf]  ;;  %v11696_v8 = vor.u32 %v13069_v4, %v11693_v61 }
 0x648   :  { %7964 = vmatpush.bf16.msra.mxu3 %v11536_v6  ;;  %7926 = vmatmul.bf16.vlgmr.msra.gmra.mxu0 %v13569_v18  ;;  %v11728_v18 = vor.u32 %v13077_v36, %v11725_v37  ;;  %v11821_v6 = vld [vmem:[#allocation4 + $0x558] sm:$0xf0]  ;;  %v7733_v49 = vadd.f32 %v13693_v53, %v7720_v43 }
 0x649   :  { %7970 = vmatpush.bf16.msrb.mxu0 %v11776_v2  ;;  %7939 = vmatmul.bf16.vlgmr.msra.gmra.mxu1 %v13583_v19  ;;  %v13133_v2 = vld [vmem:[#allocation4 + $0x64c] sm:$0xf]  ;;  %v11824_v12 = vor.u32 %v13101_v62, %v11821_v6  ;;  %v11789_v37 = vld [vmem:[#allocation4 + $0x518] sm:$0xf0] }
 0x64a   :  { %7983 = vmatpush.bf16.msrb.mxu1 %v11904_v39  ;;  %7952 = vmatmul.bf16.vlgmr.msra.gmra.mxu2 %v13599_v27  ;;  %v13109_v27 = vld [vmem:[#allocation4 + $0x58c] sm:$0xf]  ;;  %v11949_v39 = vld [vmem:[#allocation4 + $0x658] sm:$0xf0] }
 0x64b   :  { %7996 = vmatpush.bf16.msrb.mxu2 %v12032_v38  ;;  %7965 = vmatmul.bf16.vlgmr.msra.gmra.mxu3 %v13613_v40  ;;  %v11981_v40 = vld [vmem:[#allocation4 + $0x698] sm:$0xf0]  ;;  %v11856_v19 = vor.u32 %v13109_v27, %v11853_v41  ;;  %v11952_v14 = vor.u32 %v13133_v2, %v11949_v39  ;;  %v13125_v27 = vld [vmem:[#allocation4 + $0x60c] sm:$0xf] }
 0x64c   :  { %8009 = vmatpush.bf16.msrb.mxu3 %v12160_v9  ;;  %v11984_v48 = vor.u32 %v13141_v42, %v11981_v40  ;;  %v13157_v42 = vld [vmem:[#allocation4 + $0x70c] sm:$0xf]  ;;  %v12045_v40 = vld [vmem:[#allocation4 + $0x718] sm:$0xf0] }
 0x64d   :  { %7971 = vmatpush.bf16.msrb.mxu0 %v11760_v23  ;;  %v7745_v63 = vpop.f32.mrf.mxu2  ;;  %v7721_v9 = vpop.f32.mrf.mxu0 }
 0x64e   :  { %7984 = vmatpush.bf16.msrb.mxu1 %v11888_v24  ;;  %v7758_v38 = vpop.f32.mrf.mxu3  ;;  %v7734_v23 = vpop.f32.mrf.mxu1  ;;  %v12080_v24 = vor.u32 %v13165_v3, %v12077_v22  ;;  %v7746_v51 = vadd.f32 %v7745_v63, %v7733_v49  ;;  %v6320_v63 = vperm.slane %v13676_v17, 2 }
 0x64f   :  { %7997 = vmatpush.bf16.msrb.mxu2 %v12016_v44  ;;  %v11805_v44 = vld [vmem:[#allocation4 + $0x538] sm:$0xf0] }
 0x650   :  { %8010 = vmatpush.bf16.msrb.mxu3 %v12144_v29  ;;  %v12061_v29 = vld [vmem:[#allocation4 + $0x738] sm:$0xf0]  ;;  %v11808_v31 = vor.u32 %v13097_v21, %v11805_v44  ;;  %v7759_v47 = vadd.f32 %v7758_v38, %v7746_v51 }
 0x651   :  { %7972 = vmatpush.bf16.msrb.mxu0 %v11744_v5  ;;  %v11661_v5 = vld [vmem:[#allocation4 + $0x418] sm:$0xf0]  ;;  %v12064_v36 = vor.u32 %v13161_v26, %v12061_v29 }
 0x652   :  { %7985 = vmatpush.bf16.msrb.mxu1 %v11872_v35  ;;  %v13093_v35 = vld [vmem:[#allocation4 + $0x50c] sm:$0xf]  ;;  %v11664_v46 = vor.u32 %v13061_v34, %v11661_v5 }
 0x653   :  { %7998 = vmatpush.bf16.msrb.mxu2 %v12000_v13 }
 0x654   :  { %8011 = vmatpush.bf16.msrb.mxu3 %v12128_v10  ;;  %v11917_v10 = vld [vmem:[#allocation4 + $0x618] sm:$0xf0] }
 0x655   :  { %7973 = vmatpush.bf16.msrb.mxu0 %v11728_v18  ;;  %v7747_v13 = vpop.f32.mrf.mxu2  ;;  %v11792_v18 = vor.u32 %v13093_v35, %v11789_v37 }
 0x656   :  { %7986 = vmatpush.bf16.msrb.mxu1 %v11856_v19  ;;  %v7760_v41 = vpop.f32.mrf.mxu3  ;;  %v11920_v19 = vor.u32 %v13125_v27, %v11917_v10 }
 0x657   :  { %7999 = vmatpush.bf16.msrb.mxu2 %v11984_v48  ;;  %v12048_v48 = vor.u32 %v13157_v42, %v12045_v40 }
 0x658   :  { %8012 = vmatpush.bf16.msrb.mxu3 %v12112_v54 }
 0x659   :  { %7974 = vmatpush.bf16.msrb.mxu0 %v11712_v32 }
 0x65a   :  { %7987 = vmatpush.bf16.msrb.mxu1 %v11840_v59 }
 0x65b   :  { %8000 = vmatpush.bf16.msrb.mxu2 %v11968_v60 }
 0x65c   :  { %8013 = vmatpush.bf16.msrb.mxu3 %v12096_v45 }
 0x65d   :  { %7975 = vmatpush.bf16.msrb.mxu0 %v11696_v8 }
 0x65e   :  { %7988 = vmatpush.bf16.msrb.mxu1 %v11824_v12 }
 0x65f   :  { %8001 = vmatpush.bf16.msrb.mxu2 %v11952_v14 }
 0x660   :  { %8014 = vmatpush.bf16.msrb.mxu3 %v12080_v24 }
 0x661   :  { %7976 = vmatpush.bf16.msrb.mxu0 %v11680_v33 }
 0x662   :  { %7989 = vmatpush.bf16.msrb.mxu1 %v11808_v31 }
 0x663   :  { %8002 = vmatpush.bf16.msrb.mxu2 %v11936_v50  ;;  %v6321_v50 = vperm.slane %v13676_v17, 3 }
 0x664   :  { %8015 = vmatpush.bf16.msrb.mxu3 %v12064_v36 }
 0x665   :  { %7977 = vmatpush.bf16.msrb.mxu0 %v11664_v46  ;;  %v7771_v52 = vpop.f32.mrf.mxu0 }
 0x666   :  { %7990 = vmatpush.bf16.msrb.mxu1 %v11792_v18  ;;  %v7772_v54 = vadd.f32 %v7771_v52, %v7759_v47  ;;  %v7784_v0 = vpop.f32.mrf.mxu1 }
 0x667   :  { %8003 = vmatpush.bf16.msrb.mxu2 %v11920_v19 }
 0x668   :  { %8016 = vmatpush.bf16.msrb.mxu3 %v12048_v48  ;;  %7978 = vmatmul.bf16.vlgmr.msrb.gmra.mxu0 %v13629_v1  ;;  %v7785_v11 = vadd.f32 %v7784_v0, %v7772_v54 }
 0x669   :  { %7991 = vmatmul.bf16.vlgmr.msrb.gmra.mxu1 %v13640_v30 }
 0x66a   :  { %8004 = vmatmul.bf16.vlgmr.msrb.gmra.mxu2 %v13643_v58 }
 0x66b   :  { %8017 = vmatmul.bf16.vlgmr.msrb.gmra.mxu3 %v13646_v28 }
 0x66d   :  { %v7797_v55 = vpop.f32.mrf.mxu2  ;;  %v7773_v32 = vpop.f32.mrf.mxu0 }
 0x66e   :  { %v7798_v53 = vadd.f32 %v7797_v55, %v7785_v11  ;;  %v7810_v56 = vpop.f32.mrf.mxu3  ;;  %v7786_v59 = vpop.f32.mrf.mxu1 }
 0x670   :  { %v7811_v7 = vadd.f32 %v7810_v56, %v7798_v53 }
 0x672   :  { %8023 = vst [vmem:[#allocation14 + $0x8] sm:$0xff] %v7811_v7 }
 0x675   :  { %v7799_v1 = vpop.f32.mrf.mxu2 }
 0x676   :  { %v7812_v60 = vpop.f32.mrf.mxu3 }
 0x685   :  { %v7823_v4 = vpop.f32.mrf.mxu0 }
 0x686   :  { %v7836_v30 = vpop.f32.mrf.mxu1  ;;  %v7824_v2 = vadd.f32 %v7823_v4, %v6320_v63 }
 0x688   :  { %v7837_v39 = vadd.f32 %v7836_v30, %v7824_v2 }
 0x68d   :  { %v7849_v61 = vpop.f32.mrf.mxu2  ;;  %v7825_v62 = vpop.f32.mrf.mxu0 }
 0x68e   :  { %v7862_v58 = vpop.f32.mrf.mxu3  ;;  %v7838_v28 = vpop.f32.mrf.mxu1  ;;  %v7850_v38 = vadd.f32 %v7849_v61, %v7837_v39 }
 0x690   :  { %v7863_v3 = vadd.f32 %v7862_v58, %v7850_v38 }
 0x695   :  { %v7851_v45 = vpop.f32.mrf.mxu2 }
 0x696   :  { %v7864_v6 = vpop.f32.mrf.mxu3 }
 0x6a5   :  { %v7875_v22 = vpop.f32.mrf.mxu0 }
 0x6a6   :  { %v7876_v8 = vadd.f32 %v7875_v22, %v7863_v3  ;;  %v7888_v9 = vpop.f32.mrf.mxu1 }
 0x6a8   :  { %v7889_v12 = vadd.f32 %v7888_v9, %v7876_v8 }
 0x6ad   :  { %v7901_v14 = vpop.f32.mrf.mxu2  ;;  %v7877_v23 = vpop.f32.mrf.mxu0 }
 0x6ae   :  { %v7902_v15 = vadd.f32 %v7901_v14, %v7889_v12  ;;  %v7914_v20 = vpop.f32.mrf.mxu3  ;;  %v7890_v24 = vpop.f32.mrf.mxu1 }
 0x6b0   :  { %v7915_v21 = vadd.f32 %v7914_v20, %v7902_v15 }
 0x6b2   :  { %8024 = vst [vmem:[#allocation14 + $0x10] sm:$0xff] %v7915_v21 }
 0x6b5   :  { %v7903_v44 = vpop.f32.mrf.mxu2 }
 0x6b6   :  { %v7916_v57 = vpop.f32.mrf.mxu3 }
 0x6c5   :  { %v7927_v25 = vpop.f32.mrf.mxu0 }
 0x6c6   :  { %v7940_v26 = vpop.f32.mrf.mxu1  ;;  %v7928_v35 = vadd.f32 %v7927_v25, %v6321_v50 }
 0x6c8   :  { %v7941_v13 = vadd.f32 %v7940_v26, %v7928_v35 }
 0x6cd   :  { %v7953_v29 = vpop.f32.mrf.mxu2  ;;  %v7929_v33 = vpop.f32.mrf.mxu0 }
 0x6ce   :  { %v7966_v16 = vpop.f32.mrf.mxu3  ;;  %v7942_v31 = vpop.f32.mrf.mxu1  ;;  %v7954_v36 = vadd.f32 %v7953_v29, %v7941_v13 }
 0x6d0   :  { %v7967_v37 = vadd.f32 %v7966_v16, %v7954_v36 }
 0x6d5   :  { %v7955_v34 = vpop.f32.mrf.mxu2 }
 0x6d6   :  { %v7968_v5 = vpop.f32.mrf.mxu3 }
 0x6e5   :  { %v7979_v27 = vpop.f32.mrf.mxu0 }
 0x6e6   :  { %v7992_v10 = vpop.f32.mrf.mxu1  ;;  %v7980_v41 = vadd.f32 %v7979_v27, %v7967_v37 }
 0x6e8   :  { %v7993_v42 = vadd.f32 %v7992_v10, %v7980_v41 }
 0x6ed   :  { %v8005_v40 = vpop.f32.mrf.mxu2  ;;  %v7981_v17 = vpop.f32.mrf.mxu0 }
 0x6ee   :  { %v8006_v43 = vadd.f32 %v8005_v40, %v7993_v42  ;;  %v8018_v46 = vpop.f32.mrf.mxu3  ;;  %v7994_v18 = vpop.f32.mrf.mxu1 }
 0x6f0   :  { %v8019_v19 = vadd.f32 %v8018_v46, %v8006_v43 }
 0x6f2   :  { %8025 = vst [vmem:[#allocation14 + $0x18] sm:$0xff] %v8019_v19 }
 0x6f3   :  { %8036 = dma.vmem_to_hbm [thread:$0]  %s8032_s30, 512, %s8034_s10, [#allocation8]  }
 0x6f5   :  { %v8007_v48 = vpop.f32.mrf.mxu2 }
 0x6f6   :  { %v8020_v49 = vpop.f32.mrf.mxu3 }
 0x6f7   :  { %13402 = dma.done.wait [#allocation8], 512  }
 0x6f8   :  { %13403 = vsyncadd [#allocation8], 4294966784 }
 0x6f9   :  { %8041 = vsyncpa [#allocation7], 1 }
 0x6fa   :  { %8042 = vsyncpa [#allocation10], 1 }
 0x6fb   :  { %8043 = vsyncpa [#allocation13], 1 }
 0x6fc   :  { %8044 = vsyncpa [#allocation8], 1 }
 0x6fd   :  { %8045 = vsyncmov [#allocation5] }
 0x700   :  { %s8046_s11 = vpop.sfrf %8045 }
 0x701   :  { %p12161_p0 = scmp.ne.s32.totalorder %s8046_s11, 0 }
 0x703   :  { %8050 = shalt.err (%p12161_p0)  }
 0x704   :  { %8052 = vsyncmov [#allocation5 + $0x1] }
 0x707   :  { %s8053_s7 = vpop.sfrf %8052 }
 0x708   :  { %p12162_p1 = scmp.ne.s32.totalorder %s8053_s7, 0 }
 0x70a   :  { %8057 = shalt.err (%p12162_p1)  }
 0x70b   :  { %8059 = vsyncmov [#allocation5 + $0x2] }
 0x70e   :  { %s8060_s12 = vpop.sfrf %8059 }
 0x70f   :  { %p12163_p2 = scmp.ne.s32.totalorder %s8060_s12, 0 }
 0x711   :  { %8064 = shalt.err (%p12163_p2)  }

</bundles_post_ra>
